<compile_context>
chip_gen: v6e
topology: v6e:2x2x1
jax: 0.10.0
libtpu: 0.0.40
codegen_flags: <defaults>
</compile_context>

<pallas_src>
import math

import jax
import jax.numpy as jnp
from jax.experimental import pallas as pl
from jax.experimental.pallas import tpu as pltpu

# ---- model hyperparameters (small, consistent with the module) ----
B = 2                      # batch
SEQ = 8                    # sequence_size (input patch tokens)
D = 32                     # output_features_size (d_model), divisible by nhead=8
T = SEQ + 1                # +1 for cls token
NTOK = B * T               # flattened batch*tokens processed in one shot
NUM_HEADS = 8
HEAD_DIM = D // NUM_HEADS
FF = 2048                  # nn.TransformerEncoderLayer default dim_feedforward
NUM_LAYERS = 4
EPS = 1e-5
SCALE = 1.0 / math.sqrt(HEAD_DIM)
NEG_INF = -1e30


def _layer_norm(x, w, b):
    mu = jnp.mean(x, axis=-1, keepdims=True)
    var = jnp.mean((x - mu) ** 2, axis=-1, keepdims=True)
    return (x - mu) * jax.lax.rsqrt(var + EPS) * w + b


def transformer_kernel(x_ref, pos_ref, hmask_ref, abias_ref,
                       wq_ref, bq_ref, wk_ref, bk_ref, wv_ref, bv_ref,
                       ow_ref, ob_ref,
                       w1_ref, b1_ref, w2_ref, b2_ref,
                       n1w_ref, n1b_ref, n2w_ref, n2b_ref,
                       o_ref):
    f32 = jnp.float32
    bf16 = jnp.bfloat16

    # Embeddings: cls token already concatenated in wrapper; add position embeddings.
    h = x_ref[...] + pos_ref[...]                            # (NTOK, D) f32

    head_mask = hmask_ref[...]                               # (H, 1, D) f32 in {0,1}
    attn_bias = abias_ref[...]                               # (1, NTOK, NTOK) f32 {0, -1e30}

    for l in range(NUM_LAYERS):                              # static unroll
        # ---------------- multi-head self attention (all heads batched) ------
        h16 = h.astype(bf16)
        q = jnp.dot(h16, wq_ref[l], preferred_element_type=f32) + bq_ref[l]
        k = jnp.dot(h16, wk_ref[l], preferred_element_type=f32) + bk_ref[l]
        v = jnp.dot(h16, wv_ref[l], preferred_element_type=f32) + bv_ref[l]

        # Mask q/v to each head's lane group; contract over full D (cross-head
        # terms are exactly zero).  No lane slices, no concat, no reshapes.
        q_h = (q[None, :, :] * head_mask).astype(bf16)       # (H, NTOK, D)
        v_h = (v[None, :, :] * head_mask).astype(bf16)       # (H, NTOK, D)
        k_b = jnp.broadcast_to(k.astype(bf16)[None, :, :], (NUM_HEADS, NTOK, D))

        s = jnp.einsum('hqd,hkd->hqk', q_h, k_b,
                       preferred_element_type=f32)           # (H, NTOK, NTOK)
        s = s * SCALE + attn_bias                            # block-diagonal batch mask
        s = s - jnp.max(s, axis=-1, keepdims=True)
        p = jnp.exp(s)
        p = p * pl.reciprocal(jnp.sum(p, axis=-1, keepdims=True), approx=True)

        ctx_h = jnp.einsum('hqk,hkd->hqd', p.astype(bf16), v_h,
                           preferred_element_type=f32)       # (H, NTOK, D), head lanes only
        ctx = jnp.sum(ctx_h, axis=0)                         # (NTOK, D) = concat(heads)

        attn = jnp.dot(ctx.astype(bf16), ow_ref[l],
                       preferred_element_type=f32) + ob_ref[l]

        # post-norm residual 1  (src = norm1(src + attn))
        h = _layer_norm(h + attn, n1w_ref[l], n1b_ref[l])

        # ---------------- feed-forward (ReLU) --------------------------------
        ff = jnp.dot(h.astype(bf16), w1_ref[l],
                     preferred_element_type=f32) + b1_ref[l]
        ff = jnp.maximum(ff, 0.0)
        ff = jnp.dot(ff.astype(bf16), w2_ref[l],
                     preferred_element_type=f32) + b2_ref[l]

        # post-norm residual 2  (src = norm2(src + ff))
        h = _layer_norm(h + ff, n2w_ref[l], n2b_ref[l])

    # return x[:, 0, :] -> cls-token row of every batch element
    for b in range(B):
        o_ref[b:b + 1, :] = h[b * T:b * T + 1, :]


def _full_spec(shape):
    nd = len(shape)
    return pl.BlockSpec(shape, lambda i, _nd=nd: (0,) * _nd)


@jax.jit
def transformer_net(x, params):
    # Embeddings glue: expand cls token, prepend, flatten to one (B*T, D) slab.
    cls_b = jnp.broadcast_to(params["cls"], (B, 1, D))
    tokens = jnp.concatenate([cls_b, x], axis=1)                       # (B, T, D)
    tokens_flat = tokens.reshape(NTOK, D)
    pos_flat = jnp.broadcast_to(params["pos"], (B, T, D)).reshape(NTOK, D)

    # Per-head lane mask (H, 1, D) and block-diagonal (same-batch) attention bias.
    lane = jnp.arange(D)
    head_mask = (lane[None, None, :] // HEAD_DIM
                 == jnp.arange(NUM_HEADS)[:, None, None]).astype(jnp.float32)
    tok_batch = jnp.arange(NTOK) // T
    same = tok_batch[:, None] == tok_batch[None, :]
    attn_bias = jnp.where(same, 0.0, NEG_INF).astype(jnp.float32)[None]  # (1, NTOK, NTOK)

    args = (tokens_flat, pos_flat, head_mask, attn_bias,
            params["wq"], params["bq"], params["wk"], params["bk"],
            params["wv"], params["bv"], params["ow"], params["ob"],
            params["w1"], params["b1"], params["w2"], params["b2"],
            params["n1w"], params["n1b"], params["n2w"], params["n2b"])

    in_specs = [_full_spec(a.shape) for a in args]

    return pl.pallas_call(
        transformer_kernel,
        out_shape=jax.ShapeDtypeStruct((B, D), jnp.float32),
        grid=(1,),
        in_specs=in_specs,
        out_specs=pl.BlockSpec((B, D), lambda i: (0, 0)),
        compiler_params=pltpu.CompilerParams(
            dimension_semantics=("arbitrary",),
        ),
    )(*args)


def init_params(key):
    ks = jax.random.split(key, 16)

    def n(k, shape, std, dtype=jnp.float32):
        return (std * jax.random.normal(k, shape)).astype(dtype)

    std_d = 1.0 / math.sqrt(D)
    std_ff = 1.0 / math.sqrt(FF)
    bf16 = jnp.bfloat16
    return {
        # Embeddings: trunc_normal(std=0.02) approximated with normal(std=0.02)
        "cls": n(ks[0], (1, 1, D), 0.02),
        "pos": n(ks[1], (1, T, D), 0.02),
        # attention projections (stored pre-transposed: (in, out)), bf16 for MXU/HBM
        "wq": n(ks[2], (NUM_LAYERS, D, D), std_d, bf16),
        "bq": n(ks[3], (NUM_LAYERS, 1, D), 0.02),
        "wk": n(ks[4], (NUM_LAYERS, D, D), std_d, bf16),
        "bk": n(ks[5], (NUM_LAYERS, 1, D), 0.02),
        "wv": n(ks[6], (NUM_LAYERS, D, D), std_d, bf16),
        "bv": n(ks[7], (NUM_LAYERS, 1, D), 0.02),
        "ow": n(ks[8], (NUM_LAYERS, D, D), std_d, bf16),
        "ob": n(ks[9], (NUM_LAYERS, 1, D), 0.02),
        # feed-forward (bf16 weights — dominant HBM traffic)
        "w1": n(ks[10], (NUM_LAYERS, D, FF), std_d, bf16),
        "b1": n(ks[11], (NUM_LAYERS, 1, FF), 0.02),
        "w2": n(ks[12], (NUM_LAYERS, FF, D), std_ff, bf16),
        "b2": n(ks[13], (NUM_LAYERS, 1, D), 0.02),
        # layer norms (f32)
        "n1w": jnp.ones((NUM_LAYERS, 1, D), jnp.float32),
        "n1b": jnp.zeros((NUM_LAYERS, 1, D), jnp.float32),
        "n2w": jnp.ones((NUM_LAYERS, 1, D), jnp.float32),
        "n2b": jnp.zeros((NUM_LAYERS, 1, D), jnp.float32),
    }


if __name__ == "__main__":
    key = jax.random.PRNGKey(0)
    k_x, k_p = jax.random.split(key)
    x = jax.random.normal(k_x, (B, SEQ, D), jnp.float32)   # (batch, sequence, hidden)
    params = init_params(k_p)

    out = jax.block_until_ready(transformer_net(x, params))
    assert out.shape == (B, D), out.shape
    assert bool(jnp.all(jnp.isfinite(out)))
    print("KERNEL_OK")
</pallas_src>

<mosaic_0001>
module attributes {stable_mosaic.version = 11 : i64} {
  func.func @transformer_kernel(%arg0: i32, %arg1: memref<18x32xf32, #tpu.memory_space<vmem>>, %arg2: memref<18x32xf32, #tpu.memory_space<vmem>>, %arg3: memref<8x1x32xf32, #tpu.memory_space<vmem>>, %arg4: memref<1x18x18xf32, #tpu.memory_space<vmem>>, %arg5: memref<4x32x32xbf16, #tpu.memory_space<vmem>>, %arg6: memref<4x1x32xf32, #tpu.memory_space<vmem>>, %arg7: memref<4x32x32xbf16, #tpu.memory_space<vmem>>, %arg8: memref<4x1x32xf32, #tpu.memory_space<vmem>>, %arg9: memref<4x32x32xbf16, #tpu.memory_space<vmem>>, %arg10: memref<4x1x32xf32, #tpu.memory_space<vmem>>, %arg11: memref<4x32x32xbf16, #tpu.memory_space<vmem>>, %arg12: memref<4x1x32xf32, #tpu.memory_space<vmem>>, %arg13: memref<4x32x2048xbf16, #tpu.memory_space<vmem>>, %arg14: memref<4x1x2048xf32, #tpu.memory_space<vmem>>, %arg15: memref<4x2048x32xbf16, #tpu.memory_space<vmem>>, %arg16: memref<4x1x32xf32, #tpu.memory_space<vmem>>, %arg17: memref<4x1x32xf32, #tpu.memory_space<vmem>>, %arg18: memref<4x1x32xf32, #tpu.memory_space<vmem>>, %arg19: memref<4x1x32xf32, #tpu.memory_space<vmem>>, %arg20: memref<4x1x32xf32, #tpu.memory_space<vmem>>, %arg21: memref<2x32xf32, #tpu.memory_space<vmem>>) attributes {dimension_semantics = [#tpu.dimension_semantics<arbitrary>], iteration_bounds = array<i64: 1>, scalar_prefetch = 0 : i64, scratch_operands = 0 : i64, tpu.core_type = #tpu.core_type<tc>, window_params = [{pipeline_mode = #tpu.pipeline_mode<synchronous>, transform_indices = @transform_0, window_bounds = array<i64: 18, 32>}, {pipeline_mode = #tpu.pipeline_mode<synchronous>, transform_indices = @transform_1, window_bounds = array<i64: 18, 32>}, {pipeline_mode = #tpu.pipeline_mode<synchronous>, transform_indices = @transform_2, window_bounds = array<i64: 8, 1, 32>}, {pipeline_mode = #tpu.pipeline_mode<synchronous>, transform_indices = @transform_3, window_bounds = array<i64: 1, 18, 18>}, {pipeline_mode = #tpu.pipeline_mode<synchronous>, transform_indices = @transform_4, window_bounds = array<i64: 4, 32, 32>}, {pipeline_mode = #tpu.pipeline_mode<synchronous>, transform_indices = @transform_5, window_bounds = array<i64: 4, 1, 32>}, {pipeline_mode = #tpu.pipeline_mode<synchronous>, transform_indices = @transform_6, window_bounds = array<i64: 4, 32, 32>}, {pipeline_mode = #tpu.pipeline_mode<synchronous>, transform_indices = @transform_7, window_bounds = array<i64: 4, 1, 32>}, {pipeline_mode = #tpu.pipeline_mode<synchronous>, transform_indices = @transform_8, window_bounds = array<i64: 4, 32, 32>}, {pipeline_mode = #tpu.pipeline_mode<synchronous>, transform_indices = @transform_9, window_bounds = array<i64: 4, 1, 32>}, {pipeline_mode = #tpu.pipeline_mode<synchronous>, transform_indices = @transform_10, window_bounds = array<i64: 4, 32, 32>}, {pipeline_mode = #tpu.pipeline_mode<synchronous>, transform_indices = @transform_11, window_bounds = array<i64: 4, 1, 32>}, {pipeline_mode = #tpu.pipeline_mode<synchronous>, transform_indices = @transform_12, window_bounds = array<i64: 4, 32, 2048>}, {pipeline_mode = #tpu.pipeline_mode<synchronous>, transform_indices = @transform_13, window_bounds = array<i64: 4, 1, 2048>}, {pipeline_mode = #tpu.pipeline_mode<synchronous>, transform_indices = @transform_14, window_bounds = array<i64: 4, 2048, 32>}, {pipeline_mode = #tpu.pipeline_mode<synchronous>, transform_indices = @transform_15, window_bounds = array<i64: 4, 1, 32>}, {pipeline_mode = #tpu.pipeline_mode<synchronous>, transform_indices = @transform_16, window_bounds = array<i64: 4, 1, 32>}, {pipeline_mode = #tpu.pipeline_mode<synchronous>, transform_indices = @transform_17, window_bounds = array<i64: 4, 1, 32>}, {pipeline_mode = #tpu.pipeline_mode<synchronous>, transform_indices = @transform_18, window_bounds = array<i64: 4, 1, 32>}, {pipeline_mode = #tpu.pipeline_mode<synchronous>, transform_indices = @transform_19, window_bounds = array<i64: 4, 1, 32>}, {pipeline_mode = #tpu.pipeline_mode<synchronous>, transform_indices = @transform_20, window_bounds = array<i64: 2, 32>}]} {
    %c0 = arith.constant 0 : index
    %c0_0 = arith.constant 0 : index
    %0 = vector.load %arg1[%c0, %c0_0] : memref<18x32xf32, #tpu.memory_space<vmem>>, vector<18x32xf32>
    %c0_1 = arith.constant 0 : index
    %c0_2 = arith.constant 0 : index
    %1 = vector.load %arg2[%c0_1, %c0_2] : memref<18x32xf32, #tpu.memory_space<vmem>>, vector<18x32xf32>
    %2 = arith.addf %0, %1 : vector<18x32xf32>
    %c0_3 = arith.constant 0 : index
    %c0_4 = arith.constant 0 : index
    %c0_5 = arith.constant 0 : index
    %3 = vector.load %arg3[%c0_3, %c0_4, %c0_5] : memref<8x1x32xf32, #tpu.memory_space<vmem>>, vector<8x1x32xf32>
    %c0_6 = arith.constant 0 : index
    %c0_7 = arith.constant 0 : index
    %c0_8 = arith.constant 0 : index
    %4 = vector.load %arg4[%c0_6, %c0_7, %c0_8] : memref<1x18x18xf32, #tpu.memory_space<vmem>>, vector<1x18x18xf32>
    %5 = arith.truncf %2 : vector<18x32xf32> to vector<18x32xbf16>
    %c0_9 = arith.constant 0 : index
    %c0_10 = arith.constant 0 : index
    %c0_11 = arith.constant 0 : index
    %6 = vector.load %arg5[%c0_9, %c0_10, %c0_11] : memref<4x32x32xbf16, #tpu.memory_space<vmem>>, vector<1x32x32xbf16>
    %7 = vector.shape_cast %6 : vector<1x32x32xbf16> to vector<32x32xbf16>
    %cst = arith.constant dense<0.000000e+00> : vector<18x32xf32>
    %8 = tpu.matmul %5, %7, %cst {dimension_numbers = #tpu.dot_dimension_numbers<[1], [0], [0], [1], [0, 0, 1, 1], [], []>} : vector<18x32xbf16>, vector<32x32xbf16>, vector<18x32xf32> -> vector<18x32xf32>
    %c0_12 = arith.constant 0 : index
    %c0_13 = arith.constant 0 : index
    %c0_14 = arith.constant 0 : index
    %9 = vector.load %arg6[%c0_12, %c0_13, %c0_14] : memref<4x1x32xf32, #tpu.memory_space<vmem>>, vector<1x1x32xf32>
    %10 = vector.shape_cast %9 : vector<1x1x32xf32> to vector<1x32xf32>
    %11 = vector.broadcast %10 : vector<1x32xf32> to vector<18x32xf32>
    %12 = arith.addf %8, %11 : vector<18x32xf32>
    %c0_15 = arith.constant 0 : index
    %c0_16 = arith.constant 0 : index
    %c0_17 = arith.constant 0 : index
    %13 = vector.load %arg7[%c0_15, %c0_16, %c0_17] : memref<4x32x32xbf16, #tpu.memory_space<vmem>>, vector<1x32x32xbf16>
    %14 = vector.shape_cast %13 : vector<1x32x32xbf16> to vector<32x32xbf16>
    %cst_18 = arith.constant dense<0.000000e+00> : vector<18x32xf32>
    %15 = tpu.matmul %5, %14, %cst_18 {dimension_numbers = #tpu.dot_dimension_numbers<[1], [0], [0], [1], [0, 0, 1, 1], [], []>} : vector<18x32xbf16>, vector<32x32xbf16>, vector<18x32xf32> -> vector<18x32xf32>
    %c0_19 = arith.constant 0 : index
    %c0_20 = arith.constant 0 : index
    %c0_21 = arith.constant 0 : index
    %16 = vector.load %arg8[%c0_19, %c0_20, %c0_21] : memref<4x1x32xf32, #tpu.memory_space<vmem>>, vector<1x1x32xf32>
    %17 = vector.shape_cast %16 : vector<1x1x32xf32> to vector<1x32xf32>
    %18 = vector.broadcast %17 : vector<1x32xf32> to vector<18x32xf32>
    %19 = arith.addf %15, %18 : vector<18x32xf32>
    %c0_22 = arith.constant 0 : index
    %c0_23 = arith.constant 0 : index
    %c0_24 = arith.constant 0 : index
    %20 = vector.load %arg9[%c0_22, %c0_23, %c0_24] : memref<4x32x32xbf16, #tpu.memory_space<vmem>>, vector<1x32x32xbf16>
    %21 = vector.shape_cast %20 : vector<1x32x32xbf16> to vector<32x32xbf16>
    %cst_25 = arith.constant dense<0.000000e+00> : vector<18x32xf32>
    %22 = tpu.matmul %5, %21, %cst_25 {dimension_numbers = #tpu.dot_dimension_numbers<[1], [0], [0], [1], [0, 0, 1, 1], [], []>} : vector<18x32xbf16>, vector<32x32xbf16>, vector<18x32xf32> -> vector<18x32xf32>
    %c0_26 = arith.constant 0 : index
    %c0_27 = arith.constant 0 : index
    %c0_28 = arith.constant 0 : index
    %23 = vector.load %arg10[%c0_26, %c0_27, %c0_28] : memref<4x1x32xf32, #tpu.memory_space<vmem>>, vector<1x1x32xf32>
    %24 = vector.shape_cast %23 : vector<1x1x32xf32> to vector<1x32xf32>
    %25 = vector.broadcast %24 : vector<1x32xf32> to vector<18x32xf32>
    %26 = arith.addf %22, %25 : vector<18x32xf32>
    %27 = vector.shape_cast %12 : vector<18x32xf32> to vector<1x18x32xf32>
    %28 = vector.broadcast %27 : vector<1x18x32xf32> to vector<8x18x32xf32>
    %29 = vector.broadcast %3 : vector<8x1x32xf32> to vector<8x18x32xf32>
    %30 = arith.mulf %28, %29 : vector<8x18x32xf32>
    %31 = arith.truncf %30 : vector<8x18x32xf32> to vector<8x18x32xbf16>
    %32 = vector.shape_cast %26 : vector<18x32xf32> to vector<1x18x32xf32>
    %33 = vector.broadcast %32 : vector<1x18x32xf32> to vector<8x18x32xf32>
    %34 = vector.broadcast %3 : vector<8x1x32xf32> to vector<8x18x32xf32>
    %35 = arith.mulf %33, %34 : vector<8x18x32xf32>
    %36 = arith.truncf %35 : vector<8x18x32xf32> to vector<8x18x32xbf16>
    %37 = arith.truncf %19 : vector<18x32xf32> to vector<18x32xbf16>
    %38 = vector.shape_cast %37 : vector<18x32xbf16> to vector<1x18x32xbf16>
    %39 = vector.shape_cast %38 : vector<1x18x32xbf16> to vector<1x18x32xbf16>
    %40 = vector.broadcast %39 : vector<1x18x32xbf16> to vector<8x18x32xbf16>
    "tpu.trace_start"() <{level = 10 : i32, message = "hqd,hkd->hqk"}> : () -> ()
    %cst_29 = arith.constant dense<0.000000e+00> : vector<8x18x18xf32>
    %41 = tpu.matmul %31, %40, %cst_29 {dimension_numbers = #tpu.dot_dimension_numbers<[2], [2], [1], [1], [0, 0, 0, 1, 1, 1], [0], [0]>} : vector<8x18x32xbf16>, vector<8x18x32xbf16>, vector<8x18x18xf32> -> vector<8x18x18xf32>
    "tpu.trace_stop"() : () -> ()
    %cst_30 = arith.constant 5.000000e-01 : f32
    %42 = vector.broadcast %cst_30 : f32 to vector<8x18x18xf32>
    %43 = arith.mulf %41, %42 : vector<8x18x18xf32>
    %44 = vector.broadcast %4 : vector<1x18x18xf32> to vector<8x18x18xf32>
    %45 = arith.addf %43, %44 : vector<8x18x18xf32>
    %cst_31 = arith.constant dense<0xFF800000> : vector<8x18xf32>
    %46 = vector.multi_reduction <maximumf>, %45, %cst_31 [2] : vector<8x18x18xf32> to vector<8x18xf32>
    %47 = vector.shape_cast %46 : vector<8x18xf32> to vector<8x18x1xf32>
    %48 = vector.broadcast %47 : vector<8x18x1xf32> to vector<8x18x18xf32>
    %49 = arith.subf %45, %48 : vector<8x18x18xf32>
    %50 = math.exp %49 : vector<8x18x18xf32>
    %cst_32 = arith.constant dense<0.000000e+00> : vector<8x18xf32>
    %51 = vector.multi_reduction <add>, %50, %cst_32 [2] : vector<8x18x18xf32> to vector<8x18xf32>
    %52 = vector.shape_cast %51 : vector<8x18xf32> to vector<8x18x1xf32>
    %53 = tpu.reciprocal %52 {approx = true} : vector<8x18x1xf32> -> vector<8x18x1xf32>
    %54 = vector.broadcast %53 : vector<8x18x1xf32> to vector<8x18x18xf32>
    %55 = arith.mulf %50, %54 : vector<8x18x18xf32>
    %56 = arith.truncf %55 : vector<8x18x18xf32> to vector<8x18x18xbf16>
    "tpu.trace_start"() <{level = 10 : i32, message = "hqk,hkd->hqd"}> : () -> ()
    %cst_33 = arith.constant dense<0.000000e+00> : vector<8x18x32xf32>
    %57 = tpu.matmul %56, %36, %cst_33 {dimension_numbers = #tpu.dot_dimension_numbers<[2], [1], [1], [2], [0, 0, 0, 1, 1, 2], [0], [0]>} : vector<8x18x18xbf16>, vector<8x18x32xbf16>, vector<8x18x32xf32> -> vector<8x18x32xf32>
    "tpu.trace_stop"() : () -> ()
    %cst_34 = arith.constant dense<0.000000e+00> : vector<18x32xf32>
    %58 = vector.multi_reduction <add>, %57, %cst_34 [0] : vector<8x18x32xf32> to vector<18x32xf32>
    %59 = arith.truncf %58 : vector<18x32xf32> to vector<18x32xbf16>
    %c0_35 = arith.constant 0 : index
    %c0_36 = arith.constant 0 : index
    %c0_37 = arith.constant 0 : index
    %60 = vector.load %arg11[%c0_35, %c0_36, %c0_37] : memref<4x32x32xbf16, #tpu.memory_space<vmem>>, vector<1x32x32xbf16>
    %61 = vector.shape_cast %60 : vector<1x32x32xbf16> to vector<32x32xbf16>
    %cst_38 = arith.constant dense<0.000000e+00> : vector<18x32xf32>
    %62 = tpu.matmul %59, %61, %cst_38 {dimension_numbers = #tpu.dot_dimension_numbers<[1], [0], [0], [1], [0, 0, 1, 1], [], []>} : vector<18x32xbf16>, vector<32x32xbf16>, vector<18x32xf32> -> vector<18x32xf32>
    %c0_39 = arith.constant 0 : index
    %c0_40 = arith.constant 0 : index
    %c0_41 = arith.constant 0 : index
    %63 = vector.load %arg12[%c0_39, %c0_40, %c0_41] : memref<4x1x32xf32, #tpu.memory_space<vmem>>, vector<1x1x32xf32>
    %64 = vector.shape_cast %63 : vector<1x1x32xf32> to vector<1x32xf32>
    %65 = vector.broadcast %64 : vector<1x32xf32> to vector<18x32xf32>
    %66 = arith.addf %62, %65 : vector<18x32xf32>
    %67 = arith.addf %2, %66 : vector<18x32xf32>
    %c0_42 = arith.constant 0 : index
    %c0_43 = arith.constant 0 : index
    %c0_44 = arith.constant 0 : index
    %68 = vector.load %arg17[%c0_42, %c0_43, %c0_44] : memref<4x1x32xf32, #tpu.memory_space<vmem>>, vector<1x1x32xf32>
    %69 = vector.shape_cast %68 : vector<1x1x32xf32> to vector<1x32xf32>
    %c0_45 = arith.constant 0 : index
    %c0_46 = arith.constant 0 : index
    %c0_47 = arith.constant 0 : index
    %70 = vector.load %arg18[%c0_45, %c0_46, %c0_47] : memref<4x1x32xf32, #tpu.memory_space<vmem>>, vector<1x1x32xf32>
    %71 = vector.shape_cast %70 : vector<1x1x32xf32> to vector<1x32xf32>
    %cst_48 = arith.constant dense<0.000000e+00> : vector<18xf32>
    %72 = vector.multi_reduction <add>, %67, %cst_48 [1] : vector<18x32xf32> to vector<18xf32>
    %73 = vector.shape_cast %72 : vector<18xf32> to vector<18x1xf32>
    %cst_49 = arith.constant 3.200000e+01 : f32
    %74 = vector.broadcast %cst_49 : f32 to vector<18x1xf32>
    %75 = arith.divf %73, %74 : vector<18x1xf32>
    %76 = vector.broadcast %75 : vector<18x1xf32> to vector<18x32xf32>
    %77 = arith.subf %67, %76 : vector<18x32xf32>
    %78 = arith.mulf %77, %77 : vector<18x32xf32>
    %cst_50 = arith.constant dense<0.000000e+00> : vector<18xf32>
    %79 = vector.multi_reduction <add>, %78, %cst_50 [1] : vector<18x32xf32> to vector<18xf32>
    %80 = vector.shape_cast %79 : vector<18xf32> to vector<18x1xf32>
    %cst_51 = arith.constant 3.200000e+01 : f32
    %81 = vector.broadcast %cst_51 : f32 to vector<18x1xf32>
    %82 = arith.divf %80, %81 : vector<18x1xf32>
    %83 = vector.broadcast %75 : vector<18x1xf32> to vector<18x32xf32>
    %84 = arith.subf %67, %83 : vector<18x32xf32>
    %cst_52 = arith.constant 9.99999974E-6 : f32
    %85 = vector.broadcast %cst_52 : f32 to vector<18x1xf32>
    %86 = arith.addf %82, %85 : vector<18x1xf32>
    %87 = math.rsqrt %86 : vector<18x1xf32>
    %88 = vector.broadcast %87 : vector<18x1xf32> to vector<18x32xf32>
    %89 = arith.mulf %84, %88 : vector<18x32xf32>
    %90 = vector.broadcast %69 : vector<1x32xf32> to vector<18x32xf32>
    %91 = arith.mulf %89, %90 : vector<18x32xf32>
    %92 = vector.broadcast %71 : vector<1x32xf32> to vector<18x32xf32>
    %93 = arith.addf %91, %92 : vector<18x32xf32>
    %94 = arith.truncf %93 : vector<18x32xf32> to vector<18x32xbf16>
    %c0_53 = arith.constant 0 : index
    %c0_54 = arith.constant 0 : index
    %c0_55 = arith.constant 0 : index
    %95 = vector.load %arg13[%c0_53, %c0_54, %c0_55] : memref<4x32x2048xbf16, #tpu.memory_space<vmem>>, vector<1x32x2048xbf16>
    %96 = vector.shape_cast %95 : vector<1x32x2048xbf16> to vector<32x2048xbf16>
    %cst_56 = arith.constant dense<0.000000e+00> : vector<18x2048xf32>
    %97 = tpu.matmul %94, %96, %cst_56 {dimension_numbers = #tpu.dot_dimension_numbers<[1], [0], [0], [1], [0, 0, 1, 1], [], []>} : vector<18x32xbf16>, vector<32x2048xbf16>, vector<18x2048xf32> -> vector<18x2048xf32>
    %c0_57 = arith.constant 0 : index
    %c0_58 = arith.constant 0 : index
    %c0_59 = arith.constant 0 : index
    %98 = vector.load %arg14[%c0_57, %c0_58, %c0_59] : memref<4x1x2048xf32, #tpu.memory_space<vmem>>, vector<1x1x2048xf32>
    %99 = vector.shape_cast %98 : vector<1x1x2048xf32> to vector<1x2048xf32>
    %100 = vector.broadcast %99 : vector<1x2048xf32> to vector<18x2048xf32>
    %101 = arith.addf %97, %100 : vector<18x2048xf32>
    %cst_60 = arith.constant 0.000000e+00 : f32
    %102 = vector.broadcast %cst_60 : f32 to vector<18x2048xf32>
    %103 = arith.maximumf %101, %102 : vector<18x2048xf32>
    %104 = arith.truncf %103 : vector<18x2048xf32> to vector<18x2048xbf16>
    %c0_61 = arith.constant 0 : index
    %c0_62 = arith.constant 0 : index
    %c0_63 = arith.constant 0 : index
    %105 = vector.load %arg15[%c0_61, %c0_62, %c0_63] : memref<4x2048x32xbf16, #tpu.memory_space<vmem>>, vector<1x2048x32xbf16>
    %106 = vector.shape_cast %105 : vector<1x2048x32xbf16> to vector<2048x32xbf16>
    %cst_64 = arith.constant dense<0.000000e+00> : vector<18x32xf32>
    %107 = tpu.matmul %104, %106, %cst_64 {dimension_numbers = #tpu.dot_dimension_numbers<[1], [0], [0], [1], [0, 0, 1, 1], [], []>} : vector<18x2048xbf16>, vector<2048x32xbf16>, vector<18x32xf32> -> vector<18x32xf32>
    %c0_65 = arith.constant 0 : index
    %c0_66 = arith.constant 0 : index
    %c0_67 = arith.constant 0 : index
    %108 = vector.load %arg16[%c0_65, %c0_66, %c0_67] : memref<4x1x32xf32, #tpu.memory_space<vmem>>, vector<1x1x32xf32>
    %109 = vector.shape_cast %108 : vector<1x1x32xf32> to vector<1x32xf32>
    %110 = vector.broadcast %109 : vector<1x32xf32> to vector<18x32xf32>
    %111 = arith.addf %107, %110 : vector<18x32xf32>
    %112 = arith.addf %93, %111 : vector<18x32xf32>
    %c0_68 = arith.constant 0 : index
    %c0_69 = arith.constant 0 : index
    %c0_70 = arith.constant 0 : index
    %113 = vector.load %arg19[%c0_68, %c0_69, %c0_70] : memref<4x1x32xf32, #tpu.memory_space<vmem>>, vector<1x1x32xf32>
    %114 = vector.shape_cast %113 : vector<1x1x32xf32> to vector<1x32xf32>
    %c0_71 = arith.constant 0 : index
    %c0_72 = arith.constant 0 : index
    %c0_73 = arith.constant 0 : index
    %115 = vector.load %arg20[%c0_71, %c0_72, %c0_73] : memref<4x1x32xf32, #tpu.memory_space<vmem>>, vector<1x1x32xf32>
    %116 = vector.shape_cast %115 : vector<1x1x32xf32> to vector<1x32xf32>
    %cst_74 = arith.constant dense<0.000000e+00> : vector<18xf32>
    %117 = vector.multi_reduction <add>, %112, %cst_74 [1] : vector<18x32xf32> to vector<18xf32>
    %118 = vector.shape_cast %117 : vector<18xf32> to vector<18x1xf32>
    %cst_75 = arith.constant 3.200000e+01 : f32
    %119 = vector.broadcast %cst_75 : f32 to vector<18x1xf32>
    %120 = arith.divf %118, %119 : vector<18x1xf32>
    %121 = vector.broadcast %120 : vector<18x1xf32> to vector<18x32xf32>
    %122 = arith.subf %112, %121 : vector<18x32xf32>
    %123 = arith.mulf %122, %122 : vector<18x32xf32>
    %cst_76 = arith.constant dense<0.000000e+00> : vector<18xf32>
    %124 = vector.multi_reduction <add>, %123, %cst_76 [1] : vector<18x32xf32> to vector<18xf32>
    %125 = vector.shape_cast %124 : vector<18xf32> to vector<18x1xf32>
    %cst_77 = arith.constant 3.200000e+01 : f32
    %126 = vector.broadcast %cst_77 : f32 to vector<18x1xf32>
    %127 = arith.divf %125, %126 : vector<18x1xf32>
    %128 = vector.broadcast %120 : vector<18x1xf32> to vector<18x32xf32>
    %129 = arith.subf %112, %128 : vector<18x32xf32>
    %cst_78 = arith.constant 9.99999974E-6 : f32
    %130 = vector.broadcast %cst_78 : f32 to vector<18x1xf32>
    %131 = arith.addf %127, %130 : vector<18x1xf32>
    %132 = math.rsqrt %131 : vector<18x1xf32>
    %133 = vector.broadcast %132 : vector<18x1xf32> to vector<18x32xf32>
    %134 = arith.mulf %129, %133 : vector<18x32xf32>
    %135 = vector.broadcast %114 : vector<1x32xf32> to vector<18x32xf32>
    %136 = arith.mulf %134, %135 : vector<18x32xf32>
    %137 = vector.broadcast %116 : vector<1x32xf32> to vector<18x32xf32>
    %138 = arith.addf %136, %137 : vector<18x32xf32>
    %139 = arith.truncf %138 : vector<18x32xf32> to vector<18x32xbf16>
    %c1 = arith.constant 1 : index
    %c0_79 = arith.constant 0 : index
    %c0_80 = arith.constant 0 : index
    %140 = vector.load %arg5[%c1, %c0_79, %c0_80] : memref<4x32x32xbf16, #tpu.memory_space<vmem>>, vector<1x32x32xbf16>
    %141 = vector.shape_cast %140 : vector<1x32x32xbf16> to vector<32x32xbf16>
    %cst_81 = arith.constant dense<0.000000e+00> : vector<18x32xf32>
    %142 = tpu.matmul %139, %141, %cst_81 {dimension_numbers = #tpu.dot_dimension_numbers<[1], [0], [0], [1], [0, 0, 1, 1], [], []>} : vector<18x32xbf16>, vector<32x32xbf16>, vector<18x32xf32> -> vector<18x32xf32>
    %c1_82 = arith.constant 1 : index
    %c0_83 = arith.constant 0 : index
    %c0_84 = arith.constant 0 : index
    %143 = vector.load %arg6[%c1_82, %c0_83, %c0_84] : memref<4x1x32xf32, #tpu.memory_space<vmem>>, vector<1x1x32xf32>
    %144 = vector.shape_cast %143 : vector<1x1x32xf32> to vector<1x32xf32>
    %145 = vector.broadcast %144 : vector<1x32xf32> to vector<18x32xf32>
    %146 = arith.addf %142, %145 : vector<18x32xf32>
    %c1_85 = arith.constant 1 : index
    %c0_86 = arith.constant 0 : index
    %c0_87 = arith.constant 0 : index
    %147 = vector.load %arg7[%c1_85, %c0_86, %c0_87] : memref<4x32x32xbf16, #tpu.memory_space<vmem>>, vector<1x32x32xbf16>
    %148 = vector.shape_cast %147 : vector<1x32x32xbf16> to vector<32x32xbf16>
    %cst_88 = arith.constant dense<0.000000e+00> : vector<18x32xf32>
    %149 = tpu.matmul %139, %148, %cst_88 {dimension_numbers = #tpu.dot_dimension_numbers<[1], [0], [0], [1], [0, 0, 1, 1], [], []>} : vector<18x32xbf16>, vector<32x32xbf16>, vector<18x32xf32> -> vector<18x32xf32>
    %c1_89 = arith.constant 1 : index
    %c0_90 = arith.constant 0 : index
    %c0_91 = arith.constant 0 : index
    %150 = vector.load %arg8[%c1_89, %c0_90, %c0_91] : memref<4x1x32xf32, #tpu.memory_space<vmem>>, vector<1x1x32xf32>
    %151 = vector.shape_cast %150 : vector<1x1x32xf32> to vector<1x32xf32>
    %152 = vector.broadcast %151 : vector<1x32xf32> to vector<18x32xf32>
    %153 = arith.addf %149, %152 : vector<18x32xf32>
    %c1_92 = arith.constant 1 : index
    %c0_93 = arith.constant 0 : index
    %c0_94 = arith.constant 0 : index
    %154 = vector.load %arg9[%c1_92, %c0_93, %c0_94] : memref<4x32x32xbf16, #tpu.memory_space<vmem>>, vector<1x32x32xbf16>
    %155 = vector.shape_cast %154 : vector<1x32x32xbf16> to vector<32x32xbf16>
    %cst_95 = arith.constant dense<0.000000e+00> : vector<18x32xf32>
    %156 = tpu.matmul %139, %155, %cst_95 {dimension_numbers = #tpu.dot_dimension_numbers<[1], [0], [0], [1], [0, 0, 1, 1], [], []>} : vector<18x32xbf16>, vector<32x32xbf16>, vector<18x32xf32> -> vector<18x32xf32>
    %c1_96 = arith.constant 1 : index
    %c0_97 = arith.constant 0 : index
    %c0_98 = arith.constant 0 : index
    %157 = vector.load %arg10[%c1_96, %c0_97, %c0_98] : memref<4x1x32xf32, #tpu.memory_space<vmem>>, vector<1x1x32xf32>
    %158 = vector.shape_cast %157 : vector<1x1x32xf32> to vector<1x32xf32>
    %159 = vector.broadcast %158 : vector<1x32xf32> to vector<18x32xf32>
    %160 = arith.addf %156, %159 : vector<18x32xf32>
    %161 = vector.shape_cast %146 : vector<18x32xf32> to vector<1x18x32xf32>
    %162 = vector.broadcast %161 : vector<1x18x32xf32> to vector<8x18x32xf32>
    %163 = vector.broadcast %3 : vector<8x1x32xf32> to vector<8x18x32xf32>
    %164 = arith.mulf %162, %163 : vector<8x18x32xf32>
    %165 = arith.truncf %164 : vector<8x18x32xf32> to vector<8x18x32xbf16>
    %166 = vector.shape_cast %160 : vector<18x32xf32> to vector<1x18x32xf32>
    %167 = vector.broadcast %166 : vector<1x18x32xf32> to vector<8x18x32xf32>
    %168 = vector.broadcast %3 : vector<8x1x32xf32> to vector<8x18x32xf32>
    %169 = arith.mulf %167, %168 : vector<8x18x32xf32>
    %170 = arith.truncf %169 : vector<8x18x32xf32> to vector<8x18x32xbf16>
    %171 = arith.truncf %153 : vector<18x32xf32> to vector<18x32xbf16>
    %172 = vector.shape_cast %171 : vector<18x32xbf16> to vector<1x18x32xbf16>
    %173 = vector.shape_cast %172 : vector<1x18x32xbf16> to vector<1x18x32xbf16>
    %174 = vector.broadcast %173 : vector<1x18x32xbf16> to vector<8x18x32xbf16>
    "tpu.trace_start"() <{level = 10 : i32, message = "hqd,hkd->hqk"}> : () -> ()
    %cst_99 = arith.constant dense<0.000000e+00> : vector<8x18x18xf32>
    %175 = tpu.matmul %165, %174, %cst_99 {dimension_numbers = #tpu.dot_dimension_numbers<[2], [2], [1], [1], [0, 0, 0, 1, 1, 1], [0], [0]>} : vector<8x18x32xbf16>, vector<8x18x32xbf16>, vector<8x18x18xf32> -> vector<8x18x18xf32>
    "tpu.trace_stop"() : () -> ()
    %cst_100 = arith.constant 5.000000e-01 : f32
    %176 = vector.broadcast %cst_100 : f32 to vector<8x18x18xf32>
    %177 = arith.mulf %175, %176 : vector<8x18x18xf32>
    %178 = vector.broadcast %4 : vector<1x18x18xf32> to vector<8x18x18xf32>
    %179 = arith.addf %177, %178 : vector<8x18x18xf32>
    %cst_101 = arith.constant dense<0xFF800000> : vector<8x18xf32>
    %180 = vector.multi_reduction <maximumf>, %179, %cst_101 [2] : vector<8x18x18xf32> to vector<8x18xf32>
    %181 = vector.shape_cast %180 : vector<8x18xf32> to vector<8x18x1xf32>
    %182 = vector.broadcast %181 : vector<8x18x1xf32> to vector<8x18x18xf32>
    %183 = arith.subf %179, %182 : vector<8x18x18xf32>
    %184 = math.exp %183 : vector<8x18x18xf32>
    %cst_102 = arith.constant dense<0.000000e+00> : vector<8x18xf32>
    %185 = vector.multi_reduction <add>, %184, %cst_102 [2] : vector<8x18x18xf32> to vector<8x18xf32>
    %186 = vector.shape_cast %185 : vector<8x18xf32> to vector<8x18x1xf32>
    %187 = tpu.reciprocal %186 {approx = true} : vector<8x18x1xf32> -> vector<8x18x1xf32>
    %188 = vector.broadcast %187 : vector<8x18x1xf32> to vector<8x18x18xf32>
    %189 = arith.mulf %184, %188 : vector<8x18x18xf32>
    %190 = arith.truncf %189 : vector<8x18x18xf32> to vector<8x18x18xbf16>
    "tpu.trace_start"() <{level = 10 : i32, message = "hqk,hkd->hqd"}> : () -> ()
    %cst_103 = arith.constant dense<0.000000e+00> : vector<8x18x32xf32>
    %191 = tpu.matmul %190, %170, %cst_103 {dimension_numbers = #tpu.dot_dimension_numbers<[2], [1], [1], [2], [0, 0, 0, 1, 1, 2], [0], [0]>} : vector<8x18x18xbf16>, vector<8x18x32xbf16>, vector<8x18x32xf32> -> vector<8x18x32xf32>
    "tpu.trace_stop"() : () -> ()
    %cst_104 = arith.constant dense<0.000000e+00> : vector<18x32xf32>
    %192 = vector.multi_reduction <add>, %191, %cst_104 [0] : vector<8x18x32xf32> to vector<18x32xf32>
    %193 = arith.truncf %192 : vector<18x32xf32> to vector<18x32xbf16>
    %c1_105 = arith.constant 1 : index
    %c0_106 = arith.constant 0 : index
    %c0_107 = arith.constant 0 : index
    %194 = vector.load %arg11[%c1_105, %c0_106, %c0_107] : memref<4x32x32xbf16, #tpu.memory_space<vmem>>, vector<1x32x32xbf16>
    %195 = vector.shape_cast %194 : vector<1x32x32xbf16> to vector<32x32xbf16>
    %cst_108 = arith.constant dense<0.000000e+00> : vector<18x32xf32>
    %196 = tpu.matmul %193, %195, %cst_108 {dimension_numbers = #tpu.dot_dimension_numbers<[1], [0], [0], [1], [0, 0, 1, 1], [], []>} : vector<18x32xbf16>, vector<32x32xbf16>, vector<18x32xf32> -> vector<18x32xf32>
    %c1_109 = arith.constant 1 : index
    %c0_110 = arith.constant 0 : index
    %c0_111 = arith.constant 0 : index
    %197 = vector.load %arg12[%c1_109, %c0_110, %c0_111] : memref<4x1x32xf32, #tpu.memory_space<vmem>>, vector<1x1x32xf32>
    %198 = vector.shape_cast %197 : vector<1x1x32xf32> to vector<1x32xf32>
    %199 = vector.broadcast %198 : vector<1x32xf32> to vector<18x32xf32>
    %200 = arith.addf %196, %199 : vector<18x32xf32>
    %201 = arith.addf %138, %200 : vector<18x32xf32>
    %c1_112 = arith.constant 1 : index
    %c0_113 = arith.constant 0 : index
    %c0_114 = arith.constant 0 : index
    %202 = vector.load %arg17[%c1_112, %c0_113, %c0_114] : memref<4x1x32xf32, #tpu.memory_space<vmem>>, vector<1x1x32xf32>
    %203 = vector.shape_cast %202 : vector<1x1x32xf32> to vector<1x32xf32>
    %c1_115 = arith.constant 1 : index
    %c0_116 = arith.constant 0 : index
    %c0_117 = arith.constant 0 : index
    %204 = vector.load %arg18[%c1_115, %c0_116, %c0_117] : memref<4x1x32xf32, #tpu.memory_space<vmem>>, vector<1x1x32xf32>
    %205 = vector.shape_cast %204 : vector<1x1x32xf32> to vector<1x32xf32>
    %cst_118 = arith.constant dense<0.000000e+00> : vector<18xf32>
    %206 = vector.multi_reduction <add>, %201, %cst_118 [1] : vector<18x32xf32> to vector<18xf32>
    %207 = vector.shape_cast %206 : vector<18xf32> to vector<18x1xf32>
    %cst_119 = arith.constant 3.200000e+01 : f32
    %208 = vector.broadcast %cst_119 : f32 to vector<18x1xf32>
    %209 = arith.divf %207, %208 : vector<18x1xf32>
    %210 = vector.broadcast %209 : vector<18x1xf32> to vector<18x32xf32>
    %211 = arith.subf %201, %210 : vector<18x32xf32>
    %212 = arith.mulf %211, %211 : vector<18x32xf32>
    %cst_120 = arith.constant dense<0.000000e+00> : vector<18xf32>
    %213 = vector.multi_reduction <add>, %212, %cst_120 [1] : vector<18x32xf32> to vector<18xf32>
    %214 = vector.shape_cast %213 : vector<18xf32> to vector<18x1xf32>
    %cst_121 = arith.constant 3.200000e+01 : f32
    %215 = vector.broadcast %cst_121 : f32 to vector<18x1xf32>
    %216 = arith.divf %214, %215 : vector<18x1xf32>
    %217 = vector.broadcast %209 : vector<18x1xf32> to vector<18x32xf32>
    %218 = arith.subf %201, %217 : vector<18x32xf32>
    %cst_122 = arith.constant 9.99999974E-6 : f32
    %219 = vector.broadcast %cst_122 : f32 to vector<18x1xf32>
    %220 = arith.addf %216, %219 : vector<18x1xf32>
    %221 = math.rsqrt %220 : vector<18x1xf32>
    %222 = vector.broadcast %221 : vector<18x1xf32> to vector<18x32xf32>
    %223 = arith.mulf %218, %222 : vector<18x32xf32>
    %224 = vector.broadcast %203 : vector<1x32xf32> to vector<18x32xf32>
    %225 = arith.mulf %223, %224 : vector<18x32xf32>
    %226 = vector.broadcast %205 : vector<1x32xf32> to vector<18x32xf32>
    %227 = arith.addf %225, %226 : vector<18x32xf32>
    %228 = arith.truncf %227 : vector<18x32xf32> to vector<18x32xbf16>
    %c1_123 = arith.constant 1 : index
    %c0_124 = arith.constant 0 : index
    %c0_125 = arith.constant 0 : index
    %229 = vector.load %arg13[%c1_123, %c0_124, %c0_125] : memref<4x32x2048xbf16, #tpu.memory_space<vmem>>, vector<1x32x2048xbf16>
    %230 = vector.shape_cast %229 : vector<1x32x2048xbf16> to vector<32x2048xbf16>
    %cst_126 = arith.constant dense<0.000000e+00> : vector<18x2048xf32>
    %231 = tpu.matmul %228, %230, %cst_126 {dimension_numbers = #tpu.dot_dimension_numbers<[1], [0], [0], [1], [0, 0, 1, 1], [], []>} : vector<18x32xbf16>, vector<32x2048xbf16>, vector<18x2048xf32> -> vector<18x2048xf32>
    %c1_127 = arith.constant 1 : index
    %c0_128 = arith.constant 0 : index
    %c0_129 = arith.constant 0 : index
    %232 = vector.load %arg14[%c1_127, %c0_128, %c0_129] : memref<4x1x2048xf32, #tpu.memory_space<vmem>>, vector<1x1x2048xf32>
    %233 = vector.shape_cast %232 : vector<1x1x2048xf32> to vector<1x2048xf32>
    %234 = vector.broadcast %233 : vector<1x2048xf32> to vector<18x2048xf32>
    %235 = arith.addf %231, %234 : vector<18x2048xf32>
    %cst_130 = arith.constant 0.000000e+00 : f32
    %236 = vector.broadcast %cst_130 : f32 to vector<18x2048xf32>
    %237 = arith.maximumf %235, %236 : vector<18x2048xf32>
    %238 = arith.truncf %237 : vector<18x2048xf32> to vector<18x2048xbf16>
    %c1_131 = arith.constant 1 : index
    %c0_132 = arith.constant 0 : index
    %c0_133 = arith.constant 0 : index
    %239 = vector.load %arg15[%c1_131, %c0_132, %c0_133] : memref<4x2048x32xbf16, #tpu.memory_space<vmem>>, vector<1x2048x32xbf16>
    %240 = vector.shape_cast %239 : vector<1x2048x32xbf16> to vector<2048x32xbf16>
    %cst_134 = arith.constant dense<0.000000e+00> : vector<18x32xf32>
    %241 = tpu.matmul %238, %240, %cst_134 {dimension_numbers = #tpu.dot_dimension_numbers<[1], [0], [0], [1], [0, 0, 1, 1], [], []>} : vector<18x2048xbf16>, vector<2048x32xbf16>, vector<18x32xf32> -> vector<18x32xf32>
    %c1_135 = arith.constant 1 : index
    %c0_136 = arith.constant 0 : index
    %c0_137 = arith.constant 0 : index
    %242 = vector.load %arg16[%c1_135, %c0_136, %c0_137] : memref<4x1x32xf32, #tpu.memory_space<vmem>>, vector<1x1x32xf32>
    %243 = vector.shape_cast %242 : vector<1x1x32xf32> to vector<1x32xf32>
    %244 = vector.broadcast %243 : vector<1x32xf32> to vector<18x32xf32>
    %245 = arith.addf %241, %244 : vector<18x32xf32>
    %246 = arith.addf %227, %245 : vector<18x32xf32>
    %c1_138 = arith.constant 1 : index
    %c0_139 = arith.constant 0 : index
    %c0_140 = arith.constant 0 : index
    %247 = vector.load %arg19[%c1_138, %c0_139, %c0_140] : memref<4x1x32xf32, #tpu.memory_space<vmem>>, vector<1x1x32xf32>
    %248 = vector.shape_cast %247 : vector<1x1x32xf32> to vector<1x32xf32>
    %c1_141 = arith.constant 1 : index
    %c0_142 = arith.constant 0 : index
    %c0_143 = arith.constant 0 : index
    %249 = vector.load %arg20[%c1_141, %c0_142, %c0_143] : memref<4x1x32xf32, #tpu.memory_space<vmem>>, vector<1x1x32xf32>
    %250 = vector.shape_cast %249 : vector<1x1x32xf32> to vector<1x32xf32>
    %cst_144 = arith.constant dense<0.000000e+00> : vector<18xf32>
    %251 = vector.multi_reduction <add>, %246, %cst_144 [1] : vector<18x32xf32> to vector<18xf32>
    %252 = vector.shape_cast %251 : vector<18xf32> to vector<18x1xf32>
    %cst_145 = arith.constant 3.200000e+01 : f32
    %253 = vector.broadcast %cst_145 : f32 to vector<18x1xf32>
    %254 = arith.divf %252, %253 : vector<18x1xf32>
    %255 = vector.broadcast %254 : vector<18x1xf32> to vector<18x32xf32>
    %256 = arith.subf %246, %255 : vector<18x32xf32>
    %257 = arith.mulf %256, %256 : vector<18x32xf32>
    %cst_146 = arith.constant dense<0.000000e+00> : vector<18xf32>
    %258 = vector.multi_reduction <add>, %257, %cst_146 [1] : vector<18x32xf32> to vector<18xf32>
    %259 = vector.shape_cast %258 : vector<18xf32> to vector<18x1xf32>
    %cst_147 = arith.constant 3.200000e+01 : f32
    %260 = vector.broadcast %cst_147 : f32 to vector<18x1xf32>
    %261 = arith.divf %259, %260 : vector<18x1xf32>
    %262 = vector.broadcast %254 : vector<18x1xf32> to vector<18x32xf32>
    %263 = arith.subf %246, %262 : vector<18x32xf32>
    %cst_148 = arith.constant 9.99999974E-6 : f32
    %264 = vector.broadcast %cst_148 : f32 to vector<18x1xf32>
    %265 = arith.addf %261, %264 : vector<18x1xf32>
    %266 = math.rsqrt %265 : vector<18x1xf32>
    %267 = vector.broadcast %266 : vector<18x1xf32> to vector<18x32xf32>
    %268 = arith.mulf %263, %267 : vector<18x32xf32>
    %269 = vector.broadcast %248 : vector<1x32xf32> to vector<18x32xf32>
    %270 = arith.mulf %268, %269 : vector<18x32xf32>
    %271 = vector.broadcast %250 : vector<1x32xf32> to vector<18x32xf32>
    %272 = arith.addf %270, %271 : vector<18x32xf32>
    %273 = arith.truncf %272 : vector<18x32xf32> to vector<18x32xbf16>
    %c2 = arith.constant 2 : index
    %c0_149 = arith.constant 0 : index
    %c0_150 = arith.constant 0 : index
    %274 = vector.load %arg5[%c2, %c0_149, %c0_150] : memref<4x32x32xbf16, #tpu.memory_space<vmem>>, vector<1x32x32xbf16>
    %275 = vector.shape_cast %274 : vector<1x32x32xbf16> to vector<32x32xbf16>
    %cst_151 = arith.constant dense<0.000000e+00> : vector<18x32xf32>
    %276 = tpu.matmul %273, %275, %cst_151 {dimension_numbers = #tpu.dot_dimension_numbers<[1], [0], [0], [1], [0, 0, 1, 1], [], []>} : vector<18x32xbf16>, vector<32x32xbf16>, vector<18x32xf32> -> vector<18x32xf32>
    %c2_152 = arith.constant 2 : index
    %c0_153 = arith.constant 0 : index
    %c0_154 = arith.constant 0 : index
    %277 = vector.load %arg6[%c2_152, %c0_153, %c0_154] : memref<4x1x32xf32, #tpu.memory_space<vmem>>, vector<1x1x32xf32>
    %278 = vector.shape_cast %277 : vector<1x1x32xf32> to vector<1x32xf32>
    %279 = vector.broadcast %278 : vector<1x32xf32> to vector<18x32xf32>
    %280 = arith.addf %276, %279 : vector<18x32xf32>
    %c2_155 = arith.constant 2 : index
    %c0_156 = arith.constant 0 : index
    %c0_157 = arith.constant 0 : index
    %281 = vector.load %arg7[%c2_155, %c0_156, %c0_157] : memref<4x32x32xbf16, #tpu.memory_space<vmem>>, vector<1x32x32xbf16>
    %282 = vector.shape_cast %281 : vector<1x32x32xbf16> to vector<32x32xbf16>
    %cst_158 = arith.constant dense<0.000000e+00> : vector<18x32xf32>
    %283 = tpu.matmul %273, %282, %cst_158 {dimension_numbers = #tpu.dot_dimension_numbers<[1], [0], [0], [1], [0, 0, 1, 1], [], []>} : vector<18x32xbf16>, vector<32x32xbf16>, vector<18x32xf32> -> vector<18x32xf32>
    %c2_159 = arith.constant 2 : index
    %c0_160 = arith.constant 0 : index
    %c0_161 = arith.constant 0 : index
    %284 = vector.load %arg8[%c2_159, %c0_160, %c0_161] : memref<4x1x32xf32, #tpu.memory_space<vmem>>, vector<1x1x32xf32>
    %285 = vector.shape_cast %284 : vector<1x1x32xf32> to vector<1x32xf32>
    %286 = vector.broadcast %285 : vector<1x32xf32> to vector<18x32xf32>
    %287 = arith.addf %283, %286 : vector<18x32xf32>
    %c2_162 = arith.constant 2 : index
    %c0_163 = arith.constant 0 : index
    %c0_164 = arith.constant 0 : index
    %288 = vector.load %arg9[%c2_162, %c0_163, %c0_164] : memref<4x32x32xbf16, #tpu.memory_space<vmem>>, vector<1x32x32xbf16>
    %289 = vector.shape_cast %288 : vector<1x32x32xbf16> to vector<32x32xbf16>
    %cst_165 = arith.constant dense<0.000000e+00> : vector<18x32xf32>
    %290 = tpu.matmul %273, %289, %cst_165 {dimension_numbers = #tpu.dot_dimension_numbers<[1], [0], [0], [1], [0, 0, 1, 1], [], []>} : vector<18x32xbf16>, vector<32x32xbf16>, vector<18x32xf32> -> vector<18x32xf32>
    %c2_166 = arith.constant 2 : index
    %c0_167 = arith.constant 0 : index
    %c0_168 = arith.constant 0 : index
    %291 = vector.load %arg10[%c2_166, %c0_167, %c0_168] : memref<4x1x32xf32, #tpu.memory_space<vmem>>, vector<1x1x32xf32>
    %292 = vector.shape_cast %291 : vector<1x1x32xf32> to vector<1x32xf32>
    %293 = vector.broadcast %292 : vector<1x32xf32> to vector<18x32xf32>
    %294 = arith.addf %290, %293 : vector<18x32xf32>
    %295 = vector.shape_cast %280 : vector<18x32xf32> to vector<1x18x32xf32>
    %296 = vector.broadcast %295 : vector<1x18x32xf32> to vector<8x18x32xf32>
    %297 = vector.broadcast %3 : vector<8x1x32xf32> to vector<8x18x32xf32>
    %298 = arith.mulf %296, %297 : vector<8x18x32xf32>
    %299 = arith.truncf %298 : vector<8x18x32xf32> to vector<8x18x32xbf16>
    %300 = vector.shape_cast %294 : vector<18x32xf32> to vector<1x18x32xf32>
    %301 = vector.broadcast %300 : vector<1x18x32xf32> to vector<8x18x32xf32>
    %302 = vector.broadcast %3 : vector<8x1x32xf32> to vector<8x18x32xf32>
    %303 = arith.mulf %301, %302 : vector<8x18x32xf32>
    %304 = arith.truncf %303 : vector<8x18x32xf32> to vector<8x18x32xbf16>
    %305 = arith.truncf %287 : vector<18x32xf32> to vector<18x32xbf16>
    %306 = vector.shape_cast %305 : vector<18x32xbf16> to vector<1x18x32xbf16>
    %307 = vector.shape_cast %306 : vector<1x18x32xbf16> to vector<1x18x32xbf16>
    %308 = vector.broadcast %307 : vector<1x18x32xbf16> to vector<8x18x32xbf16>
    "tpu.trace_start"() <{level = 10 : i32, message = "hqd,hkd->hqk"}> : () -> ()
    %cst_169 = arith.constant dense<0.000000e+00> : vector<8x18x18xf32>
    %309 = tpu.matmul %299, %308, %cst_169 {dimension_numbers = #tpu.dot_dimension_numbers<[2], [2], [1], [1], [0, 0, 0, 1, 1, 1], [0], [0]>} : vector<8x18x32xbf16>, vector<8x18x32xbf16>, vector<8x18x18xf32> -> vector<8x18x18xf32>
    "tpu.trace_stop"() : () -> ()
    %cst_170 = arith.constant 5.000000e-01 : f32
    %310 = vector.broadcast %cst_170 : f32 to vector<8x18x18xf32>
    %311 = arith.mulf %309, %310 : vector<8x18x18xf32>
    %312 = vector.broadcast %4 : vector<1x18x18xf32> to vector<8x18x18xf32>
    %313 = arith.addf %311, %312 : vector<8x18x18xf32>
    %cst_171 = arith.constant dense<0xFF800000> : vector<8x18xf32>
    %314 = vector.multi_reduction <maximumf>, %313, %cst_171 [2] : vector<8x18x18xf32> to vector<8x18xf32>
    %315 = vector.shape_cast %314 : vector<8x18xf32> to vector<8x18x1xf32>
    %316 = vector.broadcast %315 : vector<8x18x1xf32> to vector<8x18x18xf32>
    %317 = arith.subf %313, %316 : vector<8x18x18xf32>
    %318 = math.exp %317 : vector<8x18x18xf32>
    %cst_172 = arith.constant dense<0.000000e+00> : vector<8x18xf32>
    %319 = vector.multi_reduction <add>, %318, %cst_172 [2] : vector<8x18x18xf32> to vector<8x18xf32>
    %320 = vector.shape_cast %319 : vector<8x18xf32> to vector<8x18x1xf32>
    %321 = tpu.reciprocal %320 {approx = true} : vector<8x18x1xf32> -> vector<8x18x1xf32>
    %322 = vector.broadcast %321 : vector<8x18x1xf32> to vector<8x18x18xf32>
    %323 = arith.mulf %318, %322 : vector<8x18x18xf32>
    %324 = arith.truncf %323 : vector<8x18x18xf32> to vector<8x18x18xbf16>
    "tpu.trace_start"() <{level = 10 : i32, message = "hqk,hkd->hqd"}> : () -> ()
    %cst_173 = arith.constant dense<0.000000e+00> : vector<8x18x32xf32>
    %325 = tpu.matmul %324, %304, %cst_173 {dimension_numbers = #tpu.dot_dimension_numbers<[2], [1], [1], [2], [0, 0, 0, 1, 1, 2], [0], [0]>} : vector<8x18x18xbf16>, vector<8x18x32xbf16>, vector<8x18x32xf32> -> vector<8x18x32xf32>
    "tpu.trace_stop"() : () -> ()
    %cst_174 = arith.constant dense<0.000000e+00> : vector<18x32xf32>
    %326 = vector.multi_reduction <add>, %325, %cst_174 [0] : vector<8x18x32xf32> to vector<18x32xf32>
    %327 = arith.truncf %326 : vector<18x32xf32> to vector<18x32xbf16>
    %c2_175 = arith.constant 2 : index
    %c0_176 = arith.constant 0 : index
    %c0_177 = arith.constant 0 : index
    %328 = vector.load %arg11[%c2_175, %c0_176, %c0_177] : memref<4x32x32xbf16, #tpu.memory_space<vmem>>, vector<1x32x32xbf16>
    %329 = vector.shape_cast %328 : vector<1x32x32xbf16> to vector<32x32xbf16>
    %cst_178 = arith.constant dense<0.000000e+00> : vector<18x32xf32>
    %330 = tpu.matmul %327, %329, %cst_178 {dimension_numbers = #tpu.dot_dimension_numbers<[1], [0], [0], [1], [0, 0, 1, 1], [], []>} : vector<18x32xbf16>, vector<32x32xbf16>, vector<18x32xf32> -> vector<18x32xf32>
    %c2_179 = arith.constant 2 : index
    %c0_180 = arith.constant 0 : index
    %c0_181 = arith.constant 0 : index
    %331 = vector.load %arg12[%c2_179, %c0_180, %c0_181] : memref<4x1x32xf32, #tpu.memory_space<vmem>>, vector<1x1x32xf32>
    %332 = vector.shape_cast %331 : vector<1x1x32xf32> to vector<1x32xf32>
    %333 = vector.broadcast %332 : vector<1x32xf32> to vector<18x32xf32>
    %334 = arith.addf %330, %333 : vector<18x32xf32>
    %335 = arith.addf %272, %334 : vector<18x32xf32>
    %c2_182 = arith.constant 2 : index
    %c0_183 = arith.constant 0 : index
    %c0_184 = arith.constant 0 : index
    %336 = vector.load %arg17[%c2_182, %c0_183, %c0_184] : memref<4x1x32xf32, #tpu.memory_space<vmem>>, vector<1x1x32xf32>
    %337 = vector.shape_cast %336 : vector<1x1x32xf32> to vector<1x32xf32>
    %c2_185 = arith.constant 2 : index
    %c0_186 = arith.constant 0 : index
    %c0_187 = arith.constant 0 : index
    %338 = vector.load %arg18[%c2_185, %c0_186, %c0_187] : memref<4x1x32xf32, #tpu.memory_space<vmem>>, vector<1x1x32xf32>
    %339 = vector.shape_cast %338 : vector<1x1x32xf32> to vector<1x32xf32>
    %cst_188 = arith.constant dense<0.000000e+00> : vector<18xf32>
    %340 = vector.multi_reduction <add>, %335, %cst_188 [1] : vector<18x32xf32> to vector<18xf32>
    %341 = vector.shape_cast %340 : vector<18xf32> to vector<18x1xf32>
    %cst_189 = arith.constant 3.200000e+01 : f32
    %342 = vector.broadcast %cst_189 : f32 to vector<18x1xf32>
    %343 = arith.divf %341, %342 : vector<18x1xf32>
    %344 = vector.broadcast %343 : vector<18x1xf32> to vector<18x32xf32>
    %345 = arith.subf %335, %344 : vector<18x32xf32>
    %346 = arith.mulf %345, %345 : vector<18x32xf32>
    %cst_190 = arith.constant dense<0.000000e+00> : vector<18xf32>
    %347 = vector.multi_reduction <add>, %346, %cst_190 [1] : vector<18x32xf32> to vector<18xf32>
    %348 = vector.shape_cast %347 : vector<18xf32> to vector<18x1xf32>
    %cst_191 = arith.constant 3.200000e+01 : f32
    %349 = vector.broadcast %cst_191 : f32 to vector<18x1xf32>
    %350 = arith.divf %348, %349 : vector<18x1xf32>
    %351 = vector.broadcast %343 : vector<18x1xf32> to vector<18x32xf32>
    %352 = arith.subf %335, %351 : vector<18x32xf32>
    %cst_192 = arith.constant 9.99999974E-6 : f32
    %353 = vector.broadcast %cst_192 : f32 to vector<18x1xf32>
    %354 = arith.addf %350, %353 : vector<18x1xf32>
    %355 = math.rsqrt %354 : vector<18x1xf32>
    %356 = vector.broadcast %355 : vector<18x1xf32> to vector<18x32xf32>
    %357 = arith.mulf %352, %356 : vector<18x32xf32>
    %358 = vector.broadcast %337 : vector<1x32xf32> to vector<18x32xf32>
    %359 = arith.mulf %357, %358 : vector<18x32xf32>
    %360 = vector.broadcast %339 : vector<1x32xf32> to vector<18x32xf32>
    %361 = arith.addf %359, %360 : vector<18x32xf32>
    %362 = arith.truncf %361 : vector<18x32xf32> to vector<18x32xbf16>
    %c2_193 = arith.constant 2 : index
    %c0_194 = arith.constant 0 : index
    %c0_195 = arith.constant 0 : index
    %363 = vector.load %arg13[%c2_193, %c0_194, %c0_195] : memref<4x32x2048xbf16, #tpu.memory_space<vmem>>, vector<1x32x2048xbf16>
    %364 = vector.shape_cast %363 : vector<1x32x2048xbf16> to vector<32x2048xbf16>
    %cst_196 = arith.constant dense<0.000000e+00> : vector<18x2048xf32>
    %365 = tpu.matmul %362, %364, %cst_196 {dimension_numbers = #tpu.dot_dimension_numbers<[1], [0], [0], [1], [0, 0, 1, 1], [], []>} : vector<18x32xbf16>, vector<32x2048xbf16>, vector<18x2048xf32> -> vector<18x2048xf32>
    %c2_197 = arith.constant 2 : index
    %c0_198 = arith.constant 0 : index
    %c0_199 = arith.constant 0 : index
    %366 = vector.load %arg14[%c2_197, %c0_198, %c0_199] : memref<4x1x2048xf32, #tpu.memory_space<vmem>>, vector<1x1x2048xf32>
    %367 = vector.shape_cast %366 : vector<1x1x2048xf32> to vector<1x2048xf32>
    %368 = vector.broadcast %367 : vector<1x2048xf32> to vector<18x2048xf32>
    %369 = arith.addf %365, %368 : vector<18x2048xf32>
    %cst_200 = arith.constant 0.000000e+00 : f32
    %370 = vector.broadcast %cst_200 : f32 to vector<18x2048xf32>
    %371 = arith.maximumf %369, %370 : vector<18x2048xf32>
    %372 = arith.truncf %371 : vector<18x2048xf32> to vector<18x2048xbf16>
    %c2_201 = arith.constant 2 : index
    %c0_202 = arith.constant 0 : index
    %c0_203 = arith.constant 0 : index
    %373 = vector.load %arg15[%c2_201, %c0_202, %c0_203] : memref<4x2048x32xbf16, #tpu.memory_space<vmem>>, vector<1x2048x32xbf16>
    %374 = vector.shape_cast %373 : vector<1x2048x32xbf16> to vector<2048x32xbf16>
    %cst_204 = arith.constant dense<0.000000e+00> : vector<18x32xf32>
    %375 = tpu.matmul %372, %374, %cst_204 {dimension_numbers = #tpu.dot_dimension_numbers<[1], [0], [0], [1], [0, 0, 1, 1], [], []>} : vector<18x2048xbf16>, vector<2048x32xbf16>, vector<18x32xf32> -> vector<18x32xf32>
    %c2_205 = arith.constant 2 : index
    %c0_206 = arith.constant 0 : index
    %c0_207 = arith.constant 0 : index
    %376 = vector.load %arg16[%c2_205, %c0_206, %c0_207] : memref<4x1x32xf32, #tpu.memory_space<vmem>>, vector<1x1x32xf32>
    %377 = vector.shape_cast %376 : vector<1x1x32xf32> to vector<1x32xf32>
    %378 = vector.broadcast %377 : vector<1x32xf32> to vector<18x32xf32>
    %379 = arith.addf %375, %378 : vector<18x32xf32>
    %380 = arith.addf %361, %379 : vector<18x32xf32>
    %c2_208 = arith.constant 2 : index
    %c0_209 = arith.constant 0 : index
    %c0_210 = arith.constant 0 : index
    %381 = vector.load %arg19[%c2_208, %c0_209, %c0_210] : memref<4x1x32xf32, #tpu.memory_space<vmem>>, vector<1x1x32xf32>
    %382 = vector.shape_cast %381 : vector<1x1x32xf32> to vector<1x32xf32>
    %c2_211 = arith.constant 2 : index
    %c0_212 = arith.constant 0 : index
    %c0_213 = arith.constant 0 : index
    %383 = vector.load %arg20[%c2_211, %c0_212, %c0_213] : memref<4x1x32xf32, #tpu.memory_space<vmem>>, vector<1x1x32xf32>
    %384 = vector.shape_cast %383 : vector<1x1x32xf32> to vector<1x32xf32>
    %cst_214 = arith.constant dense<0.000000e+00> : vector<18xf32>
    %385 = vector.multi_reduction <add>, %380, %cst_214 [1] : vector<18x32xf32> to vector<18xf32>
    %386 = vector.shape_cast %385 : vector<18xf32> to vector<18x1xf32>
    %cst_215 = arith.constant 3.200000e+01 : f32
    %387 = vector.broadcast %cst_215 : f32 to vector<18x1xf32>
    %388 = arith.divf %386, %387 : vector<18x1xf32>
    %389 = vector.broadcast %388 : vector<18x1xf32> to vector<18x32xf32>
    %390 = arith.subf %380, %389 : vector<18x32xf32>
    %391 = arith.mulf %390, %390 : vector<18x32xf32>
    %cst_216 = arith.constant dense<0.000000e+00> : vector<18xf32>
    %392 = vector.multi_reduction <add>, %391, %cst_216 [1] : vector<18x32xf32> to vector<18xf32>
    %393 = vector.shape_cast %392 : vector<18xf32> to vector<18x1xf32>
    %cst_217 = arith.constant 3.200000e+01 : f32
    %394 = vector.broadcast %cst_217 : f32 to vector<18x1xf32>
    %395 = arith.divf %393, %394 : vector<18x1xf32>
    %396 = vector.broadcast %388 : vector<18x1xf32> to vector<18x32xf32>
    %397 = arith.subf %380, %396 : vector<18x32xf32>
    %cst_218 = arith.constant 9.99999974E-6 : f32
    %398 = vector.broadcast %cst_218 : f32 to vector<18x1xf32>
    %399 = arith.addf %395, %398 : vector<18x1xf32>
    %400 = math.rsqrt %399 : vector<18x1xf32>
    %401 = vector.broadcast %400 : vector<18x1xf32> to vector<18x32xf32>
    %402 = arith.mulf %397, %401 : vector<18x32xf32>
    %403 = vector.broadcast %382 : vector<1x32xf32> to vector<18x32xf32>
    %404 = arith.mulf %402, %403 : vector<18x32xf32>
    %405 = vector.broadcast %384 : vector<1x32xf32> to vector<18x32xf32>
    %406 = arith.addf %404, %405 : vector<18x32xf32>
    %407 = arith.truncf %406 : vector<18x32xf32> to vector<18x32xbf16>
    %c3 = arith.constant 3 : index
    %c0_219 = arith.constant 0 : index
    %c0_220 = arith.constant 0 : index
    %408 = vector.load %arg5[%c3, %c0_219, %c0_220] : memref<4x32x32xbf16, #tpu.memory_space<vmem>>, vector<1x32x32xbf16>
    %409 = vector.shape_cast %408 : vector<1x32x32xbf16> to vector<32x32xbf16>
    %cst_221 = arith.constant dense<0.000000e+00> : vector<18x32xf32>
    %410 = tpu.matmul %407, %409, %cst_221 {dimension_numbers = #tpu.dot_dimension_numbers<[1], [0], [0], [1], [0, 0, 1, 1], [], []>} : vector<18x32xbf16>, vector<32x32xbf16>, vector<18x32xf32> -> vector<18x32xf32>
    %c3_222 = arith.constant 3 : index
    %c0_223 = arith.constant 0 : index
    %c0_224 = arith.constant 0 : index
    %411 = vector.load %arg6[%c3_222, %c0_223, %c0_224] : memref<4x1x32xf32, #tpu.memory_space<vmem>>, vector<1x1x32xf32>
    %412 = vector.shape_cast %411 : vector<1x1x32xf32> to vector<1x32xf32>
    %413 = vector.broadcast %412 : vector<1x32xf32> to vector<18x32xf32>
    %414 = arith.addf %410, %413 : vector<18x32xf32>
    %c3_225 = arith.constant 3 : index
    %c0_226 = arith.constant 0 : index
    %c0_227 = arith.constant 0 : index
    %415 = vector.load %arg7[%c3_225, %c0_226, %c0_227] : memref<4x32x32xbf16, #tpu.memory_space<vmem>>, vector<1x32x32xbf16>
    %416 = vector.shape_cast %415 : vector<1x32x32xbf16> to vector<32x32xbf16>
    %cst_228 = arith.constant dense<0.000000e+00> : vector<18x32xf32>
    %417 = tpu.matmul %407, %416, %cst_228 {dimension_numbers = #tpu.dot_dimension_numbers<[1], [0], [0], [1], [0, 0, 1, 1], [], []>} : vector<18x32xbf16>, vector<32x32xbf16>, vector<18x32xf32> -> vector<18x32xf32>
    %c3_229 = arith.constant 3 : index
    %c0_230 = arith.constant 0 : index
    %c0_231 = arith.constant 0 : index
    %418 = vector.load %arg8[%c3_229, %c0_230, %c0_231] : memref<4x1x32xf32, #tpu.memory_space<vmem>>, vector<1x1x32xf32>
    %419 = vector.shape_cast %418 : vector<1x1x32xf32> to vector<1x32xf32>
    %420 = vector.broadcast %419 : vector<1x32xf32> to vector<18x32xf32>
    %421 = arith.addf %417, %420 : vector<18x32xf32>
    %c3_232 = arith.constant 3 : index
    %c0_233 = arith.constant 0 : index
    %c0_234 = arith.constant 0 : index
    %422 = vector.load %arg9[%c3_232, %c0_233, %c0_234] : memref<4x32x32xbf16, #tpu.memory_space<vmem>>, vector<1x32x32xbf16>
    %423 = vector.shape_cast %422 : vector<1x32x32xbf16> to vector<32x32xbf16>
    %cst_235 = arith.constant dense<0.000000e+00> : vector<18x32xf32>
    %424 = tpu.matmul %407, %423, %cst_235 {dimension_numbers = #tpu.dot_dimension_numbers<[1], [0], [0], [1], [0, 0, 1, 1], [], []>} : vector<18x32xbf16>, vector<32x32xbf16>, vector<18x32xf32> -> vector<18x32xf32>
    %c3_236 = arith.constant 3 : index
    %c0_237 = arith.constant 0 : index
    %c0_238 = arith.constant 0 : index
    %425 = vector.load %arg10[%c3_236, %c0_237, %c0_238] : memref<4x1x32xf32, #tpu.memory_space<vmem>>, vector<1x1x32xf32>
    %426 = vector.shape_cast %425 : vector<1x1x32xf32> to vector<1x32xf32>
    %427 = vector.broadcast %426 : vector<1x32xf32> to vector<18x32xf32>
    %428 = arith.addf %424, %427 : vector<18x32xf32>
    %429 = vector.shape_cast %414 : vector<18x32xf32> to vector<1x18x32xf32>
    %430 = vector.broadcast %429 : vector<1x18x32xf32> to vector<8x18x32xf32>
    %431 = vector.broadcast %3 : vector<8x1x32xf32> to vector<8x18x32xf32>
    %432 = arith.mulf %430, %431 : vector<8x18x32xf32>
    %433 = arith.truncf %432 : vector<8x18x32xf32> to vector<8x18x32xbf16>
    %434 = vector.shape_cast %428 : vector<18x32xf32> to vector<1x18x32xf32>
    %435 = vector.broadcast %434 : vector<1x18x32xf32> to vector<8x18x32xf32>
    %436 = vector.broadcast %3 : vector<8x1x32xf32> to vector<8x18x32xf32>
    %437 = arith.mulf %435, %436 : vector<8x18x32xf32>
    %438 = arith.truncf %437 : vector<8x18x32xf32> to vector<8x18x32xbf16>
    %439 = arith.truncf %421 : vector<18x32xf32> to vector<18x32xbf16>
    %440 = vector.shape_cast %439 : vector<18x32xbf16> to vector<1x18x32xbf16>
    %441 = vector.shape_cast %440 : vector<1x18x32xbf16> to vector<1x18x32xbf16>
    %442 = vector.broadcast %441 : vector<1x18x32xbf16> to vector<8x18x32xbf16>
    "tpu.trace_start"() <{level = 10 : i32, message = "hqd,hkd->hqk"}> : () -> ()
    %cst_239 = arith.constant dense<0.000000e+00> : vector<8x18x18xf32>
    %443 = tpu.matmul %433, %442, %cst_239 {dimension_numbers = #tpu.dot_dimension_numbers<[2], [2], [1], [1], [0, 0, 0, 1, 1, 1], [0], [0]>} : vector<8x18x32xbf16>, vector<8x18x32xbf16>, vector<8x18x18xf32> -> vector<8x18x18xf32>
    "tpu.trace_stop"() : () -> ()
    %cst_240 = arith.constant 5.000000e-01 : f32
    %444 = vector.broadcast %cst_240 : f32 to vector<8x18x18xf32>
    %445 = arith.mulf %443, %444 : vector<8x18x18xf32>
    %446 = vector.broadcast %4 : vector<1x18x18xf32> to vector<8x18x18xf32>
    %447 = arith.addf %445, %446 : vector<8x18x18xf32>
    %cst_241 = arith.constant dense<0xFF800000> : vector<8x18xf32>
    %448 = vector.multi_reduction <maximumf>, %447, %cst_241 [2] : vector<8x18x18xf32> to vector<8x18xf32>
    %449 = vector.shape_cast %448 : vector<8x18xf32> to vector<8x18x1xf32>
    %450 = vector.broadcast %449 : vector<8x18x1xf32> to vector<8x18x18xf32>
    %451 = arith.subf %447, %450 : vector<8x18x18xf32>
    %452 = math.exp %451 : vector<8x18x18xf32>
    %cst_242 = arith.constant dense<0.000000e+00> : vector<8x18xf32>
    %453 = vector.multi_reduction <add>, %452, %cst_242 [2] : vector<8x18x18xf32> to vector<8x18xf32>
    %454 = vector.shape_cast %453 : vector<8x18xf32> to vector<8x18x1xf32>
    %455 = tpu.reciprocal %454 {approx = true} : vector<8x18x1xf32> -> vector<8x18x1xf32>
    %456 = vector.broadcast %455 : vector<8x18x1xf32> to vector<8x18x18xf32>
    %457 = arith.mulf %452, %456 : vector<8x18x18xf32>
    %458 = arith.truncf %457 : vector<8x18x18xf32> to vector<8x18x18xbf16>
    "tpu.trace_start"() <{level = 10 : i32, message = "hqk,hkd->hqd"}> : () -> ()
    %cst_243 = arith.constant dense<0.000000e+00> : vector<8x18x32xf32>
    %459 = tpu.matmul %458, %438, %cst_243 {dimension_numbers = #tpu.dot_dimension_numbers<[2], [1], [1], [2], [0, 0, 0, 1, 1, 2], [0], [0]>} : vector<8x18x18xbf16>, vector<8x18x32xbf16>, vector<8x18x32xf32> -> vector<8x18x32xf32>
    "tpu.trace_stop"() : () -> ()
    %cst_244 = arith.constant dense<0.000000e+00> : vector<18x32xf32>
    %460 = vector.multi_reduction <add>, %459, %cst_244 [0] : vector<8x18x32xf32> to vector<18x32xf32>
    %461 = arith.truncf %460 : vector<18x32xf32> to vector<18x32xbf16>
    %c3_245 = arith.constant 3 : index
    %c0_246 = arith.constant 0 : index
    %c0_247 = arith.constant 0 : index
    %462 = vector.load %arg11[%c3_245, %c0_246, %c0_247] : memref<4x32x32xbf16, #tpu.memory_space<vmem>>, vector<1x32x32xbf16>
    %463 = vector.shape_cast %462 : vector<1x32x32xbf16> to vector<32x32xbf16>
    %cst_248 = arith.constant dense<0.000000e+00> : vector<18x32xf32>
    %464 = tpu.matmul %461, %463, %cst_248 {dimension_numbers = #tpu.dot_dimension_numbers<[1], [0], [0], [1], [0, 0, 1, 1], [], []>} : vector<18x32xbf16>, vector<32x32xbf16>, vector<18x32xf32> -> vector<18x32xf32>
    %c3_249 = arith.constant 3 : index
    %c0_250 = arith.constant 0 : index
    %c0_251 = arith.constant 0 : index
    %465 = vector.load %arg12[%c3_249, %c0_250, %c0_251] : memref<4x1x32xf32, #tpu.memory_space<vmem>>, vector<1x1x32xf32>
    %466 = vector.shape_cast %465 : vector<1x1x32xf32> to vector<1x32xf32>
    %467 = vector.broadcast %466 : vector<1x32xf32> to vector<18x32xf32>
    %468 = arith.addf %464, %467 : vector<18x32xf32>
    %469 = arith.addf %406, %468 : vector<18x32xf32>
    %c3_252 = arith.constant 3 : index
    %c0_253 = arith.constant 0 : index
    %c0_254 = arith.constant 0 : index
    %470 = vector.load %arg17[%c3_252, %c0_253, %c0_254] : memref<4x1x32xf32, #tpu.memory_space<vmem>>, vector<1x1x32xf32>
    %471 = vector.shape_cast %470 : vector<1x1x32xf32> to vector<1x32xf32>
    %c3_255 = arith.constant 3 : index
    %c0_256 = arith.constant 0 : index
    %c0_257 = arith.constant 0 : index
    %472 = vector.load %arg18[%c3_255, %c0_256, %c0_257] : memref<4x1x32xf32, #tpu.memory_space<vmem>>, vector<1x1x32xf32>
    %473 = vector.shape_cast %472 : vector<1x1x32xf32> to vector<1x32xf32>
    %cst_258 = arith.constant dense<0.000000e+00> : vector<18xf32>
    %474 = vector.multi_reduction <add>, %469, %cst_258 [1] : vector<18x32xf32> to vector<18xf32>
    %475 = vector.shape_cast %474 : vector<18xf32> to vector<18x1xf32>
    %cst_259 = arith.constant 3.200000e+01 : f32
    %476 = vector.broadcast %cst_259 : f32 to vector<18x1xf32>
    %477 = arith.divf %475, %476 : vector<18x1xf32>
    %478 = vector.broadcast %477 : vector<18x1xf32> to vector<18x32xf32>
    %479 = arith.subf %469, %478 : vector<18x32xf32>
    %480 = arith.mulf %479, %479 : vector<18x32xf32>
    %cst_260 = arith.constant dense<0.000000e+00> : vector<18xf32>
    %481 = vector.multi_reduction <add>, %480, %cst_260 [1] : vector<18x32xf32> to vector<18xf32>
    %482 = vector.shape_cast %481 : vector<18xf32> to vector<18x1xf32>
    %cst_261 = arith.constant 3.200000e+01 : f32
    %483 = vector.broadcast %cst_261 : f32 to vector<18x1xf32>
    %484 = arith.divf %482, %483 : vector<18x1xf32>
    %485 = vector.broadcast %477 : vector<18x1xf32> to vector<18x32xf32>
    %486 = arith.subf %469, %485 : vector<18x32xf32>
    %cst_262 = arith.constant 9.99999974E-6 : f32
    %487 = vector.broadcast %cst_262 : f32 to vector<18x1xf32>
    %488 = arith.addf %484, %487 : vector<18x1xf32>
    %489 = math.rsqrt %488 : vector<18x1xf32>
    %490 = vector.broadcast %489 : vector<18x1xf32> to vector<18x32xf32>
    %491 = arith.mulf %486, %490 : vector<18x32xf32>
    %492 = vector.broadcast %471 : vector<1x32xf32> to vector<18x32xf32>
    %493 = arith.mulf %491, %492 : vector<18x32xf32>
    %494 = vector.broadcast %473 : vector<1x32xf32> to vector<18x32xf32>
    %495 = arith.addf %493, %494 : vector<18x32xf32>
    %496 = arith.truncf %495 : vector<18x32xf32> to vector<18x32xbf16>
    %c3_263 = arith.constant 3 : index
    %c0_264 = arith.constant 0 : index
    %c0_265 = arith.constant 0 : index
    %497 = vector.load %arg13[%c3_263, %c0_264, %c0_265] : memref<4x32x2048xbf16, #tpu.memory_space<vmem>>, vector<1x32x2048xbf16>
    %498 = vector.shape_cast %497 : vector<1x32x2048xbf16> to vector<32x2048xbf16>
    %cst_266 = arith.constant dense<0.000000e+00> : vector<18x2048xf32>
    %499 = tpu.matmul %496, %498, %cst_266 {dimension_numbers = #tpu.dot_dimension_numbers<[1], [0], [0], [1], [0, 0, 1, 1], [], []>} : vector<18x32xbf16>, vector<32x2048xbf16>, vector<18x2048xf32> -> vector<18x2048xf32>
    %c3_267 = arith.constant 3 : index
    %c0_268 = arith.constant 0 : index
    %c0_269 = arith.constant 0 : index
    %500 = vector.load %arg14[%c3_267, %c0_268, %c0_269] : memref<4x1x2048xf32, #tpu.memory_space<vmem>>, vector<1x1x2048xf32>
    %501 = vector.shape_cast %500 : vector<1x1x2048xf32> to vector<1x2048xf32>
    %502 = vector.broadcast %501 : vector<1x2048xf32> to vector<18x2048xf32>
    %503 = arith.addf %499, %502 : vector<18x2048xf32>
    %cst_270 = arith.constant 0.000000e+00 : f32
    %504 = vector.broadcast %cst_270 : f32 to vector<18x2048xf32>
    %505 = arith.maximumf %503, %504 : vector<18x2048xf32>
    %506 = arith.truncf %505 : vector<18x2048xf32> to vector<18x2048xbf16>
    %c3_271 = arith.constant 3 : index
    %c0_272 = arith.constant 0 : index
    %c0_273 = arith.constant 0 : index
    %507 = vector.load %arg15[%c3_271, %c0_272, %c0_273] : memref<4x2048x32xbf16, #tpu.memory_space<vmem>>, vector<1x2048x32xbf16>
    %508 = vector.shape_cast %507 : vector<1x2048x32xbf16> to vector<2048x32xbf16>
    %cst_274 = arith.constant dense<0.000000e+00> : vector<18x32xf32>
    %509 = tpu.matmul %506, %508, %cst_274 {dimension_numbers = #tpu.dot_dimension_numbers<[1], [0], [0], [1], [0, 0, 1, 1], [], []>} : vector<18x2048xbf16>, vector<2048x32xbf16>, vector<18x32xf32> -> vector<18x32xf32>
    %c3_275 = arith.constant 3 : index
    %c0_276 = arith.constant 0 : index
    %c0_277 = arith.constant 0 : index
    %510 = vector.load %arg16[%c3_275, %c0_276, %c0_277] : memref<4x1x32xf32, #tpu.memory_space<vmem>>, vector<1x1x32xf32>
    %511 = vector.shape_cast %510 : vector<1x1x32xf32> to vector<1x32xf32>
    %512 = vector.broadcast %511 : vector<1x32xf32> to vector<18x32xf32>
    %513 = arith.addf %509, %512 : vector<18x32xf32>
    %514 = arith.addf %495, %513 : vector<18x32xf32>
    %c3_278 = arith.constant 3 : index
    %c0_279 = arith.constant 0 : index
    %c0_280 = arith.constant 0 : index
    %515 = vector.load %arg19[%c3_278, %c0_279, %c0_280] : memref<4x1x32xf32, #tpu.memory_space<vmem>>, vector<1x1x32xf32>
    %516 = vector.shape_cast %515 : vector<1x1x32xf32> to vector<1x32xf32>
    %c3_281 = arith.constant 3 : index
    %c0_282 = arith.constant 0 : index
    %c0_283 = arith.constant 0 : index
    %517 = vector.load %arg20[%c3_281, %c0_282, %c0_283] : memref<4x1x32xf32, #tpu.memory_space<vmem>>, vector<1x1x32xf32>
    %518 = vector.shape_cast %517 : vector<1x1x32xf32> to vector<1x32xf32>
    %cst_284 = arith.constant dense<0.000000e+00> : vector<18xf32>
    %519 = vector.multi_reduction <add>, %514, %cst_284 [1] : vector<18x32xf32> to vector<18xf32>
    %520 = vector.shape_cast %519 : vector<18xf32> to vector<18x1xf32>
    %cst_285 = arith.constant 3.200000e+01 : f32
    %521 = vector.broadcast %cst_285 : f32 to vector<18x1xf32>
    %522 = arith.divf %520, %521 : vector<18x1xf32>
    %523 = vector.broadcast %522 : vector<18x1xf32> to vector<18x32xf32>
    %524 = arith.subf %514, %523 : vector<18x32xf32>
    %525 = arith.mulf %524, %524 : vector<18x32xf32>
    %cst_286 = arith.constant dense<0.000000e+00> : vector<18xf32>
    %526 = vector.multi_reduction <add>, %525, %cst_286 [1] : vector<18x32xf32> to vector<18xf32>
    %527 = vector.shape_cast %526 : vector<18xf32> to vector<18x1xf32>
    %cst_287 = arith.constant 3.200000e+01 : f32
    %528 = vector.broadcast %cst_287 : f32 to vector<18x1xf32>
    %529 = arith.divf %527, %528 : vector<18x1xf32>
    %530 = vector.broadcast %522 : vector<18x1xf32> to vector<18x32xf32>
    %531 = arith.subf %514, %530 : vector<18x32xf32>
    %cst_288 = arith.constant 9.99999974E-6 : f32
    %532 = vector.broadcast %cst_288 : f32 to vector<18x1xf32>
    %533 = arith.addf %529, %532 : vector<18x1xf32>
    %534 = math.rsqrt %533 : vector<18x1xf32>
    %535 = vector.broadcast %534 : vector<18x1xf32> to vector<18x32xf32>
    %536 = arith.mulf %531, %535 : vector<18x32xf32>
    %537 = vector.broadcast %516 : vector<1x32xf32> to vector<18x32xf32>
    %538 = arith.mulf %536, %537 : vector<18x32xf32>
    %539 = vector.broadcast %518 : vector<1x32xf32> to vector<18x32xf32>
    %540 = arith.addf %538, %539 : vector<18x32xf32>
    %541 = vector.extract_strided_slice %540 {offsets = [0, 0], sizes = [1, 32], strides = [1, 1]} : vector<18x32xf32> to vector<1x32xf32>
    %c0_289 = arith.constant 0 : index
    %c0_290 = arith.constant 0 : index
    %542 = vector.load %arg21[%c0_289, %c0_290] : memref<2x32xf32, #tpu.memory_space<vmem>>, vector<1x32xf32>
    tpu.vector_store %arg21[%c0_289, %c0_290], %541 {strides = array<i32>} : memref<2x32xf32, #tpu.memory_space<vmem>>, vector<1x32xf32>,
    %543 = vector.extract_strided_slice %540 {offsets = [9, 0], sizes = [1, 32], strides = [1, 1]} : vector<18x32xf32> to vector<1x32xf32>
    %c1_291 = arith.constant 1 : index
    %c0_292 = arith.constant 0 : index
    %544 = vector.load %arg21[%c1_291, %c0_292] : memref<2x32xf32, #tpu.memory_space<vmem>>, vector<1x32xf32>
    tpu.vector_store %arg21[%c1_291, %c0_292], %543 {strides = array<i32>} : memref<2x32xf32, #tpu.memory_space<vmem>>, vector<1x32xf32>,
    return
  }
  func.func @transform_0(%arg0: i32) -> (i32, i32) {
    %c0_i32 = arith.constant 0 : i32
    %c0_i32_0 = arith.constant 0 : i32
    %c0_i32_1 = arith.constant 0 : i32
    return %c0_i32, %c0_i32_0 : i32, i32
  }
  func.func @transform_1(%arg0: i32) -> (i32, i32) {
    %c0_i32 = arith.constant 0 : i32
    %c0_i32_0 = arith.constant 0 : i32
    %c0_i32_1 = arith.constant 0 : i32
    return %c0_i32, %c0_i32_0 : i32, i32
  }
  func.func @transform_2(%arg0: i32) -> (i32, i32, i32) {
    %c0_i32 = arith.constant 0 : i32
    %c0_i32_0 = arith.constant 0 : i32
    %c0_i32_1 = arith.constant 0 : i32
    %c0_i32_2 = arith.constant 0 : i32
    return %c0_i32, %c0_i32_0, %c0_i32_1 : i32, i32, i32
  }
  func.func @transform_3(%arg0: i32) -> (i32, i32, i32) {
    %c0_i32 = arith.constant 0 : i32
    %c0_i32_0 = arith.constant 0 : i32
    %c0_i32_1 = arith.constant 0 : i32
    %c0_i32_2 = arith.constant 0 : i32
    return %c0_i32, %c0_i32_0, %c0_i32_1 : i32, i32, i32
  }
  func.func @transform_4(%arg0: i32) -> (i32, i32, i32) {
    %c0_i32 = arith.constant 0 : i32
    %c0_i32_0 = arith.constant 0 : i32
    %c0_i32_1 = arith.constant 0 : i32
    %c0_i32_2 = arith.constant 0 : i32
    return %c0_i32, %c0_i32_0, %c0_i32_1 : i32, i32, i32
  }
  func.func @transform_5(%arg0: i32) -> (i32, i32, i32) {
    %c0_i32 = arith.constant 0 : i32
    %c0_i32_0 = arith.constant 0 : i32
    %c0_i32_1 = arith.constant 0 : i32
    %c0_i32_2 = arith.constant 0 : i32
    return %c0_i32, %c0_i32_0, %c0_i32_1 : i32, i32, i32
  }
  func.func @transform_6(%arg0: i32) -> (i32, i32, i32) {
    %c0_i32 = arith.constant 0 : i32
    %c0_i32_0 = arith.constant 0 : i32
    %c0_i32_1 = arith.constant 0 : i32
    %c0_i32_2 = arith.constant 0 : i32
    return %c0_i32, %c0_i32_0, %c0_i32_1 : i32, i32, i32
  }
  func.func @transform_7(%arg0: i32) -> (i32, i32, i32) {
    %c0_i32 = arith.constant 0 : i32
    %c0_i32_0 = arith.constant 0 : i32
    %c0_i32_1 = arith.constant 0 : i32
    %c0_i32_2 = arith.constant 0 : i32
    return %c0_i32, %c0_i32_0, %c0_i32_1 : i32, i32, i32
  }
  func.func @transform_8(%arg0: i32) -> (i32, i32, i32) {
    %c0_i32 = arith.constant 0 : i32
    %c0_i32_0 = arith.constant 0 : i32
    %c0_i32_1 = arith.constant 0 : i32
    %c0_i32_2 = arith.constant 0 : i32
    return %c0_i32, %c0_i32_0, %c0_i32_1 : i32, i32, i32
  }
  func.func @transform_9(%arg0: i32) -> (i32, i32, i32) {
    %c0_i32 = arith.constant 0 : i32
    %c0_i32_0 = arith.constant 0 : i32
    %c0_i32_1 = arith.constant 0 : i32
    %c0_i32_2 = arith.constant 0 : i32
    return %c0_i32, %c0_i32_0, %c0_i32_1 : i32, i32, i32
  }
  func.func @transform_10(%arg0: i32) -> (i32, i32, i32) {
    %c0_i32 = arith.constant 0 : i32
    %c0_i32_0 = arith.constant 0 : i32
    %c0_i32_1 = arith.constant 0 : i32
    %c0_i32_2 = arith.constant 0 : i32
    return %c0_i32, %c0_i32_0, %c0_i32_1 : i32, i32, i32
  }
  func.func @transform_11(%arg0: i32) -> (i32, i32, i32) {
    %c0_i32 = arith.constant 0 : i32
    %c0_i32_0 = arith.constant 0 : i32
    %c0_i32_1 = arith.constant 0 : i32
    %c0_i32_2 = arith.constant 0 : i32
    return %c0_i32, %c0_i32_0, %c0_i32_1 : i32, i32, i32
  }
  func.func @transform_12(%arg0: i32) -> (i32, i32, i32) {
    %c0_i32 = arith.constant 0 : i32
    %c0_i32_0 = arith.constant 0 : i32
    %c0_i32_1 = arith.constant 0 : i32
    %c0_i32_2 = arith.constant 0 : i32
    return %c0_i32, %c0_i32_0, %c0_i32_1 : i32, i32, i32
  }
  func.func @transform_13(%arg0: i32) -> (i32, i32, i32) {
    %c0_i32 = arith.constant 0 : i32
    %c0_i32_0 = arith.constant 0 : i32
    %c0_i32_1 = arith.constant 0 : i32
    %c0_i32_2 = arith.constant 0 : i32
    return %c0_i32, %c0_i32_0, %c0_i32_1 : i32, i32, i32
  }
  func.func @transform_14(%arg0: i32) -> (i32, i32, i32) {
    %c0_i32 = arith.constant 0 : i32
    %c0_i32_0 = arith.constant 0 : i32
    %c0_i32_1 = arith.constant 0 : i32
    %c0_i32_2 = arith.constant 0 : i32
    return %c0_i32, %c0_i32_0, %c0_i32_1 : i32, i32, i32
  }
  func.func @transform_15(%arg0: i32) -> (i32, i32, i32) {
    %c0_i32 = arith.constant 0 : i32
    %c0_i32_0 = arith.constant 0 : i32
    %c0_i32_1 = arith.constant 0 : i32
    %c0_i32_2 = arith.constant 0 : i32
    return %c0_i32, %c0_i32_0, %c0_i32_1 : i32, i32, i32
  }
  func.func @transform_16(%arg0: i32) -> (i32, i32, i32) {
    %c0_i32 = arith.constant 0 : i32
    %c0_i32_0 = arith.constant 0 : i32
    %c0_i32_1 = arith.constant 0 : i32
    %c0_i32_2 = arith.constant 0 : i32
    return %c0_i32, %c0_i32_0, %c0_i32_1 : i32, i32, i32
  }
  func.func @transform_17(%arg0: i32) -> (i32, i32, i32) {
    %c0_i32 = arith.constant 0 : i32
    %c0_i32_0 = arith.constant 0 : i32
    %c0_i32_1 = arith.constant 0 : i32
    %c0_i32_2 = arith.constant 0 : i32
    return %c0_i32, %c0_i32_0, %c0_i32_1 : i32, i32, i32
  }
  func.func @transform_18(%arg0: i32) -> (i32, i32, i32) {
    %c0_i32 = arith.constant 0 : i32
    %c0_i32_0 = arith.constant 0 : i32
    %c0_i32_1 = arith.constant 0 : i32
    %c0_i32_2 = arith.constant 0 : i32
    return %c0_i32, %c0_i32_0, %c0_i32_1 : i32, i32, i32
  }
  func.func @transform_19(%arg0: i32) -> (i32, i32, i32) {
    %c0_i32 = arith.constant 0 : i32
    %c0_i32_0 = arith.constant 0 : i32
    %c0_i32_1 = arith.constant 0 : i32
    %c0_i32_2 = arith.constant 0 : i32
    return %c0_i32, %c0_i32_0, %c0_i32_1 : i32, i32, i32
  }
  func.func @transform_20(%arg0: i32) -> (i32, i32) {
    %c0_i32 = arith.constant 0 : i32
    %c0_i32_0 = arith.constant 0 : i32
    %c0_i32_1 = arith.constant 0 : i32
    return %c0_i32, %c0_i32_0 : i32, i32
  }
}

</mosaic_0001>

<bundles_post_ra>
// kernel: transformer_net.1
= control target key start
LH: loop header
LB: loop body
LE: loop exit
PB: predicated region body
PF: predicated region fallthrough
CT: control target
= control target key end

     0   :  { %s26585_s0 = inlined_call_operand.vmem [shape: f32[18,32], index: 0, kind: input, shape index: {}]   ;;  %s26586_s1 = inlined_call_operand.vmem [shape: f32[18,32], index: 1, kind: input, shape index: {}]   ;;  %s26587_s2 = inlined_call_operand.vmem [shape: f32[8,1,32], index: 2, kind: input, shape index: {}]   ;;  %s26588_s3 = inlined_call_operand.vmem [shape: f32[1,18,18], index: 3, kind: input, shape index: {}]   ;;  %s26589_s4 = inlined_call_operand.vmem [shape: bf16[4,32,32], index: 4, kind: input, shape index: {}]   ;;  %s26590_s5 = inlined_call_operand.vmem [shape: f32[4,1,32], index: 5, kind: input, shape index: {}]   ;;  %s26591_s6 = inlined_call_operand.vmem [shape: bf16[4,32,32], index: 6, kind: input, shape index: {}]   ;;  %s26592_s7 = inlined_call_operand.vmem [shape: f32[4,1,32], index: 7, kind: input, shape index: {}]   ;;  %s26593_s8 = inlined_call_operand.vmem [shape: bf16[4,32,32], index: 8, kind: input, shape index: {}]   ;;  %s26594_s9 = inlined_call_operand.vmem [shape: f32[4,1,32], index: 9, kind: input, shape index: {}]   ;;  %s26595_s10 = inlined_call_operand.vmem [shape: bf16[4,32,32], index: 10, kind: input, shape index: {}]   ;;  %s26596_s11 = inlined_call_operand.vmem [shape: f32[4,1,32], index: 11, kind: input, shape index: {}]   ;;  %s26597_s12 = inlined_call_operand.vmem [shape: bf16[4,32,2048], index: 12, kind: input, shape index: {}]   ;;  %s26598_s13 = inlined_call_operand.vmem [shape: f32[4,1,2048], index: 13, kind: input, shape index: {}]   ;;  %s26599_s14 = inlined_call_operand.vmem [shape: bf16[4,2048,32], index: 14, kind: input, shape index: {}]   ;;  %s26600_s15 = inlined_call_operand.vmem [shape: f32[4,1,32], index: 15, kind: input, shape index: {}]   ;;  %s26601_s16 = inlined_call_operand.vmem [shape: f32[4,1,32], index: 16, kind: input, shape index: {}]   ;;  %s26602_s17 = inlined_call_operand.vmem [shape: f32[4,1,32], index: 17, kind: input, shape index: {}]   ;;  %s26603_s18 = inlined_call_operand.vmem [shape: f32[4,1,32], index: 18, kind: input, shape index: {}]   ;;  %s26604_s19 = inlined_call_operand.vmem [shape: f32[4,1,32], index: 19, kind: input, shape index: {}]   ;;  %s26605_s20 = inlined_call_operand.hbm [shape: f32[2,32], index: 20, kind: output, shape index: {}]  }
   0x1   :  { %26624 = sst [smem:[#allocation8_spill]] %s26585_s0 }
   0x2   :  { %26625 = sst [smem:[#allocation9_spill]] %s26586_s1 }
   0x3   :  { %26626 = sst [smem:[#allocation10_spill]] %s26587_s2 }
   0x4   :  { %26627 = sst [smem:[#allocation11_spill]] %s26588_s3 }
   0x5   :  { %26628 = sst [smem:[#allocation12_spill]] %s26589_s4 }
   0x6   :  { %v19862_v0 = vld [vmem:[%s26591_s6 + $0x8] sm:$0xff]   ;;  %s26629_s2 = sld [smem:[#allocation12_spill]]  ;;  %v19864_v2 = vld [vmem:[%s26591_s6] sm:$0xff]   ;;  %vm112_vm0 = vcmask 261120   ;;  %vm1213_vm1 = vcmask 1040384  }
   0x7   :  { %19132 = vmatprep.subr.bf16.mxu1 %v19862_v0  ;;  %s26630_s29 = sld [smem:[#allocation8_spill]]  ;;  %v19866_v13 = vld [vmem:[%s26593_s8 + $0x8] sm:$0xff]   ;;  %v19867_v14 = vld [vmem:[%s26593_s8] sm:$0xff]  }
   0x8   :  { %19133 = vmatpush3.bf16.msra.mxu1 %v19862_v0  ;;  %s26631_s22 = sld [smem:[#allocation9_spill]]  ;;  %v16028_v17 = vld [vmem:[%s26592_s7] ss:$0 sm:$0xff] }
   0x9   :  { %19134 = vmatprep.subr.bf16.mxu1 %v19864_v2  ;;  %v16023_v18 = vld [vmem:[%s26590_s5] ss:$0 sm:$0xff]  ;;  %s26632_s25 = sld [smem:[#allocation10_spill]] }
   0xa   :  { %v21101_v42 = vld [vmem:[%s26594_s9] ss:$0 sm:$0xff] }
   0xc   :  { %v19863_v1 = vld [vmem:[%s26629_s2 + $0x8] sm:$0xff]   ;;  %v19865_v3 = vld [vmem:[%s26629_s2] sm:$0xff]   ;;  %19135 = vmatpush3.bf16.msra.mxu1 %v19864_v2 }
   0xd   :  { %19124 = vmatprep.subr.bf16.mxu0 %v19863_v1  ;;  %v67_v4 = vld [vmem:[%s26630_s29] sm:$0xff]  ;;  %v68_v5 = vld [vmem:[%s26630_s29 + $0x8] sm:$0xff]  ;;  %v69_v9 = vld [vmem:[%s26630_s29 + $0x10] sm:$0x3] }
   0xe   :  { %19125 = vmatpush3.bf16.msra.mxu0 %v19863_v1  ;;  %v70_v6 = vld [vmem:[%s26631_s22] sm:$0xff]  ;;  %v71_v7 = vld [vmem:[%s26631_s22 + $0x8] sm:$0xff]  ;;  %v72_v10 = vld [vmem:[%s26631_s22 + $0x10] sm:$0x3] }
   0xf   :  { %19126 = vmatprep.subr.bf16.mxu0 %v19865_v3  ;;  %v21028_v8 = vadd.f32 %v70_v6, %v67_v4  ;;  %v21036_v11 = vadd.f32 %v71_v7, %v68_v5  ;;  %v21038_v12 = vadd.f32 %v72_v10, %v69_v9  ;;  %v21065_v24 = vld [vmem:[%s26632_s25] ss:$0 sm:$0xff]  ;;  %v21070_v25 = vld [vmem:[%s26632_s25 + $0x1] ss:$0 sm:$0xff]  ;;  %v21118_v48 = vld [vmem:[%s26632_s25 + $0x2] ss:$0 sm:$0xff] }
  0x10   :  { %v21123_v49 = vld [vmem:[%s26632_s25 + $0x3] ss:$0 sm:$0xff]  ;;  %v16042_v4 = vld [vmem:[%s26632_s25 + $0x4] ss:$0 sm:$0xff]  ;;  %v16043_v5 = vld [vmem:[%s26632_s25 + $0x5] ss:$0 sm:$0xff] }
  0x11   :  { %v87_v15 = vpack.c.bf16 %v21036_v11, %v21028_v8  ;;  %v88_v16 = vpack.c.bf16 %v21038_v12, %v21038_v12 }
  0x12   :  { %19127 = vmatpush3.bf16.msra.mxu0 %v19865_v3 }
  0x13   :  { %19140 = vmatprep.subr.bf16.mxu0 %v19866_v13  ;;  %19136 = vmatprep.mubr.msk.bf16.mxu1 %vm112_vm0, %v87_v15 }
  0x14   :  { %19128 = vmatprep.mubr.msk.bf16.mxu0 %vm112_vm0, %v87_v15  ;;  %19137 = vmatmul.mubr.msk.bf16.vlgmr.msra.gmra.mxu1 %vm112_vm0, %v88_v16 }
  0x15   :  { %19129 = vmatmul.mubr.msk.bf16.vlgmr.msra.gmra.mxu0 %vm112_vm0, %v88_v16 }
  0x16   :  { %19141 = vmatpush3.bf16.msra.mxu0 %v19866_v13  ;;  %19144 = vmatprep.mubr.msk.bf16.mxu0 %vm112_vm0, %v87_v15 }
  0x17   :  { %19142 = vmatprep.subr.bf16.mxu0 %v19867_v14 }
  0x1a   :  { %19143 = vmatpush3.bf16.msra.mxu0 %v19867_v14 }
  0x1d   :  { %19145 = vmatmul.mubr.msk.bf16.vlgmr.msra.gmra.mxu0 %vm112_vm0, %v88_v16 }
  0xd4   :  { %v19138_v19 = vpop.f32.mrf.mxu1 }
  0xd5   :  { %v19130_v20 = vpop.f32.mrf.mxu0  ;;  %v233_v21 = vadd.f32 %v19138_v19, %v16028_v17  ;;  %v16044_v19 = vld [vmem:[%s26632_s25 + $0x6] ss:$0 sm:$0xff] }
  0xd6   :  { %v224_v22 = vpop.f32.mrf.mxu1  ;;  %v21105_v44 = vadd.f32 %v19130_v20, %v16023_v18  ;;  %v16045_v20 = vld [vmem:[%s26632_s25 + $0x7] ss:$0 sm:$0xff] }
  0xd7   :  { %v153_v23 = vpop.f32.mrf.mxu0  ;;  %v21072_v26 = vpack.c.bf16 %v233_v21, %v233_v21  ;;  %v225_v31 = vadd.f32 %v16028_v17, %v224_v22 }
  0xd8   :  { %v21074_v27 = vadd.f32 %v16023_v18, %v153_v23  ;;  %v19139_v28 = vpop.f32.mrf.mxu1  ;;  %v359_v52 = vmul.f32 %v21065_v24, %v21105_v44  ;;  %v362_v53 = vmul.f32 %v21070_v25, %v21105_v44  ;;  %v365_v6 = vmul.f32 %v21118_v48, %v21105_v44 }
  0xd9   :  { %v19131_v29 = vpop.f32.mrf.mxu0  ;;  %19764 = vmatprep.subr.msk.bf16.mxu1 %vm112_vm0, %v21072_v26  ;;  %19766 = vmatprep.subr.msk.bf16.mxu0 %vm112_vm0, %v21072_v26  ;;  %v21082_v30 = vsel %vm112_vm0, %v21072_v26, 0  ;;  %v368_v7 = vmul.f32 %v21123_v49, %v21105_v44  ;;  %v371_v21 = vmul.f32 %v16042_v4, %v21105_v44  ;;  %v374_v22 = vmul.f32 %v16043_v5, %v21105_v44 }
  0xda   :  { %v227_v32 = vpop.f32.mrf.mxu1  ;;  %19149 = vmatpush3.bf16.xpose.msra.mxu1 %v21082_v30  ;;  %19157 = vmatpush3.bf16.xpose.msra.mxu0 %v21082_v30  ;;  %v357_v36 = vmul.f32 %v21065_v24, %v21074_v27  ;;  %v360_v37 = vmul.f32 %v21070_v25, %v21074_v27  ;;  %v363_v54 = vmul.f32 %v21118_v48, %v21074_v27 }
  0xdb   :  { %v156_v33 = vpop.f32.mrf.mxu0  ;;  %v228_v34 = vadd.f32 %v16028_v17, %v227_v32  ;;  %v366_v57 = vmul.f32 %v21123_v49, %v21074_v27  ;;  %v382_v61 = vpack.c.bf16 %v359_v52, %v359_v52  ;;  %v384_v62 = vpack.c.bf16 %v362_v53, %v362_v53 }
  0xdc   :  { %v21086_v35 = vadd.f32 %v16023_v18, %v156_v33  ;;  %v369_v9 = vmul.f32 %v16042_v4, %v21074_v27  ;;  %v372_v13 = vmul.f32 %v16043_v5, %v21074_v27  ;;  %v386_v15 = vpack.c.bf16 %v365_v6, %v365_v6 }
  0xdd   :  { %v19146_v38 = vpop.f32.mrf.mxu0  ;;  %v21092_v39 = vpack.c.bf16 %v228_v34, %v225_v31  ;;  %v388_v16 = vpack.c.bf16 %v368_v7, %v368_v7  ;;  %v375_v23 = vmul.f32 %v16044_v19, %v21074_v27  ;;  %v378_v29 = vmul.f32 %v16045_v20, %v21074_v27 }
  0xde   :  { %v358_v40 = vmul.f32 %v21065_v24, %v21086_v35  ;;  %v361_v41 = vmul.f32 %v21070_v25, %v21086_v35  ;;  %v21130_v51 = vadd.f32 %v19146_v38, %v21101_v42  ;;  %v364_v55 = vmul.f32 %v21118_v48, %v21086_v35 }
  0xdf   :  { %v21103_v43 = vpop.f32.mrf.mxu0  ;;  %19765 = vmatprep.subr.msk.bf16.mxu1 %vm112_vm0, %v21092_v39  ;;  %19767 = vmatprep.subr.msk.bf16.mxu0 %vm112_vm0, %v21092_v39  ;;  %v21113_v45 = vsel %vm112_vm0, %v21092_v39, 0  ;;  %v367_v58 = vmul.f32 %v21123_v49, %v21086_v35  ;;  %v370_v10 = vmul.f32 %v16042_v4, %v21086_v35  ;;  %v373_v14 = vmul.f32 %v16043_v5, %v21086_v35 }
  0xe0   :  { %v381_v46 = vpack.c.bf16 %v358_v40, %v357_v36  ;;  %v383_v47 = vpack.c.bf16 %v361_v41, %v360_v37  ;;  %v399_v56 = vmul.f32 %v21065_v24, %v21130_v51  ;;  %v402_v59 = vmul.f32 %v21070_v25, %v21130_v51 }
  0xe1   :  { %v19147_v50 = vpop.f32.mrf.mxu0  ;;  %v385_v0 = vpack.c.bf16 %v364_v55, %v363_v54  ;;  %v387_v1 = vpack.c.bf16 %v367_v58, %v366_v57  ;;  %v389_v17 = vpack.c.bf16 %v370_v10, %v369_v9  ;;  %v391_v18 = vpack.c.bf16 %v373_v14, %v372_v13 }
  0xe2   :  { %19152 = vmatprep.mubr.msk.bf16.mxu1 %vm112_vm0, %v381_v46  ;;  %19160 = vmatprep.mubr.msk.bf16.mxu0 %vm112_vm0, %v383_v47  ;;  %v21152_v60 = vpack.c.bf16 %v399_v56, %v399_v56  ;;  %v21154_v63 = vpack.c.bf16 %v402_v59, %v402_v59  ;;  %v376_v28 = vmul.f32 %v16044_v19, %v21086_v35 }
  0xe3   :  { %19151 = vmatpush3.bf16.xpose.msra.mxu1 %v21113_v45  ;;  %19159 = vmatpush3.bf16.xpose.msra.mxu0 %v21113_v45  ;;  %v379_v31 = vmul.f32 %v16045_v20, %v21086_v35  ;;  %v390_v32 = vpack.c.bf16 %v371_v21, %v371_v21  ;;  %v392_v33 = vpack.c.bf16 %v374_v22, %v374_v22  ;;  %v298_v27 = vpop.f32.mrf.mxu0 }
  0xe4   :  { %19768 = vmatprep.subr.msk.bf16.mxu1 %vm112_vm0, %v21072_v26  ;;  %19770 = vmatprep.subr.msk.bf16.mxu0 %vm112_vm0, %v21072_v26  ;;  %v21160_v2 = vsel %vm1213_vm1, %v21152_v60, 0  ;;  %v21164_v3 = vsel %vm1213_vm1, %v21154_v63, 0  ;;  %v393_v34 = vpack.c.bf16 %v376_v28, %v375_v23  ;;  %v21234_v35 = vadd.f32 %v21101_v42, %v21103_v43 }
  0xe5   :  { %v21237_v36 = vadd.f32 %v21101_v42, %v298_v27 }
  0xe6   :  { %v397_v37 = vmul.f32 %v21065_v24, %v21234_v35  ;;  %v400_v40 = vmul.f32 %v21070_v25, %v21234_v35 }
  0xe7   :  { %v398_v38 = vmul.f32 %v21065_v24, %v21237_v36  ;;  %v401_v41 = vmul.f32 %v21070_v25, %v21237_v36  ;;  %v408_v24 = vmul.f32 %v21123_v49, %v21130_v51 }
  0xe9   :  { %v421_v43 = vpack.c.bf16 %v398_v38, %v397_v37  ;;  %v423_v47 = vpack.c.bf16 %v401_v41, %v400_v40 }
  0xea   :  { %19153 = vmatmul.mubr.msk.bf16.vlgmr.msra.gmra.mxu1 %vm112_vm0, %v382_v61  ;;  %19161 = vmatmul.mubr.msk.bf16.vlgmr.msra.gmra.mxu0 %vm112_vm0, %v384_v62 }
  0xeb   :  { %19165 = vmatpush3.bf16.xpose.msra.mxu1 %v21082_v30  ;;  %19168 = vmatprep.mubr.msk.bf16.mxu1 %vm112_vm0, %v385_v0 }
  0xec   :  { %19173 = vmatpush3.bf16.xpose.msra.mxu0 %v21082_v30  ;;  %19176 = vmatprep.mubr.msk.bf16.mxu0 %vm112_vm0, %v387_v1 }
  0xed   :  { %19769 = vmatprep.subr.msk.bf16.mxu1 %vm112_vm0, %v21092_v39  ;;  %19771 = vmatprep.subr.msk.bf16.mxu0 %vm112_vm0, %v21092_v39 }
  0xf3   :  { %19167 = vmatpush3.bf16.xpose.msra.mxu1 %v21113_v45 }
  0xf4   :  { %19175 = vmatpush3.bf16.xpose.msra.mxu0 %v21113_v45  ;;  %19772 = vmatprep.subr.msk.bf16.mxu1 %vm112_vm0, %v21072_v26 }
  0xf5   :  { %19774 = vmatprep.subr.msk.bf16.mxu0 %vm112_vm0, %v21072_v26 }
  0xfa   :  { %19169 = vmatmul.mubr.msk.bf16.vlgmr.msra.gmra.mxu1 %vm112_vm0, %v386_v15 }
  0xfb   :  { %19177 = vmatmul.mubr.msk.bf16.vlgmr.msra.gmra.mxu0 %vm112_vm0, %v388_v16  ;;  %19181 = vmatpush3.bf16.xpose.msra.mxu1 %v21082_v30 }
  0xfc   :  { %19184 = vmatprep.mubr.msk.bf16.mxu1 %vm112_vm0, %v389_v17  ;;  %19189 = vmatpush3.bf16.xpose.msra.mxu0 %v21082_v30 }
  0xfd   :  { %19192 = vmatprep.mubr.msk.bf16.mxu0 %vm112_vm0, %v391_v18  ;;  %19773 = vmatprep.subr.msk.bf16.mxu1 %vm112_vm0, %v21092_v39 }
  0xfe   :  { %19775 = vmatprep.subr.msk.bf16.mxu0 %vm112_vm0, %v21092_v39 }
 0x103   :  { %19183 = vmatpush3.bf16.xpose.msra.mxu1 %v21113_v45 }
 0x104   :  { %19191 = vmatpush3.bf16.xpose.msra.mxu0 %v21113_v45  ;;  %19776 = vmatprep.subr.msk.bf16.mxu1 %vm112_vm0, %v21072_v26 }
 0x105   :  { %19778 = vmatprep.subr.msk.bf16.mxu0 %vm112_vm0, %v21072_v26  ;;  %v395_v26 = vpack.c.bf16 %v379_v31, %v378_v29 }
 0x10a   :  { %19185 = vmatmul.mubr.msk.bf16.vlgmr.msra.gmra.mxu1 %vm112_vm0, %v390_v32 }
 0x10b   :  { %19193 = vmatmul.mubr.msk.bf16.vlgmr.msra.gmra.mxu0 %vm112_vm0, %v392_v33  ;;  %19197 = vmatpush3.bf16.xpose.msra.mxu1 %v21082_v30 }
 0x10c   :  { %19200 = vmatprep.mubr.msk.bf16.mxu1 %vm112_vm0, %v393_v34  ;;  %19205 = vmatpush3.bf16.xpose.msra.mxu0 %v21082_v30  ;;  %v377_v30 = vmul.f32 %v16044_v19, %v21105_v44 }
 0x10d   :  { %19208 = vmatprep.mubr.msk.bf16.mxu0 %vm112_vm0, %v395_v26  ;;  %19777 = vmatprep.subr.msk.bf16.mxu1 %vm112_vm0, %v21092_v39 }
 0x10e   :  { %19779 = vmatprep.subr.msk.bf16.mxu0 %vm112_vm0, %v21092_v39  ;;  %v380_v39 = vmul.f32 %v16045_v20, %v21105_v44  ;;  %v394_v42 = vpack.c.bf16 %v377_v30, %v377_v30  ;;  %v21265_v44 = vpack.c.bf16 %v408_v24, %v408_v24 }
 0x110   :  { %v396_v46 = vpack.c.bf16 %v380_v39, %v380_v39 }
 0x113   :  { %19199 = vmatpush3.bf16.xpose.msra.mxu1 %v21113_v45 }
 0x114   :  { %19207 = vmatpush3.bf16.xpose.msra.mxu0 %v21113_v45  ;;  %19780 = vmatprep.subr.msk.bf16.mxu1 %vm1213_vm1, %v21152_v60  ;;  %v405_v45 = vmul.f32 %v21118_v48, %v21130_v51 }
 0x115   :  { %19781 = vmatprep.subr.msk.bf16.mxu0 %vm1213_vm1, %v21154_v63 }
 0x116   :  { %v21263_v25 = vpack.c.bf16 %v405_v45, %v405_v45 }
 0x11a   :  { %19201 = vmatmul.mubr.msk.bf16.vlgmr.msra.gmra.mxu1 %vm112_vm0, %v394_v42 }
 0x11b   :  { %19209 = vmatmul.mubr.msk.bf16.vlgmr.msra.gmra.mxu0 %vm112_vm0, %v396_v46  ;;  %19213 = vmatpush3.bf16.msra.mxu1 %v21160_v2 }
 0x11c   :  { %19221 = vmatpush3.bf16.msra.mxu0 %v21164_v3  ;;  %19214 = vmatprep.subr.bf16.mxu1 %v421_v43 }
 0x11d   :  { %19222 = vmatprep.subr.bf16.mxu0 %v423_v47 }
 0x11f   :  { %19215 = vmatpush3.bf16.msra.mxu1 %v421_v43 }
 0x120   :  { %19223 = vmatpush3.bf16.msra.mxu0 %v423_v47  ;;  %19782 = vmatprep.subr.msk.bf16.mxu1 %vm1213_vm1, %v21263_v25 }
 0x121   :  { %19783 = vmatprep.subr.msk.bf16.mxu0 %vm1213_vm1, %v21265_v44 }
 0x122   :  { %25 = vsyncpa [#allocation3], 0  ;;  %s26633_s30 = sld [smem:[#allocation11_spill]]  ;;  %vm932_vm2 = vcmask 140288   ;;  %vm925_vm3 = vcmask 146432   ;;  %vm1694_vm4 = vcmask 254976  }
 0x123   :  { %vm16005_vm5 = vcmask 253952   ;;  %s20898_s28 = smov [#allocation2]   ;;  %vm16007_vm6 = vcmask 254977  }
 0x124   :  { %s16015_s4 = sshll.u32 %s20898_s28, 4  ;;  %s16016_s4 = int_to_ptr.vmem [resolvable:$true] %s16015_s4 }
 0x125   :  { %p20880_p1 = scmp.lt.s32.totalorder %s16016_s4, %s16016_s4 }
 0x128   :  { %v21274_v50 = vld [vmem:[%s26633_s30 + $0x10] sm:$0x3]  ;;  %v21279_v56 = vld [vmem:[%s26633_s30] sm:$0xff]  ;;  %v21295_v3 = vld [vmem:[%s26633_s30 + $0x8] sm:$0xff] }
 0x1aa   :  { %v19154_v48 = vpop.f32.mrf.mxu1  ;;  %v19162_v49 = vpop.f32.mrf.mxu0 }
 0x1ab   :  { %v879_v52 = vmul.f32 0.5, %v19154_v48  ;;  %v882_v53 = vmul.f32 0.5, %v19162_v49 }
 0x1ac   :  { %v485_v54 = vpop.f32.mrf.mxu1  ;;  %v539_v55 = vpop.f32.mrf.mxu0 }
 0x1ad   :  { %v877_v57 = vmul.f32 0.5, %v485_v54  ;;  %v21282_v58 = vadd.f32 %v879_v52, %v21274_v50  ;;  %v880_v61 = vmul.f32 0.5, %v539_v55  ;;  %v21290_v0 = vadd.f32 %v882_v53, %v21274_v50 }
 0x1ae   :  { %v19155_v59 = vpop.f32.mrf.mxu1  ;;  %v19163_v60 = vpop.f32.mrf.mxu0 }
 0x1af   :  { %v933_v62 = vsel %vm932_vm2, %v21282_v58, -inf  ;;  %v21287_v63 = vadd.f32 %v877_v57, %v21279_v56  ;;  %v942_v7 = vsel %vm932_vm2, %v21290_v0, -inf  ;;  %v21305_v10 = vadd.f32 %v880_v61, %v21279_v56 }
 0x1b0   :  { %v542_v1 = vpop.f32.mrf.mxu0  ;;  %934 = vmax.xlane.f32.xlu1 %v933_v62  ;;  %v488_v2 = vpop.f32.mrf.mxu1 }
 0x1b1   :  { %v881_v4 = vmul.f32 0.5, %v542_v1  ;;  %v878_v5 = vmul.f32 0.5, %v488_v2  ;;  %v926_v6 = vsel %vm925_vm3, %v21287_v63, -inf  ;;  %v936_v15 = vsel %vm925_vm3, %v21305_v10, -inf }
 0x1b2   :  { %927 = vmax.xlane.f32.xlu0 %v926_v6 }
 0x1b3   :  { %v21302_v9 = vadd.f32 %v878_v5, %v21295_v3  ;;  %v21310_v14 = vadd.f32 %v881_v4, %v21295_v3 }
 0x1b4   :  { %943 = vmax.xlane.f32.xlu1 %v942_v7 }
 0x1b5   :  { %v929_v13 = vsel %vm925_vm3, %v21302_v9, -inf  ;;  %v939_v16 = vsel %vm925_vm3, %v21310_v14, -inf }
 0x1b6   :  { %930 = vmax.xlane.f32.xlu0 %v929_v13 }
 0x1b8   :  { %937 = vmax.xlane.f32.xlu1 %v936_v15 }
 0x1ba   :  { %940 = vmax.xlane.f32.xlu0 %v939_v16  ;;  %v19170_v17 = vpop.f32.mrf.mxu1 }
 0x1bb   :  { %v19178_v18 = vpop.f32.mrf.mxu0  ;;  %v885_v19 = vmul.f32 0.5, %v19170_v17 }
 0x1bc   :  { %v888_v20 = vmul.f32 0.5, %v19178_v18  ;;  %v593_v21 = vpop.f32.mrf.mxu1 }
 0x1bd   :  { %v883_v22 = vmul.f32 0.5, %v593_v21  ;;  %v647_v23 = vpop.f32.mrf.mxu0  ;;  %v21317_v28 = vadd.f32 %v885_v19, %v21274_v50 }
 0x1be   :  { %v886_v29 = vmul.f32 0.5, %v647_v23  ;;  %v19171_v31 = vpop.f32.mrf.mxu1  ;;  %v21320_v32 = vadd.f32 %v888_v20, %v21274_v50 }
 0x1bf   :  { %v19179_v33 = vpop.f32.mrf.mxu0  ;;  %v951_v34 = vsel %vm932_vm2, %v21317_v28, -inf  ;;  %v21325_v26 = vadd.f32 %v883_v22, %v21279_v56 }
 0x1c0   :  { %v960_v27 = vsel %vm932_vm2, %v21320_v32, -inf  ;;  %952 = vmax.xlane.f32.xlu0 %v951_v34  ;;  %v596_v30 = vpop.f32.mrf.mxu1  ;;  %v21330_v37 = vadd.f32 %v886_v29, %v21279_v56 }
 0x1c1   :  { %v650_v38 = vpop.f32.mrf.mxu0  ;;  %961 = vmax.xlane.f32.xlu1 %v960_v27  ;;  %v884_v39 = vmul.f32 0.5, %v596_v30  ;;  %v945_v41 = vsel %vm925_vm3, %v21325_v26, -inf }
 0x1c2   :  { %v887_v40 = vmul.f32 0.5, %v650_v38  ;;  %v954_v42 = vsel %vm925_vm3, %v21330_v37, -inf }
 0x1c3   :  { %v21340_v45 = vadd.f32 %v884_v39, %v21295_v3 }
 0x1c4   :  { %946 = vmax.xlane.f32.xlu0 %v945_v41  ;;  %v21337_v43 = vadd.f32 %v887_v40, %v21295_v3 }
 0x1c5   :  { %955 = vmax.xlane.f32.xlu1 %v954_v42  ;;  %v948_v47 = vsel %vm925_vm3, %v21340_v45, -inf }
 0x1c6   :  { %v957_v46 = vsel %vm925_vm3, %v21337_v43, -inf }
 0x1c8   :  { %958 = vmax.xlane.f32.xlu0 %v957_v46 }
 0x1c9   :  { %949 = vmax.xlane.f32.xlu1 %v948_v47 }
 0x1ca   :  { %v19186_v24 = vpop.f32.mrf.mxu1 }
 0x1cb   :  { %v891_v48 = vmul.f32 0.5, %v19186_v24  ;;  %v19194_v49 = vpop.f32.mrf.mxu0 }
 0x1cc   :  { %v894_v52 = vmul.f32 0.5, %v19194_v49  ;;  %v701_v53 = vpop.f32.mrf.mxu1 }
 0x1cd   :  { %v889_v54 = vmul.f32 0.5, %v701_v53  ;;  %v755_v55 = vpop.f32.mrf.mxu0  ;;  %v21347_v57 = vadd.f32 %v891_v48, %v21274_v50 }
 0x1ce   :  { %v892_v59 = vmul.f32 0.5, %v755_v55  ;;  %v19187_v60 = vpop.f32.mrf.mxu1  ;;  %v21350_v61 = vadd.f32 %v894_v52, %v21274_v50 }
 0x1cf   :  { %v19195_v62 = vpop.f32.mrf.mxu0  ;;  %v969_v1 = vsel %vm932_vm2, %v21347_v57, -inf  ;;  %v21355_v2 = vadd.f32 %v889_v54, %v21279_v56 }
 0x1d0   :  { %v978_v4 = vsel %vm932_vm2, %v21350_v61, -inf  ;;  %970 = vmax.xlane.f32.xlu0 %v969_v1  ;;  %v704_v5 = vpop.f32.mrf.mxu1  ;;  %v21360_v6 = vadd.f32 %v892_v59, %v21279_v56 }
 0x1d1   :  { %v758_v7 = vpop.f32.mrf.mxu0  ;;  %979 = vmax.xlane.f32.xlu1 %v978_v4  ;;  %v890_v13 = vmul.f32 0.5, %v704_v5  ;;  %v963_v16 = vsel %vm925_vm3, %v21355_v2, -inf }
 0x1d2   :  { %v893_v15 = vmul.f32 0.5, %v758_v7  ;;  %v972_v17 = vsel %vm925_vm3, %v21360_v6, -inf }
 0x1d3   :  { %v21370_v19 = vadd.f32 %v890_v13, %v21295_v3 }
 0x1d4   :  { %964 = vmax.xlane.f32.xlu0 %v963_v16  ;;  %v21367_v18 = vadd.f32 %v893_v15, %v21295_v3 }
 0x1d5   :  { %973 = vmax.xlane.f32.xlu1 %v972_v17  ;;  %v966_v21 = vsel %vm925_vm3, %v21370_v19, -inf }
 0x1d6   :  { %v975_v20 = vsel %vm925_vm3, %v21367_v18, -inf }
 0x1d8   :  { %976 = vmax.xlane.f32.xlu0 %v975_v20 }
 0x1d9   :  { %967 = vmax.xlane.f32.xlu1 %v966_v21 }
 0x1da   :  { %v19202_v22 = vpop.f32.mrf.mxu1 }
 0x1db   :  { %v897_v23 = vmul.f32 0.5, %v19202_v22  ;;  %v19210_v29 = vpop.f32.mrf.mxu0 }
 0x1dc   :  { %v809_v31 = vpop.f32.mrf.mxu1  ;;  %v900_v48 = vmul.f32 0.5, %v19210_v29 }
 0x1dd   :  { %v895_v33 = vmul.f32 0.5, %v809_v31  ;;  %v863_v34 = vpop.f32.mrf.mxu0  ;;  %v21377_v27 = vadd.f32 %v897_v23, %v21274_v50 }
 0x1de   :  { %v898_v30 = vmul.f32 0.5, %v863_v34  ;;  %v19203_v38 = vpop.f32.mrf.mxu1  ;;  %v21400_v59 = vadd.f32 %v900_v48, %v21274_v50 }
 0x1df   :  { %v19211_v39 = vpop.f32.mrf.mxu0  ;;  %v987_v40 = vsel %vm932_vm2, %v21377_v27, -inf  ;;  %v21382_v41 = vadd.f32 %v895_v33, %v21279_v56 }
 0x1e0   :  { %988 = vmax.xlane.f32.xlu0 %v987_v40  ;;  %v812_v42 = vpop.f32.mrf.mxu1  ;;  %v21385_v46 = vadd.f32 %v898_v30, %v21279_v56  ;;  %v996_v62 = vsel %vm932_vm2, %v21400_v59, -inf }
 0x1e1   :  { %v866_v47 = vpop.f32.mrf.mxu0  ;;  %v896_v24 = vmul.f32 0.5, %v812_v42  ;;  %v981_v53 = vsel %vm925_vm3, %v21382_v41, -inf }
 0x1e2   :  { %v899_v49 = vmul.f32 0.5, %v866_v47  ;;  %v990_v52 = vsel %vm925_vm3, %v21385_v46, -inf }
 0x1e3   :  { %991 = vmax.xlane.f32.xlu1 %v990_v52  ;;  %v21392_v54 = vadd.f32 %v896_v24, %v21295_v3 }
 0x1e4   :  { %982 = vmax.xlane.f32.xlu0 %v981_v53  ;;  %v21395_v55 = vadd.f32 %v899_v49, %v21295_v3 }
 0x1e5   :  { %v984_v56 = vsel %vm925_vm3, %v21392_v54, -inf }
 0x1e6   :  { %v993_v60 = vsel %vm925_vm3, %v21395_v55, -inf }
 0x1e7   :  { %985 = vmax.xlane.f32.xlu1 %v984_v56 }
 0x1e8   :  { %994 = vmax.xlane.f32.xlu0 %v993_v60 }
 0x1eb   :  { %997 = vmax.xlane.f32.xlu1 %v996_v62 }
 0x239   :  { %v935_v1 = vpop.xlane.xlu1 %934 }
 0x23a   :  { %v1001_v4 = vsub.f32 %v21282_v58, %v935_v1 }
 0x23b   :  { %v928_v3 = vpop.xlane.xlu0 %927 }
 0x23c   :  { %v1027_v5 = vmul.f32 1.442695, %v1001_v4  ;;  %v999_v7 = vsub.f32 %v21287_v63, %v928_v3 }
 0x23d   :  { %v944_v13 = vpop.xlane.xlu1 %943 }
 0x23e   :  { %20406 = vpow2.f32 %v1027_v5  ;;  %v1023_v50 = vmul.f32 1.442695, %v999_v7  ;;  %v1004_v15 = vsub.f32 %v21290_v0, %v944_v13 }
 0x23f   :  { %v931_v16 = vpop.xlane.xlu0 %930 }
 0x240   :  { %20408 = vpow2.f32 %v1023_v50  ;;  %v1033_v17 = vmul.f32 1.442695, %v1004_v15  ;;  %v1000_v20 = vsub.f32 %v21302_v9, %v931_v16 }
 0x241   :  { %v938_v21 = vpop.xlane.xlu1 %937 }
 0x242   :  { %20410 = vpow2.f32 %v1033_v17  ;;  %v1002_v22 = vsub.f32 %v21305_v10, %v938_v21  ;;  %v1025_v23 = vmul.f32 1.442695, %v1000_v20 }
 0x243   :  { %v941_v58 = vpop.xlane.xlu0 %940 }
 0x244   :  { %v1029_v29 = vmul.f32 1.442695, %v1002_v22  ;;  %v1003_v31 = vsub.f32 %v21310_v14, %v941_v58 }
 0x246   :  { %20412 = vpow2.f32 %v1029_v29  ;;  %v1031_v63 = vmul.f32 1.442695, %v1003_v31 }
 0x247   :  { %20414 = vpow2.f32 %v1025_v23 }
 0x248   :  { %20416 = vpow2.f32 %v1031_v63 }
 0x249   :  { %v953_v33 = vpop.xlane.xlu0 %952 }
 0x24a   :  { %v962_v0 = vpop.xlane.xlu1 %961  ;;  %v1007_v34 = vsub.f32 %v21317_v28, %v953_v33 }
 0x24b   :  { %v21413_v30 = vpop.eup %20406  ;;  %v1010_v9 = vsub.f32 %v21320_v32, %v962_v0 }
 0x24c   :  { %v1039_v38 = vmul.f32 1.442695, %v1007_v34  ;;  %v1077_v10 = vsel %vm932_vm2, %v21413_v30, 0.0 }
 0x24d   :  { %v21418_v39 = vpop.eup %20408  ;;  %v1045_v40 = vmul.f32 1.442695, %v1010_v9  ;;  %v947_v14 = vpop.xlane.xlu0 %946  ;;  %1078 = vadd.xlane.f32.xlu0 %v1077_v10 }
 0x24e   :  { %20418 = vpow2.f32 %v1039_v38  ;;  %v956_v42 = vpop.xlane.xlu1 %955  ;;  %v1005_v47 = vsub.f32 %v21325_v26, %v947_v14  ;;  %v1071_v32 = vsel %vm925_vm3, %v21418_v39, 0.0 }
 0x24f   :  { %v21421_v24 = vpop.eup %20410  ;;  %20420 = vpow2.f32 %v1045_v40  ;;  %v1008_v28 = vsub.f32 %v21330_v37, %v956_v42 }
 0x250   :  { %v1035_v48 = vmul.f32 1.442695, %v1005_v47  ;;  %v1086_v49 = vsel %vm932_vm2, %v21421_v24, 0.0 }
 0x251   :  { %v1041_v52 = vmul.f32 1.442695, %v1008_v28  ;;  %v959_v53 = vpop.xlane.xlu0 %958  ;;  %1072 = vadd.xlane.f32.xlu0 %v1071_v32  ;;  %1087 = vadd.xlane.f32.xlu1 %v1086_v49 }
 0x252   :  { %20422 = vpow2.f32 %v1035_v48  ;;  %v1009_v56 = vsub.f32 %v21337_v43, %v959_v53  ;;  %v950_v26 = vpop.xlane.xlu1 %949 }
 0x253   :  { %v21429_v60 = vpop.eup %20412  ;;  %20424 = vpow2.f32 %v1041_v52  ;;  %v1006_v37 = vsub.f32 %v21340_v45, %v950_v26 }
 0x254   :  { %v21432_v62 = vpop.eup %20414  ;;  %v1043_v1 = vmul.f32 1.442695, %v1009_v56  ;;  %v1080_v4 = vsel %vm925_vm3, %v21429_v60, 0.0 }
 0x255   :  { %v21436_v3 = vpop.eup %20416  ;;  %v1037_v5 = vmul.f32 1.442695, %v1006_v37  ;;  %1081 = vadd.xlane.f32.xlu1 %v1080_v4  ;;  %v1074_v7 = vsel %vm925_vm3, %v21432_v62, 0.0 }
 0x256   :  { %20426 = vpow2.f32 %v1043_v1  ;;  %v1083_v43 = vsel %vm925_vm3, %v21436_v3, 0.0 }
 0x257   :  { %20428 = vpow2.f32 %v1037_v5  ;;  %1084 = vadd.xlane.f32.xlu0 %v1083_v43 }
 0x259   :  { %v971_v45 = vpop.xlane.xlu0 %970  ;;  %1075 = vadd.xlane.f32.xlu1 %v1074_v7 }
 0x25a   :  { %v980_v13 = vpop.xlane.xlu1 %979  ;;  %v1013_v50 = vsub.f32 %v21347_v57, %v971_v45 }
 0x25b   :  { %v21443_v15 = vpop.eup %20418  ;;  %v1016_v16 = vsub.f32 %v21350_v61, %v980_v13 }
 0x25c   :  { %v21446_v17 = vpop.eup %20420  ;;  %v1051_v20 = vmul.f32 1.442695, %v1013_v50  ;;  %v1095_v21 = vsel %vm932_vm2, %v21443_v15, 0.0 }
 0x25d   :  { %v1057_v22 = vmul.f32 1.442695, %v1016_v16  ;;  %v965_v23 = vpop.xlane.xlu0 %964  ;;  %1096 = vadd.xlane.f32.xlu0 %v1095_v21  ;;  %v1104_v58 = vsel %vm932_vm2, %v21446_v17, 0.0 }
 0x25e   :  { %20430 = vpow2.f32 %v1051_v20  ;;  %v974_v29 = vpop.xlane.xlu1 %973  ;;  %v1011_v57 = vsub.f32 %v21355_v2, %v965_v23  ;;  %1105 = vadd.xlane.f32.xlu1 %v1104_v58 }
 0x25f   :  { %v21453_v31 = vpop.eup %20422  ;;  %20432 = vpow2.f32 %v1057_v22  ;;  %v1014_v61 = vsub.f32 %v21360_v6, %v974_v29 }
 0x260   :  { %v21456_v63 = vpop.eup %20424  ;;  %v1047_v33 = vmul.f32 1.442695, %v1011_v57  ;;  %v1089_v0 = vsel %vm925_vm3, %v21453_v31, 0.0 }
 0x261   :  { %v1053_v34 = vmul.f32 1.442695, %v1014_v61  ;;  %v977_v9 = vpop.xlane.xlu0 %976  ;;  %1090 = vadd.xlane.f32.xlu0 %v1089_v0  ;;  %v1098_v38 = vsel %vm925_vm3, %v21456_v63, 0.0 }
 0x262   :  { %20434 = vpow2.f32 %v1047_v33  ;;  %v1015_v2 = vsub.f32 %v21367_v18, %v977_v9  ;;  %v968_v10 = vpop.xlane.xlu1 %967  ;;  %1099 = vadd.xlane.f32.xlu1 %v1098_v38 }
 0x263   :  { %v21463_v40 = vpop.eup %20426  ;;  %20436 = vpow2.f32 %v1053_v34  ;;  %v1012_v6 = vsub.f32 %v21370_v19, %v968_v10 }
 0x264   :  { %v21466_v14 = vpop.eup %20428  ;;  %v1055_v42 = vmul.f32 1.442695, %v1015_v2  ;;  %v1101_v47 = vsel %vm925_vm3, %v21463_v40, 0.0 }
 0x265   :  { %v1049_v28 = vmul.f32 1.442695, %v1012_v6  ;;  %1102 = vadd.xlane.f32.xlu0 %v1101_v47  ;;  %v1092_v48 = vsel %vm925_vm3, %v21466_v14, 0.0 }
 0x266   :  { %20438 = vpow2.f32 %v1055_v42  ;;  %1093 = vadd.xlane.f32.xlu1 %v1092_v48 }
 0x267   :  { %20440 = vpow2.f32 %v1049_v28 }
 0x269   :  { %v989_v18 = vpop.xlane.xlu0 %988 }
 0x26a   :  { %v1019_v32 = vsub.f32 %v21377_v27, %v989_v18 }
 0x26b   :  { %v21473_v49 = vpop.eup %20430 }
 0x26c   :  { %v21475_v19 = vpop.eup %20432  ;;  %v1063_v52 = vmul.f32 1.442695, %v1019_v32  ;;  %v992_v53 = vpop.xlane.xlu1 %991  ;;  %v1113_v56 = vsel %vm932_vm2, %v21473_v49, 0.0 }
 0x26d   :  { %v1020_v26 = vsub.f32 %v21385_v46, %v992_v53  ;;  %1114 = vadd.xlane.f32.xlu0 %v1113_v56  ;;  %v983_v37 = vpop.xlane.xlu0 %982  ;;  %v1122_v1 = vsel %vm932_vm2, %v21475_v19, 0.0 }
 0x26e   :  { %20442 = vpow2.f32 %v1063_v52  ;;  %v1017_v4 = vsub.f32 %v21382_v41, %v983_v37  ;;  %1123 = vadd.xlane.f32.xlu1 %v1122_v1 }
 0x26f   :  { %v21483_v27 = vpop.eup %20434  ;;  %v1065_v5 = vmul.f32 1.442695, %v1020_v26 }
 0x270   :  { %v21485_v43 = vpop.eup %20436  ;;  %v1059_v7 = vmul.f32 1.442695, %v1017_v4  ;;  %v986_v45 = vpop.xlane.xlu1 %985  ;;  %v1107_v13 = vsel %vm925_vm3, %v21483_v27, 0.0 }
 0x271   :  { %20444 = vpow2.f32 %v1065_v5  ;;  %v1018_v46 = vsub.f32 %v21392_v54, %v986_v45  ;;  %1108 = vadd.xlane.f32.xlu0 %v1107_v13  ;;  %v995_v50 = vpop.xlane.xlu0 %994  ;;  %v1116_v16 = vsel %vm925_vm3, %v21485_v43, 0.0 }
 0x272   :  { %20446 = vpow2.f32 %v1059_v7  ;;  %v1021_v41 = vsub.f32 %v21395_v55, %v995_v50  ;;  %1117 = vadd.xlane.f32.xlu1 %v1116_v16 }
 0x273   :  { %v21493_v20 = vpop.eup %20438  ;;  %v1061_v21 = vmul.f32 1.442695, %v1018_v46 }
 0x274   :  { %v21495_v22 = vpop.eup %20440  ;;  %v1067_v23 = vmul.f32 1.442695, %v1021_v41  ;;  %v998_v58 = vpop.xlane.xlu1 %997  ;;  %v1119_v29 = vsel %vm925_vm3, %v21493_v20, 0.0 }
 0x275   :  { %20448 = vpow2.f32 %v1061_v21  ;;  %v1022_v54 = vsub.f32 %v21400_v59, %v998_v58  ;;  %1120 = vadd.xlane.f32.xlu0 %v1119_v29  ;;  %v1110_v57 = vsel %vm925_vm3, %v21495_v22, 0.0  ;;  %v20836_v58 = vld [vmem:[%s26632_s25 + $0x3] ss:$0 sm:$0xff] }
 0x276   :  { %20450 = vpow2.f32 %v1067_v23  ;;  %1111 = vadd.xlane.f32.xlu1 %v1110_v57  ;;  %v406_v29 = vmul.f32 %v20836_v58, %v21234_v35 }
 0x277   :  { %v1069_v55 = vmul.f32 1.442695, %v1022_v54  ;;  %v407_v54 = vmul.f32 %v20836_v58, %v21237_v36 }
 0x279   :  { %20452 = vpow2.f32 %v1069_v55 }
 0x27b   :  { %v21502_v61 = vpop.eup %20442 }
 0x27c   :  { %v1131_v33 = vsel %vm932_vm2, %v21502_v61, 0.0 }
 0x27d   :  { %1132 = vadd.xlane.f32.xlu0 %v1131_v33 }
 0x27e   :  { %v21506_v0 = vpop.eup %20444 }
 0x27f   :  { %v21508_v34 = vpop.eup %20446  ;;  %v1134_v59 = vsel %vm925_vm3, %v21506_v0, 0.0 }
 0x280   :  { %1135 = vadd.xlane.f32.xlu1 %v1134_v59  ;;  %v1125_v9 = vsel %vm925_vm3, %v21508_v34, 0.0 }
 0x281   :  { %1126 = vadd.xlane.f32.xlu0 %v1125_v9 }
 0x282   :  { %v21514_v38 = vpop.eup %20448 }
 0x283   :  { %v21516_v2 = vpop.eup %20450  ;;  %v1128_v10 = vsel %vm925_vm3, %v21514_v38, 0.0 }
 0x284   :  { %1129 = vadd.xlane.f32.xlu1 %v1128_v10  ;;  %v1137_v6 = vsel %vm925_vm3, %v21516_v2, 0.0 }
 0x285   :  { %1138 = vadd.xlane.f32.xlu0 %v1137_v6 }
 0x286   :  { %v21522_v42 = vpop.eup %20452 }
 0x287   :  { %v1140_v47 = vsel %vm932_vm2, %v21522_v42, 0.0 }
 0x288   :  { %1141 = vadd.xlane.f32.xlu1 %v1140_v47 }
 0x2d6   :  { %v1079_v28 = vpop.xlane.xlu0 %1078 }
 0x2d7   :  { %20454 = vrcp.f32 %v1079_v28 }
 0x2da   :  { %v1088_v48 = vpop.xlane.xlu1 %1087  ;;  %v1073_v18 = vpop.xlane.xlu0 %1072 }
 0x2db   :  { %20456 = vrcp.f32 %v1088_v48  ;;  %v1329_v48 = vsel %vm1213_vm1, %v21263_v25, 0 }
 0x2de   :  { %v1082_v32 = vpop.xlane.xlu1 %1081 }
 0x2df   :  { %20458 = vrcp.f32 %v1082_v32 }
 0x2e0   :  { %20460 = vrcp.f32 %v1073_v18  ;;  %v1085_v52 = vpop.xlane.xlu0 %1084 }
 0x2e1   :  { %20462 = vrcp.f32 %v1085_v52 }
 0x2e2   :  { %v1076_v53 = vpop.xlane.xlu1 %1075 }
 0x2e3   :  { %20464 = vrcp.f32 %v1076_v53 }
 0x2e4   :  { %v20455_v37 = vpop.eup %20454 }
 0x2e5   :  { %v1169_v57 = vmul.f32 %v20455_v37, %v21413_v30  ;;  %v1386_v30 = vsel %vm1213_vm1, %v21265_v44, 0  ;;  %v20839_v44 = vld [vmem:[%s26632_s25 + $0x4] ss:$0 sm:$0xff] }
 0x2e6   :  { %v1097_v56 = vpop.xlane.xlu0 %1096  ;;  %v411_v32 = vmul.f32 %v20839_v44, %v21130_v51 }
 0x2e7   :  { %v1106_v26 = vpop.xlane.xlu1 %1105  ;;  %20466 = vrcp.f32 %v1097_v56  ;;  %v1192_v6 = vpack.c.bf16 %v1169_v57, %v1169_v57  ;;  %v409_v57 = vmul.f32 %v20839_v44, %v21234_v35 }
 0x2e8   :  { %v20457_v4 = vpop.eup %20456  ;;  %20468 = vrcp.f32 %v1106_v26 }
 0x2e9   :  { %v1172_v50 = vmul.f32 %v20457_v4, %v21421_v24  ;;  %v430_v4 = vpack.c.bf16 %v411_v32, %v411_v32 }
 0x2ea   :  { %v1091_v1 = vpop.xlane.xlu0 %1090 }
 0x2eb   :  { %v1100_v5 = vpop.xlane.xlu1 %1099 }
 0x2ec   :  { %v20459_v7 = vpop.eup %20458  ;;  %20470 = vrcp.f32 %v1100_v5 }
 0x2ed   :  { %v20461_v45 = vpop.eup %20460  ;;  %20472 = vrcp.f32 %v1091_v1  ;;  %v1170_v41 = vmul.f32 %v20459_v7, %v21429_v60  ;;  %v1194_v60 = vpack.c.bf16 %v1172_v50, %v1172_v50 }
 0x2ee   :  { %v20463_v13 = vpop.eup %20462  ;;  %v1103_v46 = vpop.xlane.xlu0 %1102  ;;  %v1167_v24 = vmul.f32 %v20461_v45, %v21418_v39  ;;  %v427_v39 = vpack.c.bf16 %v407_v54, %v406_v29 }
 0x2ef   :  { %20474 = vrcp.f32 %v1103_v46  ;;  %v1094_v16 = vpop.xlane.xlu1 %1093  ;;  %v1171_v21 = vmul.f32 %v20463_v13, %v21436_v3  ;;  %v20837_v3 = vld [vmem:[%s26632_s25 + $0x2] ss:$0 sm:$0xff] }
 0x2f0   :  { %v20465_v23 = vpop.eup %20464  ;;  %20476 = vrcp.f32 %v1094_v16  ;;  %v403_v59 = vmul.f32 %v20837_v3, %v21234_v35  ;;  %v404_v9 = vmul.f32 %v20837_v3, %v21237_v36 }
 0x2f1   :  { %v1193_v55 = vpack.c.bf16 %v1171_v21, %v1170_v41  ;;  %v1168_v33 = vmul.f32 %v20465_v23, %v21432_v62  ;;  %v20838_v62 = vld [vmem:[%s26632_s25 + $0x5] ss:$0 sm:$0xff] }
 0x2f2   :  { %v414_v47 = vmul.f32 %v20838_v62, %v21130_v51  ;;  %v425_v18 = vpack.c.bf16 %v404_v9, %v403_v59  ;;  %v412_v13 = vmul.f32 %v20838_v62, %v21234_v35  ;;  %v413_v29 = vmul.f32 %v20838_v62, %v21237_v36  ;;  %v20841_v59 = vld [vmem:[%s26632_s25 + $0x6] ss:$0 sm:$0xff] }
 0x2f3   :  { %19224 = vmatprep.mubr.msk.bf16.mxu0 %vm925_vm3, %v1193_v55  ;;  %v1191_v10 = vpack.c.bf16 %v1168_v33, %v1167_v24  ;;  %v410_v55 = vmul.f32 %v20839_v44, %v21237_v36  ;;  %v20840_v24 = vld [vmem:[%s26632_s25 + $0x7] ss:$0 sm:$0xff]  ;;  %v417_v9 = vmul.f32 %v20841_v59, %v21130_v51 }
 0x2f4   :  { %19225 = vmatmul.mubr.msk.bf16.vlgmr.msra.gmra.mxu0 %vm925_vm3, %v1194_v60  ;;  %v20467_v53 = vpop.eup %20466  ;;  %v432_v56 = vpack.c.bf16 %v414_v47, %v414_v47  ;;  %v420_v33 = vmul.f32 %v20840_v24, %v21130_v51  ;;  %v1443_v60 = vsel %vm1213_vm1, %v430_v4, 0  ;;  %v418_v32 = vmul.f32 %v20840_v24, %v21234_v35 }
 0x2f5   :  { %19237 = vmatpush3.bf16.msra.mxu0 %v1386_v30  ;;  %19216 = vmatprep.mubr.msk.bf16.mxu1 %vm925_vm3, %v1191_v10  ;;  %v20469_v26 = vpop.eup %20468  ;;  %v1175_v41 = vmul.f32 %v20467_v53, %v21443_v15  ;;  %v429_v3 = vpack.c.bf16 %v410_v55, %v409_v57 }
 0x2f6   :  { %19238 = vmatprep.subr.bf16.mxu0 %v427_v39  ;;  %v1115_v28 = vpop.xlane.xlu0 %1114  ;;  %19217 = vmatmul.mubr.msk.bf16.vlgmr.msra.gmra.mxu1 %vm925_vm3, %v1192_v6  ;;  %v1178_v45 = vmul.f32 %v20469_v26, %v21446_v17  ;;  %v436_v30 = vpack.c.bf16 %v420_v33, %v420_v33 }
 0x2f7   :  { %19229 = vmatpush3.bf16.msra.mxu1 %v1329_v48  ;;  %v1124_v52 = vpop.xlane.xlu1 %1123  ;;  %20478 = vrcp.f32 %v1115_v28  ;;  %v1196_v15 = vpack.c.bf16 %v1175_v41, %v1175_v41 }
 0x2f8   :  { %19230 = vmatprep.subr.bf16.mxu1 %v425_v18  ;;  %20480 = vrcp.f32 %v1124_v52 }
 0x2f9   :  { %19239 = vmatpush3.bf16.msra.mxu0 %v427_v39  ;;  %v20471_v37 = vpop.eup %20470  ;;  %v434_v39 = vpack.c.bf16 %v417_v9, %v417_v9 }
 0x2fa   :  { %19785 = vmatprep.subr.msk.bf16.mxu0 %vm1213_vm1, %v432_v56  ;;  %v1109_v1 = vpop.xlane.xlu0 %1108  ;;  %v20473_v25 = vpop.eup %20472  ;;  %v1176_v50 = vmul.f32 %v20471_v37, %v21456_v63 }
 0x2fb   :  { %19231 = vmatpush3.bf16.msra.mxu1 %v425_v18  ;;  %v1118_v5 = vpop.xlane.xlu1 %1117  ;;  %v1173_v23 = vmul.f32 %v20473_v25, %v21453_v31  ;;  %v1500_v31 = vsel %vm1213_vm1, %v432_v56, 0 }
 0x2fc   :  { %v20475_v7 = vpop.eup %20474  ;;  %19784 = vmatprep.subr.msk.bf16.mxu1 %vm1213_vm1, %v430_v4  ;;  %20482 = vrcp.f32 %v1118_v5  ;;  %v419_v5 = vmul.f32 %v20840_v24, %v21237_v36 }
 0x2fd   :  { %v20477_v46 = vpop.eup %20476  ;;  %v1177_v16 = vmul.f32 %v20475_v7, %v21463_v40  ;;  %20484 = vrcp.f32 %v1109_v1  ;;  %v1198_v40 = vpack.c.bf16 %v1178_v45, %v1178_v45  ;;  %v415_v7 = vmul.f32 %v20841_v59, %v21234_v35 }
 0x2fe   :  { %v1121_v21 = vpop.xlane.xlu0 %1120  ;;  %v1174_v58 = vmul.f32 %v20477_v46, %v21466_v14  ;;  %v431_v14 = vpack.c.bf16 %v413_v29, %v412_v13  ;;  %v416_v45 = vmul.f32 %v20841_v59, %v21237_v36  ;;  %v1557_v35 = vsel %vm1213_vm1, %v434_v39, 0 }
 0x2ff   :  { %20486 = vrcp.f32 %v1121_v21  ;;  %v1112_v17 = vpop.xlane.xlu1 %1111  ;;  %v1197_v54 = vpack.c.bf16 %v1177_v16, %v1176_v50 }
 0x300   :  { %20488 = vrcp.f32 %v1112_v17  ;;  %v1195_v63 = vpack.c.bf16 %v1174_v58, %v1173_v23  ;;  %v433_v36 = vpack.c.bf16 %v416_v45, %v415_v7 }
 0x301   :  { %19240 = vmatprep.mubr.msk.bf16.mxu0 %vm925_vm3, %v1197_v54 }
 0x302   :  { %19232 = vmatprep.mubr.msk.bf16.mxu1 %vm925_vm3, %v1195_v63  ;;  %19241 = vmatmul.mubr.msk.bf16.vlgmr.msra.gmra.mxu0 %vm925_vm3, %v1198_v40 }
 0x303   :  { %19233 = vmatmul.mubr.msk.bf16.vlgmr.msra.gmra.mxu1 %vm925_vm3, %v1196_v15  ;;  %19253 = vmatpush3.bf16.msra.mxu0 %v1500_v31 }
 0x304   :  { %19245 = vmatpush3.bf16.msra.mxu1 %v1443_v60  ;;  %19254 = vmatprep.subr.bf16.mxu0 %v431_v14  ;;  %v20479_v6 = vpop.eup %20478 }
 0x305   :  { %19246 = vmatprep.subr.bf16.mxu1 %v429_v3  ;;  %v20481_v62 = vpop.eup %20480  ;;  %v1181_v37 = vmul.f32 %v20479_v6, %v21473_v49 }
 0x306   :  { %v1133_v10 = vpop.xlane.xlu0 %1132  ;;  %v1184_v44 = vmul.f32 %v20481_v62, %v21475_v19 }
 0x307   :  { %19255 = vmatpush3.bf16.msra.mxu0 %v431_v14  ;;  %20490 = vrcp.f32 %v1133_v10  ;;  %v1200_v49 = vpack.c.bf16 %v1181_v37, %v1181_v37 }
 0x308   :  { %19247 = vmatpush3.bf16.msra.mxu1 %v429_v3  ;;  %19787 = vmatprep.subr.msk.bf16.mxu0 %vm1213_vm1, %v436_v30 }
 0x309   :  { %19786 = vmatprep.subr.msk.bf16.mxu1 %vm1213_vm1, %v434_v39  ;;  %v1136_v47 = vpop.xlane.xlu1 %1135  ;;  %v20483_v28 = vpop.eup %20482 }
 0x30a   :  { %v1127_v48 = vpop.xlane.xlu0 %1126  ;;  %v20485_v18 = vpop.eup %20484  ;;  %v1182_v56 = vmul.f32 %v20483_v28, %v21485_v43  ;;  %v1202_v43 = vpack.c.bf16 %v1184_v44, %v1184_v44 }
 0x30b   :  { %20492 = vrcp.f32 %v1127_v48  ;;  %v1179_v4 = vmul.f32 %v20485_v18, %v21483_v27  ;;  %v1614_v27 = vsel %vm1213_vm1, %v436_v30, 0 }
 0x30c   :  { %v20487_v51 = vpop.eup %20486  ;;  %20494 = vrcp.f32 %v1136_v47 }
 0x30d   :  { %v20489_v52 = vpop.eup %20488  ;;  %v1130_v53 = vpop.xlane.xlu1 %1129  ;;  %v1183_v26 = vmul.f32 %v20487_v51, %v21493_v20  ;;  %v435_v20 = vpack.c.bf16 %v419_v5, %v418_v32 }
 0x30e   :  { %20496 = vrcp.f32 %v1130_v53  ;;  %v1139_v1 = vpop.xlane.xlu0 %1138  ;;  %v1180_v25 = vmul.f32 %v20489_v52, %v21495_v22 }
 0x30f   :  { %20498 = vrcp.f32 %v1139_v1  ;;  %v1201_v19 = vpack.c.bf16 %v1183_v26, %v1182_v56 }
 0x310   :  { %v1199_v13 = vpack.c.bf16 %v1180_v25, %v1179_v4 }
 0x311   :  { %v1142_v46 = vpop.xlane.xlu1 %1141  ;;  %19256 = vmatprep.mubr.msk.bf16.mxu0 %vm925_vm3, %v1201_v19 }
 0x312   :  { %20500 = vrcp.f32 %v1142_v46  ;;  %19248 = vmatprep.mubr.msk.bf16.mxu1 %vm925_vm3, %v1199_v13  ;;  %19257 = vmatmul.mubr.msk.bf16.vlgmr.msra.gmra.mxu0 %vm925_vm3, %v1202_v43 }
 0x313   :  { %19249 = vmatmul.mubr.msk.bf16.vlgmr.msra.gmra.mxu1 %vm925_vm3, %v1200_v49  ;;  %19269 = vmatpush3.bf16.msra.mxu0 %v1614_v27 }
 0x314   :  { %19261 = vmatpush3.bf16.msra.mxu1 %v1557_v35  ;;  %19270 = vmatprep.subr.bf16.mxu0 %v435_v20  ;;  %v20491_v22 = vpop.eup %20490 }
 0x315   :  { %19262 = vmatprep.subr.bf16.mxu1 %v433_v36  ;;  %v1187_v21 = vmul.f32 %v20491_v22, %v21502_v61 }
 0x317   :  { %19271 = vmatpush3.bf16.msra.mxu0 %v435_v20  ;;  %v1204_v63 = vpack.c.bf16 %v1187_v21, %v1187_v21 }
 0x318   :  { %19263 = vmatpush3.bf16.msra.mxu1 %v433_v36  ;;  %v20493_v50 = vpop.eup %20492 }
 0x319   :  { %v20495_v16 = vpop.eup %20494  ;;  %v1185_v58 = vmul.f32 %v20493_v50, %v21508_v34  ;;  %v19869_v34 = vld [vmem:[%s26595_s10] sm:$0xff]  }
 0x31a   :  { %v1188_v17 = vmul.f32 %v20495_v16, %v21506_v0  ;;  %v19868_v0 = vld [vmem:[%s26595_s10 + $0x8] sm:$0xff]  }
 0x31b   :  { %v20497_v41 = vpop.eup %20496  ;;  %19276 = vmatprep.subr.bf16.mxu1 %v19868_v0 }
 0x31c   :  { %v20499_v23 = vpop.eup %20498  ;;  %v1186_v29 = vmul.f32 %v20497_v41, %v21514_v38 }
 0x31d   :  { %v1189_v54 = vmul.f32 %v20499_v23, %v21516_v2 }
 0x31e   :  { %v1203_v57 = vpack.c.bf16 %v1186_v29, %v1185_v58 }
 0x31f   :  { %v20501_v55 = vpop.eup %20500  ;;  %v1205_v40 = vpack.c.bf16 %v1189_v54, %v1188_v17 }
 0x320   :  { %19264 = vmatprep.mubr.msk.bf16.mxu1 %vm925_vm3, %v1203_v57  ;;  %v1190_v15 = vmul.f32 %v20501_v55, %v21522_v42 }
 0x321   :  { %19265 = vmatmul.mubr.msk.bf16.vlgmr.msra.gmra.mxu1 %vm925_vm3, %v1204_v63  ;;  %19272 = vmatprep.mubr.msk.bf16.mxu0 %vm925_vm3, %v1205_v40 }
 0x322   :  { %v1206_v61 = vpack.c.bf16 %v1190_v15, %v1190_v15  ;;  %19277 = vmatpush3.bf16.msra.mxu1 %v19868_v0 }
 0x323   :  { %19278 = vmatprep.subr.bf16.mxu1 %v19869_v34 }
 0x324   :  { %19273 = vmatmul.mubr.msk.bf16.vlgmr.msra.gmra.mxu0 %vm925_vm3, %v1206_v61 }
 0x326   :  { %19279 = vmatpush3.bf16.msra.mxu1 %v19869_v34 }
 0x3b4   :  { %v19226_v38 = vpop.f32.mrf.mxu0 }
 0x3b5   :  { %v1696_v53 = vsel %vm1694_vm4, %v19226_v38, 0.0 }
 0x3b6   :  { %v19218_v2 = vpop.f32.mrf.mxu1  ;;  %v1308_v42 = vpop.f32.mrf.mxu0 }
 0x3b7   :  { %v1695_v51 = vsel %vm1694_vm4, %v19218_v2, 0.0  ;;  %v1665_v1 = vsel %vm112_vm0, %v1308_v42, 0.0 }
 0x3b8   :  { %v1251_v31 = vpop.f32.mrf.mxu1  ;;  %v19227_v14 = vpop.f32.mrf.mxu0  ;;  %v1697_v37 = vadd.f32 %v1696_v53, %v1695_v51 }
 0x3b9   :  { %v1664_v32 = vsel %vm112_vm0, %v1251_v31, 0.0 }
 0x3ba   :  { %v19219_v24 = vpop.f32.mrf.mxu1  ;;  %v1311_v33 = vpop.f32.mrf.mxu0  ;;  %v1666_v25 = vadd.f32 %v1665_v1, %v1664_v32 }
 0x3bb   :  { %v1680_v5 = vsel %vm112_vm0, %v1311_v33, 0.0 }
 0x3bc   :  { %v1254_v60 = vpop.f32.mrf.mxu1 }
 0x3bd   :  { %v1679_v56 = vsel %vm112_vm0, %v1254_v60, 0.0 }
 0x3be   :  { %v1681_v7 = vadd.f32 %v1680_v5, %v1679_v56 }
 0x3c2   :  { %v19242_v3 = vpop.f32.mrf.mxu0 }
 0x3c3   :  { %v19234_v59 = vpop.f32.mrf.mxu1  ;;  %v1700_v49 = vsel %vm1694_vm4, %v19242_v3, 0.0 }
 0x3c4   :  { %v1422_v9 = vpop.f32.mrf.mxu0  ;;  %v1698_v26 = vsel %vm1694_vm4, %v19234_v59, 0.0 }
 0x3c5   :  { %v1365_v10 = vpop.f32.mrf.mxu1  ;;  %v1699_v45 = vadd.f32 %v1698_v26, %v1697_v37  ;;  %v1669_v35 = vsel %vm112_vm0, %v1422_v9, 0.0 }
 0x3c6   :  { %v19243_v30 = vpop.f32.mrf.mxu0  ;;  %v1667_v4 = vsel %vm112_vm0, %v1365_v10, 0.0 }
 0x3c7   :  { %v19235_v39 = vpop.f32.mrf.mxu1  ;;  %v1668_v13 = vadd.f32 %v1667_v4, %v1666_v25  ;;  %v1701_v20 = vadd.f32 %v1700_v49, %v1699_v45 }
 0x3c8   :  { %v1425_v6 = vpop.f32.mrf.mxu0 }
 0x3c9   :  { %v1368_v62 = vpop.f32.mrf.mxu1  ;;  %v1670_v22 = vadd.f32 %v1669_v35, %v1668_v13  ;;  %v1684_v50 = vsel %vm112_vm0, %v1425_v6, 0.0 }
 0x3ca   :  { %v1682_v19 = vsel %vm112_vm0, %v1368_v62, 0.0 }
 0x3cb   :  { %v1683_v43 = vadd.f32 %v1682_v19, %v1681_v7 }
 0x3cd   :  { %v1685_v41 = vadd.f32 %v1684_v50, %v1683_v43  ;;  %v1870_v50 = vld [vmem:[%s26597_s12 + $0x80] sm:$0xff] }
 0x3d2   :  { %v19258_v47 = vpop.f32.mrf.mxu0 }
 0x3d3   :  { %v19250_v28 = vpop.f32.mrf.mxu1  ;;  %v1704_v57 = vsel %vm1694_vm4, %v19258_v47, 0.0 }
 0x3d4   :  { %v1536_v48 = vpop.f32.mrf.mxu0  ;;  %v1702_v27 = vsel %vm1694_vm4, %v19250_v28, 0.0 }
 0x3d5   :  { %v1479_v18 = vpop.f32.mrf.mxu1  ;;  %v1703_v21 = vadd.f32 %v1702_v27, %v1701_v20  ;;  %v1673_v15 = vsel %vm112_vm0, %v1536_v48, 0.0 }
 0x3d6   :  { %v19259_v44 = vpop.f32.mrf.mxu0  ;;  %v1671_v36 = vsel %vm112_vm0, %v1479_v18, 0.0  ;;  %v16078_v18 = vld [vmem:[%s26596_s11] ss:$0 sm:$0xff] }
 0x3d7   :  { %v19251_v52 = vpop.f32.mrf.mxu1  ;;  %v1672_v58 = vadd.f32 %v1671_v36, %v1670_v22  ;;  %v1705_v40 = vadd.f32 %v1704_v57, %v1703_v21  ;;  %v1862_v57 = vld [vmem:[%s26597_s12 + $0x40] sm:$0xff] }
 0x3d8   :  { %v1539_v29 = vpop.f32.mrf.mxu0 }
 0x3d9   :  { %v1482_v46 = vpop.f32.mrf.mxu1  ;;  %v1674_v34 = vadd.f32 %v1673_v15, %v1672_v58  ;;  %v1688_v38 = vsel %vm112_vm0, %v1539_v29, 0.0 }
 0x3da   :  { %v1686_v16 = vsel %vm112_vm0, %v1482_v46, 0.0 }
 0x3db   :  { %v1687_v17 = vadd.f32 %v1686_v16, %v1685_v41  ;;  %v1878_v16 = vld [vmem:[%s26597_s12 + $0xc0] sm:$0xff]  ;;  %v1871_v41 = vld [vmem:[%s26597_s12 + $0x88] sm:$0xff] }
 0x3dc   :  { %v16102_v21 = vcombine.high %v1870_v50, %v1878_v16  ;;  %v16101_v58 = vcombine.low %v1870_v50, %v1878_v16  ;;  %v1858_v50 = vld [vmem:[%s26597_s12 + $0x20] sm:$0xff] }
 0x3dd   :  { %v1689_v42 = vadd.f32 %v1688_v38, %v1687_v17  ;;  %v1872_v38 = vld [vmem:[%s26597_s12 + $0x90] sm:$0xff]  ;;  %v1866_v16 = vld [vmem:[%s26597_s12 + $0x60] sm:$0xff] }
 0x3de   :  { %2148 = vmatprep.subr.bf16.mxu0 %v16102_v21  ;;  %v1867_v21 = vld [vmem:[%s26597_s12 + $0x68] sm:$0xff] }
 0x3df   :  { %2149 = vmatpush1.bf16.msra.mxu0 %v16101_v58 }
 0x3e1   :  { %v19266_v23 = vpop.f32.mrf.mxu1 }
 0x3e2   :  { %v1706_v55 = vsel %vm1694_vm4, %v19266_v23, 0.0  ;;  %v1879_v23 = vld [vmem:[%s26597_s12 + $0xc8] sm:$0xff] }
 0x3e3   :  { %v1593_v54 = vpop.f32.mrf.mxu1  ;;  %v1707_v31 = vadd.f32 %v1706_v55, %v1705_v40  ;;  %v16103_v29 = vcombine.low %v1871_v41, %v1879_v23  ;;  %v16104_v17 = vcombine.high %v1871_v41, %v1879_v23  ;;  %v1855_v55 = vld [vmem:[%s26597_s12 + $0x8] sm:$0xff] }
 0x3e4   :  { %v19274_v63 = vpop.f32.mrf.mxu0  ;;  %v1675_v61 = vsel %vm112_vm0, %v1593_v54, 0.0  ;;  %v1854_v54 = vld [vmem:[%s26597_s12] sm:$0xff]  ;;  %v1863_v40 = vld [vmem:[%s26597_s12 + $0x48] sm:$0xff] }
 0x3e5   :  { %v19267_v0 = vpop.f32.mrf.mxu1  ;;  %v1676_v24 = vadd.f32 %v1675_v61, %v1674_v34  ;;  %v1708_v33 = vsel %vm1694_vm4, %v19274_v63, 0.0  ;;  %2199 = vmatprep.subr.bf16.mxu1 %v16104_v17  ;;  %v16086_v63 = vcombine.high %v1854_v54, %v1862_v57  ;;  %v16085_v15 = vcombine.low %v1854_v54, %v1862_v57  ;;  %v1859_v41 = vld [vmem:[%s26597_s12 + $0x28] sm:$0xff]  ;;  %v1876_v54 = vld [vmem:[%s26597_s12 + $0xb0] sm:$0xff] }
 0x3e6   :  { %v1650_v2 = vpop.f32.mrf.mxu0  ;;  %v1709_v30 = vadd.f32 %v1708_v33, %v1707_v31  ;;  %v16087_v61 = vcombine.low %v1855_v55, %v1863_v40  ;;  %v16088_v0 = vcombine.high %v1855_v55, %v1863_v40  ;;  %v26611_v34 = vmov 0   ;;  %v1884_v57 = vld [vmem:[%s26597_s12 + $0xf0] sm:$0xff]  ;;  %v1877_v55 = vld [vmem:[%s26597_s12 + $0xb8] sm:$0xff] }
 0x3e7   :  { %v1596_v14 = vpop.f32.mrf.mxu1  ;;  %v1677_v59 = vsel %vm112_vm0, %v1650_v2, 0.0  ;;  %2150 = vmatprep.subr.bf16.mxu0 %v16086_v63  ;;  %2168 = vmatprep.mubr.bf16.mxu0 %v26611_v34  ;;  %v1880_v2 = vld [vmem:[%s26597_s12 + $0xd0] sm:$0xff]  ;;  %v16096_v17 = vcombine.high %v1859_v41, %v1867_v21  ;;  %v1885_v63 = vld [vmem:[%s26597_s12 + $0xf8] sm:$0xff]  ;;  %v16093_v40 = vcombine.low %v1858_v50, %v1866_v16 }
 0x3e8   :  { %v1690_v60 = vsel %vm112_vm0, %v1596_v14, 0.0  ;;  %v19275_v3 = vpop.f32.mrf.mxu0  ;;  %v1678_v6 = vadd.f32 %v1677_v59, %v1676_v24  ;;  %v1711_v28 = vpack.c.bf16 %v1709_v30, %v1709_v30  ;;  %2151 = vmatpush1.bf16.msra.mxu0 %v16085_v15  ;;  %v16106_v31 = vcombine.high %v1872_v38, %v1880_v2  ;;  %v1881_v14 = vld [vmem:[%s26597_s12 + $0xd8] sm:$0xff] }
 0x3e9   :  { %v1691_v9 = vadd.f32 %v1690_v60, %v1689_v42  ;;  %v1873_v42 = vld [vmem:[%s26597_s12 + $0x98] sm:$0xff]  ;;  %v16105_v24 = vcombine.low %v1872_v38, %v1880_v2  ;;  %v16095_v15 = vcombine.low %v1859_v41, %v1867_v21  ;;  %v1860_v38 = vld [vmem:[%s26597_s12 + $0x30] sm:$0xff] }
 0x3ea   :  { %v1653_v10 = vpop.f32.mrf.mxu0  ;;  %v16107_v33 = vcombine.low %v1873_v42, %v1881_v14  ;;  %v16108_v60 = vcombine.high %v1873_v42, %v1881_v14  ;;  %2250 = vmatprep.subr.bf16.mxu0 %v16106_v31  ;;  %v1868_v2 = vld [vmem:[%s26597_s12 + $0x70] sm:$0xff]  ;;  %v1861_v42 = vld [vmem:[%s26597_s12 + $0x38] sm:$0xff]  ;;  %v16113_v14 = vcombine.low %v1876_v54, %v1884_v57 }
 0x3eb   :  { %v1692_v39 = vsel %vm112_vm0, %v1653_v10, 0.0  ;;  %v1869_v31 = vld [vmem:[%s26597_s12 + $0x78] sm:$0xff] }
 0x3ec   :  { %v1693_v62 = vadd.f32 %v1692_v39, %v1691_v9 }
 0x3ee   :  { %v1710_v47 = vpack.c.bf16 %v1693_v62, %v1678_v6 }
 0x3f0   :  { %19280 = vmatprep.mubr.msk.bf16.mxu1 %vm112_vm0, %v1710_v47 }
 0x3f1   :  { %19281 = vmatmul.mubr.msk.bf16.vlgmr.msra.gmra.mxu1 %vm112_vm0, %v1711_v28 }
 0x3f2   :  { %2200 = vmatpush1.bf16.msra.mxu1 %v16103_v29  ;;  %2219 = vmatprep.mubr.bf16.mxu1 %v26611_v34  ;;  %v16094_v29 = vcombine.high %v1858_v50, %v1866_v16  ;;  %v1890_v50 = vlaneseq }
 0x3f3   :  { %2201 = vmatprep.subr.bf16.mxu1 %v16088_v0  ;;  %v16116_v0 = vcombine.high %v1877_v55, %v1885_v63 }
 0x3f4   :  { %v21937_v16 = vshrl.u32 %v1890_v50, 7 }
 0x3f6   :  { %2202 = vmatpush1.bf16.msra.mxu1 %v16087_v61  ;;  %v16114_v61 = vcombine.high %v1876_v54, %v1884_v57  ;;  %v21940_v41 = vsub.s32 1, %v21937_v16  ;;  %v21943_v21 = vsub.s32 3, %v21937_v16 }
 0x3f7   :  { %2301 = vmatprep.subr.bf16.mxu1 %v16108_v60  ;;  %v16100_v60 = vcombine.high %v1861_v42, %v1869_v31 }
 0x4b1   :  { %v19282_v48 = vpop.f32.mrf.mxu1 }
 0x4b2   :  { %v1784_v44 = vadd.f32 %v19282_v48, %v16078_v18 }
 0x4b3   :  { %v1775_v51 = vpop.f32.mrf.mxu1 }
 0x4b4   :  { %v1776_v32 = vadd.f32 %v16078_v18, %v1775_v51  ;;  %v1791_v1 = vadd.f32 %v1784_v44, %v21038_v12 }
 0x4b5   :  { %v19283_v52 = vpop.f32.mrf.mxu1 }
 0x4b6   :  { %v1789_v53 = vadd.f32 %v1776_v32, %v21028_v8  ;;  %v1800_v5 = vsel %vm1694_vm4, %v1791_v1, 0.0 }
 0x4b7   :  { %v1778_v56 = vpop.f32.mrf.mxu1 }
 0x4b8   :  { %v1779_v26 = vadd.f32 %v16078_v18, %v1778_v56  ;;  %v1794_v37 = vsel %vm112_vm0, %v1789_v53, 0.0  ;;  %v16083_v18 = vld [vmem:[%s26601_s16] ss:$0 sm:$0xff] }
 0x4b9   :  { %1795 = vadd.xlane.f32.xlu0 %v1794_v37  ;;  %v1856_v37 = vld [vmem:[%s26597_s12 + $0x10] sm:$0xff] }
 0x4ba   :  { %v1790_v4 = vadd.f32 %v1779_v26, %v21036_v11 }
 0x4bc   :  { %v1797_v25 = vsel %vm112_vm0, %v1790_v4, 0.0 }
 0x4bd   :  { %1798 = vadd.xlane.f32.xlu1 %v1797_v25  ;;  %1801 = vadd.xlane.f32.xlu0 %v1800_v5  ;;  %v1864_v25 = vld [vmem:[%s26597_s12 + $0x50] sm:$0xff]  ;;  %v1857_v5 = vld [vmem:[%s26597_s12 + $0x18] sm:$0xff] }
 0x542   :  { %v1796_v19 = vpop.xlane.xlu0 %1795 }
 0x543   :  { %v1804_v7 = vmul.f32 0.03125, %v1796_v19  ;;  %v1865_v19 = vld [vmem:[%s26597_s12 + $0x58] sm:$0xff] }
 0x545   :  { %v21653_v45 = vsub.f32 %v1789_v53, %v1804_v7  ;;  %v16084_v53 = vld [vmem:[%s26602_s17] ss:$0 sm:$0xff] }
 0x546   :  { %v1799_v8 = vpop.xlane.xlu1 %1798  ;;  %v1802_v13 = vpop.xlane.xlu0 %1801 }
 0x547   :  { %v1805_v43 = vmul.f32 0.03125, %v1799_v8  ;;  %v1806_v46 = vmul.f32 0.03125, %v1802_v13  ;;  %v1810_v12 = vmul.f32 %v21653_v45, %v21653_v45  ;;  %v16090_v8 = vcombine.high %v1856_v37, %v1864_v25 }
 0x548   :  { %v16092_v13 = vcombine.high %v1857_v5, %v1865_v19 }
 0x549   :  { %v21657_v49 = vsub.f32 %v1790_v4, %v1805_v43  ;;  %v21659_v11 = vsub.f32 %v1791_v1, %v1806_v46  ;;  %v1813_v27 = vsel %vm112_vm0, %v1810_v12, 0.0  ;;  %v1874_v43 = vld [vmem:[%s26597_s12 + $0xa0] sm:$0xff]  ;;  %v1875_v12 = vld [vmem:[%s26597_s12 + $0xa8] sm:$0xff] }
 0x54a   :  { %1814 = vadd.xlane.f32.xlu1 %v1813_v27  ;;  %v1882_v46 = vld [vmem:[%s26597_s12 + $0xe0] sm:$0xff]  ;;  %v16089_v27 = vcombine.low %v1856_v37, %v1864_v25  ;;  %v19887_v37 = vld [vmem:[%s26599_s14 + $0xd8] sm:$0xff]  }
 0x54b   :  { %v1811_v20 = vmul.f32 %v21657_v49, %v21657_v49  ;;  %v1812_v35 = vmul.f32 %v21659_v11, %v21659_v11  ;;  %v16109_v23 = vcombine.low %v1874_v43, %v1882_v46  ;;  %v19888_v25 = vld [vmem:[%s26599_s14 + $0x18] sm:$0xff]  }
 0x54d   :  { %v1816_v36 = vsel %vm112_vm0, %v1811_v20, 0.0  ;;  %v1819_v22 = vsel %vm1694_vm4, %v1812_v35, 0.0  ;;  %v16091_v20 = vcombine.low %v1857_v5, %v1865_v19  ;;  %v16110_v35 = vcombine.high %v1874_v43, %v1882_v46  ;;  %v19889_v5 = vld [vmem:[%s26599_s14 + $0x98] sm:$0xff]   ;;  %v19890_v19 = vld [vmem:[%s26599_s14 + $0x50] sm:$0xff]   ;;  %v19895_v43 = vld [vmem:[%s26599_s14 + $0xc8] sm:$0xff]  }
 0x54e   :  { %1817 = vadd.xlane.f32.xlu0 %v1816_v36  ;;  %1820 = vadd.xlane.f32.xlu1 %v1819_v22  ;;  %v19896_v46 = vld [vmem:[%s26599_s14 + $0x8] sm:$0xff]  }
 0x5d3   :  { %v1815_v3 = vpop.xlane.xlu1 %1814 }
 0x5d4   :  { %v1822_v59 = vmul.f32 0.03125, %v1815_v3  ;;  %v16097_v3 = vcombine.low %v1860_v38, %v1868_v2 }
 0x5d6   :  { %v1825_v9 = vadd.f32 1e-05, %v1822_v59  ;;  %v16099_v59 = vcombine.low %v1861_v42, %v1869_v31 }
 0x5d7   :  { %v1821_v10 = vpop.xlane.xlu1 %1820  ;;  %v1818_v30 = vpop.xlane.xlu0 %1817 }
 0x5d8   :  { %20502 = vrsqrt.f32 %v1825_v9  ;;  %v1824_v39 = vmul.f32 0.03125, %v1821_v10  ;;  %v1823_v6 = vmul.f32 0.03125, %v1818_v30  ;;  %v19870_v9 = vld [vmem:[%s26599_s14 + $0x78] sm:$0xff]  }
 0x5d9   :  { %v19871_v10 = vld [vmem:[%s26599_s14 + $0xf8] sm:$0xff]  }
 0x5da   :  { %v1827_v62 = vadd.f32 1e-05, %v1824_v39  ;;  %v1826_v47 = vadd.f32 1e-05, %v1823_v6  ;;  %v19872_v30 = vld [vmem:[%s26599_s14 + $0x38] sm:$0xff]   ;;  %v19874_v6 = vld [vmem:[%s26599_s14 + $0x70] sm:$0xff]  }
 0x5db   :  { %v19873_v39 = vld [vmem:[%s26599_s14 + $0xb8] sm:$0xff]  }
 0x5dc   :  { %20504 = vrsqrt.f32 %v1827_v62  ;;  %v19875_v62 = vld [vmem:[%s26599_s14 + $0xf0] sm:$0xff]  }
 0x5dd   :  { %20506 = vrsqrt.f32 %v1826_v47  ;;  %v19876_v47 = vld [vmem:[%s26599_s14 + $0x30] sm:$0xff]  }
 0x5e5   :  { %v20503_v28 = vpop.eup %20502 }
 0x5e6   :  { %v1831_v48 = vmul.f32 %v20503_v28, %v21653_v45  ;;  %v19877_v28 = vld [vmem:[%s26599_s14 + $0xb0] sm:$0xff]  }
 0x5e8   :  { %v1840_v32 = vmul.f32 %v16083_v18, %v1831_v48  ;;  %v19878_v48 = vld [vmem:[%s26599_s14 + $0x68] sm:$0xff]  }
 0x5e9   :  { %v20505_v51 = vpop.eup %20504 }
 0x5ea   :  { %v20507_v44 = vpop.eup %20506  ;;  %v1833_v56 = vmul.f32 %v20505_v51, %v21659_v11  ;;  %v21718_v1 = vadd.f32 %v16084_v53, %v1840_v32  ;;  %v19880_v51 = vld [vmem:[%s26599_s14 + $0x28] sm:$0xff]   ;;  %v19882_v32 = vld [vmem:[%s26599_s14 + $0x60] sm:$0xff]  }
 0x5eb   :  { %v1832_v52 = vmul.f32 %v20507_v44, %v21657_v49  ;;  %v1883_v49 = vld [vmem:[%s26597_s12 + $0xe8] sm:$0xff] }
 0x5ec   :  { %v1842_v7 = vmul.f32 %v16083_v18, %v1833_v56  ;;  %v16112_v36 = vcombine.high %v1875_v12, %v1883_v49  ;;  %v16111_v58 = vcombine.low %v1875_v12, %v1883_v49  ;;  %v19881_v44 = vld [vmem:[%s26599_s14 + $0xa8] sm:$0xff]   ;;  %v19885_v56 = vld [vmem:[%s26599_s14 + $0xa0] sm:$0xff]  }
 0x5ed   :  { %v1841_v26 = vmul.f32 %v16083_v18, %v1832_v52  ;;  %v19879_v18 = vld [vmem:[%s26599_s14 + $0xe8] sm:$0xff]   ;;  %v19883_v52 = vld [vmem:[%s26599_s14 + $0xe0] sm:$0xff]  }
 0x5ee   :  { %v21753_v11 = vadd.f32 %v16084_v53, %v1842_v7  ;;  %v19891_v7 = vld [vmem:[%s26599_s14 + $0xd0] sm:$0xff]   ;;  %v19897_v12 = vld [vmem:[%s26599_s14 + $0x88] sm:$0xff]   ;;  %v19898_v49 = vld [vmem:[%s26599_s14 + $0x40] sm:$0xff]  }
 0x5ef   :  { %v21720_v4 = vadd.f32 %v16084_v53, %v1841_v26  ;;  %v19884_v53 = vld [vmem:[%s26599_s14 + $0x20] sm:$0xff]   ;;  %v19886_v26 = vld [vmem:[%s26599_s14 + $0x58] sm:$0xff]  }
 0x5f0   :  { %v21757_v22 = vpack.c.bf16 %v21753_v11, %v21753_v11 }
 0x5f1   :  { %v21733_v45 = vpack.c.bf16 %v21720_v4, %v21718_v1 }
 0x5f3   :  { %16117 = vmatmul.mubr.msk.bf16.vlgmr.msra.gmra.mxu0 %vm112_vm0, %v21733_v45  ;;  %16119 = vmatmul.mubr.msk.bf16.vlgmr.msra.gmra.mxu1 %vm112_vm0, %v21733_v45 }
 0x5f4   :  { %2178 = vmatprep.mubr.bf16.mxu0 %v26611_v34  ;;  %2229 = vmatprep.mubr.bf16.mxu1 %v26611_v34 }
 0x5f5   :  { %2251 = vmatpush1.bf16.msra.mxu0 %v16105_v24  ;;  %2302 = vmatpush1.bf16.msra.mxu1 %v16107_v33  ;;  %v16115_v24 = vcombine.low %v1877_v55, %v1885_v63  ;;  %v16098_v33 = vcombine.high %v1860_v38, %v1868_v2 }
 0x5f6   :  { %2252 = vmatprep.subr.bf16.mxu0 %v16090_v8  ;;  %2303 = vmatprep.subr.bf16.mxu1 %v16092_v13  ;;  %v19893_v8 = vld [vmem:[%s26599_s14 + $0x90] sm:$0xff]   ;;  %v19894_v13 = vld [vmem:[%s26599_s14 + $0x48] sm:$0xff]  }
 0x5f9   :  { %2253 = vmatpush1.bf16.msra.mxu0 %v16089_v27  ;;  %2304 = vmatpush1.bf16.msra.mxu1 %v16091_v20  ;;  %v19899_v27 = vld [vmem:[%s26599_s14 + $0xc0] sm:$0xff]  }
 0x5fa   :  { %2352 = vmatprep.subr.bf16.mxu0 %v16110_v35  ;;  %2403 = vmatprep.subr.bf16.mxu1 %v16112_v36  ;;  %v19900_v20 = vld [vmem:[%s26599_s14] sm:$0xff]   ;;  %v19902_v36 = vld [vmem:[%s26599_s14 + $0x178] sm:$0xff]  }
 0x5fb   :  { %16118 = vmatmul.mubr.msk.bf16.gmra.mxu0 %vm112_vm0, %v21757_v22  ;;  %16120 = vmatmul.mubr.msk.bf16.gmra.mxu1 %vm112_vm0, %v21757_v22  ;;  %v19901_v35 = vld [vmem:[%s26599_s14 + $0x80] sm:$0xff]  }
 0x5fc   :  { %2270 = vmatprep.mubr.bf16.mxu0 %v26611_v34  ;;  %2321 = vmatprep.mubr.bf16.mxu1 %v26611_v34 }
 0x603   :  { %16121 = vmatmul.mubr.msk.bf16.vlgmr.msra.gmra.mxu0 %vm112_vm0, %v21733_v45  ;;  %16123 = vmatmul.mubr.msk.bf16.vlgmr.msra.gmra.mxu1 %vm112_vm0, %v21733_v45 }
 0x604   :  { %2280 = vmatprep.mubr.bf16.mxu0 %v26611_v34  ;;  %2331 = vmatprep.mubr.bf16.mxu1 %v26611_v34 }
 0x605   :  { %2353 = vmatpush1.bf16.msra.mxu0 %v16109_v23  ;;  %2404 = vmatpush1.bf16.msra.mxu1 %v16111_v58  ;;  %v21946_v23 = vsub.s32 0, %v21937_v16  ;;  %v21949_v58 = vsub.s32 2, %v21937_v16 }
 0x606   :  { %2354 = vmatprep.subr.bf16.mxu0 %v16094_v29  ;;  %2405 = vmatprep.subr.bf16.mxu1 %v16096_v17  ;;  %v21954_v29 = vld [vmem:[%s26598_s13] sm:$0xff] }
 0x607   :  { %v1897_v57 = vrot.slane %v21954_v29, %v21940_v41  ;;  %v1905_v55 = vrot.slane %v21954_v29, %v21943_v21  ;;  %v1893_v63 = vrot.slane %v21954_v29, %v21946_v23 }
 0x609   :  { %2355 = vmatpush1.bf16.msra.mxu0 %v16093_v40  ;;  %2406 = vmatpush1.bf16.msra.mxu1 %v16095_v15  ;;  %v1901_v40 = vrot.slane %v21954_v29, %v21949_v58 }
 0x60a   :  { %2454 = vmatprep.subr.bf16.mxu0 %v16114_v61  ;;  %2505 = vmatprep.subr.bf16.mxu1 %v16116_v0 }
 0x60b   :  { %16122 = vmatmul.mubr.msk.bf16.gmra.mxu0 %vm112_vm0, %v21757_v22  ;;  %16124 = vmatmul.mubr.msk.bf16.gmra.mxu1 %vm112_vm0, %v21757_v22 }
 0x60c   :  { %2372 = vmatprep.mubr.bf16.mxu0 %v26611_v34  ;;  %2423 = vmatprep.mubr.bf16.mxu1 %v26611_v34 }
 0x613   :  { %16125 = vmatmul.mubr.msk.bf16.vlgmr.msra.gmra.mxu0 %vm112_vm0, %v21733_v45  ;;  %16127 = vmatmul.mubr.msk.bf16.vlgmr.msra.gmra.mxu1 %vm112_vm0, %v21733_v45 }
 0x614   :  { %2382 = vmatprep.mubr.bf16.mxu0 %v26611_v34  ;;  %2433 = vmatprep.mubr.bf16.mxu1 %v26611_v34 }
 0x615   :  { %2455 = vmatpush1.bf16.msra.mxu0 %v16113_v14  ;;  %2506 = vmatpush1.bf16.msra.mxu1 %v16115_v24 }
 0x616   :  { %2456 = vmatprep.subr.bf16.mxu0 %v16098_v33  ;;  %2507 = vmatprep.subr.bf16.mxu1 %v16100_v60 }
 0x619   :  { %2457 = vmatpush1.bf16.msra.mxu0 %v16097_v3  ;;  %2508 = vmatpush1.bf16.msra.mxu1 %v16099_v59 }
 0x61a   :  { %17988 = vmatprep.subr.bf16.mxu0 %v19870_v9  ;;  %18016 = vmatprep.subr.bf16.mxu1 %v19871_v10 }
 0x61b   :  { %16126 = vmatmul.mubr.msk.bf16.gmra.mxu0 %vm112_vm0, %v21757_v22  ;;  %16128 = vmatmul.mubr.msk.bf16.gmra.mxu1 %vm112_vm0, %v21757_v22 }
 0x61c   :  { %2474 = vmatprep.mubr.bf16.mxu0 %v26611_v34  ;;  %2525 = vmatprep.mubr.bf16.mxu1 %v26611_v34 }
 0x623   :  { %16129 = vmatmul.mubr.msk.bf16.vlgmr.msra.gmra.mxu0 %vm112_vm0, %v21733_v45  ;;  %16131 = vmatmul.mubr.msk.bf16.vlgmr.msra.gmra.mxu1 %vm112_vm0, %v21733_v45  ;;  %v19892_v45 = vld [vmem:[%s26599_s14 + $0x10] sm:$0xff]  }
 0x624   :  { %2484 = vmatprep.mubr.bf16.mxu0 %v26611_v34  ;;  %2535 = vmatprep.mubr.bf16.mxu1 %v26611_v34 }
 0x625   :  { %17989 = vmatpush3.bf16.msra.mxu0 %v19872_v30  ;;  %18017 = vmatpush3.bf16.msra.mxu1 %v19873_v39 }
 0x626   :  { %17990 = vmatprep.subr.bf16.mxu0 %v19874_v6  ;;  %18018 = vmatprep.subr.bf16.mxu1 %v19875_v62 }
 0x629   :  { %17991 = vmatpush3.bf16.msra.mxu0 %v19876_v47  ;;  %18019 = vmatpush3.bf16.msra.mxu1 %v19877_v28 }
 0x62a   :  { %17992 = vmatprep.subr.bf16.mxu0 %v19878_v48  ;;  %18020 = vmatprep.subr.bf16.mxu1 %v19879_v18 }
 0x62b   :  { %16130 = vmatmul.mubr.msk.bf16.gmra.mxu0 %vm112_vm0, %v21757_v22  ;;  %16132 = vmatmul.mubr.msk.bf16.gmra.mxu1 %vm112_vm0, %v21757_v22  ;;  %v19903_v22 = vld [vmem:[%s26599_s14 + $0x1f8] sm:$0xff]  }
 0x62d   :  { %17993 = vmatpush3.bf16.msra.mxu0 %v19880_v51  ;;  %18021 = vmatpush3.bf16.msra.mxu1 %v19881_v44 }
 0x62e   :  { %17994 = vmatprep.subr.bf16.mxu0 %v19882_v32  ;;  %18022 = vmatprep.subr.bf16.mxu1 %v19883_v52 }
 0x631   :  { %17995 = vmatpush3.bf16.msra.mxu0 %v19884_v53  ;;  %18023 = vmatpush3.bf16.msra.mxu1 %v19885_v56 }
 0x632   :  { %17996 = vmatprep.subr.bf16.mxu0 %v19886_v26  ;;  %18024 = vmatprep.subr.bf16.mxu1 %v19887_v37  ;;  %v19904_v37 = vld [vmem:[%s26599_s14 + $0x138] sm:$0xff]  }
 0x635   :  { %17997 = vmatpush3.bf16.msra.mxu0 %v19888_v25  ;;  %18025 = vmatpush3.bf16.msra.mxu1 %v19889_v5  ;;  %v19905_v25 = vld [vmem:[%s26599_s14 + $0x1b8] sm:$0xff]  }
 0x636   :  { %17998 = vmatprep.subr.bf16.mxu0 %v19890_v19  ;;  %18026 = vmatprep.subr.bf16.mxu1 %v19891_v7 }
 0x639   :  { %17999 = vmatpush3.bf16.msra.mxu0 %v19892_v45  ;;  %18027 = vmatpush3.bf16.msra.mxu1 %v19893_v8 }
 0x63a   :  { %18000 = vmatprep.subr.bf16.mxu0 %v19894_v13  ;;  %18028 = vmatprep.subr.bf16.mxu1 %v19895_v43  ;;  %v19906_v43 = vld [vmem:[%s26599_s14 + $0x170] sm:$0xff]  }
 0x63d   :  { %18001 = vmatpush3.bf16.msra.mxu0 %v19896_v46  ;;  %18029 = vmatpush3.bf16.msra.mxu1 %v19897_v12  ;;  %v19907_v46 = vld [vmem:[%s26599_s14 + $0x1f0] sm:$0xff]  }
 0x63e   :  { %18002 = vmatprep.subr.bf16.mxu0 %v19898_v49  ;;  %18030 = vmatprep.subr.bf16.mxu1 %v19899_v27  ;;  %v21977_v27 = vsub.s32 5, %v21937_v16 }
 0x641   :  { %18003 = vmatpush3.bf16.msra.mxu0 %v19900_v20  ;;  %18031 = vmatpush3.bf16.msra.mxu1 %v19901_v35 }
 0x642   :  { %18044 = vmatprep.subr.bf16.mxu0 %v19902_v36  ;;  %18072 = vmatprep.subr.bf16.mxu1 %v19903_v22  ;;  %v21980_v36 = vsub.s32 7, %v21937_v16 }
 0x644   :  { %26634 = vst [vmem:[#allocation5_spill] sm:$0xff] %v21980_v36 }
 0x6b3   :  { %v2170_v17 = vpop.f32.mrf.mxu0  ;;  %v2221_v54 = vpop.f32.mrf.mxu1 }
 0x6b4   :  { %v2171_v24 = vadd.f32 %v2170_v17, %v1893_v63  ;;  %v2222_v33 = vadd.f32 %v2221_v54, %v1901_v40  ;;  %v19908_v17 = vld [vmem:[%s26599_s14 + $0x130] sm:$0xff]  }
 0x6b5   :  { %v2172_v15 = vpop.f32.mrf.mxu0  ;;  %v2223_v61 = vpop.f32.mrf.mxu1  ;;  %v19909_v54 = vld [vmem:[%s26599_s14 + $0x1b0] sm:$0xff]  }
 0x6b6   :  { %v2173_v2 = vadd.f32 %v2172_v15, %v1897_v57  ;;  %v2224_v42 = vadd.f32 %v2223_v61, %v1905_v55  ;;  %v2544_v18 = vmax.f32 %v2171_v24, 0.0  ;;  %v2546_v51 = vmax.f32 %v2222_v33, 0.0  ;;  %v19910_v15 = vld [vmem:[%s26599_s14 + $0x168] sm:$0xff]  }
 0x6b7   :  { %v2174_v0 = vpop.f32.mrf.mxu0  ;;  %v2225_v38 = vpop.f32.mrf.mxu1  ;;  %v19911_v61 = vld [vmem:[%s26599_s14 + $0x1e8] sm:$0xff]  }
 0x6b8   :  { %v2175_v31 = vadd.f32 %v2174_v0, %v1893_v63  ;;  %v2226_v14 = vadd.f32 %v2225_v38, %v1901_v40  ;;  %v2545_v62 = vmax.f32 %v2173_v2, 0.0  ;;  %v2547_v47 = vmax.f32 %v2224_v42, 0.0 }
 0x6b9   :  { %v2176_v60 = vpop.f32.mrf.mxu0  ;;  %v2227_v3 = vpop.f32.mrf.mxu1  ;;  %v22000_v0 = vrot.slane %v21954_v29, %v21977_v27  ;;  %v22004_v2 = vrot.slane %v21954_v29, %v21980_v36 }
 0x6ba   :  { %v2177_v59 = vadd.f32 %v2176_v60, %v1897_v57  ;;  %v2228_v9 = vadd.f32 %v2227_v3, %v1905_v55  ;;  %v2560_v10 = vmax.f32 %v2175_v31, 0.0  ;;  %v2562_v30 = vmax.f32 %v2226_v14, 0.0  ;;  %v19912_v31 = vld [vmem:[%s26599_s14 + $0x128] sm:$0xff]  }
 0x6bb   :  { %v2180_v39 = vpop.f32.mrf.mxu0  ;;  %v2231_v6 = vpop.f32.mrf.mxu1  ;;  %v19913_v14 = vld [vmem:[%s26599_s14 + $0x1a8] sm:$0xff]  }
 0x6bc   :  { %v2561_v28 = vmax.f32 %v2177_v59, 0.0  ;;  %v2563_v48 = vmax.f32 %v2228_v9, 0.0  ;;  %v2592_v5 = vpack.c.bf16 %v2560_v10, %v2544_v18  ;;  %v2594_v19 = vpack.c.bf16 %v2562_v30, %v2546_v51  ;;  %v19914_v59 = vld [vmem:[%s26599_s14 + $0x160] sm:$0xff]  }
 0x6bd   :  { %v2182_v44 = vpop.f32.mrf.mxu0  ;;  %v2233_v32 = vpop.f32.mrf.mxu1  ;;  %v2181_v7 = vadd.f32 %v2180_v39, %v1893_v63  ;;  %v2232_v45 = vadd.f32 %v2231_v6, %v1901_v40  ;;  %v19915_v9 = vld [vmem:[%s26599_s14 + $0x1e0] sm:$0xff]  }
 0x6be   :  { %v2183_v52 = vadd.f32 %v2182_v44, %v1897_v57  ;;  %v2234_v53 = vadd.f32 %v2233_v32, %v1905_v55  ;;  %v2593_v56 = vpack.c.bf16 %v2561_v28, %v2545_v62  ;;  %v2595_v26 = vpack.c.bf16 %v2563_v48, %v2547_v47  ;;  %v19916_v28 = vld [vmem:[%s26599_s14 + $0x120] sm:$0xff]   ;;  %v19918_v44 = vld [vmem:[%s26599_s14 + $0x158] sm:$0xff]  }
 0x6bf   :  { %v2184_v8 = vpop.f32.mrf.mxu0  ;;  %v2235_v13 = vpop.f32.mrf.mxu1  ;;  %v2576_v57 = vmax.f32 %v2181_v7, 0.0  ;;  %v2578_v55 = vmax.f32 %v2232_v45, 0.0  ;;  %v19917_v48 = vld [vmem:[%s26599_s14 + $0x1a0] sm:$0xff]   ;;  %v19919_v32 = vld [vmem:[%s26599_s14 + $0x1d8] sm:$0xff]  }
 0x6c0   :  { %v2577_v12 = vmax.f32 %v2183_v52, 0.0  ;;  %v2579_v49 = vmax.f32 %v2234_v53, 0.0  ;;  %3687 = vmatprep.mubr.bf16.mxu0 %v2593_v56  ;;  %3735 = vmatprep.mubr.bf16.mxu1 %v2595_v26  ;;  %v19921_v7 = vld [vmem:[%s26599_s14 + $0x198] sm:$0xff]  }
 0x6c1   :  { %v2185_v20 = vpop.f32.mrf.mxu0  ;;  %v2236_v35 = vpop.f32.mrf.mxu1  ;;  %3688 = vmatmul.mubr.bf16.vlgmr.msra.gmra.mxu0 %v2592_v5  ;;  %3736 = vmatmul.mubr.bf16.vlgmr.msra.gmra.mxu1 %v2594_v19  ;;  %v2608_v24 = vpack.c.bf16 %v2576_v57, %v2576_v57  ;;  %v2610_v33 = vpack.c.bf16 %v2578_v55, %v2578_v55  ;;  %v19920_v19 = vld [vmem:[%s26599_s14 + $0x118] sm:$0xff]   ;;  %v19927_v57 = vld [vmem:[%s26599_s14 + $0x1c8] sm:$0xff]  }
 0x6c2   :  { %v2609_v22 = vpack.c.bf16 %v2577_v12, %v2577_v12  ;;  %v2611_v50 = vpack.c.bf16 %v2579_v49, %v2579_v49  ;;  %18045 = vmatpush3.bf16.msra.mxu0 %v19904_v37  ;;  %18073 = vmatpush3.bf16.msra.mxu1 %v19905_v25  ;;  %v22053_v12 = vsub.s32 4, %v21937_v16  ;;  %v22056_v49 = vsub.s32 6, %v21937_v16  ;;  %v19926_v16 = vld [vmem:[%s26599_s14 + $0x148] sm:$0xff]  }
 0x6c3   :  { %v21988_v63 = vpop.f32.mrf.mxu0  ;;  %v21990_v40 = vpop.f32.mrf.mxu1  ;;  %18046 = vmatprep.subr.bf16.mxu0 %v19906_v43  ;;  %18074 = vmatprep.subr.bf16.mxu1 %v19907_v46  ;;  %v19922_v43 = vld [vmem:[%s26599_s14 + $0x150] sm:$0xff]  }
 0x6c4   :  { %3695 = vmatprep.mubr.bf16.mxu0 %v2609_v22  ;;  %3743 = vmatprep.mubr.bf16.mxu1 %v2611_v50  ;;  %v19923_v46 = vld [vmem:[%s26599_s14 + $0x1d0] sm:$0xff]   ;;  %26635 = vst [vmem:[#allocation6_spill] sm:$0xff] %v22053_v12  ;;  %26636 = vst [vmem:[#allocation7_spill] sm:$0xff] %v22056_v49  ;;  %v1909_v55 = vrot.slane %v21954_v29, %v22053_v12 }
 0x6c5   :  { %v2274_v38 = vpop.f32.mrf.mxu0  ;;  %v2325_v42 = vpop.f32.mrf.mxu1  ;;  %v19924_v22 = vld [vmem:[%s26599_s14 + $0x110] sm:$0xff]  }
 0x6c6   :  { %18047 = vmatpush3.bf16.msra.mxu0 %v19908_v17  ;;  %18075 = vmatpush3.bf16.msra.mxu1 %v19909_v54  ;;  %v2275_v10 = vadd.f32 %v2274_v38, %v22000_v0  ;;  %v2326_v30 = vadd.f32 %v2325_v42, %v22004_v2  ;;  %v19925_v50 = vld [vmem:[%s26599_s14 + $0x190] sm:$0xff]  }
 0x6c7   :  { %v2276_v60 = vpop.f32.mrf.mxu0  ;;  %v22012_v3 = vpop.f32.mrf.mxu1  ;;  %18048 = vmatprep.subr.bf16.mxu0 %v19910_v15  ;;  %18076 = vmatprep.subr.bf16.mxu1 %v19911_v61  ;;  %v1917_v15 = vrot.slane %v21954_v29, %v22056_v49 }
 0x6c8   :  { %v2549_v52 = vmax.f32 %v2275_v10, 0.0  ;;  %v2551_v26 = vmax.f32 %v2326_v30, 0.0  ;;  %v2277_v42 = vadd.f32 %v2276_v60, %v1909_v55  ;;  %v19930_v60 = vld [vmem:[%s26599_s14 + $0x140] sm:$0xff]  }
 0x6c9   :  { %v2278_v39 = vpop.f32.mrf.mxu0  ;;  %v2329_v6 = vpop.f32.mrf.mxu1  ;;  %3696 = vmatmul.mubr.bf16.gmra.mxu0 %v2608_v24  ;;  %3744 = vmatmul.mubr.bf16.gmra.mxu1 %v2610_v33  ;;  %v2328_v24 = vadd.f32 %v22012_v3, %v1917_v15  ;;  %v2324_v30 = vadd.f32 %v21990_v40, %v1917_v15  ;;  %v19934_v40 = vld [vmem:[%s26599_s14 + $0x278] sm:$0xff]  }
 0x6ca   :  { %v2279_v62 = vadd.f32 %v2278_v39, %v22000_v0  ;;  %v2330_v47 = vadd.f32 %v2329_v6, %v22004_v2  ;;  %18049 = vmatpush3.bf16.msra.mxu0 %v19912_v31  ;;  %18077 = vmatpush3.bf16.msra.mxu1 %v19913_v14  ;;  %v19928_v31 = vld [vmem:[%s26599_s14 + $0x108] sm:$0xff]  }
 0x6cb   :  { %v22030_v18 = vpop.f32.mrf.mxu0  ;;  %v22032_v51 = vpop.f32.mrf.mxu1  ;;  %18050 = vmatprep.subr.bf16.mxu0 %v19914_v59  ;;  %18078 = vmatprep.subr.bf16.mxu1 %v19915_v9  ;;  %v19929_v14 = vld [vmem:[%s26599_s14 + $0x188] sm:$0xff]   ;;  %v19931_v59 = vld [vmem:[%s26599_s14 + $0x1c0] sm:$0xff]   ;;  %v2273_v9 = vadd.f32 %v21988_v63, %v1909_v55  ;;  %v2566_v63 = vmax.f32 %v2328_v24, 0.0 }
 0x6cc   :  { %v2565_v53 = vmax.f32 %v2279_v62, 0.0  ;;  %v2567_v56 = vmax.f32 %v2330_v47, 0.0  ;;  %v2564_v62 = vmax.f32 %v2277_v42, 0.0  ;;  %v19932_v47 = vld [vmem:[%s26599_s14 + $0x100] sm:$0xff]  }
 0x6cd   :  { %v2284_v37 = vpop.f32.mrf.mxu0  ;;  %v2335_v25 = vpop.f32.mrf.mxu1 }
 0x6ce   :  { %18051 = vmatpush3.bf16.msra.mxu0 %v19916_v28  ;;  %18079 = vmatpush3.bf16.msra.mxu1 %v19917_v48  ;;  %v2597_v5 = vpack.c.bf16 %v2565_v53, %v2549_v52  ;;  %v2599_v13 = vpack.c.bf16 %v2567_v56, %v2551_v26  ;;  %v2285_v10 = vadd.f32 %v2284_v37, %v22000_v0  ;;  %v19933_v28 = vld [vmem:[%s26599_s14 + $0x180] sm:$0xff]   ;;  %v2550_v53 = vmax.f32 %v2324_v30, 0.0  ;;  %v22122_v56 = vld [vmem:[%s26598_s13 + $0x8] sm:$0xff] }
 0x6cf   :  { %v2286_v45 = vpop.f32.mrf.mxu0  ;;  %v2337_v8 = vpop.f32.mrf.mxu1  ;;  %18052 = vmatprep.subr.bf16.mxu0 %v19918_v44  ;;  %18080 = vmatprep.subr.bf16.mxu1 %v19919_v32  ;;  %v2336_v3 = vadd.f32 %v2335_v25, %v22004_v2  ;;  %v19935_v2 = vld [vmem:[%s26599_s14 + $0x2f8] sm:$0xff]   ;;  %v2548_v44 = vmax.f32 %v2273_v9, 0.0 }
 0x6d0   :  { %3783 = vmatprep.mubr.bf16.mxu0 %v2597_v5  ;;  %3831 = vmatprep.mubr.bf16.mxu1 %v2599_v13  ;;  %v2581_v32 = vmax.f32 %v2285_v10, 0.0  ;;  %v22130_v5 = vrot.slane %v22122_v56, %v21940_v41  ;;  %v2283_v45 = vadd.f32 %v22030_v18, %v1909_v55  ;;  %v2334_v8 = vadd.f32 %v22032_v51, %v1917_v15  ;;  %v19938_v51 = vld [vmem:[%s26599_s14 + $0x270] sm:$0xff]   ;;  %v19942_v10 = vld [vmem:[%s26599_s14 + $0x268] sm:$0xff]  }
 0x6d1   :  { %v2287_v20 = vpop.f32.mrf.mxu0  ;;  %v2338_v35 = vpop.f32.mrf.mxu1  ;;  %v2583_v52 = vmax.f32 %v2336_v3, 0.0  ;;  %v2596_v25 = vpack.c.bf16 %v2564_v62, %v2548_v44  ;;  %v19943_v3 = vld [vmem:[%s26599_s14 + $0x2e8] sm:$0xff]  }
 0x6d2   :  { %18053 = vmatpush3.bf16.msra.mxu0 %v19920_v19  ;;  %18081 = vmatpush3.bf16.msra.mxu1 %v19921_v7  ;;  %v22134_v19 = vrot.slane %v22122_v56, %v21943_v21  ;;  %v2598_v7 = vpack.c.bf16 %v2566_v63, %v2550_v53  ;;  %v19937_v20 = vld [vmem:[%s26599_s14 + $0x2b8] sm:$0xff]   ;;  %v2613_v35 = vpack.c.bf16 %v2581_v32, %v2581_v32  ;;  %v19945_v44 = vld [vmem:[%s26599_s14 + $0x2a8] sm:$0xff]   ;;  %v19946_v53 = vld [vmem:[%s26599_s14 + $0x260] sm:$0xff]  }
 0x6d3   :  { %v22064_v17 = vpop.f32.mrf.mxu0  ;;  %v22066_v54 = vpop.f32.mrf.mxu1  ;;  %18054 = vmatprep.subr.bf16.mxu0 %v19922_v43  ;;  %18082 = vmatprep.subr.bf16.mxu1 %v19923_v46  ;;  %v19936_v46 = vld [vmem:[%s26599_s14 + $0x238] sm:$0xff]  }
 0x6d5   :  { %v22078_v61 = vpop.f32.mrf.mxu0  ;;  %v22080_v38 = vpop.f32.mrf.mxu1 }
 0x6d6   :  { %18055 = vmatpush3.bf16.msra.mxu0 %v19924_v22  ;;  %18083 = vmatpush3.bf16.msra.mxu1 %v19925_v50  ;;  %v2615_v22 = vpack.c.bf16 %v2583_v52, %v2583_v52  ;;  %v2377_v15 = vadd.f32 %v22078_v61, %v22130_v5  ;;  %v2428_v42 = vadd.f32 %v22080_v38, %v22134_v19  ;;  %v19941_v61 = vld [vmem:[%s26599_s14 + $0x2b0] sm:$0xff]  }
 0x6d7   :  { %v22089_v33 = vpop.f32.mrf.mxu0  ;;  %v22091_v29 = vpop.f32.mrf.mxu1  ;;  %18056 = vmatprep.subr.bf16.mxu0 %v19926_v16  ;;  %18084 = vmatprep.subr.bf16.mxu1 %v19927_v57  ;;  %v19939_v16 = vld [vmem:[%s26599_s14 + $0x2f0] sm:$0xff]  }
 0x6d8   :  { %v2555_v62 = vmax.f32 %v2428_v42, 0.0 }
 0x6d9   :  { %v2380_v39 = vpop.f32.mrf.mxu0  ;;  %v2431_v6 = vpop.f32.mrf.mxu1 }
 0x6da   :  { %18057 = vmatpush3.bf16.msra.mxu0 %v19928_v31  ;;  %18085 = vmatpush3.bf16.msra.mxu1 %v19929_v14  ;;  %v2381_v50 = vadd.f32 %v2380_v39, %v22130_v5  ;;  %v2432_v18 = vadd.f32 %v2431_v6, %v22134_v19  ;;  %v2580_v31 = vmax.f32 %v2283_v45, 0.0  ;;  %v2582_v14 = vmax.f32 %v2334_v8, 0.0 }
 0x6db   :  { %v22109_v48 = vpop.f32.mrf.mxu0  ;;  %v22111_v0 = vpop.f32.mrf.mxu1  ;;  %18058 = vmatprep.subr.bf16.mxu0 %v19930_v60  ;;  %18086 = vmatprep.subr.bf16.mxu1 %v19931_v59  ;;  %v19940_v59 = vld [vmem:[%s26599_s14 + $0x230] sm:$0xff]   ;;  %v2553_v6 = vmax.f32 %v2377_v15, 0.0 }
 0x6dc   :  { %v2569_v9 = vmax.f32 %v2381_v50, 0.0  ;;  %v2571_v38 = vmax.f32 %v2432_v18, 0.0  ;;  %v19955_v15 = vld [vmem:[%s26599_s14 + $0x2d0] sm:$0xff]  }
 0x6dd   :  { %v22124_v26 = vpop.f32.mrf.mxu0  ;;  %v22126_v37 = vpop.f32.mrf.mxu1 }
 0x6de   :  { %18059 = vmatpush3.bf16.msra.mxu0 %v19932_v47  ;;  %18087 = vmatpush3.bf16.msra.mxu1 %v19933_v28  ;;  %v2612_v47 = vpack.c.bf16 %v2580_v31, %v2580_v31  ;;  %v2614_v28 = vpack.c.bf16 %v2582_v14, %v2582_v14  ;;  %v2601_v32 = vpack.c.bf16 %v2569_v9, %v2553_v6  ;;  %v19956_v14 = vld [vmem:[%s26599_s14 + $0x210] sm:$0xff]   ;;  %v19959_v9 = vld [vmem:[%s26599_s14 + $0x2c8] sm:$0xff]  }
 0x6df   :  { %v2388_v13 = vpop.f32.mrf.mxu0  ;;  %v2439_v43 = vpop.f32.mrf.mxu1  ;;  %18100 = vmatprep.subr.bf16.mxu0 %v19934_v40  ;;  %18128 = vmatprep.subr.bf16.mxu1 %v19935_v2  ;;  %v19944_v2 = vld [vmem:[%s26599_s14 + $0x228] sm:$0xff]   ;;  %v2603_v52 = vpack.c.bf16 %v2571_v38, %v2555_v62  ;;  %v1925_v38 = vrot.slane %v22122_v56, %v21946_v23 }
 0x6e0   :  { %v19948_v43 = vld [vmem:[%s26599_s14 + $0x220] sm:$0xff]   ;;  %v19960_v6 = vld [vmem:[%s26599_s14 + $0x208] sm:$0xff]  }
 0x6e1   :  { %3784 = vmatmul.mubr.bf16.vlgmr.msra.gmra.mxu0 %v2596_v25  ;;  %3832 = vmatmul.mubr.bf16.vlgmr.msra.gmra.mxu1 %v2598_v7  ;;  %v2389_v57 = vpop.f32.mrf.mxu0  ;;  %v2440_v55 = vpop.f32.mrf.mxu1  ;;  %v19947_v25 = vld [vmem:[%s26599_s14 + $0x2e0] sm:$0xff]   ;;  %v19961_v62 = vld [vmem:[%s26599_s14 + $0x288] sm:$0xff]  }
 0x6e2   :  { %3791 = vmatprep.mubr.bf16.mxu0 %v2613_v35  ;;  %3839 = vmatprep.mubr.bf16.mxu1 %v2615_v22  ;;  %v19951_v35 = vld [vmem:[%s26599_s14 + $0x2d8] sm:$0xff]   ;;  %v19954_v55 = vld [vmem:[%s26599_s14 + $0x250] sm:$0xff]  }
 0x6e3   :  { %18101 = vmatpush3.bf16.msra.mxu0 %v19936_v46  ;;  %18129 = vmatpush3.bf16.msra.mxu1 %v19937_v20  ;;  %v22156_v24 = vpop.f32.mrf.mxu0  ;;  %v22158_v60 = vpop.f32.mrf.mxu1  ;;  %v19949_v46 = vld [vmem:[%s26599_s14 + $0x2a0] sm:$0xff]   ;;  %v19950_v20 = vld [vmem:[%s26599_s14 + $0x258] sm:$0xff]  }
 0x6e4   :  { %18102 = vmatprep.subr.bf16.mxu0 %v19938_v51  ;;  %18130 = vmatprep.subr.bf16.mxu1 %v19939_v16  ;;  %v19952_v16 = vld [vmem:[%s26599_s14 + $0x218] sm:$0xff]  }
 0x6e5   :  { %v22172_v30 = vpop.f32.mrf.mxu0  ;;  %v22174_v39 = vpop.f32.mrf.mxu1  ;;  %v19953_v57 = vld [vmem:[%s26599_s14 + $0x298] sm:$0xff]  }
 0x6e7   :  { %18103 = vmatpush3.bf16.msra.mxu0 %v19940_v59  ;;  %18131 = vmatpush3.bf16.msra.mxu1 %v19941_v61  ;;  %v22176_v63 = vpop.f32.mrf.mxu0  ;;  %v22178_v40 = vpop.f32.mrf.mxu1  ;;  %v19957_v59 = vld [vmem:[%s26599_s14 + $0x290] sm:$0xff]   ;;  %v19958_v61 = vld [vmem:[%s26599_s14 + $0x248] sm:$0xff]  }
 0x6e8   :  { %18104 = vmatprep.subr.bf16.mxu0 %v19942_v10  ;;  %18132 = vmatprep.subr.bf16.mxu1 %v19943_v3  ;;  %v1933_v10 = vrot.slane %v22122_v56, %v21949_v58  ;;  %v2379_v3 = vadd.f32 %v22089_v33, %v1925_v38  ;;  %v19963_v33 = vld [vmem:[%s26599_s14 + $0x2c0] sm:$0xff]  }
 0x6e9   :  { %3792 = vmatmul.mubr.bf16.gmra.mxu0 %v2612_v47  ;;  %3840 = vmatmul.mubr.bf16.gmra.mxu1 %v2614_v28  ;;  %v22192_v7 = vpop.f32.mrf.mxu0  ;;  %v22194_v45 = vpop.f32.mrf.mxu1  ;;  %v19962_v28 = vld [vmem:[%s26599_s14 + $0x240] sm:$0xff]  }
 0x6ea   :  { %3879 = vmatprep.mubr.bf16.mxu0 %v2601_v32  ;;  %3927 = vmatprep.mubr.bf16.mxu1 %v2603_v52  ;;  %v2430_v47 = vadd.f32 %v22091_v29, %v1933_v10  ;;  %v2438_v32 = vadd.f32 %v22126_v37, %v22134_v19  ;;  %v2426_v29 = vadd.f32 %v22066_v54, %v1933_v10  ;;  %v2568_v52 = vmax.f32 %v2379_v3, 0.0  ;;  %v19967_v54 = vld [vmem:[%s26599_s14 + $0x3f8] sm:$0xff]  }
 0x6eb   :  { %18105 = vmatpush3.bf16.msra.mxu0 %v19944_v2  ;;  %18133 = vmatpush3.bf16.msra.mxu1 %v19945_v44  ;;  %v22196_v8 = vpop.f32.mrf.mxu0  ;;  %v22198_v13 = vpop.f32.mrf.mxu1  ;;  %v2375_v2 = vadd.f32 %v22064_v17, %v1925_v38  ;;  %v2387_v44 = vadd.f32 %v22124_v26, %v22130_v5  ;;  %v19966_v26 = vld [vmem:[%s26599_s14 + $0x378] sm:$0xff]  }
 0x6ec   :  { %18106 = vmatprep.subr.bf16.mxu0 %v19946_v53  ;;  %18134 = vmatprep.subr.bf16.mxu1 %v19947_v25  ;;  %v19964_v53 = vld [vmem:[%s26599_s14 + $0x200] sm:$0xff]   ;;  %v2570_v17 = vmax.f32 %v2430_v47, 0.0  ;;  %v2587_v19 = vmax.f32 %v2438_v32, 0.0 }
 0x6ed   :  { %v22212_v22 = vpop.f32.mrf.mxu0  ;;  %v22214_v50 = vpop.f32.mrf.mxu1  ;;  %v19965_v25 = vld [vmem:[%s26599_s14 + $0x280] sm:$0xff]   ;;  %v2552_v37 = vmax.f32 %v2375_v2, 0.0  ;;  %v2585_v5 = vmax.f32 %v2387_v44, 0.0  ;;  %v19977_v2 = vld [vmem:[%s26599_s14 + $0x3a8] sm:$0xff]  }
 0x6ef   :  { %18107 = vmatpush3.bf16.msra.mxu0 %v19948_v43  ;;  %18135 = vmatpush3.bf16.msra.mxu1 %v19949_v46  ;;  %v2490_v18 = vpop.f32.mrf.mxu0  ;;  %v2541_v51 = vpop.f32.mrf.mxu1  ;;  %v2554_v43 = vmax.f32 %v2426_v29, 0.0  ;;  %v2600_v46 = vpack.c.bf16 %v2568_v52, %v2552_v37  ;;  %v19978_v29 = vld [vmem:[%s26599_s14 + $0x360] sm:$0xff]   ;;  %v19985_v37 = vld [vmem:[%s26599_s14 + $0x398] sm:$0xff]  }
 0x6f0   :  { %18108 = vmatprep.subr.bf16.mxu0 %v19950_v20  ;;  %18136 = vmatprep.subr.bf16.mxu1 %v19951_v35  ;;  %v22278_v20 = vrot.slane %v22122_v56, %v21977_v27  ;;  %v22282_v35 = vrot.slane %v22122_v56, %v21980_v36  ;;  %v2385_v51 = vadd.f32 %v22109_v48, %v1925_v38  ;;  %v19973_v38 = vld [vmem:[%s26599_s14 + $0x3b0] sm:$0xff]   ;;  %v19979_v52 = vld [vmem:[%s26599_s14 + $0x3e0] sm:$0xff]  }
 0x6f1   :  { %v2491_v42 = vpop.f32.mrf.mxu0  ;;  %v2542_v31 = vpop.f32.mrf.mxu1  ;;  %v2602_v18 = vpack.c.bf16 %v2570_v17, %v2554_v43  ;;  %v19982_v17 = vld [vmem:[%s26599_s14 + $0x358] sm:$0xff]   ;;  %v19988_v43 = vld [vmem:[%s26599_s14 + $0x310] sm:$0xff]  }
 0x6f2   :  { %v2619_v42 = vpack.c.bf16 %v2587_v19, %v2587_v19  ;;  %v2483_v31 = vadd.f32 %v22192_v7, %v22278_v20  ;;  %v2534_v48 = vadd.f32 %v22194_v45, %v22282_v35  ;;  %v2584_v7 = vmax.f32 %v2385_v51, 0.0  ;;  %v19987_v19 = vld [vmem:[%s26599_s14 + $0x3d0] sm:$0xff]   ;;  %v19991_v51 = vld [vmem:[%s26599_s14 + $0x3c8] sm:$0xff]  }
 0x6f3   :  { %18109 = vmatpush3.bf16.msra.mxu0 %v19952_v16  ;;  %18137 = vmatpush3.bf16.msra.mxu1 %v19953_v57  ;;  %v2436_v16 = vadd.f32 %v22111_v0, %v1933_v10  ;;  %v19968_v57 = vld [vmem:[%s26599_s14 + $0x338] sm:$0xff]   ;;  %v19970_v0 = vld [vmem:[%s26599_s14 + $0x370] sm:$0xff]  }
 0x6f4   :  { %18110 = vmatprep.subr.bf16.mxu0 %v19954_v55  ;;  %18138 = vmatprep.subr.bf16.mxu1 %v19955_v15  ;;  %v19969_v55 = vld [vmem:[%s26599_s14 + $0x3b8] sm:$0xff]   ;;  %v2617_v15 = vpack.c.bf16 %v2585_v5, %v2585_v5  ;;  %v2573_v10 = vmax.f32 %v2483_v31, 0.0  ;;  %v2575_v3 = vmax.f32 %v2534_v48, 0.0  ;;  %v2616_v47 = vpack.c.bf16 %v2584_v7, %v2584_v7  ;;  %v19986_v5 = vld [vmem:[%s26599_s14 + $0x350] sm:$0xff]   ;;  %v19995_v48 = vld [vmem:[%s26599_s14 + $0x3c0] sm:$0xff]  }
 0x6f5   :  { %v2586_v45 = vmax.f32 %v2436_v16, 0.0  ;;  %v1941_v16 = vrot.slane %v22122_v56, %v22053_v12 }
 0x6f7   :  { %18111 = vmatpush3.bf16.msra.mxu0 %v19956_v14  ;;  %18139 = vmatpush3.bf16.msra.mxu1 %v19957_v59  ;;  %v19971_v14 = vld [vmem:[%s26599_s14 + $0x3f0] sm:$0xff]   ;;  %v2479_v59 = vadd.f32 %v22172_v30, %v22278_v20  ;;  %v19974_v30 = vld [vmem:[%s26599_s14 + $0x368] sm:$0xff]  }
 0x6f8   :  { %18112 = vmatprep.subr.bf16.mxu0 %v19958_v61  ;;  %18140 = vmatprep.subr.bf16.mxu1 %v19959_v9  ;;  %v2530_v61 = vadd.f32 %v22174_v39, %v22282_v35  ;;  %v19972_v9 = vld [vmem:[%s26599_s14 + $0x330] sm:$0xff]   ;;  %v19975_v39 = vld [vmem:[%s26599_s14 + $0x3e8] sm:$0xff]  }
 0x6fb   :  { %18113 = vmatpush3.bf16.msra.mxu0 %v19960_v6  ;;  %18141 = vmatpush3.bf16.msra.mxu1 %v19961_v62  ;;  %v2557_v6 = vmax.f32 %v2479_v59, 0.0  ;;  %v2559_v62 = vmax.f32 %v2530_v61, 0.0  ;;  %v19996_v59 = vld [vmem:[%s26599_s14 + $0x300] sm:$0xff]  }
 0x6fc   :  { %18114 = vmatprep.subr.bf16.mxu0 %v19962_v28  ;;  %18142 = vmatprep.subr.bf16.mxu1 %v19963_v33  ;;  %v2618_v28 = vpack.c.bf16 %v2586_v45, %v2586_v45  ;;  %v19976_v33 = vld [vmem:[%s26599_s14 + $0x328] sm:$0xff]   ;;  %v19997_v61 = vld [vmem:[%s26599_s14 + $0x380] sm:$0xff]  }
 0x6fd   :  { %v2605_v44 = vpack.c.bf16 %v2573_v10, %v2557_v6  ;;  %v2607_v32 = vpack.c.bf16 %v2575_v3, %v2559_v62 }
 0x6ff   :  { %18115 = vmatpush3.bf16.msra.mxu0 %v19964_v53  ;;  %18143 = vmatpush3.bf16.msra.mxu1 %v19965_v25  ;;  %v19980_v53 = vld [vmem:[%s26599_s14 + $0x320] sm:$0xff]  }
 0x700   :  { %18156 = vmatprep.subr.bf16.mxu0 %v19966_v26  ;;  %18184 = vmatprep.subr.bf16.mxu1 %v19967_v54  ;;  %v19981_v25 = vld [vmem:[%s26599_s14 + $0x3a0] sm:$0xff]   ;;  %v19983_v26 = vld [vmem:[%s26599_s14 + $0x3d8] sm:$0xff]  }
 0x701   :  { %v19984_v54 = vld [vmem:[%s26599_s14 + $0x318] sm:$0xff]  }
 0x702   :  { %3880 = vmatmul.mubr.bf16.vlgmr.msra.gmra.mxu0 %v2600_v46  ;;  %3928 = vmatmul.mubr.bf16.vlgmr.msra.gmra.mxu1 %v2602_v18  ;;  %v19989_v46 = vld [vmem:[%s26599_s14 + $0x390] sm:$0xff]   ;;  %v19990_v18 = vld [vmem:[%s26599_s14 + $0x348] sm:$0xff]  }
 0x703   :  { %3887 = vmatprep.mubr.bf16.mxu0 %v2617_v15  ;;  %3935 = vmatprep.mubr.bf16.mxu1 %v2619_v42  ;;  %v19993_v15 = vld [vmem:[%s26599_s14 + $0x388] sm:$0xff]   ;;  %v2481_v42 = vadd.f32 %v22176_v63, %v1941_v16  ;;  %v2477_v63 = vadd.f32 %v22156_v24, %v1941_v16 }
 0x704   :  { %18157 = vmatpush3.bf16.msra.mxu0 %v19968_v57  ;;  %18185 = vmatpush3.bf16.msra.mxu1 %v19969_v55  ;;  %v1949_v57 = vrot.slane %v22122_v56, %v22056_v49  ;;  %v19992_v55 = vld [vmem:[%s26599_s14 + $0x308] sm:$0xff]   ;;  %v19994_v56 = vld [vmem:[%s26599_s14 + $0x340] sm:$0xff]  }
 0x705   :  { %18158 = vmatprep.subr.bf16.mxu0 %v19970_v0  ;;  %18186 = vmatprep.subr.bf16.mxu1 %v19971_v14  ;;  %v2489_v0 = vadd.f32 %v22212_v22, %v22278_v20  ;;  %v2540_v14 = vadd.f32 %v22214_v50, %v22282_v35  ;;  %v2572_v7 = vmax.f32 %v2481_v42, 0.0  ;;  %v2556_v20 = vmax.f32 %v2477_v63, 0.0 }
 0x706   :  { %v2532_v31 = vadd.f32 %v22178_v40, %v1949_v57  ;;  %v2528_v40 = vadd.f32 %v22158_v60, %v1949_v57 }
 0x707   :  { %v2589_v22 = vmax.f32 %v2489_v0, 0.0  ;;  %v2591_v50 = vmax.f32 %v2540_v14, 0.0  ;;  %v2604_v60 = vpack.c.bf16 %v2572_v7, %v2556_v20 }
 0x708   :  { %18159 = vmatpush3.bf16.msra.mxu0 %v19972_v9  ;;  %18187 = vmatpush3.bf16.msra.mxu1 %v19973_v38  ;;  %v2574_v45 = vmax.f32 %v2532_v31, 0.0  ;;  %v2558_v24 = vmax.f32 %v2528_v40, 0.0  ;;  %v2487_v9 = vadd.f32 %v22196_v8, %v1941_v16  ;;  %v2538_v38 = vadd.f32 %v22198_v13, %v1949_v57  ;;  %v16133_v8 = vld [vmem:[%s26600_s15] ss:$0 sm:$0xff] }
 0x709   :  { %18160 = vmatprep.subr.bf16.mxu0 %v19974_v30  ;;  %18188 = vmatprep.subr.bf16.mxu1 %v19975_v39  ;;  %v2621_v10 = vpack.c.bf16 %v2589_v22, %v2589_v22  ;;  %v2623_v3 = vpack.c.bf16 %v2591_v50, %v2591_v50 }
 0x70a   :  { %3888 = vmatmul.mubr.bf16.gmra.mxu0 %v2616_v47  ;;  %3936 = vmatmul.mubr.bf16.gmra.mxu1 %v2618_v28  ;;  %v2606_v35 = vpack.c.bf16 %v2574_v45, %v2558_v24  ;;  %v2588_v30 = vmax.f32 %v2487_v9, 0.0  ;;  %v2590_v39 = vmax.f32 %v2538_v38, 0.0 }
 0x70b   :  { %3975 = vmatprep.mubr.bf16.mxu0 %v2605_v44  ;;  %4023 = vmatprep.mubr.bf16.mxu1 %v2607_v32 }
 0x70c   :  { %18161 = vmatpush3.bf16.msra.mxu0 %v19976_v33  ;;  %18189 = vmatpush3.bf16.msra.mxu1 %v19977_v2  ;;  %v2620_v6 = vpack.c.bf16 %v2588_v30, %v2588_v30  ;;  %v2622_v62 = vpack.c.bf16 %v2590_v39, %v2590_v39 }
 0x70d   :  { %18162 = vmatprep.subr.bf16.mxu0 %v19978_v29  ;;  %18190 = vmatprep.subr.bf16.mxu1 %v19979_v52 }
 0x710   :  { %18163 = vmatpush3.bf16.msra.mxu0 %v19980_v53  ;;  %18191 = vmatpush3.bf16.msra.mxu1 %v19981_v25 }
 0x711   :  { %18164 = vmatprep.subr.bf16.mxu0 %v19982_v17  ;;  %18192 = vmatprep.subr.bf16.mxu1 %v19983_v26 }
 0x714   :  { %18165 = vmatpush3.bf16.msra.mxu0 %v19984_v54  ;;  %18193 = vmatpush3.bf16.msra.mxu1 %v19985_v37 }
 0x715   :  { %18166 = vmatprep.subr.bf16.mxu0 %v19986_v5  ;;  %18194 = vmatprep.subr.bf16.mxu1 %v19987_v19 }
 0x718   :  { %18167 = vmatpush3.bf16.msra.mxu0 %v19988_v43  ;;  %18195 = vmatpush3.bf16.msra.mxu1 %v19989_v46 }
 0x719   :  { %18168 = vmatprep.subr.bf16.mxu0 %v19990_v18  ;;  %18196 = vmatprep.subr.bf16.mxu1 %v19991_v51 }
 0x71c   :  { %18169 = vmatpush3.bf16.msra.mxu0 %v19992_v55  ;;  %18197 = vmatpush3.bf16.msra.mxu1 %v19993_v15 }
 0x71d   :  { %18170 = vmatprep.subr.bf16.mxu0 %v19994_v56  ;;  %18198 = vmatprep.subr.bf16.mxu1 %v19995_v48 }
 0x720   :  { %18171 = vmatpush3.bf16.msra.mxu0 %v19996_v59  ;;  %18199 = vmatpush3.bf16.msra.mxu1 %v19997_v61 }
 0x723   :  { %3976 = vmatmul.mubr.bf16.vlgmr.msra.gmra.mxu0 %v2604_v60  ;;  %4024 = vmatmul.mubr.bf16.vlgmr.msra.gmra.mxu1 %v2606_v35 }
 0x724   :  { %3983 = vmatprep.mubr.bf16.mxu0 %v2621_v10  ;;  %4031 = vmatprep.mubr.bf16.mxu1 %v2623_v3 }
 0x72b   :  { %3984 = vmatmul.mubr.bf16.gmra.mxu0 %v2620_v6  ;;  %4032 = vmatmul.mubr.bf16.gmra.mxu1 %v2622_v62 }
 0x781   :  { %v18004_v47 = vpop.f32.mrf.mxu0  ;;  %v18032_v28 = vpop.f32.mrf.mxu1 }
 0x783   :  { %v18005_v33 = vpop.f32.mrf.mxu0  ;;  %v18033_v13 = vpop.f32.mrf.mxu1 }
 0x784   :  { %v18006_v2 = vadd.f32 %v18005_v33, %v18004_v47  ;;  %v18034_v44 = vadd.f32 %v18033_v13, %v18032_v28 }
 0x785   :  { %v18007_v32 = vpop.f32.mrf.mxu0  ;;  %v18035_v29 = vpop.f32.mrf.mxu1 }
 0x786   :  { %v3690_v52 = vadd.f32 %v18006_v2, %v16133_v8 }
 0x787   :  { %v18008_v53 = vpop.f32.mrf.mxu0  ;;  %v18036_v25 = vpop.f32.mrf.mxu1 }
 0x788   :  { %v3738_v17 = vadd.f32 %v18034_v44, %v3690_v52  ;;  %v18009_v26 = vadd.f32 %v18008_v53, %v18007_v32  ;;  %v18037_v19 = vadd.f32 %v18036_v25, %v18035_v29 }
 0x789   :  { %v18010_v54 = vpop.f32.mrf.mxu0  ;;  %v18038_v37 = vpop.f32.mrf.mxu1 }
 0x78a   :  { %v3693_v5 = vadd.f32 %v18009_v26, %v16133_v8 }
 0x78b   :  { %v18011_v43 = vpop.f32.mrf.mxu0  ;;  %v18039_v46 = vpop.f32.mrf.mxu1 }
 0x78c   :  { %v3741_v18 = vadd.f32 %v18037_v19, %v3693_v5  ;;  %v18012_v51 = vadd.f32 %v18011_v43, %v18010_v54  ;;  %v18040_v16 = vadd.f32 %v18039_v46, %v18038_v37 }
 0x78d   :  { %v18013_v57 = vpop.f32.mrf.mxu0  ;;  %v18041_v55 = vpop.f32.mrf.mxu1 }
 0x78e   :  { %v3698_v15 = vadd.f32 %v18012_v51, %v16133_v8 }
 0x78f   :  { %v18014_v42 = vpop.f32.mrf.mxu0  ;;  %v18042_v31 = vpop.f32.mrf.mxu1 }
 0x790   :  { %v3746_v56 = vadd.f32 %v18040_v16, %v3698_v15 }
 0x7a1   :  { %v18060_v48 = vpop.f32.mrf.mxu0  ;;  %v18088_v0 = vpop.f32.mrf.mxu1 }
 0x7a3   :  { %v18061_v14 = vpop.f32.mrf.mxu0  ;;  %v18089_v63 = vpop.f32.mrf.mxu1 }
 0x7a4   :  { %v18062_v52 = vadd.f32 %v18061_v14, %v18060_v48  ;;  %v18090_v26 = vadd.f32 %v18089_v63, %v18088_v0 }
 0x7a5   :  { %v18063_v40 = vpop.f32.mrf.mxu0  ;;  %v18091_v59 = vpop.f32.mrf.mxu1 }
 0x7a6   :  { %v3786_v53 = vadd.f32 %v18062_v52, %v3738_v17 }
 0x7a7   :  { %v18064_v61 = vpop.f32.mrf.mxu0  ;;  %v18092_v7 = vpop.f32.mrf.mxu1 }
 0x7a8   :  { %v18065_v25 = vadd.f32 %v18064_v61, %v18063_v40  ;;  %v3834_v37 = vadd.f32 %v18090_v26, %v3786_v53  ;;  %v18093_v43 = vadd.f32 %v18092_v7, %v18091_v59 }
 0x7a9   :  { %v18066_v45 = vpop.f32.mrf.mxu0  ;;  %v18094_v22 = vpop.f32.mrf.mxu1 }
 0x7aa   :  { %v3789_v5 = vadd.f32 %v18065_v25, %v3741_v18 }
 0x7ab   :  { %v18067_v50 = vpop.f32.mrf.mxu0  ;;  %v18095_v20 = vpop.f32.mrf.mxu1 }
 0x7ac   :  { %v18068_v19 = vadd.f32 %v18067_v50, %v18066_v45  ;;  %v3837_v55 = vadd.f32 %v18093_v43, %v3789_v5  ;;  %v18096_v31 = vadd.f32 %v18095_v20, %v18094_v22 }
 0x7ad   :  { %v18069_v24 = vpop.f32.mrf.mxu0  ;;  %v18097_v60 = vpop.f32.mrf.mxu1 }
 0x7ae   :  { %v3794_v15 = vadd.f32 %v18068_v19, %v3746_v56 }
 0x7af   :  { %v18070_v35 = vpop.f32.mrf.mxu0  ;;  %v18098_v9 = vpop.f32.mrf.mxu1 }
 0x7b0   :  { %v3842_v40 = vadd.f32 %v18096_v31, %v3794_v15 }
 0x7c2   :  { %v18116_v38 = vpop.f32.mrf.mxu0  ;;  %v18144_v10 = vpop.f32.mrf.mxu1 }
 0x7c4   :  { %v18117_v3 = vpop.f32.mrf.mxu0  ;;  %v18145_v30 = vpop.f32.mrf.mxu1 }
 0x7c5   :  { %v18118_v54 = vadd.f32 %v18117_v3, %v18116_v38  ;;  %v18146_v42 = vadd.f32 %v18145_v30, %v18144_v10 }
 0x7c6   :  { %v18119_v39 = vpop.f32.mrf.mxu0  ;;  %v18147_v6 = vpop.f32.mrf.mxu1 }
 0x7c7   :  { %v3882_v46 = vadd.f32 %v18118_v54, %v3834_v37 }
 0x7c8   :  { %v18120_v62 = vpop.f32.mrf.mxu0  ;;  %v18148_v47 = vpop.f32.mrf.mxu1 }
 0x7c9   :  { %v18121_v51 = vadd.f32 %v18120_v62, %v18119_v39  ;;  %v3930_v35 = vadd.f32 %v18146_v42, %v3882_v46  ;;  %v18149_v18 = vadd.f32 %v18148_v47, %v18147_v6 }
 0x7ca   :  { %v18122_v28 = vpop.f32.mrf.mxu0  ;;  %v18150_v8 = vpop.f32.mrf.mxu1 }
 0x7cb   :  { %v3885_v48 = vadd.f32 %v18121_v51, %v3837_v55 }
 0x7cc   :  { %v18123_v33 = vpop.f32.mrf.mxu0  ;;  %v18151_v13 = vpop.f32.mrf.mxu1 }
 0x7cd   :  { %v18124_v17 = vadd.f32 %v18123_v33, %v18122_v28  ;;  %v3933_v50 = vadd.f32 %v18149_v18, %v3885_v48  ;;  %v18152_v20 = vadd.f32 %v18151_v13, %v18150_v8  ;;  %v20000_v48 = vld [vmem:[%s26591_s6 + $0x10] sm:$0xff]  }
 0x7ce   :  { %v18125_v2 = vpop.f32.mrf.mxu0  ;;  %v18153_v44 = vpop.f32.mrf.mxu1 }
 0x7cf   :  { %v3890_v9 = vadd.f32 %v18124_v17, %v3842_v40  ;;  %v20001_v17 = vld [vmem:[%s26629_s2 + $0x10] sm:$0xff]  }
 0x7d0   :  { %v18126_v32 = vpop.f32.mrf.mxu0  ;;  %v18154_v29 = vpop.f32.mrf.mxu1 }
 0x7d1   :  { %v3938_v33 = vadd.f32 %v18152_v20, %v3890_v9 }
 0x7e3   :  { %v18172_v16 = vpop.f32.mrf.mxu0  ;;  %v18200_v57 = vpop.f32.mrf.mxu1 }
 0x7e5   :  { %v18173_v24 = vpop.f32.mrf.mxu0  ;;  %v18201_v60 = vpop.f32.mrf.mxu1 }
 0x7e6   :  { %v18174_v14 = vadd.f32 %v18173_v24, %v18172_v16  ;;  %v18202_v59 = vadd.f32 %v18201_v60, %v18200_v57  ;;  %v19998_v60 = vld [vmem:[%s26591_s6 + $0x18] sm:$0xff]  }
 0x7e7   :  { %v18175_v0 = vpop.f32.mrf.mxu0  ;;  %v18203_v63 = vpop.f32.mrf.mxu1  ;;  %19292 = vmatprep.subr.bf16.mxu1 %v19998_v60 }
 0x7e8   :  { %v3978_v61 = vadd.f32 %v18174_v14, %v3930_v35  ;;  %v19999_v35 = vld [vmem:[%s26629_s2 + $0x18] sm:$0xff]   ;;  %19293 = vmatpush3.bf16.msra.mxu1 %v19998_v60 }
 0x7e9   :  { %v18176_v7 = vpop.f32.mrf.mxu0  ;;  %v18204_v45 = vpop.f32.mrf.mxu1  ;;  %19284 = vmatprep.subr.bf16.mxu0 %v19999_v35  ;;  %19294 = vmatprep.subr.bf16.mxu1 %v20000_v48  ;;  %v20002_v14 = vld [vmem:[%s26593_s8 + $0x18] sm:$0xff]  }
 0x7ea   :  { %v4026_v38 = vadd.f32 %v18202_v59, %v3978_v61  ;;  %v18177_v56 = vadd.f32 %v18176_v7, %v18175_v0  ;;  %v18205_v30 = vadd.f32 %v18204_v45, %v18203_v63  ;;  %19285 = vmatpush3.bf16.msra.mxu0 %v19999_v35 }
 0x7eb   :  { %v18178_v10 = vpop.f32.mrf.mxu0  ;;  %v18206_v22 = vpop.f32.mrf.mxu1  ;;  %19286 = vmatprep.subr.bf16.mxu0 %v20001_v17 }
 0x7ec   :  { %v3981_v3 = vadd.f32 %v18177_v56, %v3933_v50  ;;  %v4039_v39 = vadd.f32 %v4026_v38, %v21718_v1  ;;  %19295 = vmatpush3.bf16.msra.mxu1 %v20000_v48  ;;  %v16262_v56 = vld [vmem:[%s26603_s18] ss:$0 sm:$0xff] }
 0x7ed   :  { %v18179_v62 = vpop.f32.mrf.mxu0  ;;  %v18207_v28 = vpop.f32.mrf.mxu1 }
 0x7ee   :  { %v4029_v2 = vadd.f32 %v18205_v30, %v3981_v3  ;;  %v18180_v6 = vadd.f32 %v18179_v62, %v18178_v10  ;;  %v4044_v47 = vsel %vm112_vm0, %v4039_v39, 0.0  ;;  %v18208_v52 = vadd.f32 %v18207_v28, %v18206_v22  ;;  %19287 = vmatpush3.bf16.msra.mxu0 %v20001_v17  ;;  %v16263_v3 = vld [vmem:[%s26604_s19] ss:$0 sm:$0xff] }
 0x7ef   :  { %v18181_v44 = vpop.f32.mrf.mxu0  ;;  %v18209_v32 = vpop.f32.mrf.mxu1  ;;  %4045 = vadd.xlane.f32.xlu0 %v4044_v47  ;;  %19300 = vmatprep.subr.bf16.mxu0 %v20002_v14 }
 0x7f0   :  { %v3986_v29 = vadd.f32 %v18180_v6, %v3938_v33  ;;  %v4040_v53 = vadd.f32 %v4029_v2, %v21720_v4  ;;  %v20003_v32 = vld [vmem:[%s26593_s8 + $0x10] sm:$0xff]  }
 0x7f1   :  { %v18182_v25 = vpop.f32.mrf.mxu0  ;;  %v18210_v8 = vpop.f32.mrf.mxu1 }
 0x7f2   :  { %v4034_v13 = vadd.f32 %v18208_v52, %v3986_v29  ;;  %v4047_v26 = vsel %vm112_vm0, %v4040_v53, 0.0  ;;  %v16279_v29 = vld [vmem:[%s26592_s7 + $0x1] ss:$0 sm:$0xff] }
 0x7f3   :  { %4048 = vadd.xlane.f32.xlu1 %v4047_v26  ;;  %v16269_v26 = vld [vmem:[%s26590_s5 + $0x1] ss:$0 sm:$0xff] }
 0x7f4   :  { %v4041_v1 = vadd.f32 %v4034_v13, %v21753_v11 }
 0x7f6   :  { %v4050_v54 = vsel %vm1694_vm4, %v4041_v1, 0.0 }
 0x7f7   :  { %4051 = vadd.xlane.f32.xlu0 %v4050_v54 }
 0x878   :  { %v4046_v37 = vpop.xlane.xlu0 %4045 }
 0x879   :  { %v4053_v5 = vmul.f32 0.03125, %v4046_v37 }
 0x87b   :  { %v4056_v19 = vsub.f32 %v4039_v39, %v4053_v5 }
 0x87c   :  { %v4049_v43 = vpop.xlane.xlu1 %4048 }
 0x87d   :  { %v4054_v46 = vmul.f32 0.03125, %v4049_v43  ;;  %v4059_v51 = vmul.f32 %v4056_v19, %v4056_v19 }
 0x87f   :  { %v4057_v16 = vsub.f32 %v4040_v53, %v4054_v46  ;;  %v4062_v4 = vsel %vm112_vm0, %v4059_v51, 0.0 }
 0x880   :  { %4063 = vadd.xlane.f32.xlu1 %v4062_v4  ;;  %v4052_v57 = vpop.xlane.xlu0 %4051 }
 0x881   :  { %v4055_v55 = vmul.f32 0.03125, %v4052_v57  ;;  %v4060_v15 = vmul.f32 %v4057_v16, %v4057_v16 }
 0x883   :  { %v4058_v42 = vsub.f32 %v4041_v1, %v4055_v55  ;;  %v4065_v31 = vsel %vm112_vm0, %v4060_v15, 0.0  ;;  %v22477_v55 = vld [vmem:[%s26632_s25] ss:$0 sm:$0xff] }
 0x884   :  { %4066 = vadd.xlane.f32.xlu0 %v4065_v31 }
 0x885   :  { %v4061_v11 = vmul.f32 %v4058_v42, %v4058_v42 }
 0x887   :  { %v4068_v24 = vsel %vm1694_vm4, %v4061_v11, 0.0  ;;  %v22488_v11 = vld [vmem:[%s26632_s25 + $0x1] ss:$0 sm:$0xff] }
 0x888   :  { %4069 = vadd.xlane.f32.xlu1 %v4068_v24 }
 0x909   :  { %v4064_v0 = vpop.xlane.xlu1 %4063 }
 0x90a   :  { %v4071_v63 = vmul.f32 0.03125, %v4064_v0 }
 0x90c   :  { %v4074_v40 = vadd.f32 1e-05, %v4071_v63 }
 0x90d   :  { %v4067_v18 = vpop.xlane.xlu0 %4066 }
 0x90e   :  { %20508 = vrsqrt.f32 %v4074_v40  ;;  %v4072_v61 = vmul.f32 0.03125, %v4067_v18  ;;  %v22511_v18 = vld [vmem:[%s26594_s9 + $0x1] ss:$0 sm:$0xff] }
 0x910   :  { %v4075_v59 = vadd.f32 1e-05, %v4072_v61 }
 0x911   :  { %v4070_v7 = vpop.xlane.xlu1 %4069 }
 0x912   :  { %20510 = vrsqrt.f32 %v4075_v59  ;;  %v4073_v45 = vmul.f32 0.03125, %v4070_v7 }
 0x914   :  { %v4076_v50 = vadd.f32 1e-05, %v4073_v45 }
 0x916   :  { %20512 = vrsqrt.f32 %v4076_v50  ;;  %v22530_v50 = vld [vmem:[%s26632_s25 + $0x2] ss:$0 sm:$0xff] }
 0x91b   :  { %v20509_v9 = vpop.eup %20508 }
 0x91c   :  { %v4080_v38 = vmul.f32 %v20509_v9, %v4056_v19 }
 0x91e   :  { %v4089_v20 = vmul.f32 %v16262_v56, %v4080_v38  ;;  %v22537_v38 = vld [vmem:[%s26632_s25 + $0x3] ss:$0 sm:$0xff] }
 0x91f   :  { %v20511_v10 = vpop.eup %20510 }
 0x920   :  { %v4081_v22 = vmul.f32 %v20511_v10, %v4057_v16  ;;  %v22431_v28 = vadd.f32 %v16263_v3, %v4089_v20 }
 0x922   :  { %v4090_v30 = vmul.f32 %v16262_v56, %v4081_v22 }
 0x923   :  { %v20513_v39 = vpop.eup %20512 }
 0x924   :  { %v4082_v62 = vmul.f32 %v20513_v39, %v4058_v42  ;;  %v22433_v33 = vadd.f32 %v16263_v3, %v4090_v30 }
 0x926   :  { %v4091_v2 = vmul.f32 %v16262_v56, %v4082_v62  ;;  %v4101_v6 = vpack.c.bf16 %v22433_v33, %v22431_v28 }
 0x928   :  { %v22437_v47 = vadd.f32 %v16263_v3, %v4091_v2  ;;  %19288 = vmatprep.mubr.msk.bf16.mxu0 %vm112_vm0, %v4101_v6  ;;  %19296 = vmatprep.mubr.msk.bf16.mxu1 %vm112_vm0, %v4101_v6 }
 0x92a   :  { %v4102_v44 = vpack.c.bf16 %v22437_v47, %v22437_v47 }
 0x92c   :  { %19289 = vmatmul.mubr.msk.bf16.vlgmr.msra.gmra.mxu0 %vm112_vm0, %v4102_v44  ;;  %19297 = vmatmul.mubr.msk.bf16.vlgmr.msra.gmra.mxu1 %vm112_vm0, %v4102_v44 }
 0x92d   :  { %19301 = vmatpush3.bf16.msra.mxu0 %v20002_v14  ;;  %19304 = vmatprep.mubr.msk.bf16.mxu0 %vm112_vm0, %v4101_v6 }
 0x92e   :  { %19302 = vmatprep.subr.bf16.mxu0 %v20003_v32 }
 0x931   :  { %19303 = vmatpush3.bf16.msra.mxu0 %v20003_v32 }
 0x934   :  { %19305 = vmatmul.mubr.msk.bf16.vlgmr.msra.gmra.mxu0 %vm112_vm0, %v4102_v44 }
 0x9ec   :  { %v19290_v52 = vpop.f32.mrf.mxu0  ;;  %v19298_v53 = vpop.f32.mrf.mxu1 }
 0x9ed   :  { %v4250_v25 = vadd.f32 %v19298_v53, %v16279_v29  ;;  %v22494_v48 = vadd.f32 %v19290_v52, %v16269_v26  ;;  %v22570_v52 = vld [vmem:[%s26632_s25 + $0x4] ss:$0 sm:$0xff] }
 0x9ee   :  { %v4168_v8 = vpop.f32.mrf.mxu0  ;;  %v4241_v13 = vpop.f32.mrf.mxu1 }
 0x9ef   :  { %v22456_v1 = vpack.c.bf16 %v4250_v25, %v4250_v25  ;;  %v22458_v54 = vadd.f32 %v16269_v26, %v4168_v8  ;;  %v4242_v51 = vadd.f32 %v16279_v29, %v4241_v13  ;;  %v4330_v61 = vmul.f32 %v22477_v55, %v22494_v48  ;;  %v22579_v8 = vld [vmem:[%s26632_s25 + $0x5] ss:$0 sm:$0xff] }
 0x9f0   :  { %v19291_v37 = vpop.f32.mrf.mxu0  ;;  %v19299_v5 = vpop.f32.mrf.mxu1  ;;  %v4333_v59 = vmul.f32 %v22488_v11, %v22494_v48 }
 0x9f1   :  { %19788 = vmatprep.subr.msk.bf16.mxu1 %vm112_vm0, %v22456_v1  ;;  %19790 = vmatprep.subr.msk.bf16.mxu0 %vm112_vm0, %v22456_v1  ;;  %v22466_v19 = vsel %vm112_vm0, %v22456_v1, 0  ;;  %v4328_v15 = vmul.f32 %v22477_v55, %v22458_v54  ;;  %v4331_v24 = vmul.f32 %v22488_v11, %v22458_v54  ;;  %v4334_v10 = vmul.f32 %v22530_v50, %v22458_v54 }
 0x9f2   :  { %v4171_v43 = vpop.f32.mrf.mxu0  ;;  %v4244_v46 = vpop.f32.mrf.mxu1  ;;  %19309 = vmatpush3.bf16.xpose.msra.mxu1 %v22466_v19  ;;  %19317 = vmatpush3.bf16.xpose.msra.mxu0 %v22466_v19  ;;  %v4353_v22 = vpack.c.bf16 %v4330_v61, %v4330_v61  ;;  %v4355_v20 = vpack.c.bf16 %v4333_v59, %v4333_v59  ;;  %v4337_v3 = vmul.f32 %v22537_v38, %v22458_v54 }
 0x9f3   :  { %v22470_v16 = vadd.f32 %v16269_v26, %v4171_v43  ;;  %v4245_v4 = vadd.f32 %v16279_v29, %v4244_v46  ;;  %v22592_v43 = vld [vmem:[%s26632_s25 + $0x6] ss:$0 sm:$0xff]  ;;  %v4340_v61 = vmul.f32 %v22570_v52, %v22458_v54 }
 0x9f4   :  { %v22472_v57 = vpop.f32.mrf.mxu0 }
 0x9f5   :  { %v22481_v42 = vpack.c.bf16 %v4245_v4, %v4242_v51  ;;  %v4329_v31 = vmul.f32 %v22477_v55, %v22470_v16  ;;  %v4332_v60 = vmul.f32 %v22488_v11, %v22470_v16  ;;  %v4335_v9 = vmul.f32 %v22530_v50, %v22470_v16  ;;  %v22601_v4 = vld [vmem:[%s26632_s25 + $0x7] ss:$0 sm:$0xff] }
 0x9f6   :  { %v4314_v35 = vpop.f32.mrf.mxu0  ;;  %v4338_v56 = vmul.f32 %v22537_v38, %v22470_v16 }
 0x9f7   :  { %19789 = vmatprep.subr.msk.bf16.mxu1 %vm112_vm0, %v22481_v42  ;;  %19791 = vmatprep.subr.msk.bf16.mxu0 %vm112_vm0, %v22481_v42  ;;  %v4352_v17 = vpack.c.bf16 %v4329_v31, %v4328_v15  ;;  %v4354_v14 = vpack.c.bf16 %v4332_v60, %v4331_v24  ;;  %v22504_v63 = vsel %vm112_vm0, %v22481_v42, 0  ;;  %v22522_v7 = vadd.f32 %v22511_v18, %v4314_v35 }
 0x9f8   :  { %v19307_v0 = vpop.f32.mrf.mxu0  ;;  %v4356_v30 = vpack.c.bf16 %v4335_v9, %v4334_v10  ;;  %v4358_v2 = vpack.c.bf16 %v4338_v56, %v4337_v3  ;;  %v4336_v35 = vmul.f32 %v22530_v50, %v22494_v48  ;;  %v4343_v9 = vmul.f32 %v22579_v8, %v22458_v54 }
 0x9f9   :  { %19312 = vmatprep.mubr.msk.bf16.mxu1 %vm112_vm0, %v4352_v17  ;;  %19320 = vmatprep.mubr.msk.bf16.mxu0 %vm112_vm0, %v4354_v14  ;;  %v4374_v39 = vmul.f32 %v22530_v50, %v22522_v7  ;;  %v4377_v6 = vmul.f32 %v22537_v38, %v22522_v7  ;;  %v4380_v53 = vmul.f32 %v22570_v52, %v22522_v7 }
 0x9fa   :  { %v4317_v40 = vpop.f32.mrf.mxu0  ;;  %19311 = vmatpush3.bf16.xpose.msra.mxu1 %v22504_v63  ;;  %19319 = vmatpush3.bf16.xpose.msra.mxu0 %v22504_v63  ;;  %v4383_v13 = vmul.f32 %v22579_v8, %v22522_v7  ;;  %v4386_v46 = vmul.f32 %v22592_v43, %v22522_v7  ;;  %v4389_v15 = vmul.f32 %v22601_v4, %v22522_v7 }
 0x9fb   :  { %19792 = vmatprep.subr.msk.bf16.mxu1 %vm112_vm0, %v22456_v1  ;;  %19794 = vmatprep.subr.msk.bf16.mxu0 %vm112_vm0, %v22456_v1  ;;  %v22525_v45 = vadd.f32 %v22511_v18, %v4317_v40  ;;  %v4339_v17 = vmul.f32 %v22537_v38, %v22494_v48  ;;  %v4341_v14 = vmul.f32 %v22570_v52, %v22470_v16 }
 0x9fc   :  { %v4344_v0 = vmul.f32 %v22579_v8, %v22470_v16  ;;  %v4357_v40 = vpack.c.bf16 %v4336_v35, %v4336_v35  ;;  %v4347_v3 = vmul.f32 %v22592_v43, %v22470_v16 }
 0x9fd   :  { %v4375_v62 = vmul.f32 %v22530_v50, %v22525_v45  ;;  %v4378_v44 = vmul.f32 %v22537_v38, %v22525_v45  ;;  %v4381_v25 = vmul.f32 %v22570_v52, %v22525_v45  ;;  %v4384_v26 = vmul.f32 %v22579_v8, %v22525_v45 }
 0x9fe   :  { %v4387_v51 = vmul.f32 %v22592_v43, %v22525_v45  ;;  %v4390_v31 = vmul.f32 %v22601_v4, %v22525_v45  ;;  %v4359_v59 = vpack.c.bf16 %v4339_v17, %v4339_v17  ;;  %v4360_v56 = vpack.c.bf16 %v4341_v14, %v4340_v61 }
 0x9ff   :  { %v22557_v32 = vpack.c.bf16 %v4375_v62, %v4374_v39  ;;  %v22561_v29 = vpack.c.bf16 %v4378_v44, %v4377_v6  ;;  %v22585_v37 = vpack.c.bf16 %v4381_v25, %v4380_v53  ;;  %v22587_v5 = vpack.c.bf16 %v4384_v26, %v4383_v13 }
 0xa00   :  { %v22607_v24 = vpack.c.bf16 %v4387_v51, %v4386_v46  ;;  %v22610_v60 = vpack.c.bf16 %v4390_v31, %v4389_v15  ;;  %v4362_v10 = vpack.c.bf16 %v4344_v0, %v4343_v9  ;;  %v4346_v62 = vmul.f32 %v22592_v43, %v22458_v54  ;;  %v22710_v9 = vld [vmem:[%s26633_s30 + $0x10] sm:$0x3] }
 0xa01   :  { %19313 = vmatmul.mubr.msk.bf16.vlgmr.msra.gmra.mxu1 %vm112_vm0, %v4353_v22  ;;  %19321 = vmatmul.mubr.msk.bf16.vlgmr.msra.gmra.mxu0 %vm112_vm0, %v4355_v20  ;;  %v4342_v22 = vmul.f32 %v22570_v52, %v22494_v48  ;;  %v4345_v20 = vmul.f32 %v22579_v8, %v22494_v48  ;;  %v4349_v6 = vmul.f32 %v22601_v4, %v22458_v54 }
 0xa02   :  { %19325 = vmatpush3.bf16.xpose.msra.mxu1 %v22466_v19  ;;  %19328 = vmatprep.mubr.msk.bf16.mxu1 %vm112_vm0, %v4356_v30  ;;  %v4350_v30 = vmul.f32 %v22601_v4, %v22470_v16  ;;  %v4364_v44 = vpack.c.bf16 %v4347_v3, %v4346_v62  ;;  %v4369_v25 = vmul.f32 %v22477_v55, %v22525_v45 }
 0xa03   :  { %19333 = vmatpush3.bf16.xpose.msra.mxu0 %v22466_v19  ;;  %19336 = vmatprep.mubr.msk.bf16.mxu0 %vm112_vm0, %v4358_v2  ;;  %v4361_v39 = vpack.c.bf16 %v4342_v22, %v4342_v22  ;;  %v4363_v2 = vpack.c.bf16 %v4345_v20, %v4345_v20  ;;  %v4372_v13 = vmul.f32 %v22488_v11, %v22525_v45 }
 0xa04   :  { %19793 = vmatprep.subr.msk.bf16.mxu1 %vm112_vm0, %v22481_v42  ;;  %19795 = vmatprep.subr.msk.bf16.mxu0 %vm112_vm0, %v22481_v42  ;;  %v4366_v16 = vpack.c.bf16 %v4350_v30, %v4349_v6  ;;  %v4371_v51 = vmul.f32 %v22488_v11, %v22522_v7 }
 0xa06   :  { %v4394_v35 = vpack.c.bf16 %v4372_v13, %v4371_v51 }
 0xa0a   :  { %19327 = vmatpush3.bf16.xpose.msra.mxu1 %v22504_v63 }
 0xa0b   :  { %19335 = vmatpush3.bf16.xpose.msra.mxu0 %v22504_v63  ;;  %19796 = vmatprep.subr.msk.bf16.mxu1 %vm112_vm0, %v22456_v1 }
 0xa0c   :  { %19798 = vmatprep.subr.msk.bf16.mxu0 %vm112_vm0, %v22456_v1 }
 0xa11   :  { %19329 = vmatmul.mubr.msk.bf16.vlgmr.msra.gmra.mxu1 %vm112_vm0, %v4357_v40 }
 0xa12   :  { %19337 = vmatmul.mubr.msk.bf16.vlgmr.msra.gmra.mxu0 %vm112_vm0, %v4359_v59  ;;  %19341 = vmatpush3.bf16.xpose.msra.mxu1 %v22466_v19 }
 0xa13   :  { %19344 = vmatprep.mubr.msk.bf16.mxu1 %vm112_vm0, %v4360_v56  ;;  %19349 = vmatpush3.bf16.xpose.msra.mxu0 %v22466_v19 }
 0xa14   :  { %19352 = vmatprep.mubr.msk.bf16.mxu0 %vm112_vm0, %v4362_v10  ;;  %19797 = vmatprep.subr.msk.bf16.mxu1 %vm112_vm0, %v22481_v42 }
 0xa15   :  { %19799 = vmatprep.subr.msk.bf16.mxu0 %vm112_vm0, %v22481_v42 }
 0xa1a   :  { %19343 = vmatpush3.bf16.xpose.msra.mxu1 %v22504_v63 }
 0xa1b   :  { %19351 = vmatpush3.bf16.xpose.msra.mxu0 %v22504_v63  ;;  %19800 = vmatprep.subr.msk.bf16.mxu1 %vm112_vm0, %v22456_v1 }
 0xa1c   :  { %19802 = vmatprep.subr.msk.bf16.mxu0 %vm112_vm0, %v22456_v1  ;;  %v22659_v1 = vadd.f32 %v22472_v57, %v22511_v18 }
 0xa1e   :  { %v4370_v54 = vmul.f32 %v22477_v55, %v22659_v1  ;;  %v4373_v57 = vmul.f32 %v22488_v11, %v22659_v1 }
 0xa20   :  { %v4393_v18 = vpack.c.bf16 %v4370_v54, %v4370_v54  ;;  %v4395_v53 = vpack.c.bf16 %v4373_v57, %v4373_v57 }
 0xa21   :  { %19345 = vmatmul.mubr.msk.bf16.vlgmr.msra.gmra.mxu1 %vm112_vm0, %v4361_v39  ;;  %v22725_v39 = vld [vmem:[%s26633_s30] sm:$0xff] }
 0xa22   :  { %19353 = vmatmul.mubr.msk.bf16.vlgmr.msra.gmra.mxu0 %vm112_vm0, %v4363_v2  ;;  %19357 = vmatpush3.bf16.xpose.msra.mxu1 %v22466_v19  ;;  %v5183_v15 = vsel %vm1213_vm1, %v4393_v18, 0  ;;  %v5240_v45 = vsel %vm1213_vm1, %v4395_v53, 0 }
 0xa23   :  { %19360 = vmatprep.mubr.msk.bf16.mxu1 %vm112_vm0, %v4364_v44  ;;  %19365 = vmatpush3.bf16.xpose.msra.mxu0 %v22466_v19  ;;  %v4348_v19 = vmul.f32 %v22592_v43, %v22494_v48 }
 0xa24   :  { %19368 = vmatprep.mubr.msk.bf16.mxu0 %vm112_vm0, %v4366_v16  ;;  %19801 = vmatprep.subr.msk.bf16.mxu1 %vm112_vm0, %v22481_v42 }
 0xa25   :  { %19803 = vmatprep.subr.msk.bf16.mxu0 %vm112_vm0, %v22481_v42  ;;  %v4351_v42 = vmul.f32 %v22601_v4, %v22494_v48  ;;  %v4365_v26 = vpack.c.bf16 %v4348_v19, %v4348_v19  ;;  %v4376_v48 = vmul.f32 %v22530_v50, %v22659_v1 }
 0xa27   :  { %v4367_v46 = vpack.c.bf16 %v4351_v42, %v4351_v42  ;;  %v22699_v11 = vpack.c.bf16 %v4376_v48, %v4376_v48 }
 0xa2a   :  { %19359 = vmatpush3.bf16.xpose.msra.mxu1 %v22504_v63 }
 0xa2b   :  { %19367 = vmatpush3.bf16.xpose.msra.mxu0 %v22504_v63  ;;  %19804 = vmatprep.subr.msk.bf16.mxu1 %vm1213_vm1, %v4393_v18  ;;  %v4368_v63 = vmul.f32 %v22477_v55, %v22522_v7  ;;  %v4379_v55 = vmul.f32 %v22537_v38, %v22659_v1 }
 0xa2c   :  { %19805 = vmatprep.subr.msk.bf16.mxu0 %vm1213_vm1, %v4395_v53  ;;  %v22740_v53 = vld [vmem:[%s26633_s30 + $0x8] sm:$0xff] }
 0xa2d   :  { %v4392_v31 = vpack.c.bf16 %v4369_v25, %v4368_v63  ;;  %v22701_v7 = vpack.c.bf16 %v4379_v55, %v4379_v55 }
 0xa31   :  { %19361 = vmatmul.mubr.msk.bf16.vlgmr.msra.gmra.mxu1 %vm112_vm0, %v4365_v26 }
 0xa32   :  { %19369 = vmatmul.mubr.msk.bf16.vlgmr.msra.gmra.mxu0 %vm112_vm0, %v4367_v46  ;;  %19373 = vmatpush3.bf16.msra.mxu1 %v5183_v15 }
 0xa33   :  { %19381 = vmatpush3.bf16.msra.mxu0 %v5240_v45  ;;  %19374 = vmatprep.subr.bf16.mxu1 %v4392_v31 }
 0xa34   :  { %19382 = vmatprep.subr.bf16.mxu0 %v4394_v35 }
 0xa36   :  { %19375 = vmatpush3.bf16.msra.mxu1 %v4392_v31 }
 0xa37   :  { %19383 = vmatpush3.bf16.msra.mxu0 %v4394_v35  ;;  %19806 = vmatprep.subr.msk.bf16.mxu1 %vm1213_vm1, %v22699_v11 }
 0xa38   :  { %19807 = vmatprep.subr.msk.bf16.mxu0 %vm1213_vm1, %v22701_v7 }
 0xac1   :  { %v19314_v50 = vpop.f32.mrf.mxu1  ;;  %v19322_v17 = vpop.f32.mrf.mxu0 }
 0xac2   :  { %v4850_v14 = vmul.f32 0.5, %v19314_v50  ;;  %v4853_v0 = vmul.f32 0.5, %v19322_v17 }
 0xac3   :  { %v4456_v38 = vpop.f32.mrf.mxu1  ;;  %v4510_v40 = vpop.f32.mrf.mxu0 }
 0xac4   :  { %v4848_v61 = vmul.f32 0.5, %v4456_v38  ;;  %v4851_v59 = vmul.f32 0.5, %v4510_v40  ;;  %v22713_v56 = vadd.f32 %v22710_v9, %v4853_v0  ;;  %v22716_v10 = vadd.f32 %v22710_v9, %v4850_v14 }
 0xac5   :  { %v19315_v22 = vpop.f32.mrf.mxu1  ;;  %v19323_v20 = vpop.f32.mrf.mxu0 }
 0xac6   :  { %v4911_v3 = vsel %vm932_vm2, %v22713_v56, -inf  ;;  %v4902_v30 = vsel %vm932_vm2, %v22716_v10, -inf  ;;  %v22728_v62 = vadd.f32 %v22725_v39, %v4851_v59  ;;  %v22731_v2 = vadd.f32 %v22725_v39, %v4848_v61 }
 0xac7   :  { %4912 = vmax.xlane.f32.xlu1 %v4911_v3  ;;  %v4513_v6 = vpop.f32.mrf.mxu0  ;;  %4903 = vmax.xlane.f32.xlu0 %v4902_v30  ;;  %v4459_v44 = vpop.f32.mrf.mxu1 }
 0xac8   :  { %v4852_v16 = vmul.f32 0.5, %v4513_v6  ;;  %v4849_v54 = vmul.f32 0.5, %v4459_v44  ;;  %v4905_v57 = vsel %vm925_vm3, %v22728_v62, -inf  ;;  %v4896_v18 = vsel %vm925_vm3, %v22731_v2, -inf }
 0xaca   :  { %v22743_v19 = vadd.f32 %v22740_v53, %v4852_v16  ;;  %v22746_v42 = vadd.f32 %v22740_v53, %v4849_v54 }
 0xacb   :  { %4906 = vmax.xlane.f32.xlu1 %v4905_v57  ;;  %4897 = vmax.xlane.f32.xlu0 %v4896_v18 }
 0xacc   :  { %v4908_v25 = vsel %vm925_vm3, %v22743_v19, -inf  ;;  %v4899_v13 = vsel %vm925_vm3, %v22746_v42, -inf }
 0xacf   :  { %4909 = vmax.xlane.f32.xlu0 %v4908_v25  ;;  %4900 = vmax.xlane.f32.xlu1 %v4899_v13 }
 0xad1   :  { %v19330_v26 = vpop.f32.mrf.mxu1 }
 0xad2   :  { %v4856_v63 = vmul.f32 0.5, %v19330_v26  ;;  %v19338_v46 = vpop.f32.mrf.mxu0 }
 0xad3   :  { %v4859_v51 = vmul.f32 0.5, %v19338_v46  ;;  %v4564_v15 = vpop.f32.mrf.mxu1 }
 0xad4   :  { %v4854_v31 = vmul.f32 0.5, %v4564_v15  ;;  %v4618_v48 = vpop.f32.mrf.mxu0  ;;  %v22753_v45 = vadd.f32 %v22710_v9, %v4856_v63 }
 0xad5   :  { %v4857_v35 = vmul.f32 0.5, %v4618_v48  ;;  %v19331_v55 = vpop.f32.mrf.mxu1  ;;  %v22756_v50 = vadd.f32 %v22710_v9, %v4859_v51 }
 0xad6   :  { %v19339_v17 = vpop.f32.mrf.mxu0  ;;  %v4920_v14 = vsel %vm932_vm2, %v22753_v45, -inf  ;;  %v22761_v0 = vadd.f32 %v22725_v39, %v4854_v31 }
 0xad7   :  { %v4929_v38 = vsel %vm932_vm2, %v22756_v50, -inf  ;;  %4921 = vmax.xlane.f32.xlu0 %v4920_v14  ;;  %v4567_v40 = vpop.f32.mrf.mxu1  ;;  %v22766_v61 = vadd.f32 %v22725_v39, %v4857_v35 }
 0xad8   :  { %v4621_v59 = vpop.f32.mrf.mxu0  ;;  %4930 = vmax.xlane.f32.xlu1 %v4929_v38  ;;  %v4855_v22 = vmul.f32 0.5, %v4567_v40  ;;  %v4914_v3 = vsel %vm925_vm3, %v22761_v0, -inf }
 0xad9   :  { %v4858_v20 = vmul.f32 0.5, %v4621_v59  ;;  %v4923_v30 = vsel %vm925_vm3, %v22766_v61, -inf }
 0xada   :  { %v22776_v44 = vadd.f32 %v22740_v53, %v4855_v22 }
 0xadb   :  { %4915 = vmax.xlane.f32.xlu0 %v4914_v3  ;;  %v22773_v6 = vadd.f32 %v22740_v53, %v4858_v20 }
 0xadc   :  { %4924 = vmax.xlane.f32.xlu1 %v4923_v30  ;;  %v4917_v54 = vsel %vm925_vm3, %v22776_v44, -inf }
 0xadd   :  { %v4926_v16 = vsel %vm925_vm3, %v22773_v6, -inf }
 0xadf   :  { %4927 = vmax.xlane.f32.xlu0 %v4926_v16 }
 0xae0   :  { %4918 = vmax.xlane.f32.xlu1 %v4917_v54 }
 0xae1   :  { %v19346_v57 = vpop.f32.mrf.mxu1 }
 0xae2   :  { %v4862_v18 = vmul.f32 0.5, %v19346_v57  ;;  %v19354_v25 = vpop.f32.mrf.mxu0 }
 0xae3   :  { %v4865_v13 = vmul.f32 0.5, %v19354_v25  ;;  %v4672_v26 = vpop.f32.mrf.mxu1 }
 0xae4   :  { %v4860_v63 = vmul.f32 0.5, %v4672_v26  ;;  %v4726_v46 = vpop.f32.mrf.mxu0  ;;  %v22783_v51 = vadd.f32 %v22710_v9, %v4862_v18 }
 0xae5   :  { %v4863_v15 = vmul.f32 0.5, %v4726_v46  ;;  %v19347_v31 = vpop.f32.mrf.mxu1  ;;  %v22786_v48 = vadd.f32 %v22710_v9, %v4865_v13 }
 0xae6   :  { %v19355_v35 = vpop.f32.mrf.mxu0  ;;  %v4938_v55 = vsel %vm932_vm2, %v22783_v51, -inf  ;;  %v22791_v17 = vadd.f32 %v22725_v39, %v4860_v63 }
 0xae7   :  { %v4947_v14 = vsel %vm932_vm2, %v22786_v48, -inf  ;;  %4939 = vmax.xlane.f32.xlu0 %v4938_v55  ;;  %v4675_v38 = vpop.f32.mrf.mxu1  ;;  %v22796_v40 = vadd.f32 %v22725_v39, %v4863_v15 }
 0xae8   :  { %v4729_v59 = vpop.f32.mrf.mxu0  ;;  %4948 = vmax.xlane.f32.xlu1 %v4947_v14  ;;  %v4861_v22 = vmul.f32 0.5, %v4675_v38  ;;  %v4932_v3 = vsel %vm925_vm3, %v22791_v17, -inf }
 0xae9   :  { %v4864_v20 = vmul.f32 0.5, %v4729_v59  ;;  %v4941_v30 = vsel %vm925_vm3, %v22796_v40, -inf }
 0xaea   :  { %v22806_v54 = vadd.f32 %v22740_v53, %v4861_v22 }
 0xaeb   :  { %4933 = vmax.xlane.f32.xlu0 %v4932_v3  ;;  %v22803_v16 = vadd.f32 %v22740_v53, %v4864_v20 }
 0xaec   :  { %4942 = vmax.xlane.f32.xlu1 %v4941_v30  ;;  %v4935_v18 = vsel %vm925_vm3, %v22806_v54, -inf }
 0xaed   :  { %v4944_v57 = vsel %vm925_vm3, %v22803_v16, -inf }
 0xaef   :  { %4945 = vmax.xlane.f32.xlu0 %v4944_v57 }
 0xaf0   :  { %4936 = vmax.xlane.f32.xlu1 %v4935_v18 }
 0xaf1   :  { %v19362_v25 = vpop.f32.mrf.mxu1 }
 0xaf2   :  { %v4868_v13 = vmul.f32 0.5, %v19362_v25  ;;  %v19370_v26 = vpop.f32.mrf.mxu0 }
 0xaf3   :  { %v4780_v63 = vpop.f32.mrf.mxu1  ;;  %v4871_v57 = vmul.f32 0.5, %v19370_v26 }
 0xaf4   :  { %v4866_v46 = vmul.f32 0.5, %v4780_v63  ;;  %v4834_v15 = vpop.f32.mrf.mxu0  ;;  %v22813_v31 = vadd.f32 %v22710_v9, %v4868_v13 }
 0xaf5   :  { %v4869_v35 = vmul.f32 0.5, %v4834_v15  ;;  %v19363_v55 = vpop.f32.mrf.mxu1  ;;  %v22836_v26 = vadd.f32 %v22710_v9, %v4871_v57 }
 0xaf6   :  { %v19371_v14 = vpop.f32.mrf.mxu0  ;;  %v4956_v38 = vsel %vm932_vm2, %v22813_v31, -inf  ;;  %v22818_v59 = vadd.f32 %v22725_v39, %v4866_v46 }
 0xaf7   :  { %4957 = vmax.xlane.f32.xlu0 %v4956_v38  ;;  %v4783_v22 = vpop.f32.mrf.mxu1  ;;  %v22821_v20 = vadd.f32 %v22725_v39, %v4869_v35  ;;  %v4965_v35 = vsel %vm932_vm2, %v22836_v26, -inf }
 0xaf8   :  { %v4837_v3 = vpop.f32.mrf.mxu0  ;;  %v4867_v30 = vmul.f32 0.5, %v4783_v22  ;;  %v4950_v13 = vsel %vm925_vm3, %v22818_v59, -inf }
 0xaf9   :  { %v4870_v18 = vmul.f32 0.5, %v4837_v3  ;;  %v4959_v25 = vsel %vm925_vm3, %v22821_v20, -inf }
 0xafa   :  { %4960 = vmax.xlane.f32.xlu1 %v4959_v25  ;;  %v22828_v63 = vadd.f32 %v22740_v53, %v4867_v30 }
 0xafb   :  { %4951 = vmax.xlane.f32.xlu0 %v4950_v13  ;;  %v22831_v46 = vadd.f32 %v22740_v53, %v4870_v18 }
 0xafc   :  { %v4953_v39 = vsel %vm925_vm3, %v22828_v63, -inf }
 0xafd   :  { %v4962_v15 = vsel %vm925_vm3, %v22831_v46, -inf }
 0xafe   :  { %4954 = vmax.xlane.f32.xlu1 %v4953_v39 }
 0xaff   :  { %4963 = vmax.xlane.f32.xlu0 %v4962_v15 }
 0xb02   :  { %4966 = vmax.xlane.f32.xlu1 %v4965_v35 }
 0xb50   :  { %v4913_v55 = vpop.xlane.xlu1 %4912  ;;  %v4904_v14 = vpop.xlane.xlu0 %4903 }
 0xb51   :  { %v4973_v53 = vsub.f32 %v22713_v56, %v4913_v55  ;;  %v4970_v38 = vsub.f32 %v22716_v10, %v4904_v14 }
 0xb53   :  { %v5002_v22 = vmul.f32 1.442695, %v4973_v53  ;;  %v4996_v3 = vmul.f32 1.442695, %v4970_v38 }
 0xb54   :  { %v4907_v30 = vpop.xlane.xlu1 %4906  ;;  %v4898_v9 = vpop.xlane.xlu0 %4897 }
 0xb55   :  { %20514 = vpow2.f32 %v5002_v22  ;;  %v4971_v57 = vsub.f32 %v22728_v62, %v4907_v30  ;;  %v4968_v18 = vsub.f32 %v22731_v2, %v4898_v9 }
 0xb56   :  { %20516 = vpow2.f32 %v4996_v3 }
 0xb57   :  { %v4998_v25 = vmul.f32 1.442695, %v4971_v57  ;;  %v4992_v13 = vmul.f32 1.442695, %v4968_v18 }
 0xb58   :  { %v4910_v39 = vpop.xlane.xlu0 %4909  ;;  %v4901_v15 = vpop.xlane.xlu1 %4900 }
 0xb59   :  { %20518 = vpow2.f32 %v4998_v25  ;;  %v4972_v35 = vsub.f32 %v22743_v19, %v4910_v39  ;;  %v4969_v56 = vsub.f32 %v22746_v42, %v4901_v15 }
 0xb5a   :  { %20520 = vpow2.f32 %v4992_v13 }
 0xb5b   :  { %v5000_v10 = vmul.f32 1.442695, %v4972_v35  ;;  %v4994_v55 = vmul.f32 1.442695, %v4969_v56 }
 0xb5d   :  { %20522 = vpow2.f32 %v5000_v10 }
 0xb5e   :  { %20524 = vpow2.f32 %v4994_v55 }
 0xb60   :  { %v4922_v14 = vpop.xlane.xlu0 %4921 }
 0xb61   :  { %v4931_v53 = vpop.xlane.xlu1 %4930  ;;  %v4976_v62 = vsub.f32 %v22753_v45, %v4922_v14 }
 0xb62   :  { %v22849_v2 = vpop.eup %20514  ;;  %v4979_v38 = vsub.f32 %v22756_v50, %v4931_v53 }
 0xb63   :  { %v22852_v22 = vpop.eup %20516  ;;  %v5008_v3 = vmul.f32 1.442695, %v4976_v62  ;;  %v5055_v19 = vsel %vm932_vm2, %v22849_v2, 0.0 }
 0xb64   :  { %v5014_v42 = vmul.f32 1.442695, %v4979_v38  ;;  %v4916_v30 = vpop.xlane.xlu0 %4915  ;;  %v5046_v9 = vsel %vm932_vm2, %v22852_v22, 0.0  ;;  %5056 = vadd.xlane.f32.xlu1 %v5055_v19 }
 0xb65   :  { %20526 = vpow2.f32 %v5008_v3  ;;  %v4925_v57 = vpop.xlane.xlu1 %4924  ;;  %v4974_v45 = vsub.f32 %v22761_v0, %v4916_v30  ;;  %5047 = vadd.xlane.f32.xlu0 %v5046_v9 }
 0xb66   :  { %v22859_v18 = vpop.eup %20518  ;;  %20528 = vpow2.f32 %v5014_v42  ;;  %v4977_v50 = vsub.f32 %v22766_v61, %v4925_v57 }
 0xb67   :  { %v22862_v25 = vpop.eup %20520  ;;  %v5004_v13 = vmul.f32 1.442695, %v4974_v45  ;;  %v5049_v39 = vsel %vm925_vm3, %v22859_v18, 0.0 }
 0xb68   :  { %v5010_v15 = vmul.f32 1.442695, %v4977_v50  ;;  %v4928_v35 = vpop.xlane.xlu0 %4927  ;;  %v5040_v56 = vsel %vm925_vm3, %v22862_v25, 0.0  ;;  %5050 = vadd.xlane.f32.xlu1 %v5049_v39 }
 0xb69   :  { %20530 = vpow2.f32 %v5004_v13  ;;  %v4978_v0 = vsub.f32 %v22773_v6, %v4928_v35  ;;  %v4919_v10 = vpop.xlane.xlu1 %4918  ;;  %5041 = vadd.xlane.f32.xlu0 %v5040_v56 }
 0xb6a   :  { %v22869_v55 = vpop.eup %20522  ;;  %20532 = vpow2.f32 %v5010_v15  ;;  %v4975_v61 = vsub.f32 %v22776_v44, %v4919_v10 }
 0xb6b   :  { %v22872_v14 = vpop.eup %20524  ;;  %v5012_v53 = vmul.f32 1.442695, %v4978_v0  ;;  %v5052_v62 = vsel %vm925_vm3, %v22869_v55, 0.0 }
 0xb6c   :  { %v5006_v38 = vmul.f32 1.442695, %v4975_v61  ;;  %v5043_v3 = vsel %vm925_vm3, %v22872_v14, 0.0 }
 0xb6d   :  { %20534 = vpow2.f32 %v5012_v53  ;;  %5053 = vadd.xlane.f32.xlu0 %v5052_v62  ;;  %5044 = vadd.xlane.f32.xlu1 %v5043_v3 }
 0xb6e   :  { %20536 = vpow2.f32 %v5006_v38 }
 0xb70   :  { %v4940_v6 = vpop.xlane.xlu0 %4939 }
 0xb71   :  { %v4949_v19 = vpop.xlane.xlu1 %4948  ;;  %v4982_v42 = vsub.f32 %v22783_v51, %v4940_v6 }
 0xb72   :  { %v22879_v30 = vpop.eup %20526  ;;  %v4985_v44 = vsub.f32 %v22786_v48, %v4949_v19 }
 0xb73   :  { %v22882_v9 = vpop.eup %20528  ;;  %v5020_v57 = vmul.f32 1.442695, %v4982_v42  ;;  %v5064_v45 = vsel %vm932_vm2, %v22879_v30, 0.0 }
 0xb74   :  { %v5026_v50 = vmul.f32 1.442695, %v4985_v44  ;;  %v4934_v13 = vpop.xlane.xlu0 %4933  ;;  %5065 = vadd.xlane.f32.xlu0 %v5064_v45  ;;  %v5073_v39 = vsel %vm932_vm2, %v22882_v9, 0.0 }
 0xb75   :  { %20538 = vpow2.f32 %v5020_v57  ;;  %v4943_v15 = vpop.xlane.xlu1 %4942  ;;  %v4980_v51 = vsub.f32 %v22791_v17, %v4934_v13  ;;  %5074 = vadd.xlane.f32.xlu1 %v5073_v39 }
 0xb76   :  { %v22889_v35 = vpop.eup %20530  ;;  %20540 = vpow2.f32 %v5026_v50  ;;  %v4983_v48 = vsub.f32 %v22796_v40, %v4943_v15 }
 0xb77   :  { %v22892_v56 = vpop.eup %20532  ;;  %v5016_v0 = vmul.f32 1.442695, %v4980_v51  ;;  %v5058_v10 = vsel %vm925_vm3, %v22889_v35, 0.0 }
 0xb78   :  { %v5022_v61 = vmul.f32 1.442695, %v4983_v48  ;;  %v4946_v53 = vpop.xlane.xlu0 %4945  ;;  %5059 = vadd.xlane.f32.xlu0 %v5058_v10  ;;  %v5067_v62 = vsel %vm925_vm3, %v22892_v56, 0.0 }
 0xb79   :  { %20542 = vpow2.f32 %v5016_v0  ;;  %v4984_v17 = vsub.f32 %v22803_v16, %v4946_v53  ;;  %v4937_v38 = vpop.xlane.xlu1 %4936  ;;  %5068 = vadd.xlane.f32.xlu1 %v5067_v62 }
 0xb7a   :  { %v22899_v3 = vpop.eup %20534  ;;  %20544 = vpow2.f32 %v5022_v61  ;;  %v4981_v40 = vsub.f32 %v22806_v54, %v4937_v38 }
 0xb7b   :  { %v22902_v6 = vpop.eup %20536  ;;  %v5024_v19 = vmul.f32 1.442695, %v4984_v17  ;;  %v5070_v42 = vsel %vm925_vm3, %v22899_v3, 0.0 }
 0xb7c   :  { %v5018_v44 = vmul.f32 1.442695, %v4981_v40  ;;  %5071 = vadd.xlane.f32.xlu0 %v5070_v42  ;;  %v5061_v57 = vsel %vm925_vm3, %v22902_v6, 0.0 }
 0xb7d   :  { %20546 = vpow2.f32 %v5024_v19  ;;  %5062 = vadd.xlane.f32.xlu1 %v5061_v57 }
 0xb7e   :  { %20548 = vpow2.f32 %v5018_v44 }
 0xb80   :  { %v4958_v16 = vpop.xlane.xlu0 %4957 }
 0xb81   :  { %v4988_v45 = vsub.f32 %v22813_v31, %v4958_v16 }
 0xb82   :  { %v22909_v50 = vpop.eup %20538 }
 0xb83   :  { %v22911_v54 = vpop.eup %20540  ;;  %v5032_v13 = vmul.f32 1.442695, %v4988_v45  ;;  %v4961_v39 = vpop.xlane.xlu1 %4960  ;;  %v5082_v15 = vsel %vm932_vm2, %v22909_v50, 0.0 }
 0xb84   :  { %v4989_v51 = vsub.f32 %v22821_v20, %v4961_v39  ;;  %5083 = vadd.xlane.f32.xlu0 %v5082_v15  ;;  %v4952_v48 = vpop.xlane.xlu0 %4951  ;;  %v5091_v0 = vsel %vm932_vm2, %v22911_v54, 0.0 }
 0xb85   :  { %20550 = vpow2.f32 %v5032_v13  ;;  %v4986_v10 = vsub.f32 %v22818_v59, %v4952_v48  ;;  %5092 = vadd.xlane.f32.xlu1 %v5091_v0 }
 0xb86   :  { %v22919_v31 = vpop.eup %20542  ;;  %v5034_v61 = vmul.f32 1.442695, %v4989_v51 }
 0xb87   :  { %v22921_v53 = vpop.eup %20544  ;;  %v5028_v62 = vmul.f32 1.442695, %v4986_v10  ;;  %v4955_v17 = vpop.xlane.xlu1 %4954  ;;  %v5076_v38 = vsel %vm925_vm3, %v22919_v31, 0.0 }
 0xb88   :  { %20552 = vpow2.f32 %v5034_v61  ;;  %v4987_v20 = vsub.f32 %v22828_v63, %v4955_v17  ;;  %5077 = vadd.xlane.f32.xlu0 %v5076_v38  ;;  %v4964_v40 = vpop.xlane.xlu0 %4963  ;;  %v5085_v19 = vsel %vm925_vm3, %v22921_v53, 0.0 }
 0xb89   :  { %20554 = vpow2.f32 %v5028_v62  ;;  %v4990_v59 = vsub.f32 %v22831_v46, %v4964_v40  ;;  %5086 = vadd.xlane.f32.xlu1 %v5085_v19 }
 0xb8a   :  { %v22929_v42 = vpop.eup %20546  ;;  %v5030_v44 = vmul.f32 1.442695, %v4987_v20 }
 0xb8b   :  { %v22931_v57 = vpop.eup %20548  ;;  %v5036_v16 = vmul.f32 1.442695, %v4990_v59  ;;  %v4967_v45 = vpop.xlane.xlu1 %4966  ;;  %v5088_v13 = vsel %vm925_vm3, %v22929_v42, 0.0 }
 0xb8c   :  { %20556 = vpow2.f32 %v5030_v44  ;;  %v4991_v63 = vsub.f32 %v22836_v26, %v4967_v45  ;;  %5089 = vadd.xlane.f32.xlu0 %v5088_v13  ;;  %v5079_v39 = vsel %vm925_vm3, %v22931_v57, 0.0 }
 0xb8d   :  { %20558 = vpow2.f32 %v5036_v16  ;;  %5080 = vadd.xlane.f32.xlu1 %v5079_v39 }
 0xb8e   :  { %v5038_v46 = vmul.f32 1.442695, %v4991_v63 }
 0xb90   :  { %20560 = vpow2.f32 %v5038_v46 }
 0xb92   :  { %v22938_v15 = vpop.eup %20550 }
 0xb93   :  { %v5100_v51 = vsel %vm932_vm2, %v22938_v15, 0.0 }
 0xb94   :  { %5101 = vadd.xlane.f32.xlu0 %v5100_v51 }
 0xb95   :  { %v22942_v48 = vpop.eup %20552 }
 0xb96   :  { %v22944_v0 = vpop.eup %20554  ;;  %v5103_v26 = vsel %vm925_vm3, %v22942_v48, 0.0 }
 0xb97   :  { %5104 = vadd.xlane.f32.xlu1 %v5103_v26  ;;  %v5094_v10 = vsel %vm925_vm3, %v22944_v0, 0.0 }
 0xb98   :  { %5095 = vadd.xlane.f32.xlu0 %v5094_v10 }
 0xb99   :  { %v22950_v61 = vpop.eup %20556 }
 0xb9a   :  { %v22952_v62 = vpop.eup %20558  ;;  %v5097_v17 = vsel %vm925_vm3, %v22950_v61, 0.0 }
 0xb9b   :  { %5098 = vadd.xlane.f32.xlu1 %v5097_v17  ;;  %v5106_v38 = vsel %vm925_vm3, %v22952_v62, 0.0 }
 0xb9c   :  { %5107 = vadd.xlane.f32.xlu0 %v5106_v38 }
 0xb9d   :  { %v22958_v20 = vpop.eup %20560 }
 0xb9e   :  { %v5109_v40 = vsel %vm932_vm2, %v22958_v20, 0.0 }
 0xb9f   :  { %5110 = vadd.xlane.f32.xlu1 %v5109_v40 }
 0xbed   :  { %v5057_v19 = vpop.xlane.xlu1 %5056 }
 0xbee   :  { %v5048_v59 = vpop.xlane.xlu0 %5047  ;;  %20562 = vrcp.f32 %v5057_v19 }
 0xbef   :  { %20564 = vrcp.f32 %v5048_v59 }
 0xbf1   :  { %v5051_v44 = vpop.xlane.xlu1 %5050 }
 0xbf2   :  { %v5042_v16 = vpop.xlane.xlu0 %5041  ;;  %20566 = vrcp.f32 %v5051_v44 }
 0xbf3   :  { %20568 = vrcp.f32 %v5042_v16 }
 0xbf6   :  { %v5054_v45 = vpop.xlane.xlu0 %5053  ;;  %v5045_v13 = vpop.xlane.xlu1 %5044 }
 0xbf7   :  { %20570 = vrcp.f32 %v5054_v45 }
 0xbf8   :  { %20572 = vrcp.f32 %v5045_v13 }
 0xbfb   :  { %v20563_v46 = vpop.eup %20562 }
 0xbfc   :  { %v20565_v51 = vpop.eup %20564  ;;  %v5141_v19 = vmul.f32 %v20563_v46, %v22849_v2 }
 0xbfd   :  { %v5066_v63 = vpop.xlane.xlu0 %5065  ;;  %v5138_v44 = vmul.f32 %v20565_v51, %v22852_v22  ;;  %v5354_v22 = vsel %vm1213_vm1, %v22701_v7, 0 }
 0xbfe   :  { %v5075_v39 = vpop.xlane.xlu1 %5074  ;;  %20574 = vrcp.f32 %v5066_v63  ;;  %v5163_v12 = vpack.c.bf16 %v5141_v19, %v5141_v19 }
 0xbff   :  { %v20567_v10 = vpop.eup %20566  ;;  %20576 = vrcp.f32 %v5075_v39  ;;  %v5161_v46 = vpack.c.bf16 %v5138_v44, %v5138_v44 }
 0xc00   :  { %v20569_v38 = vpop.eup %20568  ;;  %v5139_v45 = vmul.f32 %v20567_v10, %v22859_v18  ;;  %v4385_v18 = vmul.f32 %v22579_v8, %v22659_v1 }
 0xc01   :  { %v5060_v26 = vpop.xlane.xlu0 %5059  ;;  %v5136_v63 = vmul.f32 %v20569_v38, %v22862_v25 }
 0xc02   :  { %v5069_v17 = vpop.xlane.xlu1 %5068  ;;  %v4403_v7 = vpack.c.bf16 %v4385_v18, %v4385_v18 }
 0xc03   :  { %20578 = vrcp.f32 %v5069_v17 }
 0xc04   :  { %v20571_v40 = vpop.eup %20570  ;;  %20580 = vrcp.f32 %v5060_v26 }
 0xc05   :  { %v20573_v59 = vpop.eup %20572  ;;  %v5072_v16 = vpop.xlane.xlu0 %5071  ;;  %v5140_v13 = vmul.f32 %v20571_v40, %v22869_v55 }
 0xc06   :  { %20582 = vrcp.f32 %v5072_v16  ;;  %v5063_v34 = vpop.xlane.xlu1 %5062  ;;  %v5137_v49 = vmul.f32 %v20573_v59, %v22872_v14 }
 0xc07   :  { %20584 = vrcp.f32 %v5063_v34  ;;  %v5162_v39 = vpack.c.bf16 %v5140_v13, %v5139_v45  ;;  %v5297_v34 = vsel %vm1213_vm1, %v22699_v11, 0 }
 0xc08   :  { %v5160_v2 = vpack.c.bf16 %v5137_v49, %v5136_v63  ;;  %v4382_v49 = vmul.f32 %v22570_v52, %v22659_v1 }
 0xc09   :  { %19384 = vmatprep.mubr.msk.bf16.mxu0 %vm925_vm3, %v5162_v39 }
 0xc0a   :  { %19376 = vmatprep.mubr.msk.bf16.mxu1 %vm925_vm3, %v5160_v2  ;;  %19385 = vmatmul.mubr.msk.bf16.vlgmr.msra.gmra.mxu0 %vm925_vm3, %v5163_v12  ;;  %v4401_v8 = vpack.c.bf16 %v4382_v49, %v4382_v49 }
 0xc0b   :  { %19377 = vmatmul.mubr.msk.bf16.vlgmr.msra.gmra.mxu1 %vm925_vm3, %v5161_v46  ;;  %19397 = vmatpush3.bf16.msra.mxu0 %v5354_v22  ;;  %v20575_v55 = vpop.eup %20574 }
 0xc0c   :  { %19389 = vmatpush3.bf16.msra.mxu1 %v5297_v34  ;;  %19398 = vmatprep.subr.bf16.mxu0 %v22561_v29  ;;  %v20577_v14 = vpop.eup %20576 }
 0xc0d   :  { %19390 = vmatprep.subr.bf16.mxu1 %v22557_v32  ;;  %v5084_v12 = vpop.xlane.xlu0 %5083  ;;  %v5147_v17 = vmul.f32 %v20577_v14, %v22882_v9 }
 0xc0e   :  { %v5093_v25 = vpop.xlane.xlu1 %5092  ;;  %20586 = vrcp.f32 %v5084_v12 }
 0xc0f   :  { %19399 = vmatpush3.bf16.msra.mxu0 %v22561_v29  ;;  %20588 = vrcp.f32 %v5093_v25  ;;  %v5144_v29 = vmul.f32 %v20575_v55, %v22879_v30  ;;  %v5167_v13 = vpack.c.bf16 %v5147_v17, %v5147_v17  ;;  %v5468_v30 = vsel %vm1213_vm1, %v4403_v7, 0 }
 0xc10   :  { %19391 = vmatpush3.bf16.msra.mxu1 %v22557_v32  ;;  %19809 = vmatprep.subr.msk.bf16.mxu0 %vm1213_vm1, %v4403_v7  ;;  %v20579_v11 = vpop.eup %20578 }
 0xc11   :  { %19808 = vmatprep.subr.msk.bf16.mxu1 %vm1213_vm1, %v4401_v8  ;;  %v5078_v52 = vpop.xlane.xlu0 %5077  ;;  %v20581_v51 = vpop.eup %20580  ;;  %v5145_v40 = vmul.f32 %v20579_v11, %v22892_v56  ;;  %v5165_v63 = vpack.c.bf16 %v5144_v29, %v5144_v29  ;;  %v5411_v56 = vsel %vm1213_vm1, %v4401_v8, 0 }
 0xc12   :  { %v5087_v26 = vpop.xlane.xlu1 %5086  ;;  %v5142_v59 = vmul.f32 %v20581_v51, %v22889_v35  ;;  %v4391_v35 = vmul.f32 %v22601_v4, %v22659_v1 }
 0xc13   :  { %v20583_v10 = vpop.eup %20582  ;;  %20590 = vrcp.f32 %v5087_v26 }
 0xc14   :  { %v20585_v38 = vpop.eup %20584  ;;  %v5146_v32 = vmul.f32 %v20583_v10, %v22899_v3  ;;  %20592 = vrcp.f32 %v5078_v52  ;;  %v4388_v3 = vmul.f32 %v22592_v43, %v22659_v1  ;;  %v4407_v39 = vpack.c.bf16 %v4391_v35, %v4391_v35 }
 0xc15   :  { %v5090_v19 = vpop.xlane.xlu0 %5089  ;;  %v5143_v44 = vmul.f32 %v20585_v38, %v22902_v6 }
 0xc16   :  { %20594 = vrcp.f32 %v5090_v19  ;;  %v5081_v16 = vpop.xlane.xlu1 %5080  ;;  %v5166_v45 = vpack.c.bf16 %v5146_v32, %v5145_v40  ;;  %v4405_v2 = vpack.c.bf16 %v4388_v3, %v4388_v3 }
 0xc17   :  { %20596 = vrcp.f32 %v5081_v16  ;;  %v5164_v9 = vpack.c.bf16 %v5143_v44, %v5142_v59 }
 0xc18   :  { %19400 = vmatprep.mubr.msk.bf16.mxu0 %vm925_vm3, %v5166_v45 }
 0xc19   :  { %19392 = vmatprep.mubr.msk.bf16.mxu1 %vm925_vm3, %v5164_v9  ;;  %19401 = vmatmul.mubr.msk.bf16.vlgmr.msra.gmra.mxu0 %vm925_vm3, %v5167_v13 }
 0xc1a   :  { %19393 = vmatmul.mubr.msk.bf16.vlgmr.msra.gmra.mxu1 %vm925_vm3, %v5165_v63  ;;  %19413 = vmatpush3.bf16.msra.mxu0 %v5468_v30 }
 0xc1b   :  { %19405 = vmatpush3.bf16.msra.mxu1 %v5411_v56  ;;  %19414 = vmatprep.subr.bf16.mxu0 %v22587_v5  ;;  %v20587_v46 = vpop.eup %20586 }
 0xc1c   :  { %19406 = vmatprep.subr.bf16.mxu1 %v22585_v37  ;;  %v20589_v4 = vpop.eup %20588 }
 0xc1d   :  { %v5102_v6 = vpop.xlane.xlu0 %5101  ;;  %v5153_v49 = vmul.f32 %v20589_v4, %v22911_v54 }
 0xc1e   :  { %19415 = vmatpush3.bf16.msra.mxu0 %v22587_v5  ;;  %20598 = vrcp.f32 %v5102_v6  ;;  %v5150_v5 = vmul.f32 %v20587_v46, %v22909_v50  ;;  %v5582_v50 = vsel %vm1213_vm1, %v4407_v39, 0 }
 0xc1f   :  { %19407 = vmatpush3.bf16.msra.mxu1 %v22585_v37  ;;  %19811 = vmatprep.subr.msk.bf16.mxu0 %vm1213_vm1, %v4407_v39  ;;  %v5171_v52 = vpack.c.bf16 %v5153_v49, %v5153_v49 }
 0xc20   :  { %19810 = vmatprep.subr.msk.bf16.mxu1 %vm1213_vm1, %v4405_v2  ;;  %v5105_v22 = vpop.xlane.xlu1 %5104  ;;  %v20591_v43 = vpop.eup %20590  ;;  %v5169_v51 = vpack.c.bf16 %v5150_v5, %v5150_v5 }
 0xc21   :  { %v5096_v1 = vpop.xlane.xlu0 %5095  ;;  %v20593_v18 = vpop.eup %20592  ;;  %v5151_v37 = vmul.f32 %v20591_v43, %v22921_v53 }
 0xc22   :  { %20600 = vrcp.f32 %v5096_v1  ;;  %v5148_v8 = vmul.f32 %v20593_v18, %v22919_v31  ;;  %v5525_v31 = vsel %vm1213_vm1, %v4405_v2, 0 }
 0xc23   :  { %v20595_v34 = vpop.eup %20594  ;;  %20602 = vrcp.f32 %v5105_v22 }
 0xc24   :  { %v20597_v12 = vpop.eup %20596  ;;  %v5099_v25 = vpop.xlane.xlu1 %5098  ;;  %v5152_v7 = vmul.f32 %v20595_v34, %v22929_v42 }
 0xc25   :  { %20604 = vrcp.f32 %v5099_v25  ;;  %v5108_v55 = vpop.xlane.xlu0 %5107  ;;  %v5149_v14 = vmul.f32 %v20597_v12, %v22931_v57 }
 0xc26   :  { %20606 = vrcp.f32 %v5108_v55  ;;  %v5170_v11 = vpack.c.bf16 %v5152_v7, %v5151_v37 }
 0xc27   :  { %v5168_v54 = vpack.c.bf16 %v5149_v14, %v5148_v8 }
 0xc28   :  { %v5111_v26 = vpop.xlane.xlu1 %5110  ;;  %19416 = vmatprep.mubr.msk.bf16.mxu0 %vm925_vm3, %v5170_v11 }
 0xc29   :  { %20608 = vrcp.f32 %v5111_v26  ;;  %19408 = vmatprep.mubr.msk.bf16.mxu1 %vm925_vm3, %v5168_v54  ;;  %19417 = vmatmul.mubr.msk.bf16.vlgmr.msra.gmra.mxu0 %vm925_vm3, %v5171_v52 }
 0xc2a   :  { %19409 = vmatmul.mubr.msk.bf16.vlgmr.msra.gmra.mxu1 %vm925_vm3, %v5169_v51  ;;  %19429 = vmatpush3.bf16.msra.mxu0 %v5582_v50 }
 0xc2b   :  { %19421 = vmatpush3.bf16.msra.mxu1 %v5525_v31  ;;  %19430 = vmatprep.subr.bf16.mxu0 %v22610_v60  ;;  %v20599_v53 = vpop.eup %20598 }
 0xc2c   :  { %19422 = vmatprep.subr.bf16.mxu1 %v22607_v24  ;;  %v5156_v17 = vmul.f32 %v20599_v53, %v22938_v15 }
 0xc2e   :  { %19431 = vmatpush3.bf16.msra.mxu0 %v22610_v60  ;;  %v5173_v60 = vpack.c.bf16 %v5156_v17, %v5156_v17 }
 0xc2f   :  { %19423 = vmatpush3.bf16.msra.mxu1 %v22607_v24  ;;  %v20601_v42 = vpop.eup %20600 }
 0xc30   :  { %v20603_v57 = vpop.eup %20602  ;;  %v5154_v29 = vmul.f32 %v20601_v42, %v22944_v0  ;;  %v26637_v0 = vmov 0  }
 0xc31   :  { %v5157_v32 = vmul.f32 %v20603_v57, %v22942_v48  ;;  %v20004_v48 = vld [vmem:[%s26595_s10 + $0x18] sm:$0xff]  }
 0xc32   :  { %v20605_v10 = vpop.eup %20604  ;;  %19436 = vmatprep.subr.bf16.mxu1 %v20004_v48 }
 0xc33   :  { %v20607_v38 = vpop.eup %20606  ;;  %v5155_v40 = vmul.f32 %v20605_v10, %v22950_v61  ;;  %v20005_v61 = vld [vmem:[%s26595_s10 + $0x10] sm:$0xff]  }
 0xc34   :  { %v5158_v19 = vmul.f32 %v20607_v38, %v22952_v62 }
 0xc35   :  { %v5172_v59 = vpack.c.bf16 %v5155_v40, %v5154_v29 }
 0xc36   :  { %v20609_v44 = vpop.eup %20608  ;;  %v5174_v16 = vpack.c.bf16 %v5158_v19, %v5157_v32 }
 0xc37   :  { %v5159_v24 = vmul.f32 %v20609_v44, %v22958_v20  ;;  %19424 = vmatprep.mubr.msk.bf16.mxu1 %vm925_vm3, %v5172_v59 }
 0xc38   :  { %19425 = vmatmul.mubr.msk.bf16.vlgmr.msra.gmra.mxu1 %vm925_vm3, %v5173_v60  ;;  %19432 = vmatprep.mubr.msk.bf16.mxu0 %vm925_vm3, %v5174_v16 }
 0xc39   :  { %v5175_v15 = vpack.c.bf16 %v5159_v24, %v5159_v24  ;;  %19437 = vmatpush3.bf16.msra.mxu1 %v20004_v48 }
 0xc3a   :  { %19438 = vmatprep.subr.bf16.mxu1 %v20005_v61 }
 0xc3b   :  { %19433 = vmatmul.mubr.msk.bf16.vlgmr.msra.gmra.mxu0 %vm925_vm3, %v5175_v15 }
 0xc3c   :  { %6140 = vmatprep.mubr.bf16.mxu0 %v26637_v0 }
 0xc3d   :  { %19439 = vmatpush3.bf16.msra.mxu1 %v20005_v61 }
 0xcca   :  { %v19386_v62 = vpop.f32.mrf.mxu0 }
 0xccb   :  { %v19378_v20 = vpop.f32.mrf.mxu1  ;;  %v5663_v12 = vsel %vm1694_vm4, %v19386_v62, 0.0 }
 0xccc   :  { %v5276_v45 = vpop.f32.mrf.mxu0  ;;  %v5662_v49 = vsel %vm1694_vm4, %v19378_v20, 0.0 }
 0xccd   :  { %v5219_v13 = vpop.f32.mrf.mxu1  ;;  %v5633_v37 = vsel %vm112_vm0, %v5276_v45, 0.0  ;;  %v5664_v11 = vadd.f32 %v5663_v12, %v5662_v49 }
 0xcce   :  { %v19387_v9 = vpop.f32.mrf.mxu0  ;;  %v5632_v25 = vsel %vm112_vm0, %v5219_v13, 0.0 }
 0xccf   :  { %v19379_v63 = vpop.f32.mrf.mxu1  ;;  %v5634_v54 = vadd.f32 %v5633_v37, %v5632_v25 }
 0xcd0   :  { %v5279_v30 = vpop.f32.mrf.mxu0 }
 0xcd1   :  { %v5222_v35 = vpop.f32.mrf.mxu1  ;;  %v5648_v8 = vsel %vm112_vm0, %v5279_v30, 0.0 }
 0xcd2   :  { %v5647_v55 = vsel %vm112_vm0, %v5222_v35, 0.0 }
 0xcd3   :  { %v5649_v26 = vadd.f32 %v5648_v8, %v5647_v55  ;;  %v16331_v55 = vld [vmem:[%s26596_s11 + $0x1] ss:$0 sm:$0xff] }
 0xcd9   :  { %v19402_v56 = vpop.f32.mrf.mxu0 }
 0xcda   :  { %v19394_v3 = vpop.f32.mrf.mxu1  ;;  %v5667_v57 = vsel %vm1694_vm4, %v19402_v56, 0.0 }
 0xcdb   :  { %v5390_v6 = vpop.f32.mrf.mxu0  ;;  %v5665_v14 = vsel %vm1694_vm4, %v19394_v3, 0.0 }
 0xcdc   :  { %v5333_v39 = vpop.f32.mrf.mxu1  ;;  %v5666_v50 = vadd.f32 %v5665_v14, %v5664_v11  ;;  %v5637_v38 = vsel %vm112_vm0, %v5390_v6, 0.0 }
 0xcdd   :  { %v19403_v2 = vpop.f32.mrf.mxu0  ;;  %v5635_v52 = vsel %vm112_vm0, %v5333_v39, 0.0 }
 0xcde   :  { %v19395_v46 = vpop.f32.mrf.mxu1  ;;  %v5636_v31 = vadd.f32 %v5635_v52, %v5634_v54  ;;  %v5668_v17 = vadd.f32 %v5667_v57, %v5666_v50 }
 0xcdf   :  { %v5393_v4 = vpop.f32.mrf.mxu0 }
 0xce0   :  { %v5336_v22 = vpop.f32.mrf.mxu1  ;;  %v5638_v40 = vadd.f32 %v5637_v38, %v5636_v31  ;;  %v5652_v32 = vsel %vm112_vm0, %v5393_v4, 0.0 }
 0xce1   :  { %v5650_v51 = vsel %vm112_vm0, %v5336_v22, 0.0 }
 0xce2   :  { %v5651_v53 = vadd.f32 %v5650_v51, %v5649_v26 }
 0xce4   :  { %v5653_v59 = vadd.f32 %v5652_v32, %v5651_v53 }
 0xce9   :  { %v19418_v43 = vpop.f32.mrf.mxu0 }
 0xcea   :  { %v19410_v1 = vpop.f32.mrf.mxu1  ;;  %v5671_v61 = vsel %vm1694_vm4, %v19418_v43, 0.0 }
 0xceb   :  { %v5504_v18 = vpop.f32.mrf.mxu0  ;;  %v5669_v10 = vsel %vm1694_vm4, %v19410_v1, 0.0 }
 0xcec   :  { %v5447_v34 = vpop.f32.mrf.mxu1  ;;  %v5670_v44 = vadd.f32 %v5669_v10, %v5668_v17  ;;  %v5641_v13 = vsel %vm112_vm0, %v5504_v18, 0.0 }
 0xced   :  { %v19419_v5 = vpop.f32.mrf.mxu0  ;;  %v5639_v29 = vsel %vm112_vm0, %v5447_v34, 0.0 }
 0xcee   :  { %v19411_v7 = vpop.f32.mrf.mxu1  ;;  %v5640_v16 = vadd.f32 %v5639_v29, %v5638_v40  ;;  %v5672_v45 = vadd.f32 %v5671_v61, %v5670_v44  ;;  %v16357_v61 = vld [vmem:[%s26597_s12 + $0x188] sm:$0xff] }
 0xcef   :  { %v5507_v24 = vpop.f32.mrf.mxu0 }
 0xcf0   :  { %v5450_v42 = vpop.f32.mrf.mxu1  ;;  %v5642_v30 = vadd.f32 %v5641_v13, %v5640_v16  ;;  %v5656_v35 = vsel %vm112_vm0, %v5507_v24, 0.0  ;;  %v16340_v13 = vld [vmem:[%s26597_s12 + $0x100] sm:$0xff] }
 0xcf1   :  { %v5654_v19 = vsel %vm112_vm0, %v5450_v42, 0.0 }
 0xcf2   :  { %v5655_v15 = vadd.f32 %v5654_v19, %v5653_v59 }
 0xcf4   :  { %v5657_v3 = vadd.f32 %v5656_v35, %v5655_v15  ;;  %v16356_v15 = vld [vmem:[%s26597_s12 + $0x180] sm:$0xff] }
 0xcf8   :  { %v19426_v60 = vpop.f32.mrf.mxu1 }
 0xcf9   :  { %v5673_v62 = vsel %vm1694_vm4, %v19426_v60, 0.0 }
 0xcfa   :  { %v5561_v48 = vpop.f32.mrf.mxu1  ;;  %v5674_v6 = vadd.f32 %v5673_v62, %v5672_v45  ;;  %v16365_v45 = vld [vmem:[%s26597_s12 + $0x1c8] sm:$0xff] }
 0xcfb   :  { %v19434_v20 = vpop.f32.mrf.mxu0  ;;  %v5643_v9 = vsel %vm112_vm0, %v5561_v48, 0.0  ;;  %v16364_v48 = vld [vmem:[%s26597_s12 + $0x1c0] sm:$0xff] }
 0xcfc   :  { %v19427_v63 = vpop.f32.mrf.mxu1  ;;  %v5644_v2 = vadd.f32 %v5643_v9, %v5642_v30  ;;  %v5675_v46 = vsel %vm1694_vm4, %v19434_v20, 0.0  ;;  %v16390_v62 = vcombine.low %v16356_v15, %v16364_v48  ;;  %v16391_v20 = vcombine.high %v16356_v15, %v16364_v48  ;;  %v16348_v9 = vld [vmem:[%s26597_s12 + $0x140] sm:$0xff] }
 0xcfd   :  { %v5618_v56 = vpop.f32.mrf.mxu0  ;;  %v5676_v34 = vadd.f32 %v5675_v46, %v5674_v6  ;;  %v16392_v63 = vcombine.low %v16357_v61, %v16365_v45  ;;  %v16393_v30 = vcombine.high %v16357_v61, %v16365_v45  ;;  %v16375_v35 = vcombine.high %v16340_v13, %v16348_v9  ;;  %v16358_v46 = vld [vmem:[%s26597_s12 + $0x190] sm:$0xff] }
 0xcfe   :  { %v5564_v39 = vpop.f32.mrf.mxu1  ;;  %v5645_v43 = vsel %vm112_vm0, %v5618_v56, 0.0  ;;  %v16341_v56 = vld [vmem:[%s26597_s12 + $0x108] sm:$0xff]  ;;  %6120 = vmatprep.subr.bf16.mxu0 %v16391_v20 }
 0xcff   :  { %v5658_v4 = vsel %vm112_vm0, %v5564_v39, 0.0  ;;  %v19435_v22 = vpop.f32.mrf.mxu0  ;;  %v5646_v12 = vadd.f32 %v5645_v43, %v5644_v2  ;;  %v5678_v37 = vpack.c.bf16 %v5676_v34, %v5676_v34  ;;  %6121 = vmatpush1.bf16.msra.mxu0 %v16390_v62  ;;  %6171 = vmatprep.subr.bf16.mxu1 %v16393_v30  ;;  %v16374_v39 = vcombine.low %v16340_v13, %v16348_v9  ;;  %v16344_v13 = vld [vmem:[%s26597_s12 + $0x120] sm:$0xff]  ;;  %v16353_v30 = vld [vmem:[%s26597_s12 + $0x168] sm:$0xff] }
 0xd00   :  { %v5659_v1 = vadd.f32 %v5658_v4, %v5657_v3  ;;  %v16349_v3 = vld [vmem:[%s26597_s12 + $0x148] sm:$0xff]  ;;  %6122 = vmatprep.subr.bf16.mxu0 %v16375_v35  ;;  %v16366_v4 = vld [vmem:[%s26597_s12 + $0x1d0] sm:$0xff]  ;;  %v16359_v22 = vld [vmem:[%s26597_s12 + $0x198] sm:$0xff] }
 0xd01   :  { %v5621_v18 = vpop.f32.mrf.mxu0  ;;  %v16377_v6 = vcombine.high %v16341_v56, %v16349_v3  ;;  %v16376_v2 = vcombine.low %v16341_v56, %v16349_v3  ;;  %v16394_v43 = vcombine.low %v16358_v46, %v16366_v4  ;;  %v16352_v9 = vld [vmem:[%s26597_s12 + $0x160] sm:$0xff] }
 0xd02   :  { %v5660_v49 = vsel %vm112_vm0, %v5621_v18, 0.0  ;;  %v16367_v18 = vld [vmem:[%s26597_s12 + $0x1d8] sm:$0xff]  ;;  %v16383_v3 = vcombine.high %v16344_v13, %v16352_v9 }
 0xd03   :  { %v5661_v5 = vadd.f32 %v5660_v49, %v5659_v1  ;;  %6123 = vmatpush1.bf16.msra.mxu0 %v16374_v39  ;;  %v16395_v1 = vcombine.high %v16358_v46, %v16366_v4  ;;  %v16396_v34 = vcombine.low %v16359_v22, %v16367_v18  ;;  %v16397_v49 = vcombine.high %v16359_v22, %v16367_v18  ;;  %v16362_v39 = vld [vmem:[%s26597_s12 + $0x1b0] sm:$0xff]  ;;  %v16363_v46 = vld [vmem:[%s26597_s12 + $0x1b8] sm:$0xff] }
 0xd04   :  { %v16371_v4 = vld [vmem:[%s26597_s12 + $0x1f8] sm:$0xff]  ;;  %v16382_v22 = vcombine.low %v16344_v13, %v16352_v9  ;;  %v20034_v13 = vld [vmem:[%s26599_s14 + $0x440] sm:$0xff]  }
 0xd05   :  { %v5677_v25 = vpack.c.bf16 %v5661_v5, %v5646_v12  ;;  %6222 = vmatprep.subr.bf16.mxu0 %v16395_v1  ;;  %v16405_v18 = vcombine.high %v16363_v46, %v16371_v4  ;;  %v20035_v9 = vld [vmem:[%s26599_s14 + $0x4c0] sm:$0xff]  }
 0xd07   :  { %19440 = vmatprep.mubr.msk.bf16.mxu1 %vm112_vm0, %v5677_v25 }
 0xd08   :  { %19441 = vmatmul.mubr.msk.bf16.vlgmr.msra.gmra.mxu1 %vm112_vm0, %v5678_v37 }
 0xd09   :  { %6191 = vmatprep.mubr.bf16.mxu1 %v26637_v0  ;;  %6172 = vmatpush1.bf16.msra.mxu1 %v16392_v63  ;;  %v16345_v63 = vld [vmem:[%s26597_s12 + $0x128] sm:$0xff] }
 0xd0a   :  { %6173 = vmatprep.subr.bf16.mxu1 %v16377_v6  ;;  %v16385_v6 = vcombine.high %v16345_v63, %v16353_v30 }
 0xd0d   :  { %6174 = vmatpush1.bf16.msra.mxu1 %v16376_v2  ;;  %v16370_v2 = vld [vmem:[%s26597_s12 + $0x1f0] sm:$0xff] }
 0xd0e   :  { %6273 = vmatprep.subr.bf16.mxu1 %v16397_v49  ;;  %v16403_v1 = vcombine.high %v16362_v39, %v16370_v2  ;;  %v16354_v49 = vld [vmem:[%s26597_s12 + $0x170] sm:$0xff] }
 0xdc8   :  { %v19442_v7 = vpop.f32.mrf.mxu1 }
 0xdc9   :  { %v5753_v14 = vadd.f32 %v19442_v7, %v16331_v55 }
 0xdca   :  { %v5744_v8 = vpop.f32.mrf.mxu1 }
 0xdcb   :  { %v5745_v11 = vadd.f32 %v16331_v55, %v5744_v8  ;;  %v5760_v26 = vadd.f32 %v5753_v14, %v22437_v47 }
 0xdcc   :  { %v19443_v52 = vpop.f32.mrf.mxu1 }
 0xdcd   :  { %v5758_v54 = vadd.f32 %v5745_v11, %v22431_v28  ;;  %v5771_v57 = vsel %vm1694_vm4, %v5760_v26, 0.0 }
 0xdce   :  { %v5747_v51 = vpop.f32.mrf.mxu1 }
 0xdcf   :  { %v5748_v50 = vadd.f32 %v16331_v55, %v5747_v51  ;;  %v5765_v31 = vsel %vm112_vm0, %v5758_v54, 0.0  ;;  %v16338_v51 = vld [vmem:[%s26601_s16 + $0x1] ss:$0 sm:$0xff] }
 0xdd0   :  { %5766 = vadd.xlane.f32.xlu0 %v5765_v31 }
 0xdd1   :  { %v5759_v53 = vadd.f32 %v5748_v50, %v22433_v33 }
 0xdd3   :  { %v5768_v42 = vsel %vm112_vm0, %v5759_v53, 0.0 }
 0xdd4   :  { %5769 = vadd.xlane.f32.xlu1 %v5768_v42  ;;  %5772 = vadd.xlane.f32.xlu0 %v5771_v57  ;;  %v16339_v42 = vld [vmem:[%s26602_s17 + $0x1] ss:$0 sm:$0xff] }
 0xe59   :  { %v5767_v10 = vpop.xlane.xlu0 %5766 }
 0xe5a   :  { %v5774_v17 = vmul.f32 0.03125, %v5767_v10 }
 0xe5c   :  { %v23077_v38 = vsub.f32 %v5758_v54, %v5774_v17  ;;  %v16342_v17 = vld [vmem:[%s26597_s12 + $0x110] sm:$0xff] }
 0xe5d   :  { %v5770_v28 = vpop.xlane.xlu1 %5769  ;;  %v5773_v29 = vpop.xlane.xlu0 %5772 }
 0xe5e   :  { %v5775_v40 = vmul.f32 0.03125, %v5770_v28  ;;  %v5776_v47 = vmul.f32 0.03125, %v5773_v29  ;;  %v5780_v32 = vmul.f32 %v23077_v38, %v23077_v38  ;;  %v16350_v29 = vld [vmem:[%s26597_s12 + $0x150] sm:$0xff] }
 0xe5f   :  { %v16378_v48 = vcombine.low %v16342_v17, %v16350_v29 }
 0xe60   :  { %v5778_v19 = vsub.f32 %v5759_v53, %v5775_v40  ;;  %v23081_v59 = vsub.f32 %v5760_v26, %v5776_v47  ;;  %v5783_v33 = vsel %vm112_vm0, %v5780_v32, 0.0  ;;  %v16343_v40 = vld [vmem:[%s26597_s12 + $0x118] sm:$0xff] }
 0xe61   :  { %5784 = vadd.xlane.f32.xlu1 %v5783_v33  ;;  %v16351_v47 = vld [vmem:[%s26597_s12 + $0x158] sm:$0xff] }
 0xe62   :  { %v5781_v44 = vmul.f32 %v5778_v19, %v5778_v19  ;;  %v5782_v60 = vmul.f32 %v23081_v59, %v23081_v59  ;;  %v16381_v33 = vcombine.high %v16343_v40, %v16351_v47  ;;  %v16380_v61 = vcombine.low %v16343_v40, %v16351_v47  ;;  %v20019_v40 = vld [vmem:[%s26599_s14 + $0x4e0] sm:$0xff]  }
 0xe63   :  { %v20020_v47 = vld [vmem:[%s26599_s14 + $0x420] sm:$0xff]  }
 0xe64   :  { %v5786_v16 = vsel %vm112_vm0, %v5781_v44, 0.0  ;;  %v5789_v24 = vsel %vm1694_vm4, %v5782_v60, 0.0  ;;  %v16360_v44 = vld [vmem:[%s26597_s12 + $0x1a0] sm:$0xff] }
 0xe65   :  { %5787 = vadd.xlane.f32.xlu0 %v5786_v16  ;;  %5790 = vadd.xlane.f32.xlu1 %v5789_v24  ;;  %v16368_v60 = vld [vmem:[%s26597_s12 + $0x1e0] sm:$0xff]  ;;  %v16361_v16 = vld [vmem:[%s26597_s12 + $0x1a8] sm:$0xff] }
 0xe66   :  { %v16369_v24 = vld [vmem:[%s26597_s12 + $0x1e8] sm:$0xff]  ;;  %v16399_v62 = vcombine.high %v16360_v44, %v16368_v60  ;;  %v16398_v35 = vcombine.low %v16360_v44, %v16368_v60  ;;  %v20025_v44 = vld [vmem:[%s26599_s14 + $0x498] sm:$0xff]   ;;  %v20026_v60 = vld [vmem:[%s26599_s14 + $0x450] sm:$0xff]  }
 0xe67   :  { %v16401_v20 = vcombine.high %v16361_v16, %v16369_v24  ;;  %v16400_v56 = vcombine.low %v16361_v16, %v16369_v24  ;;  %v20027_v16 = vld [vmem:[%s26599_s14 + $0x4d0] sm:$0xff]  }
 0xe68   :  { %v20028_v24 = vld [vmem:[%s26599_s14 + $0x410] sm:$0xff]  }
 0xeea   :  { %v5785_v12 = vpop.xlane.xlu1 %5784 }
 0xeeb   :  { %v5792_v5 = vmul.f32 0.03125, %v5785_v12  ;;  %v16347_v12 = vld [vmem:[%s26597_s12 + $0x138] sm:$0xff] }
 0xeed   :  { %v5795_v25 = vadd.f32 1e-05, %v5792_v5  ;;  %v16355_v5 = vld [vmem:[%s26597_s12 + $0x178] sm:$0xff] }
 0xeee   :  { %v5791_v37 = vpop.xlane.xlu1 %5790  ;;  %v5788_v7 = vpop.xlane.xlu0 %5787 }
 0xeef   :  { %20610 = vrsqrt.f32 %v5795_v25  ;;  %v5794_v55 = vmul.f32 0.03125, %v5791_v37  ;;  %v5793_v8 = vmul.f32 0.03125, %v5788_v7  ;;  %v16402_v25 = vcombine.low %v16362_v39, %v16370_v2 }
 0xef0   :  { %v16404_v37 = vcombine.low %v16363_v46, %v16371_v4 }
 0xef1   :  { %v5797_v14 = vadd.f32 1e-05, %v5794_v55  ;;  %v5796_v11 = vadd.f32 1e-05, %v5793_v8  ;;  %v16389_v55 = vcombine.high %v16347_v12, %v16355_v5 }
 0xef3   :  { %20612 = vrsqrt.f32 %v5797_v14  ;;  %v16388_v14 = vcombine.low %v16347_v12, %v16355_v5 }
 0xef4   :  { %20614 = vrsqrt.f32 %v5796_v11  ;;  %v20006_v11 = vld [vmem:[%s26599_s14 + $0x478] sm:$0xff]  }
 0xefc   :  { %v20611_v52 = vpop.eup %20610 }
 0xefd   :  { %v5801_v54 = vmul.f32 %v20611_v52, %v23077_v38  ;;  %v20007_v52 = vld [vmem:[%s26599_s14 + $0x4f8] sm:$0xff]  }
 0xeff   :  { %v5810_v31 = vmul.f32 %v16338_v51, %v5801_v54  ;;  %v20008_v54 = vld [vmem:[%s26599_s14 + $0x438] sm:$0xff]  }
 0xf00   :  { %v20613_v26 = vpop.eup %20612 }
 0xf01   :  { %v20615_v50 = vpop.eup %20614  ;;  %v5803_v57 = vmul.f32 %v20613_v26, %v23081_v59  ;;  %v23135_v38 = vadd.f32 %v16339_v42, %v5810_v31  ;;  %v16379_v59 = vcombine.high %v16342_v17, %v16350_v29  ;;  %v20010_v26 = vld [vmem:[%s26599_s14 + $0x470] sm:$0xff]   ;;  %v20017_v17 = vld [vmem:[%s26599_s14 + $0x4a8] sm:$0xff]   ;;  %v20018_v29 = vld [vmem:[%s26599_s14 + $0x460] sm:$0xff]  }
 0xf02   :  { %v5802_v53 = vmul.f32 %v20615_v50, %v5778_v19  ;;  %v20011_v50 = vld [vmem:[%s26599_s14 + $0x4f0] sm:$0xff]  }
 0xf03   :  { %v5812_v32 = vmul.f32 %v16338_v51, %v5803_v57  ;;  %v20012_v31 = vld [vmem:[%s26599_s14 + $0x430] sm:$0xff]   ;;  %v20015_v57 = vld [vmem:[%s26599_s14 + $0x4e8] sm:$0xff]  }
 0xf04   :  { %v5811_v10 = vmul.f32 %v16338_v51, %v5802_v53  ;;  %v20009_v51 = vld [vmem:[%s26599_s14 + $0x4b8] sm:$0xff]   ;;  %v20013_v53 = vld [vmem:[%s26599_s14 + $0x4b0] sm:$0xff]  }
 0xf05   :  { %v23170_v15 = vadd.f32 %v16339_v42, %v5812_v32  ;;  %v20021_v32 = vld [vmem:[%s26599_s14 + $0x4a0] sm:$0xff]  }
 0xf06   :  { %v23137_v28 = vadd.f32 %v16339_v42, %v5811_v10  ;;  %v20014_v42 = vld [vmem:[%s26599_s14 + $0x468] sm:$0xff]  }
 0xf07   :  { %v23174_v45 = vpack.c.bf16 %v23170_v15, %v23170_v15  ;;  %v20016_v10 = vld [vmem:[%s26599_s14 + $0x428] sm:$0xff]  }
 0xf08   :  { %v23150_v19 = vpack.c.bf16 %v23137_v28, %v23135_v38 }
 0xf0a   :  { %16406 = vmatmul.mubr.msk.bf16.vlgmr.msra.gmra.mxu0 %vm112_vm0, %v23150_v19  ;;  %16408 = vmatmul.mubr.msk.bf16.vlgmr.msra.gmra.mxu1 %vm112_vm0, %v23150_v19 }
 0xf0b   :  { %6150 = vmatprep.mubr.bf16.mxu0 %v26637_v0  ;;  %6201 = vmatprep.mubr.bf16.mxu1 %v26637_v0 }
 0xf0c   :  { %6223 = vmatpush1.bf16.msra.mxu0 %v16394_v43  ;;  %6274 = vmatpush1.bf16.msra.mxu1 %v16396_v34  ;;  %v16384_v43 = vcombine.low %v16345_v63, %v16353_v30  ;;  %v16346_v34 = vld [vmem:[%s26597_s12 + $0x130] sm:$0xff]  ;;  %v20036_v63 = vld [vmem:[%s26599_s14 + $0x400] sm:$0xff]  }
 0xf0d   :  { %6224 = vmatprep.subr.bf16.mxu0 %v16379_v59  ;;  %6275 = vmatprep.subr.bf16.mxu1 %v16381_v33  ;;  %v16387_v7 = vcombine.high %v16346_v34, %v16354_v49  ;;  %v16386_v8 = vcombine.low %v16346_v34, %v16354_v49  ;;  %v20023_v59 = vld [vmem:[%s26599_s14 + $0x4d8] sm:$0xff]   ;;  %v20037_v30 = vld [vmem:[%s26599_s14 + $0x480] sm:$0xff]  }
 0xf0e   :  { %v20024_v33 = vld [vmem:[%s26599_s14 + $0x418] sm:$0xff]  }
 0xf10   :  { %6225 = vmatpush1.bf16.msra.mxu0 %v16378_v48  ;;  %6276 = vmatpush1.bf16.msra.mxu1 %v16380_v61  ;;  %v20029_v48 = vld [vmem:[%s26599_s14 + $0x490] sm:$0xff]   ;;  %v20030_v61 = vld [vmem:[%s26599_s14 + $0x448] sm:$0xff]  }
 0xf11   :  { %6324 = vmatprep.subr.bf16.mxu0 %v16399_v62  ;;  %6375 = vmatprep.subr.bf16.mxu1 %v16401_v20  ;;  %v20031_v62 = vld [vmem:[%s26599_s14 + $0x4c8] sm:$0xff]  }
 0xf12   :  { %16407 = vmatmul.mubr.msk.bf16.gmra.mxu0 %vm112_vm0, %v23174_v45  ;;  %16409 = vmatmul.mubr.msk.bf16.gmra.mxu1 %vm112_vm0, %v23174_v45  ;;  %v20032_v20 = vld [vmem:[%s26599_s14 + $0x408] sm:$0xff]  }
 0xf13   :  { %6242 = vmatprep.mubr.bf16.mxu0 %v26637_v0  ;;  %6293 = vmatprep.mubr.bf16.mxu1 %v26637_v0 }
 0xf1a   :  { %16410 = vmatmul.mubr.msk.bf16.vlgmr.msra.gmra.mxu0 %vm112_vm0, %v23150_v19  ;;  %16412 = vmatmul.mubr.msk.bf16.vlgmr.msra.gmra.mxu1 %vm112_vm0, %v23150_v19 }
 0xf1b   :  { %6252 = vmatprep.mubr.bf16.mxu0 %v26637_v0  ;;  %6303 = vmatprep.mubr.bf16.mxu1 %v26637_v0 }
 0xf1c   :  { %6325 = vmatpush1.bf16.msra.mxu0 %v16398_v35  ;;  %6376 = vmatpush1.bf16.msra.mxu1 %v16400_v56  ;;  %v20038_v35 = vld [vmem:[%s26599_s14 + $0x578] sm:$0xff]  }
 0xf1d   :  { %6326 = vmatprep.subr.bf16.mxu0 %v16383_v3  ;;  %6377 = vmatprep.subr.bf16.mxu1 %v16385_v6  ;;  %v20039_v56 = vld [vmem:[%s26599_s14 + $0x5f8] sm:$0xff]   ;;  %v23357_v3 = vld [vmem:[%s26598_s13 + $0x10] sm:$0xff] }
 0xf1e   :  { %v5869_v2 = vrot.slane %v23357_v3, %v21940_v41  ;;  %v5877_v46 = vrot.slane %v23357_v3, %v21943_v21  ;;  %v5865_v4 = vrot.slane %v23357_v3, %v21946_v23 }
 0xf20   :  { %6327 = vmatpush1.bf16.msra.mxu0 %v16382_v22  ;;  %6378 = vmatpush1.bf16.msra.mxu1 %v16384_v43  ;;  %v5873_v22 = vrot.slane %v23357_v3, %v21949_v58 }
 0xf21   :  { %6426 = vmatprep.subr.bf16.mxu0 %v16403_v1  ;;  %6477 = vmatprep.subr.bf16.mxu1 %v16405_v18 }
 0xf22   :  { %16411 = vmatmul.mubr.msk.bf16.gmra.mxu0 %vm112_vm0, %v23174_v45  ;;  %16413 = vmatmul.mubr.msk.bf16.gmra.mxu1 %vm112_vm0, %v23174_v45 }
 0xf23   :  { %6344 = vmatprep.mubr.bf16.mxu0 %v26637_v0  ;;  %6395 = vmatprep.mubr.bf16.mxu1 %v26637_v0 }
 0xf2a   :  { %16414 = vmatmul.mubr.msk.bf16.vlgmr.msra.gmra.mxu0 %vm112_vm0, %v23150_v19  ;;  %16416 = vmatmul.mubr.msk.bf16.vlgmr.msra.gmra.mxu1 %vm112_vm0, %v23150_v19 }
 0xf2b   :  { %6354 = vmatprep.mubr.bf16.mxu0 %v26637_v0  ;;  %6405 = vmatprep.mubr.bf16.mxu1 %v26637_v0 }
 0xf2c   :  { %6427 = vmatpush1.bf16.msra.mxu0 %v16402_v25  ;;  %6478 = vmatpush1.bf16.msra.mxu1 %v16404_v37 }
 0xf2d   :  { %6428 = vmatprep.subr.bf16.mxu0 %v16387_v7  ;;  %6479 = vmatprep.subr.bf16.mxu1 %v16389_v55 }
 0xf30   :  { %6429 = vmatpush1.bf16.msra.mxu0 %v16386_v8  ;;  %6480 = vmatpush1.bf16.msra.mxu1 %v16388_v14 }
 0xf31   :  { %18292 = vmatprep.subr.bf16.mxu0 %v20006_v11  ;;  %18320 = vmatprep.subr.bf16.mxu1 %v20007_v52 }
 0xf32   :  { %16415 = vmatmul.mubr.msk.bf16.gmra.mxu0 %vm112_vm0, %v23174_v45  ;;  %16417 = vmatmul.mubr.msk.bf16.gmra.mxu1 %vm112_vm0, %v23174_v45 }
 0xf33   :  { %6446 = vmatprep.mubr.bf16.mxu0 %v26637_v0  ;;  %6497 = vmatprep.mubr.bf16.mxu1 %v26637_v0 }
 0xf3a   :  { %16418 = vmatmul.mubr.msk.bf16.vlgmr.msra.gmra.mxu0 %vm112_vm0, %v23150_v19  ;;  %16420 = vmatmul.mubr.msk.bf16.vlgmr.msra.gmra.mxu1 %vm112_vm0, %v23150_v19  ;;  %v20022_v19 = vld [vmem:[%s26599_s14 + $0x458] sm:$0xff]  }
 0xf3b   :  { %6456 = vmatprep.mubr.bf16.mxu0 %v26637_v0  ;;  %6507 = vmatprep.mubr.bf16.mxu1 %v26637_v0 }
 0xf3c   :  { %18293 = vmatpush3.bf16.msra.mxu0 %v20008_v54  ;;  %18321 = vmatpush3.bf16.msra.mxu1 %v20009_v51 }
 0xf3d   :  { %18294 = vmatprep.subr.bf16.mxu0 %v20010_v26  ;;  %18322 = vmatprep.subr.bf16.mxu1 %v20011_v50 }
 0xf40   :  { %18295 = vmatpush3.bf16.msra.mxu0 %v20012_v31  ;;  %18323 = vmatpush3.bf16.msra.mxu1 %v20013_v53 }
 0xf41   :  { %18296 = vmatprep.subr.bf16.mxu0 %v20014_v42  ;;  %18324 = vmatprep.subr.bf16.mxu1 %v20015_v57 }
 0xf42   :  { %16419 = vmatmul.mubr.msk.bf16.gmra.mxu0 %vm112_vm0, %v23174_v45  ;;  %16421 = vmatmul.mubr.msk.bf16.gmra.mxu1 %vm112_vm0, %v23174_v45  ;;  %v20033_v45 = vld [vmem:[%s26599_s14 + $0x488] sm:$0xff]  }
 0xf44   :  { %18297 = vmatpush3.bf16.msra.mxu0 %v20016_v10  ;;  %18325 = vmatpush3.bf16.msra.mxu1 %v20017_v17 }
 0xf45   :  { %18298 = vmatprep.subr.bf16.mxu0 %v20018_v29  ;;  %18326 = vmatprep.subr.bf16.mxu1 %v20019_v40 }
 0xf48   :  { %18299 = vmatpush3.bf16.msra.mxu0 %v20020_v47  ;;  %18327 = vmatpush3.bf16.msra.mxu1 %v20021_v32 }
 0xf49   :  { %18300 = vmatprep.subr.bf16.mxu0 %v20022_v19  ;;  %18328 = vmatprep.subr.bf16.mxu1 %v20023_v59  ;;  %v20040_v59 = vld [vmem:[%s26599_s14 + $0x538] sm:$0xff]  }
 0xf4c   :  { %18301 = vmatpush3.bf16.msra.mxu0 %v20024_v33  ;;  %18329 = vmatpush3.bf16.msra.mxu1 %v20025_v44  ;;  %v20041_v33 = vld [vmem:[%s26599_s14 + $0x5b8] sm:$0xff]  }
 0xf4d   :  { %18302 = vmatprep.subr.bf16.mxu0 %v20026_v60  ;;  %18330 = vmatprep.subr.bf16.mxu1 %v20027_v16 }
 0xf50   :  { %18303 = vmatpush3.bf16.msra.mxu0 %v20028_v24  ;;  %18331 = vmatpush3.bf16.msra.mxu1 %v20029_v48 }
 0xf51   :  { %18304 = vmatprep.subr.bf16.mxu0 %v20030_v61  ;;  %18332 = vmatprep.subr.bf16.mxu1 %v20031_v62  ;;  %v20042_v62 = vld [vmem:[%s26599_s14 + $0x570] sm:$0xff]  }
 0xf54   :  { %18305 = vmatpush3.bf16.msra.mxu0 %v20032_v20  ;;  %18333 = vmatpush3.bf16.msra.mxu1 %v20033_v45  ;;  %v20043_v20 = vld [vmem:[%s26599_s14 + $0x5f0] sm:$0xff]  }
 0xf55   :  { %18306 = vmatprep.subr.bf16.mxu0 %v20034_v13  ;;  %18334 = vmatprep.subr.bf16.mxu1 %v20035_v9 }
 0xf58   :  { %18307 = vmatpush3.bf16.msra.mxu0 %v20036_v63  ;;  %18335 = vmatpush3.bf16.msra.mxu1 %v20037_v30 }
 0xf59   :  { %18348 = vmatprep.subr.bf16.mxu0 %v20038_v35  ;;  %18376 = vmatprep.subr.bf16.mxu1 %v20039_v56  ;;  %v20044_v56 = vld [vmem:[%s26599_s14 + $0x530] sm:$0xff]  }
 0xfca   :  { %v6142_v6 = vpop.f32.mrf.mxu0  ;;  %v6193_v39 = vpop.f32.mrf.mxu1 }
 0xfcb   :  { %v6143_v37 = vadd.f32 %v6142_v6, %v5865_v4  ;;  %v6194_v7 = vadd.f32 %v6193_v39, %v5873_v22  ;;  %v20045_v6 = vld [vmem:[%s26599_s14 + $0x5b0] sm:$0xff]  }
 0xfcc   :  { %v6144_v43 = vpop.f32.mrf.mxu0  ;;  %v6195_v1 = vpop.f32.mrf.mxu1 }
 0xfcd   :  { %v6145_v49 = vadd.f32 %v6144_v43, %v5869_v2  ;;  %v6196_v12 = vadd.f32 %v6195_v1, %v5877_v46  ;;  %v6516_v57 = vmax.f32 %v6143_v37, 0.0  ;;  %v6518_v10 = vmax.f32 %v6194_v7, 0.0  ;;  %v20047_v43 = vld [vmem:[%s26599_s14 + $0x5e8] sm:$0xff]  }
 0xfce   :  { %v6146_v18 = vpop.f32.mrf.mxu0  ;;  %v6197_v34 = vpop.f32.mrf.mxu1  ;;  %v23397_v1 = vrot.slane %v23357_v3, %v21977_v27 }
 0xfcf   :  { %v6147_v5 = vadd.f32 %v6146_v18, %v5865_v4  ;;  %v6198_v25 = vadd.f32 %v6197_v34, %v5873_v22  ;;  %v6517_v50 = vmax.f32 %v6145_v49, 0.0  ;;  %v6519_v31 = vmax.f32 %v6196_v12, 0.0  ;;  %v20048_v12 = vld [vmem:[%s26599_s14 + $0x528] sm:$0xff]  }
 0xfd0   :  { %v6148_v55 = vpop.f32.mrf.mxu0  ;;  %v6199_v8 = vpop.f32.mrf.mxu1  ;;  %v23401_v34 = vrot.slane %v23357_v3, %v21980_v36 }
 0xfd1   :  { %v6149_v14 = vadd.f32 %v6148_v55, %v5869_v2  ;;  %v6200_v11 = vadd.f32 %v6199_v8, %v5877_v46  ;;  %v6532_v52 = vmax.f32 %v6147_v5, 0.0  ;;  %v6534_v54 = vmax.f32 %v6198_v25, 0.0  ;;  %v20049_v5 = vld [vmem:[%s26599_s14 + $0x5a8] sm:$0xff]   ;;  %v20050_v8 = vld [vmem:[%s26599_s14 + $0x560] sm:$0xff]  }
 0xfd2   :  { %v6152_v51 = vpop.f32.mrf.mxu0  ;;  %v6203_v26 = vpop.f32.mrf.mxu1 }
 0xfd3   :  { %v6533_v53 = vmax.f32 %v6149_v14, 0.0  ;;  %v6535_v42 = vmax.f32 %v6200_v11, 0.0  ;;  %v6564_v44 = vpack.c.bf16 %v6532_v52, %v6516_v57  ;;  %v6566_v60 = vpack.c.bf16 %v6534_v54, %v6518_v10  ;;  %v20051_v14 = vld [vmem:[%s26599_s14 + $0x5e0] sm:$0xff]   ;;  %v20054_v10 = vld [vmem:[%s26599_s14 + $0x558] sm:$0xff]  }
 0xfd4   :  { %v6154_v17 = vpop.f32.mrf.mxu0  ;;  %v6205_v29 = vpop.f32.mrf.mxu1  ;;  %v6153_v16 = vadd.f32 %v6152_v51, %v5865_v4  ;;  %v6204_v24 = vadd.f32 %v6203_v26, %v5873_v22  ;;  %v20046_v22 = vld [vmem:[%s26599_s14 + $0x568] sm:$0xff]  }
 0xfd5   :  { %v6155_v40 = vadd.f32 %v6154_v17, %v5869_v2  ;;  %v6206_v47 = vadd.f32 %v6205_v29, %v5877_v46  ;;  %v6565_v32 = vpack.c.bf16 %v6533_v53, %v6517_v50  ;;  %v6567_v19 = vpack.c.bf16 %v6535_v42, %v6519_v31  ;;  %v20052_v31 = vld [vmem:[%s26599_s14 + $0x520] sm:$0xff]   ;;  %v20055_v17 = vld [vmem:[%s26599_s14 + $0x5d8] sm:$0xff]  }
 0xfd6   :  { %v6156_v48 = vpop.f32.mrf.mxu0  ;;  %v6207_v61 = vpop.f32.mrf.mxu1  ;;  %v6548_v39 = vmax.f32 %v6153_v16, 0.0  ;;  %v6550_v2 = vmax.f32 %v6204_v24, 0.0  ;;  %v20053_v53 = vld [vmem:[%s26599_s14 + $0x5a0] sm:$0xff]  }
 0xfd7   :  { %v6549_v45 = vmax.f32 %v6155_v40, 0.0  ;;  %v6551_v13 = vmax.f32 %v6206_v47, 0.0  ;;  %7661 = vmatprep.mubr.bf16.mxu0 %v6565_v32  ;;  %7709 = vmatprep.mubr.bf16.mxu1 %v6567_v19  ;;  %v20058_v61 = vld [vmem:[%s26599_s14 + $0x550] sm:$0xff]  }
 0xfd8   :  { %v6157_v9 = vpop.f32.mrf.mxu0  ;;  %v6208_v63 = vpop.f32.mrf.mxu1  ;;  %7662 = vmatmul.mubr.bf16.vlgmr.msra.gmra.mxu0 %v6564_v44  ;;  %7710 = vmatmul.mubr.bf16.vlgmr.msra.gmra.mxu1 %v6566_v60  ;;  %v6580_v25 = vpack.c.bf16 %v6548_v39, %v6548_v39  ;;  %v6582_v37 = vpack.c.bf16 %v6550_v2, %v6550_v2  ;;  %v20056_v44 = vld [vmem:[%s26599_s14 + $0x518] sm:$0xff]  }
 0xfd9   :  { %v6581_v30 = vpack.c.bf16 %v6549_v45, %v6549_v45  ;;  %v6583_v35 = vpack.c.bf16 %v6551_v13, %v6551_v13  ;;  %18349 = vmatpush3.bf16.msra.mxu0 %v20040_v59  ;;  %18377 = vmatpush3.bf16.msra.mxu1 %v20041_v33  ;;  %v20057_v60 = vld [vmem:[%s26599_s14 + $0x598] sm:$0xff]   ;;  %v20060_v13 = vld [vmem:[%s26599_s14 + $0x510] sm:$0xff]  }
 0xfda   :  { %v23385_v46 = vpop.f32.mrf.mxu0  ;;  %v23387_v4 = vpop.f32.mrf.mxu1  ;;  %18350 = vmatprep.subr.bf16.mxu0 %v20042_v62  ;;  %18378 = vmatprep.subr.bf16.mxu1 %v20043_v20  ;;  %v20059_v62 = vld [vmem:[%s26599_s14 + $0x5d0] sm:$0xff]  }
 0xfdb   :  { %7669 = vmatprep.mubr.bf16.mxu0 %v6581_v30  ;;  %7717 = vmatprep.mubr.bf16.mxu1 %v6583_v35  ;;  %v20061_v9 = vld [vmem:[%s26599_s14 + $0x590] sm:$0xff]   ;;  %v20062_v35 = vld [vmem:[%s26599_s14 + $0x548] sm:$0xff]  }
 0xfdc   :  { %v6246_v18 = vpop.f32.mrf.mxu0  ;;  %v6297_v49 = vpop.f32.mrf.mxu1  ;;  %v26639_v2 = vld [vmem:[#allocation7_spill] sm:$0xff] }
 0xfdd   :  { %18351 = vmatpush3.bf16.msra.mxu0 %v20044_v56  ;;  %18379 = vmatpush3.bf16.msra.mxu1 %v20045_v6  ;;  %v6247_v11 = vadd.f32 %v6246_v18, %v23397_v1  ;;  %v6298_v52 = vadd.f32 %v6297_v49, %v23401_v34  ;;  %v20063_v56 = vld [vmem:[%s26599_s14 + $0x5c8] sm:$0xff]  }
 0xfde   :  { %v6248_v7 = vpop.f32.mrf.mxu0  ;;  %v23409_v55 = vpop.f32.mrf.mxu1  ;;  %18352 = vmatprep.subr.bf16.mxu0 %v20046_v22  ;;  %18380 = vmatprep.subr.bf16.mxu1 %v20047_v43  ;;  %v26638_v6 = vld [vmem:[#allocation6_spill] sm:$0xff]  ;;  %v5889_v22 = vrot.slane %v23357_v3, %v26639_v2 }
 0xfdf   :  { %v6521_v29 = vmax.f32 %v6247_v11, 0.0  ;;  %v6523_v32 = vmax.f32 %v6298_v52, 0.0  ;;  %v5881_v39 = vrot.slane %v23357_v3, %v26638_v6 }
 0xfe0   :  { %v6250_v54 = vpop.f32.mrf.mxu0  ;;  %v6301_v51 = vpop.f32.mrf.mxu1  ;;  %7670 = vmatmul.mubr.bf16.gmra.mxu0 %v6580_v25  ;;  %7718 = vmatmul.mubr.bf16.gmra.mxu1 %v6582_v37  ;;  %v6300_v25 = vadd.f32 %v23409_v55, %v5889_v22  ;;  %v6296_v52 = vadd.f32 %v23387_v4, %v5889_v22  ;;  %v20070_v4 = vld [vmem:[%s26599_s14 + $0x678] sm:$0xff]  }
 0xfe1   :  { %v6251_v26 = vadd.f32 %v6250_v54, %v23397_v1  ;;  %v6302_v50 = vadd.f32 %v6301_v51, %v23401_v34  ;;  %18353 = vmatpush3.bf16.msra.mxu0 %v20048_v12  ;;  %18381 = vmatpush3.bf16.msra.mxu1 %v20049_v5  ;;  %v6249_v49 = vadd.f32 %v6248_v7, %v5881_v39  ;;  %v20064_v12 = vld [vmem:[%s26599_s14 + $0x508] sm:$0xff]   ;;  %v20066_v7 = vld [vmem:[%s26599_s14 + $0x540] sm:$0xff]  }
 0xfe2   :  { %v23427_v42 = vpop.f32.mrf.mxu0  ;;  %v23429_v57 = vpop.f32.mrf.mxu1  ;;  %18354 = vmatprep.subr.bf16.mxu0 %v20050_v8  ;;  %18382 = vmatprep.subr.bf16.mxu1 %v20051_v14  ;;  %v20065_v5 = vld [vmem:[%s26599_s14 + $0x588] sm:$0xff]   ;;  %v20067_v8 = vld [vmem:[%s26599_s14 + $0x5c0] sm:$0xff]   ;;  %v6245_v14 = vadd.f32 %v23385_v46, %v5881_v39  ;;  %v6538_v46 = vmax.f32 %v6300_v25, 0.0 }
 0xfe3   :  { %v6537_v40 = vmax.f32 %v6251_v26, 0.0  ;;  %v6539_v47 = vmax.f32 %v6302_v50, 0.0  ;;  %v6536_v26 = vmax.f32 %v6249_v49, 0.0  ;;  %v20068_v50 = vld [vmem:[%s26599_s14 + $0x500] sm:$0xff]  }
 0xfe4   :  { %v6256_v19 = vpop.f32.mrf.mxu0  ;;  %v6307_v59 = vpop.f32.mrf.mxu1 }
 0xfe5   :  { %18355 = vmatpush3.bf16.msra.mxu0 %v20052_v31  ;;  %18383 = vmatpush3.bf16.msra.mxu1 %v20053_v53  ;;  %v6569_v33 = vpack.c.bf16 %v6537_v40, %v6521_v29  ;;  %v6571_v48 = vpack.c.bf16 %v6539_v47, %v6523_v32  ;;  %v6257_v11 = vadd.f32 %v6256_v19, %v23397_v1  ;;  %v20069_v31 = vld [vmem:[%s26599_s14 + $0x580] sm:$0xff]   ;;  %v6522_v40 = vmax.f32 %v6296_v52, 0.0  ;;  %v23513_v47 = vld [vmem:[%s26598_s13 + $0x18] sm:$0xff] }
 0xfe6   :  { %v6258_v16 = vpop.f32.mrf.mxu0  ;;  %v6309_v24 = vpop.f32.mrf.mxu1  ;;  %18356 = vmatprep.subr.bf16.mxu0 %v20054_v10  ;;  %18384 = vmatprep.subr.bf16.mxu1 %v20055_v17  ;;  %v6308_v55 = vadd.f32 %v6307_v59, %v23401_v34  ;;  %v20071_v34 = vld [vmem:[%s26599_s14 + $0x6f8] sm:$0xff]   ;;  %v6520_v10 = vmax.f32 %v6245_v14, 0.0 }
 0xfe7   :  { %7757 = vmatprep.mubr.bf16.mxu0 %v6569_v33  ;;  %7805 = vmatprep.mubr.bf16.mxu1 %v6571_v48  ;;  %v6553_v17 = vmax.f32 %v6257_v11, 0.0  ;;  %v23521_v33 = vrot.slane %v23513_v47, %v21940_v41  ;;  %v6255_v16 = vadd.f32 %v23427_v42, %v5881_v39  ;;  %v6306_v24 = vadd.f32 %v23429_v57, %v5889_v22  ;;  %v20074_v57 = vld [vmem:[%s26599_s14 + $0x670] sm:$0xff]   ;;  %v20078_v11 = vld [vmem:[%s26599_s14 + $0x668] sm:$0xff]  }
 0xfe8   :  { %v6259_v20 = vpop.f32.mrf.mxu0  ;;  %v6310_v45 = vpop.f32.mrf.mxu1  ;;  %v6555_v29 = vmax.f32 %v6308_v55, 0.0  ;;  %v6568_v59 = vpack.c.bf16 %v6536_v26, %v6520_v10  ;;  %v20079_v55 = vld [vmem:[%s26599_s14 + $0x6e8] sm:$0xff]  }
 0xfe9   :  { %18357 = vmatpush3.bf16.msra.mxu0 %v20056_v44  ;;  %18385 = vmatpush3.bf16.msra.mxu1 %v20057_v60  ;;  %v23525_v44 = vrot.slane %v23513_v47, %v21943_v21  ;;  %v6570_v60 = vpack.c.bf16 %v6538_v46, %v6522_v40  ;;  %v20073_v20 = vld [vmem:[%s26599_s14 + $0x6b8] sm:$0xff]   ;;  %v6585_v45 = vpack.c.bf16 %v6553_v17, %v6553_v17  ;;  %v20081_v10 = vld [vmem:[%s26599_s14 + $0x6a8] sm:$0xff]   ;;  %v20082_v40 = vld [vmem:[%s26599_s14 + $0x660] sm:$0xff]  }
 0xfea   :  { %v23455_v63 = vpop.f32.mrf.mxu0  ;;  %v23457_v30 = vpop.f32.mrf.mxu1  ;;  %18358 = vmatprep.subr.bf16.mxu0 %v20058_v61  ;;  %18386 = vmatprep.subr.bf16.mxu1 %v20059_v62  ;;  %v20072_v62 = vld [vmem:[%s26599_s14 + $0x638] sm:$0xff]  }
 0xfec   :  { %v23469_v43 = vpop.f32.mrf.mxu0  ;;  %v23471_v18 = vpop.f32.mrf.mxu1 }
 0xfed   :  { %18359 = vmatpush3.bf16.msra.mxu0 %v20060_v13  ;;  %18387 = vmatpush3.bf16.msra.mxu1 %v20061_v9  ;;  %v6587_v13 = vpack.c.bf16 %v6555_v29, %v6555_v29  ;;  %v6349_v22 = vadd.f32 %v23469_v43, %v23521_v33  ;;  %v6400_v49 = vadd.f32 %v23471_v18, %v23525_v44  ;;  %v20077_v43 = vld [vmem:[%s26599_s14 + $0x6b0] sm:$0xff]  }
 0xfee   :  { %v23480_v37 = vpop.f32.mrf.mxu0  ;;  %v23482_v3 = vpop.f32.mrf.mxu1  ;;  %18360 = vmatprep.subr.bf16.mxu0 %v20062_v35  ;;  %18388 = vmatprep.subr.bf16.mxu1 %v20063_v56  ;;  %v20075_v35 = vld [vmem:[%s26599_s14 + $0x6f0] sm:$0xff]  }
 0xfef   :  { %v6527_v26 = vmax.f32 %v6400_v49, 0.0 }
 0xff0   :  { %v6352_v54 = vpop.f32.mrf.mxu0  ;;  %v6403_v51 = vpop.f32.mrf.mxu1 }
 0xff1   :  { %18361 = vmatpush3.bf16.msra.mxu0 %v20064_v12  ;;  %18389 = vmatpush3.bf16.msra.mxu1 %v20065_v5  ;;  %v6353_v9 = vadd.f32 %v6352_v54, %v23521_v33  ;;  %v6404_v42 = vadd.f32 %v6403_v51, %v23525_v44  ;;  %v6552_v12 = vmax.f32 %v6255_v16, 0.0  ;;  %v6554_v5 = vmax.f32 %v6306_v24, 0.0 }
 0xff2   :  { %v23500_v53 = vpop.f32.mrf.mxu0  ;;  %v23502_v1 = vpop.f32.mrf.mxu1  ;;  %18362 = vmatprep.subr.bf16.mxu0 %v20066_v7  ;;  %18390 = vmatprep.subr.bf16.mxu1 %v20067_v8  ;;  %v20076_v8 = vld [vmem:[%s26599_s14 + $0x630] sm:$0xff]   ;;  %v6525_v51 = vmax.f32 %v6349_v22, 0.0 }
 0xff3   :  { %v6541_v14 = vmax.f32 %v6353_v9, 0.0  ;;  %v6543_v18 = vmax.f32 %v6404_v42, 0.0  ;;  %v20091_v22 = vld [vmem:[%s26599_s14 + $0x6d0] sm:$0xff]  }
 0xff4   :  { %v23515_v32 = vpop.f32.mrf.mxu0  ;;  %v23517_v19 = vpop.f32.mrf.mxu1 }
 0xff5   :  { %18363 = vmatpush3.bf16.msra.mxu0 %v20068_v50  ;;  %18391 = vmatpush3.bf16.msra.mxu1 %v20069_v31  ;;  %v6584_v50 = vpack.c.bf16 %v6552_v12, %v6552_v12  ;;  %v6586_v31 = vpack.c.bf16 %v6554_v5, %v6554_v5  ;;  %v6573_v17 = vpack.c.bf16 %v6541_v14, %v6525_v51  ;;  %v20092_v5 = vld [vmem:[%s26599_s14 + $0x610] sm:$0xff]   ;;  %v20095_v14 = vld [vmem:[%s26599_s14 + $0x6c8] sm:$0xff]  }
 0xff6   :  { %v6360_v48 = vpop.f32.mrf.mxu0  ;;  %v6411_v61 = vpop.f32.mrf.mxu1  ;;  %18404 = vmatprep.subr.bf16.mxu0 %v20070_v4  ;;  %18432 = vmatprep.subr.bf16.mxu1 %v20071_v34  ;;  %v20080_v34 = vld [vmem:[%s26599_s14 + $0x628] sm:$0xff]   ;;  %v6575_v29 = vpack.c.bf16 %v6543_v18, %v6527_v26  ;;  %v5897_v18 = vrot.slane %v23513_v47, %v21946_v23 }
 0xff7   :  { %v20084_v61 = vld [vmem:[%s26599_s14 + $0x620] sm:$0xff]   ;;  %v20096_v51 = vld [vmem:[%s26599_s14 + $0x608] sm:$0xff]  }
 0xff8   :  { %7758 = vmatmul.mubr.bf16.vlgmr.msra.gmra.mxu0 %v6568_v59  ;;  %7806 = vmatmul.mubr.bf16.vlgmr.msra.gmra.mxu1 %v6570_v60  ;;  %v6361_v56 = vpop.f32.mrf.mxu0  ;;  %v6412_v39 = vpop.f32.mrf.mxu1  ;;  %v20083_v59 = vld [vmem:[%s26599_s14 + $0x6e0] sm:$0xff]   ;;  %v20097_v26 = vld [vmem:[%s26599_s14 + $0x688] sm:$0xff]  }
 0xff9   :  { %7765 = vmatprep.mubr.bf16.mxu0 %v6585_v45  ;;  %7813 = vmatprep.mubr.bf16.mxu1 %v6587_v13  ;;  %v20087_v45 = vld [vmem:[%s26599_s14 + $0x6d8] sm:$0xff]   ;;  %v20090_v39 = vld [vmem:[%s26599_s14 + $0x650] sm:$0xff]  }
 0xffa   :  { %18405 = vmatpush3.bf16.msra.mxu0 %v20072_v62  ;;  %18433 = vmatpush3.bf16.msra.mxu1 %v20073_v20  ;;  %v23547_v25 = vpop.f32.mrf.mxu0  ;;  %v23549_v7 = vpop.f32.mrf.mxu1  ;;  %v20085_v62 = vld [vmem:[%s26599_s14 + $0x6a0] sm:$0xff]   ;;  %v20086_v20 = vld [vmem:[%s26599_s14 + $0x658] sm:$0xff]  }
 0xffb   :  { %18406 = vmatprep.subr.bf16.mxu0 %v20074_v57  ;;  %18434 = vmatprep.subr.bf16.mxu1 %v20075_v35  ;;  %v20088_v35 = vld [vmem:[%s26599_s14 + $0x618] sm:$0xff]  }
 0xffc   :  { %v23563_v52 = vpop.f32.mrf.mxu0  ;;  %v23565_v54 = vpop.f32.mrf.mxu1  ;;  %v20089_v56 = vld [vmem:[%s26599_s14 + $0x698] sm:$0xff]  }
 0xffe   :  { %18407 = vmatpush3.bf16.msra.mxu0 %v20076_v8  ;;  %18435 = vmatpush3.bf16.msra.mxu1 %v20077_v43  ;;  %v23567_v46 = vpop.f32.mrf.mxu0  ;;  %v23569_v4 = vpop.f32.mrf.mxu1  ;;  %v20093_v8 = vld [vmem:[%s26599_s14 + $0x690] sm:$0xff]   ;;  %v20094_v43 = vld [vmem:[%s26599_s14 + $0x648] sm:$0xff]  }
 0xfff   :  { %18408 = vmatprep.subr.bf16.mxu0 %v20078_v11  ;;  %18436 = vmatprep.subr.bf16.mxu1 %v20079_v55  ;;  %v5905_v11 = vrot.slane %v23513_v47, %v21949_v58  ;;  %v6351_v55 = vadd.f32 %v23480_v37, %v5897_v18  ;;  %v20099_v37 = vld [vmem:[%s26599_s14 + $0x6c0] sm:$0xff]  }
0x1000   :  { %7766 = vmatmul.mubr.bf16.gmra.mxu0 %v6584_v50  ;;  %7814 = vmatmul.mubr.bf16.gmra.mxu1 %v6586_v31  ;;  %v23583_v60 = vpop.f32.mrf.mxu0  ;;  %v23585_v16 = vpop.f32.mrf.mxu1  ;;  %v20098_v31 = vld [vmem:[%s26599_s14 + $0x640] sm:$0xff]  }
0x1001   :  { %7853 = vmatprep.mubr.bf16.mxu0 %v6573_v17  ;;  %7901 = vmatprep.mubr.bf16.mxu1 %v6575_v29  ;;  %v6402_v50 = vadd.f32 %v23482_v3, %v5905_v11  ;;  %v6410_v17 = vadd.f32 %v23517_v19, %v23525_v44  ;;  %v6398_v3 = vadd.f32 %v23457_v30, %v5905_v11  ;;  %v6540_v29 = vmax.f32 %v6351_v55, 0.0  ;;  %v20103_v30 = vld [vmem:[%s26599_s14 + $0x7f8] sm:$0xff]  }
0x1002   :  { %18409 = vmatpush3.bf16.msra.mxu0 %v20080_v34  ;;  %18437 = vmatpush3.bf16.msra.mxu1 %v20081_v10  ;;  %v23587_v24 = vpop.f32.mrf.mxu0  ;;  %v23589_v48 = vpop.f32.mrf.mxu1  ;;  %v6347_v34 = vadd.f32 %v23455_v63, %v5897_v18  ;;  %v6359_v10 = vadd.f32 %v23515_v32, %v23521_v33  ;;  %v20102_v32 = vld [vmem:[%s26599_s14 + $0x778] sm:$0xff]  }
0x1003   :  { %18410 = vmatprep.subr.bf16.mxu0 %v20082_v40  ;;  %18438 = vmatprep.subr.bf16.mxu1 %v20083_v59  ;;  %v20100_v40 = vld [vmem:[%s26599_s14 + $0x600] sm:$0xff]   ;;  %v6542_v63 = vmax.f32 %v6402_v50, 0.0  ;;  %v6559_v44 = vmax.f32 %v6410_v17, 0.0 }
0x1004   :  { %v23603_v13 = vpop.f32.mrf.mxu0  ;;  %v23605_v9 = vpop.f32.mrf.mxu1  ;;  %v20101_v59 = vld [vmem:[%s26599_s14 + $0x680] sm:$0xff]   ;;  %v6524_v19 = vmax.f32 %v6347_v34, 0.0  ;;  %v6557_v33 = vmax.f32 %v6359_v10, 0.0  ;;  %v20113_v34 = vld [vmem:[%s26599_s14 + $0x7a8] sm:$0xff]  }
0x1006   :  { %18411 = vmatpush3.bf16.msra.mxu0 %v20084_v61  ;;  %18439 = vmatpush3.bf16.msra.mxu1 %v20085_v62  ;;  %v6462_v42 = vpop.f32.mrf.mxu0  ;;  %v6513_v57 = vpop.f32.mrf.mxu1  ;;  %v6526_v61 = vmax.f32 %v6398_v3, 0.0  ;;  %v6572_v62 = vpack.c.bf16 %v6540_v29, %v6524_v19  ;;  %v20114_v3 = vld [vmem:[%s26599_s14 + $0x760] sm:$0xff]   ;;  %v20121_v19 = vld [vmem:[%s26599_s14 + $0x798] sm:$0xff]  }
0x1007   :  { %18412 = vmatprep.subr.bf16.mxu0 %v20086_v20  ;;  %18440 = vmatprep.subr.bf16.mxu1 %v20087_v45  ;;  %v23669_v20 = vrot.slane %v23513_v47, %v21977_v27  ;;  %v23673_v45 = vrot.slane %v23513_v47, %v21980_v36  ;;  %v6357_v57 = vadd.f32 %v23500_v53, %v5897_v18  ;;  %v20109_v18 = vld [vmem:[%s26599_s14 + $0x7b0] sm:$0xff]   ;;  %v20115_v29 = vld [vmem:[%s26599_s14 + $0x7e0] sm:$0xff]  }
0x1008   :  { %v6463_v49 = vpop.f32.mrf.mxu0  ;;  %v6514_v12 = vpop.f32.mrf.mxu1  ;;  %v6574_v42 = vpack.c.bf16 %v6542_v63, %v6526_v61  ;;  %v20118_v63 = vld [vmem:[%s26599_s14 + $0x758] sm:$0xff]   ;;  %v20124_v61 = vld [vmem:[%s26599_s14 + $0x710] sm:$0xff]  }
0x1009   :  { %v6591_v49 = vpack.c.bf16 %v6559_v44, %v6559_v44  ;;  %v6455_v12 = vadd.f32 %v23583_v60, %v23669_v20  ;;  %v6506_v53 = vadd.f32 %v23585_v16, %v23673_v45  ;;  %v6556_v60 = vmax.f32 %v6357_v57, 0.0  ;;  %v20123_v44 = vld [vmem:[%s26599_s14 + $0x7d0] sm:$0xff]   ;;  %v20127_v57 = vld [vmem:[%s26599_s14 + $0x7c8] sm:$0xff]  }
0x100a   :  { %18413 = vmatpush3.bf16.msra.mxu0 %v20088_v35  ;;  %18441 = vmatpush3.bf16.msra.mxu1 %v20089_v56  ;;  %v6408_v35 = vadd.f32 %v23502_v1, %v5905_v11  ;;  %v20104_v56 = vld [vmem:[%s26599_s14 + $0x738] sm:$0xff]   ;;  %v20106_v1 = vld [vmem:[%s26599_s14 + $0x770] sm:$0xff]  }
0x100b   :  { %18414 = vmatprep.subr.bf16.mxu0 %v20090_v39  ;;  %18442 = vmatprep.subr.bf16.mxu1 %v20091_v22  ;;  %v20105_v39 = vld [vmem:[%s26599_s14 + $0x7b8] sm:$0xff]   ;;  %v6589_v22 = vpack.c.bf16 %v6557_v33, %v6557_v33  ;;  %v6545_v11 = vmax.f32 %v6455_v12, 0.0  ;;  %v6547_v55 = vmax.f32 %v6506_v53, 0.0  ;;  %v6588_v50 = vpack.c.bf16 %v6556_v60, %v6556_v60  ;;  %v20122_v33 = vld [vmem:[%s26599_s14 + $0x750] sm:$0xff]   ;;  %v20131_v53 = vld [vmem:[%s26599_s14 + $0x7c0] sm:$0xff]  }
0x100c   :  { %v6558_v16 = vmax.f32 %v6408_v35, 0.0  ;;  %v5913_v35 = vrot.slane %v23513_v47, %v26638_v6 }
0x100e   :  { %18415 = vmatpush3.bf16.msra.mxu0 %v20092_v5  ;;  %18443 = vmatpush3.bf16.msra.mxu1 %v20093_v8  ;;  %v20107_v5 = vld [vmem:[%s26599_s14 + $0x7f0] sm:$0xff]   ;;  %v6451_v8 = vadd.f32 %v23563_v52, %v23669_v20  ;;  %v20110_v52 = vld [vmem:[%s26599_s14 + $0x768] sm:$0xff]  }
0x100f   :  { %18416 = vmatprep.subr.bf16.mxu0 %v20094_v43  ;;  %18444 = vmatprep.subr.bf16.mxu1 %v20095_v14  ;;  %v6502_v43 = vadd.f32 %v23565_v54, %v23673_v45  ;;  %v20108_v14 = vld [vmem:[%s26599_s14 + $0x730] sm:$0xff]   ;;  %v20111_v54 = vld [vmem:[%s26599_s14 + $0x7e8] sm:$0xff]  }
0x1012   :  { %18417 = vmatpush3.bf16.msra.mxu0 %v20096_v51  ;;  %18445 = vmatpush3.bf16.msra.mxu1 %v20097_v26  ;;  %v6529_v51 = vmax.f32 %v6451_v8, 0.0  ;;  %v6531_v26 = vmax.f32 %v6502_v43, 0.0  ;;  %v20132_v8 = vld [vmem:[%s26599_s14 + $0x700] sm:$0xff]  }
0x1013   :  { %18418 = vmatprep.subr.bf16.mxu0 %v20098_v31  ;;  %18446 = vmatprep.subr.bf16.mxu1 %v20099_v37  ;;  %v6590_v31 = vpack.c.bf16 %v6558_v16, %v6558_v16  ;;  %v20112_v37 = vld [vmem:[%s26599_s14 + $0x728] sm:$0xff]   ;;  %v20133_v43 = vld [vmem:[%s26599_s14 + $0x780] sm:$0xff]  }
0x1014   :  { %v6577_v10 = vpack.c.bf16 %v6545_v11, %v6529_v51  ;;  %v6579_v17 = vpack.c.bf16 %v6547_v55, %v6531_v26 }
0x1016   :  { %18419 = vmatpush3.bf16.msra.mxu0 %v20100_v40  ;;  %18447 = vmatpush3.bf16.msra.mxu1 %v20101_v59  ;;  %v20116_v40 = vld [vmem:[%s26599_s14 + $0x720] sm:$0xff]  }
0x1017   :  { %18460 = vmatprep.subr.bf16.mxu0 %v20102_v32  ;;  %18488 = vmatprep.subr.bf16.mxu1 %v20103_v30  ;;  %v20117_v59 = vld [vmem:[%s26599_s14 + $0x7a0] sm:$0xff]   ;;  %v20119_v32 = vld [vmem:[%s26599_s14 + $0x7d8] sm:$0xff]  }
0x1018   :  { %v20120_v30 = vld [vmem:[%s26599_s14 + $0x718] sm:$0xff]  }
0x1019   :  { %7854 = vmatmul.mubr.bf16.vlgmr.msra.gmra.mxu0 %v6572_v62  ;;  %7902 = vmatmul.mubr.bf16.vlgmr.msra.gmra.mxu1 %v6574_v42  ;;  %v20125_v62 = vld [vmem:[%s26599_s14 + $0x790] sm:$0xff]   ;;  %v20126_v42 = vld [vmem:[%s26599_s14 + $0x748] sm:$0xff]  }
0x101a   :  { %7861 = vmatprep.mubr.bf16.mxu0 %v6589_v22  ;;  %7909 = vmatprep.mubr.bf16.mxu1 %v6591_v49  ;;  %v20129_v22 = vld [vmem:[%s26599_s14 + $0x788] sm:$0xff]   ;;  %v6453_v49 = vadd.f32 %v23567_v46, %v5913_v35  ;;  %v6449_v46 = vadd.f32 %v23547_v25, %v5913_v35 }
0x101b   :  { %18461 = vmatpush3.bf16.msra.mxu0 %v20104_v56  ;;  %18489 = vmatpush3.bf16.msra.mxu1 %v20105_v39  ;;  %v5921_v56 = vrot.slane %v23513_v47, %v26639_v2  ;;  %v20128_v39 = vld [vmem:[%s26599_s14 + $0x708] sm:$0xff]   ;;  %v20130_v47 = vld [vmem:[%s26599_s14 + $0x740] sm:$0xff]  }
0x101c   :  { %18462 = vmatprep.subr.bf16.mxu0 %v20106_v1  ;;  %18490 = vmatprep.subr.bf16.mxu1 %v20107_v5  ;;  %v6461_v1 = vadd.f32 %v23603_v13, %v23669_v20  ;;  %v6512_v5 = vadd.f32 %v23605_v9, %v23673_v45  ;;  %v6544_v60 = vmax.f32 %v6453_v49, 0.0  ;;  %v6528_v20 = vmax.f32 %v6449_v46, 0.0 }
0x101d   :  { %v6504_v12 = vadd.f32 %v23569_v4, %v5921_v56  ;;  %v6500_v4 = vadd.f32 %v23549_v7, %v5921_v56 }
0x101e   :  { %v6561_v13 = vmax.f32 %v6461_v1, 0.0  ;;  %v6563_v9 = vmax.f32 %v6512_v5, 0.0  ;;  %v6576_v7 = vpack.c.bf16 %v6544_v60, %v6528_v20 }
0x101f   :  { %18463 = vmatpush3.bf16.msra.mxu0 %v20108_v14  ;;  %18491 = vmatpush3.bf16.msra.mxu1 %v20109_v18  ;;  %v6546_v16 = vmax.f32 %v6504_v12, 0.0  ;;  %v6530_v25 = vmax.f32 %v6500_v4, 0.0  ;;  %v6459_v14 = vadd.f32 %v23587_v24, %v5913_v35  ;;  %v6510_v18 = vadd.f32 %v23589_v48, %v5921_v56  ;;  %v16679_v24 = vld [vmem:[%s26600_s15 + $0x1] ss:$0 sm:$0xff] }
0x1020   :  { %18464 = vmatprep.subr.bf16.mxu0 %v20110_v52  ;;  %18492 = vmatprep.subr.bf16.mxu1 %v20111_v54  ;;  %v6593_v11 = vpack.c.bf16 %v6561_v13, %v6561_v13  ;;  %v6595_v55 = vpack.c.bf16 %v6563_v9, %v6563_v9 }
0x1021   :  { %7862 = vmatmul.mubr.bf16.gmra.mxu0 %v6588_v50  ;;  %7910 = vmatmul.mubr.bf16.gmra.mxu1 %v6590_v31  ;;  %v6578_v45 = vpack.c.bf16 %v6546_v16, %v6530_v25  ;;  %v6560_v52 = vmax.f32 %v6459_v14, 0.0  ;;  %v6562_v54 = vmax.f32 %v6510_v18, 0.0 }
0x1022   :  { %7949 = vmatprep.mubr.bf16.mxu0 %v6577_v10  ;;  %7997 = vmatprep.mubr.bf16.mxu1 %v6579_v17 }
0x1023   :  { %18465 = vmatpush3.bf16.msra.mxu0 %v20112_v37  ;;  %18493 = vmatpush3.bf16.msra.mxu1 %v20113_v34  ;;  %v6592_v51 = vpack.c.bf16 %v6560_v52, %v6560_v52  ;;  %v6594_v26 = vpack.c.bf16 %v6562_v54, %v6562_v54 }
0x1024   :  { %18466 = vmatprep.subr.bf16.mxu0 %v20114_v3  ;;  %18494 = vmatprep.subr.bf16.mxu1 %v20115_v29 }
0x1027   :  { %18467 = vmatpush3.bf16.msra.mxu0 %v20116_v40  ;;  %18495 = vmatpush3.bf16.msra.mxu1 %v20117_v59 }
0x1028   :  { %18468 = vmatprep.subr.bf16.mxu0 %v20118_v63  ;;  %18496 = vmatprep.subr.bf16.mxu1 %v20119_v32 }
0x102b   :  { %18469 = vmatpush3.bf16.msra.mxu0 %v20120_v30  ;;  %18497 = vmatpush3.bf16.msra.mxu1 %v20121_v19 }
0x102c   :  { %18470 = vmatprep.subr.bf16.mxu0 %v20122_v33  ;;  %18498 = vmatprep.subr.bf16.mxu1 %v20123_v44 }
0x102f   :  { %18471 = vmatpush3.bf16.msra.mxu0 %v20124_v61  ;;  %18499 = vmatpush3.bf16.msra.mxu1 %v20125_v62 }
0x1030   :  { %18472 = vmatprep.subr.bf16.mxu0 %v20126_v42  ;;  %18500 = vmatprep.subr.bf16.mxu1 %v20127_v57 }
0x1033   :  { %18473 = vmatpush3.bf16.msra.mxu0 %v20128_v39  ;;  %18501 = vmatpush3.bf16.msra.mxu1 %v20129_v22 }
0x1034   :  { %18474 = vmatprep.subr.bf16.mxu0 %v20130_v47  ;;  %18502 = vmatprep.subr.bf16.mxu1 %v20131_v53 }
0x1037   :  { %18475 = vmatpush3.bf16.msra.mxu0 %v20132_v8  ;;  %18503 = vmatpush3.bf16.msra.mxu1 %v20133_v43 }
0x103a   :  { %7950 = vmatmul.mubr.bf16.vlgmr.msra.gmra.mxu0 %v6576_v7  ;;  %7998 = vmatmul.mubr.bf16.vlgmr.msra.gmra.mxu1 %v6578_v45 }
0x103b   :  { %7957 = vmatprep.mubr.bf16.mxu0 %v6593_v11  ;;  %8005 = vmatprep.mubr.bf16.mxu1 %v6595_v55 }
0x1042   :  { %7958 = vmatmul.mubr.bf16.gmra.mxu0 %v6592_v51  ;;  %8006 = vmatmul.mubr.bf16.gmra.mxu1 %v6594_v26 }
0x1098   :  { %v18308_v50 = vpop.f32.mrf.mxu0  ;;  %v18336_v31 = vpop.f32.mrf.mxu1 }
0x109a   :  { %v18309_v37 = vpop.f32.mrf.mxu0  ;;  %v18337_v48 = vpop.f32.mrf.mxu1 }
0x109b   :  { %v18310_v34 = vadd.f32 %v18309_v37, %v18308_v50  ;;  %v18338_v10 = vadd.f32 %v18337_v48, %v18336_v31 }
0x109c   :  { %v18311_v17 = vpop.f32.mrf.mxu0  ;;  %v18339_v3 = vpop.f32.mrf.mxu1 }
0x109d   :  { %v7664_v29 = vadd.f32 %v18310_v34, %v16679_v24 }
0x109e   :  { %v18312_v40 = vpop.f32.mrf.mxu0  ;;  %v18340_v59 = vpop.f32.mrf.mxu1 }
0x109f   :  { %v7712_v63 = vadd.f32 %v18338_v10, %v7664_v29  ;;  %v18313_v32 = vadd.f32 %v18312_v40, %v18311_v17  ;;  %v18341_v44 = vadd.f32 %v18340_v59, %v18339_v3 }
0x10a0   :  { %v18314_v30 = vpop.f32.mrf.mxu0  ;;  %v18342_v19 = vpop.f32.mrf.mxu1 }
0x10a1   :  { %v7667_v33 = vadd.f32 %v18313_v32, %v16679_v24 }
0x10a2   :  { %v18315_v61 = vpop.f32.mrf.mxu0  ;;  %v18343_v62 = vpop.f32.mrf.mxu1 }
0x10a3   :  { %v7715_v42 = vadd.f32 %v18341_v44, %v7667_v33  ;;  %v18316_v57 = vadd.f32 %v18315_v61, %v18314_v30  ;;  %v18344_v35 = vadd.f32 %v18343_v62, %v18342_v19 }
0x10a4   :  { %v18317_v56 = vpop.f32.mrf.mxu0  ;;  %v18345_v39 = vpop.f32.mrf.mxu1 }
0x10a5   :  { %v7672_v22 = vadd.f32 %v18316_v57, %v16679_v24 }
0x10a6   :  { %v18318_v49 = vpop.f32.mrf.mxu0  ;;  %v18346_v12 = vpop.f32.mrf.mxu1 }
0x10a7   :  { %v7720_v47 = vadd.f32 %v18344_v35, %v7672_v22 }
0x10b8   :  { %v18364_v53 = vpop.f32.mrf.mxu0  ;;  %v18392_v1 = vpop.f32.mrf.mxu1 }
0x10ba   :  { %v18365_v5 = vpop.f32.mrf.mxu0  ;;  %v18393_v46 = vpop.f32.mrf.mxu1 }
0x10bb   :  { %v18366_v29 = vadd.f32 %v18365_v5, %v18364_v53  ;;  %v18394_v32 = vadd.f32 %v18393_v46, %v18392_v1 }
0x10bc   :  { %v18367_v4 = vpop.f32.mrf.mxu0  ;;  %v18395_v8 = vpop.f32.mrf.mxu1 }
0x10bd   :  { %v7760_v40 = vadd.f32 %v18366_v29, %v7712_v63 }
0x10be   :  { %v18368_v43 = vpop.f32.mrf.mxu0  ;;  %v18396_v60 = vpop.f32.mrf.mxu1 }
0x10bf   :  { %v18369_v59 = vadd.f32 %v18368_v43, %v18367_v4  ;;  %v7808_v19 = vadd.f32 %v18394_v32, %v7760_v40  ;;  %v18397_v61 = vadd.f32 %v18396_v60, %v18395_v8 }
0x10c0   :  { %v18370_v16 = vpop.f32.mrf.mxu0  ;;  %v18398_v13 = vpop.f32.mrf.mxu1 }
0x10c1   :  { %v7763_v33 = vadd.f32 %v18369_v59, %v7715_v42 }
0x10c2   :  { %v18371_v9 = vpop.f32.mrf.mxu0  ;;  %v18399_v20 = vpop.f32.mrf.mxu1 }
0x10c3   :  { %v18372_v44 = vadd.f32 %v18371_v9, %v18370_v16  ;;  %v7811_v39 = vadd.f32 %v18397_v61, %v7763_v33  ;;  %v18400_v12 = vadd.f32 %v18399_v20, %v18398_v13 }
0x10c4   :  { %v18373_v25 = vpop.f32.mrf.mxu0  ;;  %v18401_v7 = vpop.f32.mrf.mxu1 }
0x10c5   :  { %v7768_v22 = vadd.f32 %v18372_v44, %v7720_v47 }
0x10c6   :  { %v18374_v45 = vpop.f32.mrf.mxu0  ;;  %v18402_v14 = vpop.f32.mrf.mxu1 }
0x10c7   :  { %v7816_v4 = vadd.f32 %v18400_v12, %v7768_v22 }
0x10d9   :  { %v18420_v18 = vpop.f32.mrf.mxu0  ;;  %v18448_v11 = vpop.f32.mrf.mxu1 }
0x10db   :  { %v18421_v55 = vpop.f32.mrf.mxu0  ;;  %v18449_v52 = vpop.f32.mrf.mxu1 }
0x10dc   :  { %v18422_v30 = vadd.f32 %v18421_v55, %v18420_v18  ;;  %v18450_v49 = vadd.f32 %v18449_v52, %v18448_v11 }
0x10dd   :  { %v18423_v54 = vpop.f32.mrf.mxu0  ;;  %v18451_v51 = vpop.f32.mrf.mxu1 }
0x10de   :  { %v7856_v62 = vadd.f32 %v18422_v30, %v7808_v19 }
0x10df   :  { %v18424_v26 = vpop.f32.mrf.mxu0  ;;  %v18452_v50 = vpop.f32.mrf.mxu1 }
0x10e0   :  { %v18425_v57 = vadd.f32 %v18424_v26, %v18423_v54  ;;  %v7904_v45 = vadd.f32 %v18450_v49, %v7856_v62  ;;  %v18453_v42 = vadd.f32 %v18452_v50, %v18451_v51 }
0x10e1   :  { %v18426_v31 = vpop.f32.mrf.mxu0  ;;  %v18454_v24 = vpop.f32.mrf.mxu1 }
0x10e2   :  { %v7859_v53 = vadd.f32 %v18425_v57, %v7811_v39 }
0x10e3   :  { %v18427_v37 = vpop.f32.mrf.mxu0  ;;  %v18455_v48 = vpop.f32.mrf.mxu1 }
0x10e4   :  { %v18428_v63 = vadd.f32 %v18427_v37, %v18426_v31  ;;  %v7907_v9 = vadd.f32 %v18453_v42, %v7859_v53  ;;  %v18456_v20 = vadd.f32 %v18455_v48, %v18454_v24  ;;  %v20136_v53 = vld [vmem:[%s26591_s6 + $0x20] sm:$0xff]  }
0x10e5   :  { %v18429_v34 = vpop.f32.mrf.mxu0  ;;  %v18457_v10 = vpop.f32.mrf.mxu1 }
0x10e6   :  { %v7864_v14 = vadd.f32 %v18428_v63, %v7816_v4  ;;  %v20137_v63 = vld [vmem:[%s26629_s2 + $0x20] sm:$0xff]  }
0x10e7   :  { %v18430_v17 = vpop.f32.mrf.mxu0  ;;  %v18458_v3 = vpop.f32.mrf.mxu1 }
0x10e8   :  { %v7912_v37 = vadd.f32 %v18456_v20, %v7864_v14 }
0x10fa   :  { %v18476_v35 = vpop.f32.mrf.mxu0  ;;  %v18504_v56 = vpop.f32.mrf.mxu1 }
0x10fc   :  { %v18477_v25 = vpop.f32.mrf.mxu0  ;;  %v18505_v7 = vpop.f32.mrf.mxu1 }
0x10fd   :  { %v18478_v5 = vadd.f32 %v18477_v25, %v18476_v35  ;;  %v18506_v8 = vadd.f32 %v18505_v7, %v18504_v56  ;;  %v20134_v7 = vld [vmem:[%s26591_s6 + $0x28] sm:$0xff]  }
0x10fe   :  { %v18479_v1 = vpop.f32.mrf.mxu0  ;;  %v18507_v46 = vpop.f32.mrf.mxu1  ;;  %19452 = vmatprep.subr.bf16.mxu1 %v20134_v7 }
0x10ff   :  { %v7952_v43 = vadd.f32 %v18478_v5, %v7904_v45  ;;  %v20135_v45 = vld [vmem:[%s26629_s2 + $0x28] sm:$0xff]   ;;  %19453 = vmatpush3.bf16.msra.mxu1 %v20134_v7 }
0x1100   :  { %v18480_v60 = vpop.f32.mrf.mxu0  ;;  %v18508_v16 = vpop.f32.mrf.mxu1  ;;  %19444 = vmatprep.subr.bf16.mxu0 %v20135_v45  ;;  %19454 = vmatprep.subr.bf16.mxu1 %v20136_v53  ;;  %v20138_v5 = vld [vmem:[%s26593_s8 + $0x28] sm:$0xff]  }
0x1101   :  { %v8000_v18 = vadd.f32 %v18506_v8, %v7952_v43  ;;  %v18481_v47 = vadd.f32 %v18480_v60, %v18479_v1  ;;  %v18509_v52 = vadd.f32 %v18508_v16, %v18507_v46  ;;  %19445 = vmatpush3.bf16.msra.mxu0 %v20135_v45 }
0x1102   :  { %v18482_v11 = vpop.f32.mrf.mxu0  ;;  %v18510_v13 = vpop.f32.mrf.mxu1  ;;  %19446 = vmatprep.subr.bf16.mxu0 %v20137_v63 }
0x1103   :  { %v7955_v55 = vadd.f32 %v18481_v47, %v7907_v9  ;;  %v8013_v54 = vadd.f32 %v8000_v18, %v23135_v38  ;;  %19455 = vmatpush3.bf16.msra.mxu1 %v20136_v53  ;;  %v16810_v47 = vld [vmem:[%s26603_s18 + $0x1] ss:$0 sm:$0xff] }
0x1104   :  { %v18483_v26 = vpop.f32.mrf.mxu0  ;;  %v18511_v31 = vpop.f32.mrf.mxu1 }
0x1105   :  { %v8003_v34 = vadd.f32 %v18509_v52, %v7955_v55  ;;  %v18484_v51 = vadd.f32 %v18483_v26, %v18482_v11  ;;  %v8020_v50 = vsel %vm112_vm0, %v8013_v54, 0.0  ;;  %v18512_v29 = vadd.f32 %v18511_v31, %v18510_v13  ;;  %19447 = vmatpush3.bf16.msra.mxu0 %v20137_v63  ;;  %v16811_v55 = vld [vmem:[%s26604_s19 + $0x1] ss:$0 sm:$0xff] }
0x1106   :  { %v18485_v10 = vpop.f32.mrf.mxu0  ;;  %v18513_v17 = vpop.f32.mrf.mxu1  ;;  %8021 = vadd.xlane.f32.xlu0 %v8020_v50  ;;  %19460 = vmatprep.subr.bf16.mxu0 %v20138_v5 }
0x1107   :  { %v7960_v3 = vadd.f32 %v18484_v51, %v7912_v37  ;;  %v8014_v40 = vadd.f32 %v8003_v34, %v23137_v28  ;;  %v20139_v17 = vld [vmem:[%s26593_s8 + $0x20] sm:$0xff]  }
0x1108   :  { %v18486_v59 = vpop.f32.mrf.mxu0  ;;  %v18514_v24 = vpop.f32.mrf.mxu1 }
0x1109   :  { %v8008_v48 = vadd.f32 %v18512_v29, %v7960_v3  ;;  %v8023_v32 = vsel %vm112_vm0, %v8014_v40, 0.0  ;;  %v16827_v3 = vld [vmem:[%s26592_s7 + $0x2] ss:$0 sm:$0xff] }
0x110a   :  { %8024 = vadd.xlane.f32.xlu1 %v8023_v32  ;;  %v16817_v32 = vld [vmem:[%s26590_s5 + $0x2] ss:$0 sm:$0xff] }
0x110b   :  { %v8015_v38 = vadd.f32 %v8008_v48, %v23170_v15 }
0x110d   :  { %v8026_v30 = vsel %vm1694_vm4, %v8015_v38, 0.0 }
0x110e   :  { %8027 = vadd.xlane.f32.xlu0 %v8026_v30 }
0x118f   :  { %v8022_v19 = vpop.xlane.xlu0 %8021 }
0x1190   :  { %v8029_v33 = vmul.f32 0.03125, %v8022_v19 }
0x1192   :  { %v8032_v44 = vsub.f32 %v8013_v54, %v8029_v33 }
0x1193   :  { %v8025_v61 = vpop.xlane.xlu1 %8024 }
0x1194   :  { %v8030_v62 = vmul.f32 0.03125, %v8025_v61  ;;  %v8035_v57 = vmul.f32 %v8032_v44, %v8032_v44 }
0x1196   :  { %v8033_v35 = vsub.f32 %v8014_v40, %v8030_v62  ;;  %v8038_v28 = vsel %vm112_vm0, %v8035_v57, 0.0 }
0x1197   :  { %8039 = vadd.xlane.f32.xlu1 %v8038_v28  ;;  %v8028_v56 = vpop.xlane.xlu0 %8027 }
0x1198   :  { %v8031_v39 = vmul.f32 0.03125, %v8028_v56  ;;  %v8036_v22 = vmul.f32 %v8033_v35, %v8033_v35 }
0x119a   :  { %v8034_v49 = vsub.f32 %v8015_v38, %v8031_v39  ;;  %v8041_v12 = vsel %vm112_vm0, %v8036_v22, 0.0  ;;  %v23868_v39 = vld [vmem:[%s26632_s25] ss:$0 sm:$0xff] }
0x119b   :  { %8042 = vadd.xlane.f32.xlu0 %v8041_v12 }
0x119c   :  { %v8037_v15 = vmul.f32 %v8034_v49, %v8034_v49 }
0x119e   :  { %v8044_v25 = vsel %vm1694_vm4, %v8037_v15, 0.0  ;;  %v23879_v15 = vld [vmem:[%s26632_s25 + $0x1] ss:$0 sm:$0xff] }
0x119f   :  { %8045 = vadd.xlane.f32.xlu1 %v8044_v25 }
0x1220   :  { %v8040_v1 = vpop.xlane.xlu1 %8039 }
0x1221   :  { %v8047_v46 = vmul.f32 0.03125, %v8040_v1 }
0x1223   :  { %v8050_v4 = vadd.f32 1e-05, %v8047_v46 }
0x1224   :  { %v8043_v42 = vpop.xlane.xlu0 %8042 }
0x1225   :  { %20616 = vrsqrt.f32 %v8050_v4  ;;  %v8048_v43 = vmul.f32 0.03125, %v8043_v42  ;;  %v23902_v42 = vld [vmem:[%s26594_s9 + $0x2] ss:$0 sm:$0xff] }
0x1227   :  { %v8051_v8 = vadd.f32 1e-05, %v8048_v43 }
0x1228   :  { %v8046_v60 = vpop.xlane.xlu1 %8045 }
0x1229   :  { %20618 = vrsqrt.f32 %v8051_v8  ;;  %v8049_v16 = vmul.f32 0.03125, %v8046_v60 }
0x122b   :  { %v8052_v9 = vadd.f32 1e-05, %v8049_v16 }
0x122d   :  { %20620 = vrsqrt.f32 %v8052_v9  ;;  %v23921_v9 = vld [vmem:[%s26632_s25 + $0x2] ss:$0 sm:$0xff] }
0x1232   :  { %v20617_v14 = vpop.eup %20616 }
0x1233   :  { %v8056_v18 = vmul.f32 %v20617_v14, %v8032_v44 }
0x1235   :  { %v8065_v20 = vmul.f32 %v16810_v47, %v8056_v18  ;;  %v23928_v18 = vld [vmem:[%s26632_s25 + $0x3] ss:$0 sm:$0xff] }
0x1236   :  { %v20619_v11 = vpop.eup %20618 }
0x1237   :  { %v8057_v13 = vmul.f32 %v20619_v11, %v8033_v35  ;;  %v23822_v31 = vadd.f32 %v16811_v55, %v8065_v20 }
0x1239   :  { %v8066_v52 = vmul.f32 %v16810_v47, %v8057_v13 }
0x123a   :  { %v20621_v54 = vpop.eup %20620 }
0x123b   :  { %v8058_v26 = vmul.f32 %v20621_v54, %v8034_v49  ;;  %v23824_v37 = vadd.f32 %v16811_v55, %v8066_v52 }
0x123d   :  { %v8067_v34 = vmul.f32 %v16810_v47, %v8058_v26  ;;  %v8077_v51 = vpack.c.bf16 %v23824_v37, %v23822_v31 }
0x123f   :  { %v23828_v50 = vadd.f32 %v16811_v55, %v8067_v34  ;;  %19448 = vmatprep.mubr.msk.bf16.mxu0 %vm112_vm0, %v8077_v51  ;;  %19456 = vmatprep.mubr.msk.bf16.mxu1 %vm112_vm0, %v8077_v51 }
0x1241   :  { %v8078_v10 = vpack.c.bf16 %v23828_v50, %v23828_v50 }
0x1243   :  { %19449 = vmatmul.mubr.msk.bf16.vlgmr.msra.gmra.mxu0 %vm112_vm0, %v8078_v10  ;;  %19457 = vmatmul.mubr.msk.bf16.vlgmr.msra.gmra.mxu1 %vm112_vm0, %v8078_v10 }
0x1244   :  { %19461 = vmatpush3.bf16.msra.mxu0 %v20138_v5  ;;  %19464 = vmatprep.mubr.msk.bf16.mxu0 %vm112_vm0, %v8077_v51 }
0x1245   :  { %19462 = vmatprep.subr.bf16.mxu0 %v20139_v17 }
0x1248   :  { %19463 = vmatpush3.bf16.msra.mxu0 %v20139_v17 }
0x124b   :  { %19465 = vmatmul.mubr.msk.bf16.vlgmr.msra.gmra.mxu0 %vm112_vm0, %v8078_v10 }
0x1303   :  { %v19450_v29 = vpop.f32.mrf.mxu0  ;;  %v19458_v40 = vpop.f32.mrf.mxu1 }
0x1304   :  { %v8226_v59 = vadd.f32 %v19458_v40, %v16827_v3  ;;  %v23885_v53 = vadd.f32 %v19450_v29, %v16817_v32  ;;  %v23961_v29 = vld [vmem:[%s26632_s25 + $0x4] ss:$0 sm:$0xff] }
0x1305   :  { %v8144_v24 = vpop.f32.mrf.mxu0  ;;  %v8217_v48 = vpop.f32.mrf.mxu1 }
0x1306   :  { %v23847_v38 = vpack.c.bf16 %v8226_v59, %v8226_v59  ;;  %v23849_v30 = vadd.f32 %v16817_v32, %v8144_v24  ;;  %v8218_v57 = vadd.f32 %v16827_v3, %v8217_v48  ;;  %v8306_v43 = vmul.f32 %v23868_v39, %v23885_v53  ;;  %v23970_v24 = vld [vmem:[%s26632_s25 + $0x5] ss:$0 sm:$0xff] }
0x1307   :  { %v19451_v19 = vpop.f32.mrf.mxu0  ;;  %v19459_v33 = vpop.f32.mrf.mxu1  ;;  %v8309_v8 = vmul.f32 %v23879_v15, %v23885_v53 }
0x1308   :  { %19812 = vmatprep.subr.msk.bf16.mxu1 %vm112_vm0, %v23847_v38  ;;  %19814 = vmatprep.subr.msk.bf16.mxu0 %vm112_vm0, %v23847_v38  ;;  %v23857_v44 = vsel %vm112_vm0, %v23847_v38, 0  ;;  %v8304_v22 = vmul.f32 %v23868_v39, %v23849_v30  ;;  %v8307_v25 = vmul.f32 %v23879_v15, %v23849_v30  ;;  %v8310_v11 = vmul.f32 %v23921_v9, %v23849_v30 }
0x1309   :  { %v8147_v61 = vpop.f32.mrf.mxu0  ;;  %v8220_v62 = vpop.f32.mrf.mxu1  ;;  %19469 = vmatpush3.bf16.xpose.msra.mxu1 %v23857_v44  ;;  %19477 = vmatpush3.bf16.xpose.msra.mxu0 %v23857_v44  ;;  %v8329_v13 = vpack.c.bf16 %v8306_v43, %v8306_v43  ;;  %v8331_v20 = vpack.c.bf16 %v8309_v8, %v8309_v8  ;;  %v8313_v55 = vmul.f32 %v23928_v18, %v23849_v30 }
0x130a   :  { %v23861_v35 = vadd.f32 %v16817_v32, %v8147_v61  ;;  %v8221_v28 = vadd.f32 %v16827_v3, %v8220_v62  ;;  %v23983_v61 = vld [vmem:[%s26632_s25 + $0x6] ss:$0 sm:$0xff]  ;;  %v8316_v43 = vmul.f32 %v23961_v29, %v23849_v30 }
0x130b   :  { %v23863_v56 = vpop.f32.mrf.mxu0 }
0x130c   :  { %v23872_v49 = vpack.c.bf16 %v8221_v28, %v8218_v57  ;;  %v8305_v12 = vmul.f32 %v23868_v39, %v23861_v35  ;;  %v8308_v7 = vmul.f32 %v23879_v15, %v23861_v35  ;;  %v8311_v14 = vmul.f32 %v23921_v9, %v23861_v35  ;;  %v23992_v28 = vld [vmem:[%s26632_s25 + $0x7] ss:$0 sm:$0xff] }
0x130d   :  { %v8290_v45 = vpop.f32.mrf.mxu0  ;;  %v8314_v47 = vmul.f32 %v23928_v18, %v23861_v35 }
0x130e   :  { %19813 = vmatprep.subr.msk.bf16.mxu1 %vm112_vm0, %v23872_v49  ;;  %19815 = vmatprep.subr.msk.bf16.mxu0 %vm112_vm0, %v23872_v49  ;;  %v8328_v63 = vpack.c.bf16 %v8305_v12, %v8304_v22  ;;  %v8330_v5 = vpack.c.bf16 %v8308_v7, %v8307_v25  ;;  %v23895_v46 = vsel %vm112_vm0, %v23872_v49, 0  ;;  %v23913_v60 = vadd.f32 %v23902_v42, %v8290_v45 }
0x130f   :  { %v19467_v1 = vpop.f32.mrf.mxu0  ;;  %v8332_v52 = vpack.c.bf16 %v8311_v14, %v8310_v11  ;;  %v8334_v34 = vpack.c.bf16 %v8314_v47, %v8313_v55  ;;  %v8312_v45 = vmul.f32 %v23921_v9, %v23885_v53  ;;  %v8319_v14 = vmul.f32 %v23970_v24, %v23849_v30 }
0x1310   :  { %19472 = vmatprep.mubr.msk.bf16.mxu1 %vm112_vm0, %v8328_v63  ;;  %19480 = vmatprep.mubr.msk.bf16.mxu0 %vm112_vm0, %v8330_v5  ;;  %v8350_v54 = vmul.f32 %v23921_v9, %v23913_v60  ;;  %v8353_v51 = vmul.f32 %v23928_v18, %v23913_v60  ;;  %v8356_v40 = vmul.f32 %v23961_v29, %v23913_v60 }
0x1311   :  { %v8293_v4 = vpop.f32.mrf.mxu0  ;;  %19471 = vmatpush3.bf16.xpose.msra.mxu1 %v23895_v46  ;;  %19479 = vmatpush3.bf16.xpose.msra.mxu0 %v23895_v46  ;;  %v8359_v48 = vmul.f32 %v23970_v24, %v23913_v60  ;;  %v8362_v62 = vmul.f32 %v23983_v61, %v23913_v60  ;;  %v8365_v22 = vmul.f32 %v23992_v28, %v23913_v60 }
0x1312   :  { %19816 = vmatprep.subr.msk.bf16.mxu1 %vm112_vm0, %v23847_v38  ;;  %19818 = vmatprep.subr.msk.bf16.mxu0 %vm112_vm0, %v23847_v38  ;;  %v23916_v16 = vadd.f32 %v23902_v42, %v8293_v4  ;;  %v8315_v63 = vmul.f32 %v23928_v18, %v23885_v53  ;;  %v8317_v5 = vmul.f32 %v23961_v29, %v23861_v35 }
0x1313   :  { %v8320_v1 = vmul.f32 %v23970_v24, %v23861_v35  ;;  %v8333_v4 = vpack.c.bf16 %v8312_v45, %v8312_v45  ;;  %v8323_v55 = vmul.f32 %v23983_v61, %v23861_v35 }
0x1314   :  { %v8351_v26 = vmul.f32 %v23921_v9, %v23916_v16  ;;  %v8354_v10 = vmul.f32 %v23928_v18, %v23916_v16  ;;  %v8357_v59 = vmul.f32 %v23961_v29, %v23916_v16  ;;  %v8360_v32 = vmul.f32 %v23970_v24, %v23916_v16 }
0x1315   :  { %v8363_v57 = vmul.f32 %v23983_v61, %v23916_v16  ;;  %v8366_v12 = vmul.f32 %v23992_v28, %v23916_v16  ;;  %v8335_v8 = vpack.c.bf16 %v8315_v63, %v8315_v63  ;;  %v8336_v47 = vpack.c.bf16 %v8317_v5, %v8316_v43  ;;  %v24101_v43 = vld [vmem:[%s26633_s30 + $0x10] sm:$0x3] }
0x1316   :  { %v23948_v17 = vpack.c.bf16 %v8351_v26, %v8350_v54  ;;  %v23952_v3 = vpack.c.bf16 %v8354_v10, %v8353_v51  ;;  %v23976_v19 = vpack.c.bf16 %v8357_v59, %v8356_v40  ;;  %v23978_v33 = vpack.c.bf16 %v8360_v32, %v8359_v48 }
0x1317   :  { %v23998_v25 = vpack.c.bf16 %v8363_v57, %v8362_v62  ;;  %v24001_v7 = vpack.c.bf16 %v8366_v12, %v8365_v22  ;;  %v8338_v11 = vpack.c.bf16 %v8320_v1, %v8319_v14  ;;  %v8322_v26 = vmul.f32 %v23983_v61, %v23849_v30 }
0x1318   :  { %19473 = vmatmul.mubr.msk.bf16.vlgmr.msra.gmra.mxu1 %vm112_vm0, %v8329_v13  ;;  %19481 = vmatmul.mubr.msk.bf16.vlgmr.msra.gmra.mxu0 %vm112_vm0, %v8331_v20  ;;  %v8318_v13 = vmul.f32 %v23961_v29, %v23885_v53  ;;  %v8321_v20 = vmul.f32 %v23970_v24, %v23885_v53  ;;  %v8325_v51 = vmul.f32 %v23992_v28, %v23849_v30 }
0x1319   :  { %19485 = vmatpush3.bf16.xpose.msra.mxu1 %v23857_v44  ;;  %19488 = vmatprep.mubr.msk.bf16.mxu1 %vm112_vm0, %v8332_v52  ;;  %v8326_v52 = vmul.f32 %v23992_v28, %v23861_v35  ;;  %v8340_v10 = vpack.c.bf16 %v8323_v55, %v8322_v26  ;;  %v8345_v59 = vmul.f32 %v23868_v39, %v23916_v16  ;;  %v24112_v55 = vld [vmem:[%s26633_s30] sm:$0xff] }
0x131a   :  { %19493 = vmatpush3.bf16.xpose.msra.mxu0 %v23857_v44  ;;  %19496 = vmatprep.mubr.msk.bf16.mxu0 %vm112_vm0, %v8334_v34  ;;  %v8337_v54 = vpack.c.bf16 %v8318_v13, %v8318_v13  ;;  %v8339_v34 = vpack.c.bf16 %v8321_v20, %v8321_v20  ;;  %v8348_v48 = vmul.f32 %v23879_v15, %v23916_v16 }
0x131b   :  { %19817 = vmatprep.subr.msk.bf16.mxu1 %vm112_vm0, %v23872_v49  ;;  %19819 = vmatprep.subr.msk.bf16.mxu0 %vm112_vm0, %v23872_v49  ;;  %v8342_v35 = vpack.c.bf16 %v8326_v52, %v8325_v51  ;;  %v8347_v57 = vmul.f32 %v23879_v15, %v23913_v60 }
0x131d   :  { %v8370_v45 = vpack.c.bf16 %v8348_v48, %v8347_v57 }
0x1321   :  { %19487 = vmatpush3.bf16.xpose.msra.mxu1 %v23895_v46 }
0x1322   :  { %19495 = vmatpush3.bf16.xpose.msra.mxu0 %v23895_v46  ;;  %19820 = vmatprep.subr.msk.bf16.mxu1 %vm112_vm0, %v23847_v38 }
0x1323   :  { %19822 = vmatprep.subr.msk.bf16.mxu0 %vm112_vm0, %v23847_v38 }
0x1328   :  { %19489 = vmatmul.mubr.msk.bf16.vlgmr.msra.gmra.mxu1 %vm112_vm0, %v8333_v4 }
0x1329   :  { %19497 = vmatmul.mubr.msk.bf16.vlgmr.msra.gmra.mxu0 %vm112_vm0, %v8335_v8  ;;  %19501 = vmatpush3.bf16.xpose.msra.mxu1 %v23857_v44 }
0x132a   :  { %19504 = vmatprep.mubr.msk.bf16.mxu1 %vm112_vm0, %v8336_v47  ;;  %19509 = vmatpush3.bf16.xpose.msra.mxu0 %v23857_v44 }
0x132b   :  { %19512 = vmatprep.mubr.msk.bf16.mxu0 %vm112_vm0, %v8338_v11  ;;  %19821 = vmatprep.subr.msk.bf16.mxu1 %vm112_vm0, %v23872_v49 }
0x132c   :  { %19823 = vmatprep.subr.msk.bf16.mxu0 %vm112_vm0, %v23872_v49 }
0x1331   :  { %19503 = vmatpush3.bf16.xpose.msra.mxu1 %v23895_v46 }
0x1332   :  { %19511 = vmatpush3.bf16.xpose.msra.mxu0 %v23895_v46  ;;  %19824 = vmatprep.subr.msk.bf16.mxu1 %vm112_vm0, %v23847_v38 }
0x1333   :  { %19826 = vmatprep.subr.msk.bf16.mxu0 %vm112_vm0, %v23847_v38  ;;  %v24050_v38 = vadd.f32 %v23863_v56, %v23902_v42 }
0x1335   :  { %v8346_v30 = vmul.f32 %v23868_v39, %v24050_v38  ;;  %v8349_v56 = vmul.f32 %v23879_v15, %v24050_v38 }
0x1337   :  { %v8369_v42 = vpack.c.bf16 %v8346_v30, %v8346_v30  ;;  %v8371_v40 = vpack.c.bf16 %v8349_v56, %v8349_v56 }
0x1338   :  { %19505 = vmatmul.mubr.msk.bf16.vlgmr.msra.gmra.mxu1 %vm112_vm0, %v8337_v54 }
0x1339   :  { %19513 = vmatmul.mubr.msk.bf16.vlgmr.msra.gmra.mxu0 %vm112_vm0, %v8339_v34  ;;  %19517 = vmatpush3.bf16.xpose.msra.mxu1 %v23857_v44  ;;  %v9159_v22 = vsel %vm1213_vm1, %v8369_v42, 0  ;;  %v9216_v16 = vsel %vm1213_vm1, %v8371_v40, 0 }
0x133a   :  { %19520 = vmatprep.mubr.msk.bf16.mxu1 %vm112_vm0, %v8340_v10  ;;  %19525 = vmatpush3.bf16.xpose.msra.mxu0 %v23857_v44  ;;  %v8324_v44 = vmul.f32 %v23983_v61, %v23885_v53 }
0x133b   :  { %19528 = vmatprep.mubr.msk.bf16.mxu0 %vm112_vm0, %v8342_v35  ;;  %19825 = vmatprep.subr.msk.bf16.mxu1 %vm112_vm0, %v23872_v49 }
0x133c   :  { %19827 = vmatprep.subr.msk.bf16.mxu0 %vm112_vm0, %v23872_v49  ;;  %v8327_v49 = vmul.f32 %v23992_v28, %v23885_v53  ;;  %v8341_v32 = vpack.c.bf16 %v8324_v44, %v8324_v44  ;;  %v8352_v53 = vmul.f32 %v23921_v9, %v24050_v38 }
0x133e   :  { %v8343_v62 = vpack.c.bf16 %v8327_v49, %v8327_v49  ;;  %v24090_v15 = vpack.c.bf16 %v8352_v53, %v8352_v53 }
0x1341   :  { %19519 = vmatpush3.bf16.xpose.msra.mxu1 %v23895_v46 }
0x1342   :  { %19527 = vmatpush3.bf16.xpose.msra.mxu0 %v23895_v46  ;;  %19828 = vmatprep.subr.msk.bf16.mxu1 %vm1213_vm1, %v8369_v42  ;;  %v8344_v46 = vmul.f32 %v23868_v39, %v23913_v60  ;;  %v8355_v39 = vmul.f32 %v23928_v18, %v24050_v38 }
0x1343   :  { %19829 = vmatprep.subr.msk.bf16.mxu0 %vm1213_vm1, %v8371_v40  ;;  %v24131_v40 = vld [vmem:[%s26633_s30 + $0x8] sm:$0xff] }
0x1344   :  { %v8368_v12 = vpack.c.bf16 %v8345_v59, %v8344_v46  ;;  %v24092_v60 = vpack.c.bf16 %v8355_v39, %v8355_v39 }
0x1348   :  { %19521 = vmatmul.mubr.msk.bf16.vlgmr.msra.gmra.mxu1 %vm112_vm0, %v8341_v32 }
0x1349   :  { %19529 = vmatmul.mubr.msk.bf16.vlgmr.msra.gmra.mxu0 %vm112_vm0, %v8343_v62  ;;  %19533 = vmatpush3.bf16.msra.mxu1 %v9159_v22 }
0x134a   :  { %19541 = vmatpush3.bf16.msra.mxu0 %v9216_v16  ;;  %19534 = vmatprep.subr.bf16.mxu1 %v8368_v12 }
0x134b   :  { %19542 = vmatprep.subr.bf16.mxu0 %v8370_v45 }
0x134d   :  { %19535 = vmatpush3.bf16.msra.mxu1 %v8368_v12 }
0x134e   :  { %19543 = vmatpush3.bf16.msra.mxu0 %v8370_v45  ;;  %19830 = vmatprep.subr.msk.bf16.mxu1 %vm1213_vm1, %v24090_v15 }
0x134f   :  { %19831 = vmatprep.subr.msk.bf16.mxu0 %vm1213_vm1, %v24092_v60 }
0x13d8   :  { %v19474_v9 = vpop.f32.mrf.mxu1  ;;  %v19482_v63 = vpop.f32.mrf.mxu0 }
0x13d9   :  { %v8826_v5 = vmul.f32 0.5, %v19474_v9  ;;  %v8829_v1 = vmul.f32 0.5, %v19482_v63 }
0x13da   :  { %v8432_v18 = vpop.f32.mrf.mxu1  ;;  %v8486_v4 = vpop.f32.mrf.mxu0 }
0x13db   :  { %v24104_v8 = vadd.f32 %v24101_v43, %v8826_v5  ;;  %v24107_v14 = vadd.f32 %v24101_v43, %v8829_v1  ;;  %v8824_v47 = vmul.f32 0.5, %v8432_v18  ;;  %v8827_v11 = vmul.f32 0.5, %v8486_v4 }
0x13dc   :  { %v19475_v13 = vpop.f32.mrf.mxu1  ;;  %v19483_v20 = vpop.f32.mrf.mxu0 }
0x13dd   :  { %v24115_v52 = vadd.f32 %v24112_v55, %v8824_v47  ;;  %v24118_v54 = vadd.f32 %v24112_v55, %v8827_v11  ;;  %v8887_v26 = vsel %vm932_vm2, %v24107_v14, -inf  ;;  %v8878_v34 = vsel %vm932_vm2, %v24104_v8, -inf }
0x13de   :  { %8888 = vmax.xlane.f32.xlu1 %v8887_v26  ;;  %v8489_v51 = vpop.f32.mrf.mxu0  ;;  %8879 = vmax.xlane.f32.xlu0 %v8878_v34  ;;  %v8435_v10 = vpop.f32.mrf.mxu1 }
0x13df   :  { %v8828_v35 = vmul.f32 0.5, %v8489_v51  ;;  %v8825_v30 = vmul.f32 0.5, %v8435_v10  ;;  %v8881_v56 = vsel %vm925_vm3, %v24118_v54, -inf  ;;  %v8872_v42 = vsel %vm925_vm3, %v24115_v52, -inf }
0x13e1   :  { %v24134_v44 = vadd.f32 %v24131_v40, %v8828_v35  ;;  %v24137_v49 = vadd.f32 %v24131_v40, %v8825_v30 }
0x13e2   :  { %8882 = vmax.xlane.f32.xlu1 %v8881_v56  ;;  %8873 = vmax.xlane.f32.xlu0 %v8872_v42 }
0x13e3   :  { %v8884_v59 = vsel %vm925_vm3, %v24134_v44, -inf  ;;  %v8875_v48 = vsel %vm925_vm3, %v24137_v49, -inf }
0x13e6   :  { %8885 = vmax.xlane.f32.xlu0 %v8884_v59  ;;  %8876 = vmax.xlane.f32.xlu1 %v8875_v48 }
0x13e8   :  { %v19490_v32 = vpop.f32.mrf.mxu1 }
0x13e9   :  { %v8832_v46 = vmul.f32 0.5, %v19490_v32  ;;  %v19498_v62 = vpop.f32.mrf.mxu0 }
0x13ea   :  { %v8835_v57 = vmul.f32 0.5, %v19498_v62  ;;  %v8540_v22 = vpop.f32.mrf.mxu1 }
0x13eb   :  { %v24144_v12 = vadd.f32 %v24101_v43, %v8832_v46  ;;  %v8830_v53 = vmul.f32 0.5, %v8540_v22  ;;  %v8594_v16 = vpop.f32.mrf.mxu0 }
0x13ec   :  { %v24147_v45 = vadd.f32 %v24101_v43, %v8835_v57  ;;  %v8833_v39 = vmul.f32 0.5, %v8594_v16  ;;  %v19491_v9 = vpop.f32.mrf.mxu1 }
0x13ed   :  { %v24150_v63 = vadd.f32 %v24112_v55, %v8830_v53  ;;  %v19499_v5 = vpop.f32.mrf.mxu0  ;;  %v8896_v1 = vsel %vm932_vm2, %v24144_v12, -inf }
0x13ee   :  { %v24155_v18 = vadd.f32 %v24112_v55, %v8833_v39  ;;  %v8905_v4 = vsel %vm932_vm2, %v24147_v45, -inf  ;;  %8897 = vmax.xlane.f32.xlu0 %v8896_v1  ;;  %v8543_v47 = vpop.f32.mrf.mxu1 }
0x13ef   :  { %v8597_v11 = vpop.f32.mrf.mxu0  ;;  %8906 = vmax.xlane.f32.xlu1 %v8905_v4  ;;  %v8831_v13 = vmul.f32 0.5, %v8543_v47  ;;  %v8890_v26 = vsel %vm925_vm3, %v24150_v63, -inf }
0x13f0   :  { %v8834_v20 = vmul.f32 0.5, %v8597_v11  ;;  %v8899_v34 = vsel %vm925_vm3, %v24155_v18, -inf }
0x13f1   :  { %v24167_v10 = vadd.f32 %v24131_v40, %v8831_v13 }
0x13f2   :  { %8891 = vmax.xlane.f32.xlu0 %v8890_v26  ;;  %v24164_v51 = vadd.f32 %v24131_v40, %v8834_v20 }
0x13f3   :  { %8900 = vmax.xlane.f32.xlu1 %v8899_v34  ;;  %v8893_v30 = vsel %vm925_vm3, %v24167_v10, -inf }
0x13f4   :  { %v8902_v35 = vsel %vm925_vm3, %v24164_v51, -inf }
0x13f6   :  { %8903 = vmax.xlane.f32.xlu0 %v8902_v35 }
0x13f7   :  { %8894 = vmax.xlane.f32.xlu1 %v8893_v30 }
0x13f8   :  { %v19506_v56 = vpop.f32.mrf.mxu1 }
0x13f9   :  { %v8838_v42 = vmul.f32 0.5, %v19506_v56  ;;  %v19514_v59 = vpop.f32.mrf.mxu0 }
0x13fa   :  { %v8841_v48 = vmul.f32 0.5, %v19514_v59  ;;  %v8648_v32 = vpop.f32.mrf.mxu1 }
0x13fb   :  { %v24174_v46 = vadd.f32 %v24101_v43, %v8838_v42  ;;  %v8836_v62 = vmul.f32 0.5, %v8648_v32  ;;  %v8702_v57 = vpop.f32.mrf.mxu0 }
0x13fc   :  { %v24177_v22 = vadd.f32 %v24101_v43, %v8841_v48  ;;  %v8839_v53 = vmul.f32 0.5, %v8702_v57  ;;  %v19507_v16 = vpop.f32.mrf.mxu1 }
0x13fd   :  { %v24180_v39 = vadd.f32 %v24112_v55, %v8836_v62  ;;  %v19515_v9 = vpop.f32.mrf.mxu0  ;;  %v8914_v5 = vsel %vm932_vm2, %v24174_v46, -inf }
0x13fe   :  { %v24185_v1 = vadd.f32 %v24112_v55, %v8839_v53  ;;  %v8923_v4 = vsel %vm932_vm2, %v24177_v22, -inf  ;;  %8915 = vmax.xlane.f32.xlu0 %v8914_v5  ;;  %v8651_v47 = vpop.f32.mrf.mxu1 }
0x13ff   :  { %v8705_v11 = vpop.f32.mrf.mxu0  ;;  %8924 = vmax.xlane.f32.xlu1 %v8923_v4  ;;  %v8837_v13 = vmul.f32 0.5, %v8651_v47  ;;  %v8908_v26 = vsel %vm925_vm3, %v24180_v39, -inf }
0x1400   :  { %v8840_v20 = vmul.f32 0.5, %v8705_v11  ;;  %v8917_v34 = vsel %vm925_vm3, %v24185_v1, -inf }
0x1401   :  { %v24197_v30 = vadd.f32 %v24131_v40, %v8837_v13 }
0x1402   :  { %8909 = vmax.xlane.f32.xlu0 %v8908_v26  ;;  %v24194_v35 = vadd.f32 %v24131_v40, %v8840_v20 }
0x1403   :  { %8918 = vmax.xlane.f32.xlu1 %v8917_v34  ;;  %v8911_v42 = vsel %vm925_vm3, %v24197_v30, -inf }
0x1404   :  { %v8920_v56 = vsel %vm925_vm3, %v24194_v35, -inf }
0x1406   :  { %8921 = vmax.xlane.f32.xlu0 %v8920_v56 }
0x1407   :  { %8912 = vmax.xlane.f32.xlu1 %v8911_v42 }
0x1408   :  { %v19522_v59 = vpop.f32.mrf.mxu1 }
0x1409   :  { %v8844_v48 = vmul.f32 0.5, %v19522_v59  ;;  %v19530_v32 = vpop.f32.mrf.mxu0 }
0x140a   :  { %v8756_v62 = vpop.f32.mrf.mxu1  ;;  %v8847_v56 = vmul.f32 0.5, %v19530_v32 }
0x140b   :  { %v24204_v57 = vadd.f32 %v24101_v43, %v8844_v48  ;;  %v8842_v53 = vmul.f32 0.5, %v8756_v62  ;;  %v8810_v16 = vpop.f32.mrf.mxu0 }
0x140c   :  { %v8845_v9 = vmul.f32 0.5, %v8810_v16  ;;  %v19523_v5 = vpop.f32.mrf.mxu1  ;;  %v24227_v32 = vadd.f32 %v24101_v43, %v8847_v56 }
0x140d   :  { %v24207_v4 = vadd.f32 %v24112_v55, %v8842_v53  ;;  %v19531_v47 = vpop.f32.mrf.mxu0  ;;  %v8932_v11 = vsel %vm932_vm2, %v24204_v57, -inf }
0x140e   :  { %v24212_v13 = vadd.f32 %v24112_v55, %v8845_v9  ;;  %8933 = vmax.xlane.f32.xlu0 %v8932_v11  ;;  %v8759_v20 = vpop.f32.mrf.mxu1  ;;  %v8941_v9 = vsel %vm932_vm2, %v24227_v32, -inf }
0x140f   :  { %v8813_v26 = vpop.f32.mrf.mxu0  ;;  %v8843_v34 = vmul.f32 0.5, %v8759_v20  ;;  %v8926_v48 = vsel %vm925_vm3, %v24207_v4, -inf }
0x1410   :  { %v8846_v42 = vmul.f32 0.5, %v8813_v26  ;;  %v8935_v59 = vsel %vm925_vm3, %v24212_v13, -inf }
0x1411   :  { %8936 = vmax.xlane.f32.xlu1 %v8935_v59  ;;  %v24219_v62 = vadd.f32 %v24131_v40, %v8843_v34 }
0x1412   :  { %8927 = vmax.xlane.f32.xlu0 %v8926_v48  ;;  %v24222_v55 = vadd.f32 %v24131_v40, %v8846_v42 }
0x1413   :  { %v8929_v53 = vsel %vm925_vm3, %v24219_v62, -inf }
0x1414   :  { %v8938_v16 = vsel %vm925_vm3, %v24222_v55, -inf }
0x1415   :  { %8930 = vmax.xlane.f32.xlu1 %v8929_v53 }
0x1416   :  { %8939 = vmax.xlane.f32.xlu0 %v8938_v16 }
0x1419   :  { %8942 = vmax.xlane.f32.xlu1 %v8941_v9 }
0x1467   :  { %v8889_v5 = vpop.xlane.xlu1 %8888  ;;  %v8880_v47 = vpop.xlane.xlu0 %8879 }
0x1468   :  { %v8949_v40 = vsub.f32 %v24107_v14, %v8889_v5  ;;  %v8946_v11 = vsub.f32 %v24104_v8, %v8880_v47 }
0x146a   :  { %v8978_v20 = vmul.f32 1.442695, %v8949_v40  ;;  %v8972_v26 = vmul.f32 1.442695, %v8946_v11 }
0x146b   :  { %v8883_v34 = vpop.xlane.xlu1 %8882  ;;  %v8874_v43 = vpop.xlane.xlu0 %8873 }
0x146c   :  { %20622 = vpow2.f32 %v8978_v20  ;;  %v8947_v56 = vsub.f32 %v24118_v54, %v8883_v34  ;;  %v8944_v42 = vsub.f32 %v24115_v52, %v8874_v43 }
0x146d   :  { %20624 = vpow2.f32 %v8972_v26 }
0x146e   :  { %v8974_v59 = vmul.f32 1.442695, %v8947_v56  ;;  %v8968_v48 = vmul.f32 1.442695, %v8944_v42 }
0x146f   :  { %v8886_v53 = vpop.xlane.xlu0 %8885  ;;  %v8877_v16 = vpop.xlane.xlu1 %8876 }
0x1470   :  { %20626 = vpow2.f32 %v8974_v59  ;;  %v8948_v9 = vsub.f32 %v24134_v44, %v8886_v53  ;;  %v8945_v14 = vsub.f32 %v24137_v49, %v8877_v16 }
0x1471   :  { %20628 = vpow2.f32 %v8968_v48 }
0x1472   :  { %v8976_v8 = vmul.f32 1.442695, %v8948_v9  ;;  %v8970_v5 = vmul.f32 1.442695, %v8945_v14 }
0x1474   :  { %20630 = vpow2.f32 %v8976_v8 }
0x1475   :  { %20632 = vpow2.f32 %v8970_v5 }
0x1477   :  { %v8898_v47 = vpop.xlane.xlu0 %8897 }
0x1478   :  { %v8907_v40 = vpop.xlane.xlu1 %8906  ;;  %v8952_v54 = vsub.f32 %v24144_v12, %v8898_v47 }
0x1479   :  { %v24240_v52 = vpop.eup %20622  ;;  %v8955_v11 = vsub.f32 %v24147_v45, %v8907_v40 }
0x147a   :  { %v24243_v20 = vpop.eup %20624  ;;  %v8984_v26 = vmul.f32 1.442695, %v8952_v54  ;;  %v9031_v44 = vsel %vm932_vm2, %v24240_v52, 0.0 }
0x147b   :  { %v8990_v49 = vmul.f32 1.442695, %v8955_v11  ;;  %v8892_v34 = vpop.xlane.xlu0 %8891  ;;  %v9022_v43 = vsel %vm932_vm2, %v24243_v20, 0.0  ;;  %9032 = vadd.xlane.f32.xlu1 %v9031_v44 }
0x147c   :  { %20634 = vpow2.f32 %v8984_v26  ;;  %v8901_v56 = vpop.xlane.xlu1 %8900  ;;  %v8950_v12 = vsub.f32 %v24150_v63, %v8892_v34  ;;  %9023 = vadd.xlane.f32.xlu0 %v9022_v43 }
0x147d   :  { %v24250_v42 = vpop.eup %20626  ;;  %20636 = vpow2.f32 %v8990_v49  ;;  %v8953_v45 = vsub.f32 %v24155_v18, %v8901_v56 }
0x147e   :  { %v24253_v59 = vpop.eup %20628  ;;  %v8980_v48 = vmul.f32 1.442695, %v8950_v12  ;;  %v9025_v53 = vsel %vm925_vm3, %v24250_v42, 0.0 }
0x147f   :  { %v8986_v16 = vmul.f32 1.442695, %v8953_v45  ;;  %v8904_v9 = vpop.xlane.xlu0 %8903  ;;  %v9016_v14 = vsel %vm925_vm3, %v24253_v59, 0.0  ;;  %9026 = vadd.xlane.f32.xlu1 %v9025_v53 }
0x1480   :  { %20638 = vpow2.f32 %v8980_v48  ;;  %v8954_v63 = vsub.f32 %v24164_v51, %v8904_v9  ;;  %v8895_v8 = vpop.xlane.xlu1 %8894  ;;  %9017 = vadd.xlane.f32.xlu0 %v9016_v14 }
0x1481   :  { %v24260_v5 = vpop.eup %20630  ;;  %20640 = vpow2.f32 %v8986_v16  ;;  %v8951_v18 = vsub.f32 %v24167_v10, %v8895_v8 }
0x1482   :  { %v24263_v47 = vpop.eup %20632  ;;  %v8988_v40 = vmul.f32 1.442695, %v8954_v63  ;;  %v9028_v54 = vsel %vm925_vm3, %v24260_v5, 0.0 }
0x1483   :  { %v8982_v11 = vmul.f32 1.442695, %v8951_v18  ;;  %v9019_v26 = vsel %vm925_vm3, %v24263_v47, 0.0 }
0x1484   :  { %20642 = vpow2.f32 %v8988_v40  ;;  %9029 = vadd.xlane.f32.xlu0 %v9028_v54  ;;  %9020 = vadd.xlane.f32.xlu1 %v9019_v26 }
0x1485   :  { %20644 = vpow2.f32 %v8982_v11 }
0x1487   :  { %v8916_v51 = vpop.xlane.xlu0 %8915 }
0x1488   :  { %v8925_v44 = vpop.xlane.xlu1 %8924  ;;  %v8958_v49 = vsub.f32 %v24174_v46, %v8916_v51 }
0x1489   :  { %v24270_v34 = vpop.eup %20634  ;;  %v8961_v10 = vsub.f32 %v24177_v22, %v8925_v44 }
0x148a   :  { %v24273_v43 = vpop.eup %20636  ;;  %v8996_v56 = vmul.f32 1.442695, %v8958_v49  ;;  %v9040_v12 = vsel %vm932_vm2, %v24270_v34, 0.0 }
0x148b   :  { %v9002_v45 = vmul.f32 1.442695, %v8961_v10  ;;  %v8910_v48 = vpop.xlane.xlu0 %8909  ;;  %9041 = vadd.xlane.f32.xlu0 %v9040_v12  ;;  %v9049_v53 = vsel %vm932_vm2, %v24273_v43, 0.0 }
0x148c   :  { %20646 = vpow2.f32 %v8996_v56  ;;  %v8919_v16 = vpop.xlane.xlu1 %8918  ;;  %v8956_v46 = vsub.f32 %v24180_v39, %v8910_v48  ;;  %9050 = vadd.xlane.f32.xlu1 %v9049_v53 }
0x148d   :  { %v24280_v9 = vpop.eup %20638  ;;  %20648 = vpow2.f32 %v9002_v45  ;;  %v8959_v22 = vsub.f32 %v24185_v1, %v8919_v16 }
0x148e   :  { %v24283_v14 = vpop.eup %20640  ;;  %v8992_v63 = vmul.f32 1.442695, %v8956_v46  ;;  %v9034_v8 = vsel %vm925_vm3, %v24280_v9, 0.0 }
0x148f   :  { %v8998_v18 = vmul.f32 1.442695, %v8959_v22  ;;  %v8922_v40 = vpop.xlane.xlu0 %8921  ;;  %9035 = vadd.xlane.f32.xlu0 %v9034_v8  ;;  %v9043_v54 = vsel %vm925_vm3, %v24283_v14, 0.0 }
0x1490   :  { %20650 = vpow2.f32 %v8992_v63  ;;  %v8960_v39 = vsub.f32 %v24194_v35, %v8922_v40  ;;  %v8913_v11 = vpop.xlane.xlu1 %8912  ;;  %9044 = vadd.xlane.f32.xlu1 %v9043_v54 }
0x1491   :  { %v24290_v26 = vpop.eup %20642  ;;  %20652 = vpow2.f32 %v8998_v18  ;;  %v8957_v1 = vsub.f32 %v24197_v30, %v8913_v11 }
0x1492   :  { %v24293_v51 = vpop.eup %20644  ;;  %v9000_v44 = vmul.f32 1.442695, %v8960_v39  ;;  %v9046_v49 = vsel %vm925_vm3, %v24290_v26, 0.0 }
0x1493   :  { %v8994_v10 = vmul.f32 1.442695, %v8957_v1  ;;  %9047 = vadd.xlane.f32.xlu0 %v9046_v49  ;;  %v9037_v56 = vsel %vm925_vm3, %v24293_v51, 0.0 }
0x1494   :  { %20654 = vpow2.f32 %v9000_v44  ;;  %9038 = vadd.xlane.f32.xlu1 %v9037_v56 }
0x1495   :  { %20656 = vpow2.f32 %v8994_v10 }
0x1497   :  { %v8934_v35 = vpop.xlane.xlu0 %8933 }
0x1498   :  { %v8964_v12 = vsub.f32 %v24204_v57, %v8934_v35 }
0x1499   :  { %v24300_v45 = vpop.eup %20646 }
0x149a   :  { %v24302_v30 = vpop.eup %20648  ;;  %v9008_v48 = vmul.f32 1.442695, %v8964_v12  ;;  %v8937_v53 = vpop.xlane.xlu1 %8936  ;;  %v9058_v16 = vsel %vm932_vm2, %v24300_v45, 0.0 }
0x149b   :  { %v8965_v46 = vsub.f32 %v24212_v13, %v8937_v53  ;;  %9059 = vadd.xlane.f32.xlu0 %v9058_v16  ;;  %v8928_v22 = vpop.xlane.xlu0 %8927  ;;  %v9067_v63 = vsel %vm932_vm2, %v24302_v30, 0.0 }
0x149c   :  { %20658 = vpow2.f32 %v9008_v48  ;;  %v8962_v8 = vsub.f32 %v24207_v4, %v8928_v22  ;;  %9068 = vadd.xlane.f32.xlu1 %v9067_v63 }
0x149d   :  { %v24310_v57 = vpop.eup %20650  ;;  %v9010_v18 = vmul.f32 1.442695, %v8965_v46 }
0x149e   :  { %v24312_v40 = vpop.eup %20652  ;;  %v9004_v54 = vmul.f32 1.442695, %v8962_v8  ;;  %v8931_v39 = vpop.xlane.xlu1 %8930  ;;  %v9052_v11 = vsel %vm925_vm3, %v24310_v57, 0.0 }
0x149f   :  { %20660 = vpow2.f32 %v9010_v18  ;;  %v8963_v13 = vsub.f32 %v24219_v62, %v8931_v39  ;;  %9053 = vadd.xlane.f32.xlu0 %v9052_v11  ;;  %v8940_v1 = vpop.xlane.xlu0 %8939  ;;  %v9061_v44 = vsel %vm925_vm3, %v24312_v40, 0.0 }
0x14a0   :  { %20662 = vpow2.f32 %v9004_v54  ;;  %v8966_v4 = vsub.f32 %v24222_v55, %v8940_v1  ;;  %9062 = vadd.xlane.f32.xlu1 %v9061_v44 }
0x14a1   :  { %v24320_v49 = vpop.eup %20654  ;;  %v9006_v10 = vmul.f32 1.442695, %v8963_v13 }
0x14a2   :  { %v24322_v56 = vpop.eup %20656  ;;  %v9012_v35 = vmul.f32 1.442695, %v8966_v4  ;;  %v8943_v12 = vpop.xlane.xlu1 %8942  ;;  %v9064_v48 = vsel %vm925_vm3, %v24320_v49, 0.0 }
0x14a3   :  { %20664 = vpow2.f32 %v9006_v10  ;;  %v8967_v62 = vsub.f32 %v24227_v32, %v8943_v12  ;;  %9065 = vadd.xlane.f32.xlu0 %v9064_v48  ;;  %v9055_v53 = vsel %vm925_vm3, %v24322_v56, 0.0 }
0x14a4   :  { %20666 = vpow2.f32 %v9012_v35  ;;  %9056 = vadd.xlane.f32.xlu1 %v9055_v53 }
0x14a5   :  { %v9014_v55 = vmul.f32 1.442695, %v8967_v62 }
0x14a7   :  { %20668 = vpow2.f32 %v9014_v55 }
0x14a9   :  { %v24329_v16 = vpop.eup %20658 }
0x14aa   :  { %v9076_v46 = vsel %vm932_vm2, %v24329_v16, 0.0 }
0x14ab   :  { %9077 = vadd.xlane.f32.xlu0 %v9076_v46 }
0x14ac   :  { %v24333_v22 = vpop.eup %20660 }
0x14ad   :  { %v24335_v63 = vpop.eup %20662  ;;  %v9079_v32 = vsel %vm925_vm3, %v24333_v22, 0.0 }
0x14ae   :  { %9080 = vadd.xlane.f32.xlu1 %v9079_v32  ;;  %v9070_v8 = vsel %vm925_vm3, %v24335_v63, 0.0 }
0x14af   :  { %9071 = vadd.xlane.f32.xlu0 %v9070_v8 }
0x14b0   :  { %v24341_v18 = vpop.eup %20664 }
0x14b1   :  { %v24343_v54 = vpop.eup %20666  ;;  %v9073_v39 = vsel %vm925_vm3, %v24341_v18, 0.0 }
0x14b2   :  { %9074 = vadd.xlane.f32.xlu1 %v9073_v39  ;;  %v9082_v11 = vsel %vm925_vm3, %v24343_v54, 0.0 }
0x14b3   :  { %9083 = vadd.xlane.f32.xlu0 %v9082_v11 }
0x14b4   :  { %v24349_v13 = vpop.eup %20668 }
0x14b5   :  { %v9085_v1 = vsel %vm932_vm2, %v24349_v13, 0.0 }
0x14b6   :  { %9086 = vadd.xlane.f32.xlu1 %v9085_v1 }
0x1504   :  { %v9033_v44 = vpop.xlane.xlu1 %9032 }
0x1505   :  { %v9024_v4 = vpop.xlane.xlu0 %9023  ;;  %20670 = vrcp.f32 %v9033_v44 }
0x1506   :  { %20672 = vrcp.f32 %v9024_v4 }
0x1508   :  { %v9027_v10 = vpop.xlane.xlu1 %9026 }
0x1509   :  { %v9018_v35 = vpop.xlane.xlu0 %9017  ;;  %20674 = vrcp.f32 %v9027_v10 }
0x150a   :  { %20676 = vrcp.f32 %v9018_v35 }
0x150d   :  { %v9030_v12 = vpop.xlane.xlu0 %9029  ;;  %v9021_v48 = vpop.xlane.xlu1 %9020 }
0x150e   :  { %20678 = vrcp.f32 %v9030_v12 }
0x150f   :  { %20680 = vrcp.f32 %v9021_v48 }
0x1512   :  { %v20671_v55 = vpop.eup %20670 }
0x1513   :  { %v20673_v46 = vpop.eup %20672  ;;  %v9117_v44 = vmul.f32 %v20671_v55, %v24240_v52 }
0x1514   :  { %v9042_v62 = vpop.xlane.xlu0 %9041  ;;  %v9114_v10 = vmul.f32 %v20673_v46, %v24243_v20  ;;  %v9330_v20 = vsel %vm1213_vm1, %v24092_v60, 0 }
0x1515   :  { %v9051_v53 = vpop.xlane.xlu1 %9050  ;;  %20682 = vrcp.f32 %v9042_v62  ;;  %v9139_v36 = vpack.c.bf16 %v9117_v44, %v9117_v44 }
0x1516   :  { %v20675_v8 = vpop.eup %20674  ;;  %20684 = vrcp.f32 %v9051_v53  ;;  %v9137_v55 = vpack.c.bf16 %v9114_v10, %v9114_v10 }
0x1517   :  { %v20677_v11 = vpop.eup %20676  ;;  %v9115_v12 = vmul.f32 %v20675_v8, %v24250_v42  ;;  %v8361_v42 = vmul.f32 %v23970_v24, %v24050_v38 }
0x1518   :  { %v9036_v32 = vpop.xlane.xlu0 %9035  ;;  %v9112_v62 = vmul.f32 %v20677_v11, %v24253_v59 }
0x1519   :  { %v9045_v39 = vpop.xlane.xlu1 %9044  ;;  %v8379_v60 = vpack.c.bf16 %v8361_v42, %v8361_v42 }
0x151a   :  { %20686 = vrcp.f32 %v9045_v39 }
0x151b   :  { %v20679_v1 = vpop.eup %20678  ;;  %20688 = vrcp.f32 %v9036_v32 }
0x151c   :  { %v20681_v4 = vpop.eup %20680  ;;  %v9048_v35 = vpop.xlane.xlu0 %9047  ;;  %v9116_v48 = vmul.f32 %v20679_v1, %v24260_v5 }
0x151d   :  { %20690 = vrcp.f32 %v9048_v35  ;;  %v9039_v2 = vpop.xlane.xlu1 %9038  ;;  %v9113_v6 = vmul.f32 %v20681_v4, %v24263_v47 }
0x151e   :  { %20692 = vrcp.f32 %v9039_v2  ;;  %v9138_v53 = vpack.c.bf16 %v9116_v48, %v9115_v12  ;;  %v9273_v2 = vsel %vm1213_vm1, %v24090_v15, 0 }
0x151f   :  { %v9136_v52 = vpack.c.bf16 %v9113_v6, %v9112_v62  ;;  %v8358_v6 = vmul.f32 %v23961_v29, %v24050_v38 }
0x1520   :  { %19544 = vmatprep.mubr.msk.bf16.mxu0 %vm925_vm3, %v9138_v53 }
0x1521   :  { %19536 = vmatprep.mubr.msk.bf16.mxu1 %vm925_vm3, %v9136_v52  ;;  %19545 = vmatmul.mubr.msk.bf16.vlgmr.msra.gmra.mxu0 %vm925_vm3, %v9139_v36  ;;  %v8377_v24 = vpack.c.bf16 %v8358_v6, %v8358_v6 }
0x1522   :  { %19537 = vmatmul.mubr.msk.bf16.vlgmr.msra.gmra.mxu1 %vm925_vm3, %v9137_v55  ;;  %19557 = vmatpush3.bf16.msra.mxu0 %v9330_v20  ;;  %v20683_v5 = vpop.eup %20682 }
0x1523   :  { %19549 = vmatpush3.bf16.msra.mxu1 %v9273_v2  ;;  %19558 = vmatprep.subr.bf16.mxu0 %v23952_v3  ;;  %v20685_v47 = vpop.eup %20684 }
0x1524   :  { %19550 = vmatprep.subr.bf16.mxu1 %v23948_v17  ;;  %v9060_v36 = vpop.xlane.xlu0 %9059  ;;  %v9123_v39 = vmul.f32 %v20685_v47, %v24273_v43 }
0x1525   :  { %v9069_v59 = vpop.xlane.xlu1 %9068  ;;  %20694 = vrcp.f32 %v9060_v36 }
0x1526   :  { %19559 = vmatpush3.bf16.msra.mxu0 %v23952_v3  ;;  %20696 = vrcp.f32 %v9069_v59  ;;  %v9120_v3 = vmul.f32 %v20683_v5, %v24270_v34  ;;  %v9143_v48 = vpack.c.bf16 %v9123_v39, %v9123_v39  ;;  %v9444_v34 = vsel %vm1213_vm1, %v8379_v60, 0 }
0x1527   :  { %19551 = vmatpush3.bf16.msra.mxu1 %v23948_v17  ;;  %19833 = vmatprep.subr.msk.bf16.mxu0 %vm1213_vm1, %v8379_v60  ;;  %v20687_v15 = vpop.eup %20686 }
0x1528   :  { %19832 = vmatprep.subr.msk.bf16.mxu1 %vm1213_vm1, %v8377_v24  ;;  %v9054_v29 = vpop.xlane.xlu0 %9053  ;;  %v20689_v46 = vpop.eup %20688  ;;  %v9121_v1 = vmul.f32 %v20687_v15, %v24283_v14  ;;  %v9141_v62 = vpack.c.bf16 %v9120_v3, %v9120_v3  ;;  %v9387_v14 = vsel %vm1213_vm1, %v8377_v24, 0 }
0x1529   :  { %v9063_v32 = vpop.xlane.xlu1 %9062  ;;  %v9118_v4 = vmul.f32 %v20689_v46, %v24280_v9  ;;  %v8367_v9 = vmul.f32 %v23992_v28, %v24050_v38 }
0x152a   :  { %v20691_v8 = vpop.eup %20690  ;;  %20698 = vrcp.f32 %v9063_v32 }
0x152b   :  { %v20693_v11 = vpop.eup %20692  ;;  %v9122_v17 = vmul.f32 %v20691_v8, %v24290_v26  ;;  %20700 = vrcp.f32 %v9054_v29  ;;  %v8364_v26 = vmul.f32 %v23983_v61, %v24050_v38  ;;  %v8383_v53 = vpack.c.bf16 %v8367_v9, %v8367_v9 }
0x152c   :  { %v9066_v44 = vpop.xlane.xlu0 %9065  ;;  %v9119_v10 = vmul.f32 %v20693_v11, %v24293_v51 }
0x152d   :  { %20702 = vrcp.f32 %v9066_v44  ;;  %v9057_v35 = vpop.xlane.xlu1 %9056  ;;  %v9142_v12 = vpack.c.bf16 %v9122_v17, %v9121_v1  ;;  %v8381_v52 = vpack.c.bf16 %v8364_v26, %v8364_v26 }
0x152e   :  { %20704 = vrcp.f32 %v9057_v35  ;;  %v9140_v43 = vpack.c.bf16 %v9119_v10, %v9118_v4 }
0x152f   :  { %19560 = vmatprep.mubr.msk.bf16.mxu0 %vm925_vm3, %v9142_v12 }
0x1530   :  { %19552 = vmatprep.mubr.msk.bf16.mxu1 %vm925_vm3, %v9140_v43  ;;  %19561 = vmatmul.mubr.msk.bf16.vlgmr.msra.gmra.mxu0 %vm925_vm3, %v9143_v48 }
0x1531   :  { %19553 = vmatmul.mubr.msk.bf16.vlgmr.msra.gmra.mxu1 %vm925_vm3, %v9141_v62  ;;  %19573 = vmatpush3.bf16.msra.mxu0 %v9444_v34 }
0x1532   :  { %19565 = vmatpush3.bf16.msra.mxu1 %v9387_v14  ;;  %19574 = vmatprep.subr.bf16.mxu0 %v23978_v33  ;;  %v20695_v55 = vpop.eup %20694 }
0x1533   :  { %19566 = vmatprep.subr.bf16.mxu1 %v23976_v19  ;;  %v20697_v28 = vpop.eup %20696 }
0x1534   :  { %v9078_v51 = vpop.xlane.xlu0 %9077  ;;  %v9129_v6 = vmul.f32 %v20697_v28, %v24302_v30 }
0x1535   :  { %19575 = vmatpush3.bf16.msra.mxu0 %v23978_v33  ;;  %20706 = vrcp.f32 %v9078_v51  ;;  %v9126_v33 = vmul.f32 %v20695_v55, %v24300_v45  ;;  %v9558_v45 = vsel %vm1213_vm1, %v8383_v53, 0 }
0x1536   :  { %19567 = vmatpush3.bf16.msra.mxu1 %v23976_v19  ;;  %19835 = vmatprep.subr.msk.bf16.mxu0 %vm1213_vm1, %v8383_v53  ;;  %v9147_v29 = vpack.c.bf16 %v9129_v6, %v9129_v6 }
0x1537   :  { %19834 = vmatprep.subr.msk.bf16.mxu1 %vm1213_vm1, %v8381_v52  ;;  %v9081_v20 = vpop.xlane.xlu1 %9080  ;;  %v20699_v61 = vpop.eup %20698  ;;  %v9145_v46 = vpack.c.bf16 %v9126_v33, %v9126_v33 }
0x1538   :  { %v9072_v38 = vpop.xlane.xlu0 %9071  ;;  %v20701_v42 = vpop.eup %20700  ;;  %v9127_v19 = vmul.f32 %v20699_v61, %v24312_v40 }
0x1539   :  { %20708 = vrcp.f32 %v9072_v38  ;;  %v9124_v24 = vmul.f32 %v20701_v42, %v24310_v57  ;;  %v9501_v57 = vsel %vm1213_vm1, %v8381_v52, 0 }
0x153a   :  { %v20703_v2 = vpop.eup %20702  ;;  %20710 = vrcp.f32 %v9081_v20 }
0x153b   :  { %v20705_v36 = vpop.eup %20704  ;;  %v9075_v59 = vpop.xlane.xlu1 %9074  ;;  %v9128_v60 = vmul.f32 %v20703_v2, %v24320_v49 }
0x153c   :  { %20712 = vrcp.f32 %v9075_v59  ;;  %v9084_v5 = vpop.xlane.xlu0 %9083  ;;  %v9125_v47 = vmul.f32 %v20705_v36, %v24322_v56 }
0x153d   :  { %20714 = vrcp.f32 %v9084_v5  ;;  %v9146_v15 = vpack.c.bf16 %v9128_v60, %v9127_v19 }
0x153e   :  { %v9144_v30 = vpack.c.bf16 %v9125_v47, %v9124_v24 }
0x153f   :  { %v9087_v32 = vpop.xlane.xlu1 %9086  ;;  %19576 = vmatprep.mubr.msk.bf16.mxu0 %vm925_vm3, %v9146_v15 }
0x1540   :  { %20716 = vrcp.f32 %v9087_v32  ;;  %19568 = vmatprep.mubr.msk.bf16.mxu1 %vm925_vm3, %v9144_v30  ;;  %19577 = vmatmul.mubr.msk.bf16.vlgmr.msra.gmra.mxu0 %vm925_vm3, %v9147_v29 }
0x1541   :  { %19569 = vmatmul.mubr.msk.bf16.vlgmr.msra.gmra.mxu1 %vm925_vm3, %v9145_v46  ;;  %19589 = vmatpush3.bf16.msra.mxu0 %v9558_v45 }
0x1542   :  { %19581 = vmatpush3.bf16.msra.mxu1 %v9501_v57  ;;  %19590 = vmatprep.subr.bf16.mxu0 %v24001_v7  ;;  %v20707_v40 = vpop.eup %20706 }
0x1543   :  { %19582 = vmatprep.subr.bf16.mxu1 %v23998_v25  ;;  %v9132_v39 = vmul.f32 %v20707_v40, %v24329_v16 }
0x1545   :  { %19591 = vmatpush3.bf16.msra.mxu0 %v24001_v7  ;;  %v9149_v7 = vpack.c.bf16 %v9132_v39, %v9132_v39 }
0x1546   :  { %19583 = vmatpush3.bf16.msra.mxu1 %v23998_v25  ;;  %v20709_v49 = vpop.eup %20708 }
0x1547   :  { %v20711_v56 = vpop.eup %20710  ;;  %v9130_v3 = vmul.f32 %v20709_v49, %v24335_v63  ;;  %v20141_v63 = vld [vmem:[%s26595_s10 + $0x20] sm:$0xff]  }
0x1548   :  { %v9133_v17 = vmul.f32 %v20711_v56, %v24333_v22  ;;  %v20140_v22 = vld [vmem:[%s26595_s10 + $0x28] sm:$0xff]  }
0x1549   :  { %v20713_v8 = vpop.eup %20712  ;;  %19596 = vmatprep.subr.bf16.mxu1 %v20140_v22 }
0x154a   :  { %v20715_v11 = vpop.eup %20714  ;;  %v9131_v1 = vmul.f32 %v20713_v8, %v24341_v18 }
0x154b   :  { %v9134_v44 = vmul.f32 %v20715_v11, %v24343_v54 }
0x154c   :  { %v9148_v4 = vpack.c.bf16 %v9131_v1, %v9130_v3 }
0x154d   :  { %v20717_v10 = vpop.eup %20716  ;;  %v9150_v35 = vpack.c.bf16 %v9134_v44, %v9133_v17 }
0x154e   :  { %v9135_v25 = vmul.f32 %v20717_v10, %v24349_v13  ;;  %19584 = vmatprep.mubr.msk.bf16.mxu1 %vm925_vm3, %v9148_v4 }
0x154f   :  { %19585 = vmatmul.mubr.msk.bf16.vlgmr.msra.gmra.mxu1 %vm925_vm3, %v9149_v7  ;;  %19592 = vmatprep.mubr.msk.bf16.mxu0 %vm925_vm3, %v9150_v35 }
0x1550   :  { %v9151_v16 = vpack.c.bf16 %v9135_v25, %v9135_v25  ;;  %19597 = vmatpush3.bf16.msra.mxu1 %v20140_v22 }
0x1551   :  { %19598 = vmatprep.subr.bf16.mxu1 %v20141_v63 }
0x1552   :  { %19593 = vmatmul.mubr.msk.bf16.vlgmr.msra.gmra.mxu0 %vm925_vm3, %v9151_v16 }
0x1553   :  { %10116 = vmatprep.mubr.bf16.mxu0 %v26637_v0 }
0x1554   :  { %19599 = vmatpush3.bf16.msra.mxu1 %v20141_v63 }
0x15e1   :  { %v19546_v18 = vpop.f32.mrf.mxu0 }
0x15e2   :  { %v19538_v54 = vpop.f32.mrf.mxu1  ;;  %v9639_v6 = vsel %vm1694_vm4, %v19546_v18, 0.0 }
0x15e3   :  { %v9252_v13 = vpop.f32.mrf.mxu0  ;;  %v9638_v2 = vsel %vm1694_vm4, %v19538_v54, 0.0 }
0x15e4   :  { %v9195_v12 = vpop.f32.mrf.mxu1  ;;  %v9609_v59 = vsel %vm112_vm0, %v9252_v13, 0.0  ;;  %v9640_v47 = vadd.f32 %v9639_v6, %v9638_v2 }
0x15e5   :  { %v19547_v48 = vpop.f32.mrf.mxu0  ;;  %v9608_v33 = vsel %vm112_vm0, %v9195_v12, 0.0 }
0x15e6   :  { %v19539_v43 = vpop.f32.mrf.mxu1  ;;  %v9610_v29 = vadd.f32 %v9609_v59, %v9608_v33 }
0x15e7   :  { %v9255_v62 = vpop.f32.mrf.mxu0 }
0x15e8   :  { %v9198_v34 = vpop.f32.mrf.mxu1  ;;  %v9624_v5 = vsel %vm112_vm0, %v9255_v62, 0.0 }
0x15e9   :  { %v9623_v60 = vsel %vm112_vm0, %v9198_v34, 0.0 }
0x15ea   :  { %v9625_v46 = vadd.f32 %v9624_v5, %v9623_v60 }
0x15f0   :  { %v19562_v9 = vpop.f32.mrf.mxu0 }
0x15f1   :  { %v19554_v14 = vpop.f32.mrf.mxu1  ;;  %v9643_v49 = vsel %vm1694_vm4, %v19562_v9, 0.0 }
0x15f2   :  { %v9366_v26 = vpop.f32.mrf.mxu0  ;;  %v9641_v24 = vsel %vm1694_vm4, %v19554_v14, 0.0 }
0x15f3   :  { %v9309_v51 = vpop.f32.mrf.mxu1  ;;  %v9642_v32 = vadd.f32 %v9641_v24, %v9640_v47  ;;  %v9613_v39 = vsel %vm112_vm0, %v9366_v26, 0.0 }
0x15f4   :  { %v19563_v53 = vpop.f32.mrf.mxu0  ;;  %v9611_v15 = vsel %vm112_vm0, %v9309_v51, 0.0 }
0x15f5   :  { %v19555_v52 = vpop.f32.mrf.mxu1  ;;  %v9612_v45 = vadd.f32 %v9611_v15, %v9610_v29  ;;  %v9644_v8 = vadd.f32 %v9643_v49, %v9642_v32 }
0x15f6   :  { %v9369_v55 = vpop.f32.mrf.mxu0 }
0x15f7   :  { %v9312_v28 = vpop.f32.mrf.mxu1  ;;  %v9614_v3 = vadd.f32 %v9613_v39, %v9612_v45  ;;  %v9628_v1 = vsel %vm112_vm0, %v9369_v55, 0.0 }
0x15f8   :  { %v9626_v30 = vsel %vm112_vm0, %v9312_v28, 0.0 }
0x15f9   :  { %v9627_v57 = vadd.f32 %v9626_v30, %v9625_v46 }
0x15fb   :  { %v9629_v44 = vadd.f32 %v9628_v1, %v9627_v57 }
0x1600   :  { %v19578_v20 = vpop.f32.mrf.mxu0 }
0x1601   :  { %v19570_v61 = vpop.f32.mrf.mxu1  ;;  %v9647_v22 = vsel %vm1694_vm4, %v19578_v20, 0.0 }
0x1602   :  { %v9480_v38 = vpop.f32.mrf.mxu0  ;;  %v9645_v56 = vsel %vm1694_vm4, %v19570_v61, 0.0 }
0x1603   :  { %v9423_v42 = vpop.f32.mrf.mxu1  ;;  %v9646_v4 = vadd.f32 %v9645_v56, %v9644_v8  ;;  %v9617_v13 = vsel %vm112_vm0, %v9480_v38, 0.0 }
0x1604   :  { %v19579_v36 = vpop.f32.mrf.mxu0  ;;  %v9615_v11 = vsel %vm112_vm0, %v9423_v42, 0.0 }
0x1605   :  { %v19571_v19 = vpop.f32.mrf.mxu1  ;;  %v9616_v7 = vadd.f32 %v9615_v11, %v9614_v3  ;;  %v9648_v54 = vadd.f32 %v9647_v22, %v9646_v4 }
0x1606   :  { %v9483_v35 = vpop.f32.mrf.mxu0  ;;  %v16879_v19 = vld [vmem:[%s26596_s11 + $0x2] ss:$0 sm:$0xff] }
0x1607   :  { %v9426_v40 = vpop.f32.mrf.mxu1  ;;  %v9618_v43 = vadd.f32 %v9617_v13, %v9616_v7  ;;  %v9632_v62 = vsel %vm112_vm0, %v9483_v35, 0.0  ;;  %v16904_v35 = vld [vmem:[%s26597_s12 + $0x280] sm:$0xff] }
0x1608   :  { %v9630_v17 = vsel %vm112_vm0, %v9426_v40, 0.0  ;;  %v16896_v13 = vld [vmem:[%s26597_s12 + $0x240] sm:$0xff] }
0x1609   :  { %v9631_v25 = vadd.f32 %v9630_v17, %v9629_v44 }
0x160b   :  { %v9633_v9 = vadd.f32 %v9632_v62, %v9631_v25  ;;  %v16912_v25 = vld [vmem:[%s26597_s12 + $0x2c0] sm:$0xff]  ;;  %v16889_v62 = vld [vmem:[%s26597_s12 + $0x208] sm:$0xff] }
0x160c   :  { %v16938_v22 = vcombine.low %v16904_v35, %v16912_v25 }
0x160f   :  { %v19586_v10 = vpop.f32.mrf.mxu1 }
0x1610   :  { %v9649_v63 = vsel %vm1694_vm4, %v19586_v10, 0.0 }
0x1611   :  { %v9537_v16 = vpop.f32.mrf.mxu1  ;;  %v9650_v14 = vadd.f32 %v9649_v63, %v9648_v54  ;;  %v16939_v63 = vcombine.high %v16904_v35, %v16912_v25  ;;  %v16888_v54 = vld [vmem:[%s26597_s12 + $0x200] sm:$0xff] }
0x1612   :  { %v19594_v18 = vpop.f32.mrf.mxu0  ;;  %v9619_v12 = vsel %vm112_vm0, %v9537_v16, 0.0  ;;  %v16905_v16 = vld [vmem:[%s26597_s12 + $0x288] sm:$0xff] }
0x1613   :  { %v19587_v48 = vpop.f32.mrf.mxu1  ;;  %v9620_v51 = vadd.f32 %v9619_v12, %v9618_v43  ;;  %v9651_v53 = vsel %vm1694_vm4, %v19594_v18, 0.0  ;;  %v16913_v18 = vld [vmem:[%s26597_s12 + $0x2c8] sm:$0xff]  ;;  %v16923_v43 = vcombine.high %v16888_v54, %v16896_v13  ;;  %10096 = vmatprep.subr.bf16.mxu0 %v16939_v63 }
0x1614   :  { %v9594_v34 = vpop.f32.mrf.mxu0  ;;  %v9652_v38 = vadd.f32 %v9651_v53, %v9650_v14  ;;  %v16940_v12 = vcombine.low %v16905_v16, %v16913_v18  ;;  %v16941_v48 = vcombine.high %v16905_v16, %v16913_v18  ;;  %10097 = vmatpush1.bf16.msra.mxu0 %v16938_v22  ;;  %v16922_v14 = vcombine.low %v16888_v54, %v16896_v13  ;;  %v16914_v53 = vld [vmem:[%s26597_s12 + $0x2d0] sm:$0xff]  ;;  %v16892_v18 = vld [vmem:[%s26597_s12 + $0x220] sm:$0xff]  ;;  %v16893_v13 = vld [vmem:[%s26597_s12 + $0x228] sm:$0xff] }
0x1615   :  { %v9540_v26 = vpop.f32.mrf.mxu1  ;;  %v9621_v28 = vsel %vm112_vm0, %v9594_v34, 0.0  ;;  %v16897_v34 = vld [vmem:[%s26597_s12 + $0x248] sm:$0xff]  ;;  %10098 = vmatprep.subr.bf16.mxu0 %v16923_v43  ;;  %v16900_v54 = vld [vmem:[%s26597_s12 + $0x260] sm:$0xff] }
0x1616   :  { %v9634_v52 = vsel %vm112_vm0, %v9540_v26, 0.0  ;;  %v19595_v55 = vpop.f32.mrf.mxu0  ;;  %v9622_v2 = vadd.f32 %v9621_v28, %v9620_v51  ;;  %v9654_v33 = vpack.c.bf16 %v9652_v38, %v9652_v38  ;;  %10147 = vmatprep.subr.bf16.mxu1 %v16941_v48  ;;  %v16924_v26 = vcombine.low %v16889_v62, %v16897_v34  ;;  %v16906_v51 = vld [vmem:[%s26597_s12 + $0x290] sm:$0xff] }
0x1617   :  { %v9635_v20 = vadd.f32 %v9634_v52, %v9633_v9  ;;  %v16925_v9 = vcombine.high %v16889_v62, %v16897_v34  ;;  %v16907_v52 = vld [vmem:[%s26597_s12 + $0x298] sm:$0xff]  ;;  %v16942_v55 = vcombine.low %v16906_v51, %v16914_v53  ;;  %v16943_v28 = vcombine.high %v16906_v51, %v16914_v53 }
0x1618   :  { %v9597_v61 = vpop.f32.mrf.mxu0  ;;  %10099 = vmatpush1.bf16.msra.mxu0 %v16922_v14  ;;  %v16931_v62 = vcombine.high %v16892_v18, %v16900_v54  ;;  %v16918_v14 = vld [vmem:[%s26597_s12 + $0x2f0] sm:$0xff]  ;;  %v16919_v51 = vld [vmem:[%s26597_s12 + $0x2f8] sm:$0xff]  ;;  %v16930_v53 = vcombine.low %v16892_v18, %v16900_v54  ;;  %v20171_v18 = vld [vmem:[%s26599_s14 + $0x8c0] sm:$0xff]  }
0x1619   :  { %v9636_v42 = vsel %vm112_vm0, %v9597_v61, 0.0  ;;  %10198 = vmatprep.subr.bf16.mxu0 %v16943_v28  ;;  %v20172_v54 = vld [vmem:[%s26599_s14 + $0x800] sm:$0xff]  }
0x161a   :  { %v9637_v6 = vadd.f32 %v9636_v42, %v9635_v20  ;;  %v16915_v20 = vld [vmem:[%s26597_s12 + $0x2d8] sm:$0xff] }
0x161b   :  { %v16944_v61 = vcombine.low %v16907_v52, %v16915_v20  ;;  %v16945_v38 = vcombine.high %v16907_v52, %v16915_v20  ;;  %v16894_v20 = vld [vmem:[%s26597_s12 + $0x230] sm:$0xff] }
0x161c   :  { %v9653_v36 = vpack.c.bf16 %v9637_v6, %v9622_v2 }
0x161e   :  { %19600 = vmatprep.mubr.msk.bf16.mxu1 %vm112_vm0, %v9653_v36 }
0x161f   :  { %19601 = vmatmul.mubr.msk.bf16.vlgmr.msra.gmra.mxu1 %vm112_vm0, %v9654_v33 }
0x1620   :  { %10167 = vmatprep.mubr.bf16.mxu1 %v26637_v0  ;;  %10148 = vmatpush1.bf16.msra.mxu1 %v16940_v12  ;;  %v16901_v12 = vld [vmem:[%s26597_s12 + $0x268] sm:$0xff] }
0x1621   :  { %10149 = vmatprep.subr.bf16.mxu1 %v16925_v9  ;;  %v16933_v34 = vcombine.high %v16893_v13, %v16901_v12  ;;  %v16910_v9 = vld [vmem:[%s26597_s12 + $0x2b0] sm:$0xff]  ;;  %v16932_v52 = vcombine.low %v16893_v13, %v16901_v12  ;;  %v20173_v13 = vld [vmem:[%s26599_s14 + $0x880] sm:$0xff]   ;;  %v20174_v12 = vld [vmem:[%s26599_s14 + $0x978] sm:$0xff]  }
0x1624   :  { %10150 = vmatpush1.bf16.msra.mxu1 %v16924_v26  ;;  %v16911_v26 = vld [vmem:[%s26597_s12 + $0x2b8] sm:$0xff] }
0x1625   :  { %10249 = vmatprep.subr.bf16.mxu1 %v16945_v38  ;;  %v16953_v28 = vcombine.high %v16911_v26, %v16919_v51  ;;  %v16895_v38 = vld [vmem:[%s26597_s12 + $0x238] sm:$0xff] }
0x16df   :  { %v19602_v59 = vpop.f32.mrf.mxu1 }
0x16e0   :  { %v9729_v5 = vadd.f32 %v19602_v59, %v16879_v19 }
0x16e1   :  { %v9720_v60 = vpop.f32.mrf.mxu1 }
0x16e2   :  { %v9721_v24 = vadd.f32 %v16879_v19, %v9720_v60  ;;  %v9736_v30 = vadd.f32 %v9729_v5, %v23828_v50 }
0x16e3   :  { %v19603_v47 = vpop.f32.mrf.mxu1 }
0x16e4   :  { %v9734_v15 = vadd.f32 %v9721_v24, %v23822_v31  ;;  %v9747_v40 = vsel %vm1694_vm4, %v9736_v30, 0.0 }
0x16e5   :  { %v9723_v29 = vpop.f32.mrf.mxu1 }
0x16e6   :  { %v9724_v46 = vadd.f32 %v16879_v19, %v9723_v29  ;;  %v9741_v32 = vsel %vm112_vm0, %v9734_v15, 0.0 }
0x16e7   :  { %9742 = vadd.xlane.f32.xlu0 %v9741_v32 }
0x16e8   :  { %v9735_v45 = vadd.f32 %v9724_v46, %v23824_v37 }
0x16ea   :  { %v9744_v57 = vsel %vm112_vm0, %v9735_v45, 0.0 }
0x16eb   :  { %9745 = vadd.xlane.f32.xlu1 %v9744_v57  ;;  %9748 = vadd.xlane.f32.xlu0 %v9747_v40 }
0x1770   :  { %v9743_v49 = vpop.xlane.xlu0 %9742 }
0x1771   :  { %v9750_v56 = vmul.f32 0.03125, %v9743_v49  ;;  %v16890_v49 = vld [vmem:[%s26597_s12 + $0x210] sm:$0xff] }
0x1773   :  { %v24468_v8 = vsub.f32 %v9734_v15, %v9750_v56  ;;  %v16886_v15 = vld [vmem:[%s26601_s16 + $0x2] ss:$0 sm:$0xff] }
0x1774   :  { %v9746_v31 = vpop.xlane.xlu1 %9745  ;;  %v9749_v39 = vpop.xlane.xlu0 %9748 }
0x1775   :  { %v9751_v11 = vmul.f32 0.03125, %v9746_v31  ;;  %v9752_v50 = vmul.f32 0.03125, %v9749_v39  ;;  %v9756_v3 = vmul.f32 %v24468_v8, %v24468_v8  ;;  %v16898_v31 = vld [vmem:[%s26597_s12 + $0x250] sm:$0xff]  ;;  %v16891_v39 = vld [vmem:[%s26597_s12 + $0x218] sm:$0xff] }
0x1776   :  { %v16926_v35 = vcombine.low %v16890_v49, %v16898_v31 }
0x1777   :  { %v9754_v1 = vsub.f32 %v9735_v45, %v9751_v11  ;;  %v24472_v17 = vsub.f32 %v9736_v30, %v9752_v50  ;;  %v9759_v37 = vsel %vm112_vm0, %v9756_v3, 0.0  ;;  %v16887_v45 = vld [vmem:[%s26602_s17 + $0x2] ss:$0 sm:$0xff]  ;;  %v16899_v11 = vld [vmem:[%s26597_s12 + $0x258] sm:$0xff] }
0x1778   :  { %9760 = vadd.xlane.f32.xlu1 %v9759_v37  ;;  %v16908_v37 = vld [vmem:[%s26597_s12 + $0x2a0] sm:$0xff]  ;;  %v16928_v25 = vcombine.low %v16891_v39, %v16899_v11 }
0x1779   :  { %v9757_v44 = vmul.f32 %v9754_v1, %v9754_v1  ;;  %v9758_v4 = vmul.f32 %v24472_v17, %v24472_v17 }
0x177b   :  { %v9762_v10 = vsel %vm112_vm0, %v9757_v44, 0.0  ;;  %v9765_v7 = vsel %vm1694_vm4, %v9758_v4, 0.0  ;;  %v16916_v44 = vld [vmem:[%s26597_s12 + $0x2e0] sm:$0xff]  ;;  %v16909_v4 = vld [vmem:[%s26597_s12 + $0x2a8] sm:$0xff] }
0x177c   :  { %9763 = vadd.xlane.f32.xlu0 %v9762_v10  ;;  %9766 = vadd.xlane.f32.xlu1 %v9765_v7  ;;  %v16917_v10 = vld [vmem:[%s26597_s12 + $0x2e8] sm:$0xff]  ;;  %v16947_v16 = vcombine.high %v16908_v37, %v16916_v44  ;;  %v16946_v48 = vcombine.low %v16908_v37, %v16916_v44  ;;  %v20162_v37 = vld [vmem:[%s26599_s14 + $0x850] sm:$0xff]  }
0x177d   :  { %v16949_v22 = vcombine.high %v16909_v4, %v16917_v10  ;;  %v16948_v43 = vcombine.low %v16909_v4, %v16917_v10  ;;  %v20163_v44 = vld [vmem:[%s26599_s14 + $0x8d0] sm:$0xff]  }
0x177e   :  { %v20164_v4 = vld [vmem:[%s26599_s14 + $0x810] sm:$0xff]  }
0x177f   :  { %v20165_v10 = vld [vmem:[%s26599_s14 + $0x890] sm:$0xff]  }
0x1801   :  { %v9761_v42 = vpop.xlane.xlu1 %9760 }
0x1802   :  { %v9768_v2 = vmul.f32 0.03125, %v9761_v42  ;;  %v16903_v42 = vld [vmem:[%s26597_s12 + $0x278] sm:$0xff] }
0x1804   :  { %v9771_v6 = vadd.f32 1e-05, %v9768_v2  ;;  %v16950_v2 = vcombine.low %v16910_v9, %v16918_v14 }
0x1805   :  { %v9767_v36 = vpop.xlane.xlu1 %9766  ;;  %v9764_v33 = vpop.xlane.xlu0 %9763 }
0x1806   :  { %20718 = vrsqrt.f32 %v9771_v6  ;;  %v9770_v59 = vmul.f32 0.03125, %v9767_v36  ;;  %v9769_v19 = vmul.f32 0.03125, %v9764_v33  ;;  %v16952_v6 = vcombine.low %v16911_v26, %v16919_v51 }
0x1807   :  { %v16937_v33 = vcombine.high %v16895_v38, %v16903_v42 }
0x1808   :  { %v9773_v60 = vadd.f32 1e-05, %v9770_v59  ;;  %v9772_v5 = vadd.f32 1e-05, %v9769_v19  ;;  %v16936_v19 = vcombine.low %v16895_v38, %v16903_v42 }
0x180a   :  { %20720 = vrsqrt.f32 %v9773_v60  ;;  %v20142_v60 = vld [vmem:[%s26599_s14 + $0x878] sm:$0xff]  }
0x180b   :  { %20722 = vrsqrt.f32 %v9772_v5  ;;  %v20143_v5 = vld [vmem:[%s26599_s14 + $0x8f8] sm:$0xff]  }
0x1813   :  { %v20719_v24 = vpop.eup %20718 }
0x1814   :  { %v9777_v47 = vmul.f32 %v20719_v24, %v24468_v8  ;;  %v20144_v24 = vld [vmem:[%s26599_s14 + $0x838] sm:$0xff]  }
0x1816   :  { %v9786_v46 = vmul.f32 %v16886_v15, %v9777_v47  ;;  %v20145_v47 = vld [vmem:[%s26599_s14 + $0x8b8] sm:$0xff]  }
0x1817   :  { %v20721_v29 = vpop.eup %20720 }
0x1818   :  { %v20723_v30 = vpop.eup %20722  ;;  %v9779_v57 = vmul.f32 %v20721_v29, %v24472_v17  ;;  %v24526_v56 = vadd.f32 %v16887_v45, %v9786_v46  ;;  %v16929_v17 = vcombine.high %v16891_v39, %v16899_v11  ;;  %v20147_v29 = vld [vmem:[%s26599_s14 + $0x8f0] sm:$0xff]   ;;  %v20156_v39 = vld [vmem:[%s26599_s14 + $0x820] sm:$0xff]  }
0x1819   :  { %v9778_v32 = vmul.f32 %v20723_v30, %v9754_v1  ;;  %v16927_v1 = vcombine.high %v16890_v49, %v16898_v31  ;;  %v20148_v30 = vld [vmem:[%s26599_s14 + $0x830] sm:$0xff]   ;;  %v20154_v49 = vld [vmem:[%s26599_s14 + $0x860] sm:$0xff]  }
0x181a   :  { %v9788_v50 = vmul.f32 %v16886_v15, %v9779_v57  ;;  %v20149_v46 = vld [vmem:[%s26599_s14 + $0x8b0] sm:$0xff]   ;;  %v20152_v57 = vld [vmem:[%s26599_s14 + $0x828] sm:$0xff]   ;;  %v20155_v31 = vld [vmem:[%s26599_s14 + $0x8e0] sm:$0xff]  }
0x181b   :  { %v9787_v40 = vmul.f32 %v16886_v15, %v9778_v32  ;;  %v20146_v15 = vld [vmem:[%s26599_s14 + $0x870] sm:$0xff]   ;;  %v20150_v32 = vld [vmem:[%s26599_s14 + $0x868] sm:$0xff]   ;;  %v20157_v11 = vld [vmem:[%s26599_s14 + $0x8a0] sm:$0xff]  }
0x181c   :  { %v24561_v7 = vadd.f32 %v16887_v45, %v9788_v50  ;;  %v20158_v50 = vld [vmem:[%s26599_s14 + $0x858] sm:$0xff]  }
0x181d   :  { %v24528_v8 = vadd.f32 %v16887_v45, %v9787_v40  ;;  %v20151_v45 = vld [vmem:[%s26599_s14 + $0x8e8] sm:$0xff]  }
0x181e   :  { %v24565_v63 = vpack.c.bf16 %v24561_v7, %v24561_v7  ;;  %v20153_v40 = vld [vmem:[%s26599_s14 + $0x8a8] sm:$0xff]  }
0x181f   :  { %v24541_v3 = vpack.c.bf16 %v24528_v8, %v24526_v56 }
0x1821   :  { %16954 = vmatmul.mubr.msk.bf16.vlgmr.msra.gmra.mxu0 %vm112_vm0, %v24541_v3  ;;  %16956 = vmatmul.mubr.msk.bf16.vlgmr.msra.gmra.mxu1 %vm112_vm0, %v24541_v3 }
0x1822   :  { %10126 = vmatprep.mubr.bf16.mxu0 %v26637_v0  ;;  %10177 = vmatprep.mubr.bf16.mxu1 %v26637_v0 }
0x1823   :  { %10199 = vmatpush1.bf16.msra.mxu0 %v16942_v55  ;;  %10250 = vmatpush1.bf16.msra.mxu1 %v16944_v61  ;;  %v16951_v55 = vcombine.high %v16910_v9, %v16918_v14  ;;  %v16902_v61 = vld [vmem:[%s26597_s12 + $0x270] sm:$0xff] }
0x1824   :  { %10200 = vmatprep.subr.bf16.mxu0 %v16927_v1  ;;  %10251 = vmatprep.subr.bf16.mxu1 %v16929_v17  ;;  %v16935_v36 = vcombine.high %v16894_v20, %v16902_v61  ;;  %v16934_v59 = vcombine.low %v16894_v20, %v16902_v61  ;;  %v20160_v1 = vld [vmem:[%s26599_s14 + $0x818] sm:$0xff]  }
0x1825   :  { %v20161_v17 = vld [vmem:[%s26599_s14 + $0x898] sm:$0xff]  }
0x1827   :  { %10201 = vmatpush1.bf16.msra.mxu0 %v16926_v35  ;;  %10252 = vmatpush1.bf16.msra.mxu1 %v16928_v25  ;;  %v20166_v35 = vld [vmem:[%s26599_s14 + $0x848] sm:$0xff]  }
0x1828   :  { %10300 = vmatprep.subr.bf16.mxu0 %v16947_v16  ;;  %10351 = vmatprep.subr.bf16.mxu1 %v16949_v22  ;;  %v20167_v25 = vld [vmem:[%s26599_s14 + $0x8c8] sm:$0xff]  }
0x1829   :  { %16955 = vmatmul.mubr.msk.bf16.gmra.mxu0 %vm112_vm0, %v24565_v63  ;;  %16957 = vmatmul.mubr.msk.bf16.gmra.mxu1 %vm112_vm0, %v24565_v63  ;;  %v20168_v16 = vld [vmem:[%s26599_s14 + $0x808] sm:$0xff]  }
0x182a   :  { %10218 = vmatprep.mubr.bf16.mxu0 %v26637_v0  ;;  %10269 = vmatprep.mubr.bf16.mxu1 %v26637_v0  ;;  %v20169_v22 = vld [vmem:[%s26599_s14 + $0x888] sm:$0xff]  }
0x1831   :  { %16958 = vmatmul.mubr.msk.bf16.vlgmr.msra.gmra.mxu0 %vm112_vm0, %v24541_v3  ;;  %16960 = vmatmul.mubr.msk.bf16.vlgmr.msra.gmra.mxu1 %vm112_vm0, %v24541_v3 }
0x1832   :  { %10228 = vmatprep.mubr.bf16.mxu0 %v26637_v0  ;;  %10279 = vmatprep.mubr.bf16.mxu1 %v26637_v0 }
0x1833   :  { %10301 = vmatpush1.bf16.msra.mxu0 %v16946_v48  ;;  %10352 = vmatpush1.bf16.msra.mxu1 %v16948_v43  ;;  %v20175_v48 = vld [vmem:[%s26599_s14 + $0x9f8] sm:$0xff]   ;;  %v24748_v43 = vld [vmem:[%s26598_s13 + $0x20] sm:$0xff] }
0x1834   :  { %10302 = vmatprep.subr.bf16.mxu0 %v16931_v62  ;;  %10353 = vmatprep.subr.bf16.mxu1 %v16933_v34  ;;  %v9845_v9 = vrot.slane %v24748_v43, %v21940_v41  ;;  %v9853_v14 = vrot.slane %v24748_v43, %v21943_v21  ;;  %v9841_v26 = vrot.slane %v24748_v43, %v21946_v23 }
0x1835   :  { %v9849_v51 = vrot.slane %v24748_v43, %v21949_v58 }
0x1837   :  { %10303 = vmatpush1.bf16.msra.mxu0 %v16930_v53  ;;  %10354 = vmatpush1.bf16.msra.mxu1 %v16932_v52 }
0x1838   :  { %10402 = vmatprep.subr.bf16.mxu0 %v16951_v55  ;;  %10453 = vmatprep.subr.bf16.mxu1 %v16953_v28 }
0x1839   :  { %16959 = vmatmul.mubr.msk.bf16.gmra.mxu0 %vm112_vm0, %v24565_v63  ;;  %16961 = vmatmul.mubr.msk.bf16.gmra.mxu1 %vm112_vm0, %v24565_v63 }
0x183a   :  { %10320 = vmatprep.mubr.bf16.mxu0 %v26637_v0  ;;  %10371 = vmatprep.mubr.bf16.mxu1 %v26637_v0 }
0x1841   :  { %16962 = vmatmul.mubr.msk.bf16.vlgmr.msra.gmra.mxu0 %vm112_vm0, %v24541_v3  ;;  %16964 = vmatmul.mubr.msk.bf16.vlgmr.msra.gmra.mxu1 %vm112_vm0, %v24541_v3 }
0x1842   :  { %10330 = vmatprep.mubr.bf16.mxu0 %v26637_v0  ;;  %10381 = vmatprep.mubr.bf16.mxu1 %v26637_v0 }
0x1843   :  { %10403 = vmatpush1.bf16.msra.mxu0 %v16950_v2  ;;  %10454 = vmatpush1.bf16.msra.mxu1 %v16952_v6 }
0x1844   :  { %10404 = vmatprep.subr.bf16.mxu0 %v16935_v36  ;;  %10455 = vmatprep.subr.bf16.mxu1 %v16937_v33 }
0x1847   :  { %10405 = vmatpush1.bf16.msra.mxu0 %v16934_v59  ;;  %10456 = vmatpush1.bf16.msra.mxu1 %v16936_v19 }
0x1848   :  { %18596 = vmatprep.subr.bf16.mxu0 %v20142_v60  ;;  %18624 = vmatprep.subr.bf16.mxu1 %v20143_v5 }
0x1849   :  { %16963 = vmatmul.mubr.msk.bf16.gmra.mxu0 %vm112_vm0, %v24565_v63  ;;  %16965 = vmatmul.mubr.msk.bf16.gmra.mxu1 %vm112_vm0, %v24565_v63 }
0x184a   :  { %10422 = vmatprep.mubr.bf16.mxu0 %v26637_v0  ;;  %10473 = vmatprep.mubr.bf16.mxu1 %v26637_v0 }
0x1851   :  { %16966 = vmatmul.mubr.msk.bf16.vlgmr.msra.gmra.mxu0 %vm112_vm0, %v24541_v3  ;;  %16968 = vmatmul.mubr.msk.bf16.vlgmr.msra.gmra.mxu1 %vm112_vm0, %v24541_v3  ;;  %v20159_v3 = vld [vmem:[%s26599_s14 + $0x8d8] sm:$0xff]  }
0x1852   :  { %10432 = vmatprep.mubr.bf16.mxu0 %v26637_v0  ;;  %10483 = vmatprep.mubr.bf16.mxu1 %v26637_v0 }
0x1853   :  { %18597 = vmatpush3.bf16.msra.mxu0 %v20144_v24  ;;  %18625 = vmatpush3.bf16.msra.mxu1 %v20145_v47 }
0x1854   :  { %18598 = vmatprep.subr.bf16.mxu0 %v20146_v15  ;;  %18626 = vmatprep.subr.bf16.mxu1 %v20147_v29 }
0x1857   :  { %18599 = vmatpush3.bf16.msra.mxu0 %v20148_v30  ;;  %18627 = vmatpush3.bf16.msra.mxu1 %v20149_v46 }
0x1858   :  { %18600 = vmatprep.subr.bf16.mxu0 %v20150_v32  ;;  %18628 = vmatprep.subr.bf16.mxu1 %v20151_v45 }
0x1859   :  { %16967 = vmatmul.mubr.msk.bf16.gmra.mxu0 %vm112_vm0, %v24565_v63  ;;  %16969 = vmatmul.mubr.msk.bf16.gmra.mxu1 %vm112_vm0, %v24565_v63  ;;  %v20170_v63 = vld [vmem:[%s26599_s14 + $0x840] sm:$0xff]  }
0x185b   :  { %18601 = vmatpush3.bf16.msra.mxu0 %v20152_v57  ;;  %18629 = vmatpush3.bf16.msra.mxu1 %v20153_v40 }
0x185c   :  { %18602 = vmatprep.subr.bf16.mxu0 %v20154_v49  ;;  %18630 = vmatprep.subr.bf16.mxu1 %v20155_v31 }
0x185f   :  { %18603 = vmatpush3.bf16.msra.mxu0 %v20156_v39  ;;  %18631 = vmatpush3.bf16.msra.mxu1 %v20157_v11 }
0x1860   :  { %18604 = vmatprep.subr.bf16.mxu0 %v20158_v50  ;;  %18632 = vmatprep.subr.bf16.mxu1 %v20159_v3  ;;  %v20176_v50 = vld [vmem:[%s26599_s14 + $0x938] sm:$0xff]  }
0x1861   :  { %v20177_v3 = vld [vmem:[%s26599_s14 + $0x9b8] sm:$0xff]  }
0x1863   :  { %18605 = vmatpush3.bf16.msra.mxu0 %v20160_v1  ;;  %18633 = vmatpush3.bf16.msra.mxu1 %v20161_v17 }
0x1864   :  { %18606 = vmatprep.subr.bf16.mxu0 %v20162_v37  ;;  %18634 = vmatprep.subr.bf16.mxu1 %v20163_v44 }
0x1867   :  { %18607 = vmatpush3.bf16.msra.mxu0 %v20164_v4  ;;  %18635 = vmatpush3.bf16.msra.mxu1 %v20165_v10 }
0x1868   :  { %18608 = vmatprep.subr.bf16.mxu0 %v20166_v35  ;;  %18636 = vmatprep.subr.bf16.mxu1 %v20167_v25  ;;  %v20178_v35 = vld [vmem:[%s26599_s14 + $0x970] sm:$0xff]  }
0x1869   :  { %v20179_v25 = vld [vmem:[%s26599_s14 + $0x9f0] sm:$0xff]  }
0x186b   :  { %18609 = vmatpush3.bf16.msra.mxu0 %v20168_v16  ;;  %18637 = vmatpush3.bf16.msra.mxu1 %v20169_v22 }
0x186c   :  { %18610 = vmatprep.subr.bf16.mxu0 %v20170_v63  ;;  %18638 = vmatprep.subr.bf16.mxu1 %v20171_v18 }
0x186f   :  { %18611 = vmatpush3.bf16.msra.mxu0 %v20172_v54  ;;  %18639 = vmatpush3.bf16.msra.mxu1 %v20173_v13 }
0x1870   :  { %18652 = vmatprep.subr.bf16.mxu0 %v20174_v12  ;;  %18680 = vmatprep.subr.bf16.mxu1 %v20175_v48  ;;  %v20180_v12 = vld [vmem:[%s26599_s14 + $0x930] sm:$0xff]  }
0x1871   :  { %v20181_v48 = vld [vmem:[%s26599_s14 + $0x9b0] sm:$0xff]  }
0x18e1   :  { %v10118_v62 = vpop.f32.mrf.mxu0  ;;  %v10169_v34 = vpop.f32.mrf.mxu1 }
0x18e2   :  { %v10119_v2 = vadd.f32 %v10118_v62, %v9841_v26  ;;  %v10170_v6 = vadd.f32 %v10169_v34, %v9849_v51 }
0x18e3   :  { %v10120_v53 = vpop.f32.mrf.mxu0  ;;  %v10171_v52 = vpop.f32.mrf.mxu1 }
0x18e4   :  { %v10121_v20 = vadd.f32 %v10120_v53, %v9845_v9  ;;  %v10172_v61 = vadd.f32 %v10171_v52, %v9853_v14  ;;  %v10492_v32 = vmax.f32 %v10119_v2, 0.0  ;;  %v10494_v45 = vmax.f32 %v10170_v6, 0.0 }
0x18e5   :  { %v10122_v55 = vpop.f32.mrf.mxu0  ;;  %v10173_v28 = vpop.f32.mrf.mxu1  ;;  %v24788_v53 = vrot.slane %v24748_v43, %v21977_v27 }
0x18e6   :  { %v10123_v38 = vadd.f32 %v10122_v55, %v9841_v26  ;;  %v10174_v42 = vadd.f32 %v10173_v28, %v9849_v51  ;;  %v10493_v15 = vmax.f32 %v10121_v20, 0.0  ;;  %v10495_v29 = vmax.f32 %v10172_v61, 0.0  ;;  %v26640_v55 = vld [vmem:[#allocation5_spill] sm:$0xff] }
0x18e7   :  { %v10124_v36 = vpop.f32.mrf.mxu0  ;;  %v10175_v33 = vpop.f32.mrf.mxu1  ;;  %v24792_v28 = vrot.slane %v24748_v43, %v26640_v55  ;;  %v20184_v61 = vld [vmem:[%s26599_s14 + $0x928] sm:$0xff]  }
0x18e8   :  { %v10125_v59 = vadd.f32 %v10124_v36, %v9845_v9  ;;  %v10176_v19 = vadd.f32 %v10175_v33, %v9853_v14  ;;  %v10508_v60 = vmax.f32 %v10123_v38, 0.0  ;;  %v10510_v5 = vmax.f32 %v10174_v42, 0.0  ;;  %v20185_v38 = vld [vmem:[%s26599_s14 + $0x9a8] sm:$0xff]   ;;  %v20186_v33 = vld [vmem:[%s26599_s14 + $0x960] sm:$0xff]  }
0x18e9   :  { %v10128_v24 = vpop.f32.mrf.mxu0  ;;  %v10179_v47 = vpop.f32.mrf.mxu1 }
0x18ea   :  { %v10509_v30 = vmax.f32 %v10125_v59, 0.0  ;;  %v10511_v46 = vmax.f32 %v10176_v19, 0.0  ;;  %v10540_v1 = vpack.c.bf16 %v10508_v60, %v10492_v32  ;;  %v10542_v17 = vpack.c.bf16 %v10510_v5, %v10494_v45  ;;  %v20187_v59 = vld [vmem:[%s26599_s14 + $0x9e0] sm:$0xff]   ;;  %v20190_v45 = vld [vmem:[%s26599_s14 + $0x958] sm:$0xff]  }
0x18eb   :  { %v10130_v57 = vpop.f32.mrf.mxu0  ;;  %v10181_v40 = vpop.f32.mrf.mxu1  ;;  %v10129_v37 = vadd.f32 %v10128_v24, %v9841_v26  ;;  %v10180_v44 = vadd.f32 %v10179_v47, %v9849_v51  ;;  %v20182_v26 = vld [vmem:[%s26599_s14 + $0x968] sm:$0xff]  }
0x18ec   :  { %v10131_v49 = vadd.f32 %v10130_v57, %v9845_v9  ;;  %v10182_v31 = vadd.f32 %v10181_v40, %v9853_v14  ;;  %v10541_v39 = vpack.c.bf16 %v10509_v30, %v10493_v15  ;;  %v10543_v11 = vpack.c.bf16 %v10511_v46, %v10495_v29  ;;  %v20183_v51 = vld [vmem:[%s26599_s14 + $0x9e8] sm:$0xff]   ;;  %v20188_v29 = vld [vmem:[%s26599_s14 + $0x920] sm:$0xff]   ;;  %v20191_v57 = vld [vmem:[%s26599_s14 + $0x9d8] sm:$0xff]  }
0x18ed   :  { %v10132_v4 = vpop.f32.mrf.mxu0  ;;  %v10183_v10 = vpop.f32.mrf.mxu1  ;;  %v10524_v62 = vmax.f32 %v10129_v37, 0.0  ;;  %v10526_v34 = vmax.f32 %v10180_v44, 0.0  ;;  %v20189_v30 = vld [vmem:[%s26599_s14 + $0x9a0] sm:$0xff]  }
0x18ee   :  { %v10525_v16 = vmax.f32 %v10131_v49, 0.0  ;;  %v10527_v22 = vmax.f32 %v10182_v31, 0.0  ;;  %11637 = vmatprep.mubr.bf16.mxu0 %v10541_v39  ;;  %11685 = vmatprep.mubr.bf16.mxu1 %v10543_v11  ;;  %v20194_v10 = vld [vmem:[%s26599_s14 + $0x950] sm:$0xff]  }
0x18ef   :  { %v10133_v63 = vpop.f32.mrf.mxu0  ;;  %v10184_v18 = vpop.f32.mrf.mxu1  ;;  %11638 = vmatmul.mubr.bf16.vlgmr.msra.gmra.mxu0 %v10540_v1  ;;  %11686 = vmatmul.mubr.bf16.vlgmr.msra.gmra.mxu1 %v10542_v17  ;;  %v10556_v42 = vpack.c.bf16 %v10524_v62, %v10524_v62  ;;  %v10558_v2 = vpack.c.bf16 %v10526_v34, %v10526_v34  ;;  %v20192_v1 = vld [vmem:[%s26599_s14 + $0x918] sm:$0xff]  }
0x18f0   :  { %v10557_v54 = vpack.c.bf16 %v10525_v16, %v10525_v16  ;;  %v10559_v13 = vpack.c.bf16 %v10527_v22, %v10527_v22  ;;  %18653 = vmatpush3.bf16.msra.mxu0 %v20176_v50  ;;  %18681 = vmatpush3.bf16.msra.mxu1 %v20177_v3  ;;  %v20193_v17 = vld [vmem:[%s26599_s14 + $0x998] sm:$0xff]   ;;  %v20196_v22 = vld [vmem:[%s26599_s14 + $0x910] sm:$0xff]  }
0x18f1   :  { %v24776_v9 = vpop.f32.mrf.mxu0  ;;  %v24778_v14 = vpop.f32.mrf.mxu1  ;;  %18654 = vmatprep.subr.bf16.mxu0 %v20178_v35  ;;  %18682 = vmatprep.subr.bf16.mxu1 %v20179_v25  ;;  %v20195_v35 = vld [vmem:[%s26599_s14 + $0x9d0] sm:$0xff]  }
0x18f2   :  { %11645 = vmatprep.mubr.bf16.mxu0 %v10557_v54  ;;  %11693 = vmatprep.mubr.bf16.mxu1 %v10559_v13  ;;  %v20197_v63 = vld [vmem:[%s26599_s14 + $0x990] sm:$0xff]   ;;  %v20198_v13 = vld [vmem:[%s26599_s14 + $0x948] sm:$0xff]  }
0x18f3   :  { %v10222_v52 = vpop.f32.mrf.mxu0  ;;  %v10273_v20 = vpop.f32.mrf.mxu1  ;;  %v26642_v34 = vld [vmem:[#allocation7_spill] sm:$0xff] }
0x18f4   :  { %18655 = vmatpush3.bf16.msra.mxu0 %v20180_v12  ;;  %18683 = vmatpush3.bf16.msra.mxu1 %v20181_v48  ;;  %v10223_v19 = vadd.f32 %v10222_v52, %v24788_v53  ;;  %v10274_v60 = vadd.f32 %v10273_v20, %v24792_v28  ;;  %v20199_v12 = vld [vmem:[%s26599_s14 + $0x9c8] sm:$0xff]  }
0x18f5   :  { %v10224_v6 = vpop.f32.mrf.mxu0  ;;  %v24800_v36 = vpop.f32.mrf.mxu1  ;;  %18656 = vmatprep.subr.bf16.mxu0 %v20182_v26  ;;  %18684 = vmatprep.subr.bf16.mxu1 %v20183_v51  ;;  %v26641_v48 = vld [vmem:[#allocation6_spill] sm:$0xff]  ;;  %v9865_v26 = vrot.slane %v24748_v43, %v26642_v34 }
0x18f6   :  { %v10497_v40 = vmax.f32 %v10223_v19, 0.0  ;;  %v10499_v39 = vmax.f32 %v10274_v60, 0.0  ;;  %v9857_v62 = vrot.slane %v24748_v43, %v26641_v48 }
0x18f7   :  { %v10226_v5 = vpop.f32.mrf.mxu0  ;;  %v10277_v24 = vpop.f32.mrf.mxu1  ;;  %11646 = vmatmul.mubr.bf16.gmra.mxu0 %v10556_v42  ;;  %11694 = vmatmul.mubr.bf16.gmra.mxu1 %v10558_v2  ;;  %v10276_v42 = vadd.f32 %v24800_v36, %v9865_v26  ;;  %v10272_v60 = vadd.f32 %v24778_v14, %v9865_v26  ;;  %v20206_v14 = vld [vmem:[%s26599_s14 + $0xa78] sm:$0xff]  }
0x18f8   :  { %v10227_v47 = vadd.f32 %v10226_v5, %v24788_v53  ;;  %v10278_v15 = vadd.f32 %v10277_v24, %v24792_v28  ;;  %18657 = vmatpush3.bf16.msra.mxu0 %v20184_v61  ;;  %18685 = vmatpush3.bf16.msra.mxu1 %v20185_v38  ;;  %v10225_v20 = vadd.f32 %v10224_v6, %v9857_v62  ;;  %v20200_v61 = vld [vmem:[%s26599_s14 + $0x908] sm:$0xff]   ;;  %v20202_v6 = vld [vmem:[%s26599_s14 + $0x940] sm:$0xff]  }
0x18f9   :  { %v24818_v46 = vpop.f32.mrf.mxu0  ;;  %v24820_v32 = vpop.f32.mrf.mxu1  ;;  %18658 = vmatprep.subr.bf16.mxu0 %v20186_v33  ;;  %18686 = vmatprep.subr.bf16.mxu1 %v20187_v59  ;;  %v20201_v38 = vld [vmem:[%s26599_s14 + $0x988] sm:$0xff]   ;;  %v20203_v33 = vld [vmem:[%s26599_s14 + $0x9c0] sm:$0xff]   ;;  %v10221_v59 = vadd.f32 %v24776_v9, %v9857_v62  ;;  %v10514_v9 = vmax.f32 %v10276_v42, 0.0 }
0x18fa   :  { %v10513_v49 = vmax.f32 %v10227_v47, 0.0  ;;  %v10515_v31 = vmax.f32 %v10278_v15, 0.0  ;;  %v10512_v47 = vmax.f32 %v10225_v20, 0.0  ;;  %v20204_v15 = vld [vmem:[%s26599_s14 + $0x900] sm:$0xff]  }
0x18fb   :  { %v10232_v11 = vpop.f32.mrf.mxu0  ;;  %v10283_v50 = vpop.f32.mrf.mxu1 }
0x18fc   :  { %18659 = vmatpush3.bf16.msra.mxu0 %v20188_v29  ;;  %18687 = vmatpush3.bf16.msra.mxu1 %v20189_v30  ;;  %v10545_v3 = vpack.c.bf16 %v10513_v49, %v10497_v40  ;;  %v10547_v4 = vpack.c.bf16 %v10515_v31, %v10499_v39  ;;  %v10233_v19 = vadd.f32 %v10232_v11, %v24788_v53  ;;  %v20205_v29 = vld [vmem:[%s26599_s14 + $0x980] sm:$0xff]   ;;  %v10498_v49 = vmax.f32 %v10272_v60, 0.0  ;;  %v24904_v31 = vld [vmem:[%s26598_s13 + $0x28] sm:$0xff] }
0x18fd   :  { %v10234_v37 = vpop.f32.mrf.mxu0  ;;  %v10285_v44 = vpop.f32.mrf.mxu1  ;;  %18660 = vmatprep.subr.bf16.mxu0 %v20190_v45  ;;  %18688 = vmatprep.subr.bf16.mxu1 %v20191_v57  ;;  %v10284_v36 = vadd.f32 %v10283_v50, %v24792_v28  ;;  %v20207_v28 = vld [vmem:[%s26599_s14 + $0xaf8] sm:$0xff]   ;;  %v10496_v45 = vmax.f32 %v10221_v59, 0.0 }
0x18fe   :  { %11733 = vmatprep.mubr.bf16.mxu0 %v10545_v3  ;;  %11781 = vmatprep.mubr.bf16.mxu1 %v10547_v4  ;;  %v10529_v57 = vmax.f32 %v10233_v19, 0.0  ;;  %v24912_v3 = vrot.slane %v24904_v31, %v21940_v41  ;;  %v10231_v37 = vadd.f32 %v24818_v46, %v9857_v62  ;;  %v10282_v44 = vadd.f32 %v24820_v32, %v9865_v26  ;;  %v20210_v32 = vld [vmem:[%s26599_s14 + $0xa70] sm:$0xff]   ;;  %v20214_v19 = vld [vmem:[%s26599_s14 + $0xa68] sm:$0xff]  }
0x18ff   :  { %v10235_v25 = vpop.f32.mrf.mxu0  ;;  %v10286_v16 = vpop.f32.mrf.mxu1  ;;  %v10531_v40 = vmax.f32 %v10284_v36, 0.0  ;;  %v10544_v50 = vpack.c.bf16 %v10512_v47, %v10496_v45  ;;  %v20215_v36 = vld [vmem:[%s26599_s14 + $0xae8] sm:$0xff]  }
0x1900   :  { %18661 = vmatpush3.bf16.msra.mxu0 %v20192_v1  ;;  %18689 = vmatpush3.bf16.msra.mxu1 %v20193_v17  ;;  %v24916_v1 = vrot.slane %v24904_v31, %v21943_v21  ;;  %v10546_v17 = vpack.c.bf16 %v10514_v9, %v10498_v49  ;;  %v20209_v25 = vld [vmem:[%s26599_s14 + $0xab8] sm:$0xff]   ;;  %v10561_v16 = vpack.c.bf16 %v10529_v57, %v10529_v57  ;;  %v20217_v45 = vld [vmem:[%s26599_s14 + $0xaa8] sm:$0xff]   ;;  %v20218_v49 = vld [vmem:[%s26599_s14 + $0xa60] sm:$0xff]  }
0x1901   :  { %v24846_v18 = vpop.f32.mrf.mxu0  ;;  %v24848_v54 = vpop.f32.mrf.mxu1  ;;  %18662 = vmatprep.subr.bf16.mxu0 %v20194_v10  ;;  %18690 = vmatprep.subr.bf16.mxu1 %v20195_v35  ;;  %v20208_v35 = vld [vmem:[%s26599_s14 + $0xa38] sm:$0xff]  }
0x1903   :  { %v24860_v51 = vpop.f32.mrf.mxu0  ;;  %v24862_v52 = vpop.f32.mrf.mxu1 }
0x1904   :  { %18663 = vmatpush3.bf16.msra.mxu0 %v20196_v22  ;;  %18691 = vmatpush3.bf16.msra.mxu1 %v20197_v63  ;;  %v10563_v22 = vpack.c.bf16 %v10531_v40, %v10531_v40  ;;  %v10325_v26 = vadd.f32 %v24860_v51, %v24912_v3  ;;  %v10376_v20 = vadd.f32 %v24862_v52, %v24916_v1  ;;  %v20213_v51 = vld [vmem:[%s26599_s14 + $0xab0] sm:$0xff]  }
0x1905   :  { %v24871_v2 = vpop.f32.mrf.mxu0  ;;  %v24873_v43 = vpop.f32.mrf.mxu1  ;;  %18664 = vmatprep.subr.bf16.mxu0 %v20198_v13  ;;  %18692 = vmatprep.subr.bf16.mxu1 %v20199_v12  ;;  %v20211_v13 = vld [vmem:[%s26599_s14 + $0xaf0] sm:$0xff]  }
0x1906   :  { %v10503_v47 = vmax.f32 %v10376_v20, 0.0 }
0x1907   :  { %v10328_v5 = vpop.f32.mrf.mxu0  ;;  %v10379_v24 = vpop.f32.mrf.mxu1 }
0x1908   :  { %18665 = vmatpush3.bf16.msra.mxu0 %v20200_v61  ;;  %18693 = vmatpush3.bf16.msra.mxu1 %v20201_v38  ;;  %v10329_v63 = vadd.f32 %v10328_v5, %v24912_v3  ;;  %v10380_v46 = vadd.f32 %v10379_v24, %v24916_v1  ;;  %v10528_v61 = vmax.f32 %v10231_v37, 0.0  ;;  %v10530_v38 = vmax.f32 %v10282_v44, 0.0 }
0x1909   :  { %v24891_v30 = vpop.f32.mrf.mxu0  ;;  %v24893_v53 = vpop.f32.mrf.mxu1  ;;  %18666 = vmatprep.subr.bf16.mxu0 %v20202_v6  ;;  %18694 = vmatprep.subr.bf16.mxu1 %v20203_v33  ;;  %v20212_v33 = vld [vmem:[%s26599_s14 + $0xa30] sm:$0xff]   ;;  %v10501_v24 = vmax.f32 %v10325_v26, 0.0 }
0x190a   :  { %v10517_v59 = vmax.f32 %v10329_v63, 0.0  ;;  %v10519_v52 = vmax.f32 %v10380_v46, 0.0  ;;  %v20227_v26 = vld [vmem:[%s26599_s14 + $0xad0] sm:$0xff]  }
0x190b   :  { %v24906_v39 = vpop.f32.mrf.mxu0  ;;  %v24908_v11 = vpop.f32.mrf.mxu1 }
0x190c   :  { %18667 = vmatpush3.bf16.msra.mxu0 %v20204_v15  ;;  %18695 = vmatpush3.bf16.msra.mxu1 %v20205_v29  ;;  %v10560_v15 = vpack.c.bf16 %v10528_v61, %v10528_v61  ;;  %v10562_v29 = vpack.c.bf16 %v10530_v38, %v10530_v38  ;;  %v10549_v57 = vpack.c.bf16 %v10517_v59, %v10501_v24  ;;  %v20228_v38 = vld [vmem:[%s26599_s14 + $0xa10] sm:$0xff]   ;;  %v20231_v59 = vld [vmem:[%s26599_s14 + $0xac8] sm:$0xff]  }
0x190d   :  { %v10336_v4 = vpop.f32.mrf.mxu0  ;;  %v10387_v10 = vpop.f32.mrf.mxu1  ;;  %18708 = vmatprep.subr.bf16.mxu0 %v20206_v14  ;;  %18736 = vmatprep.subr.bf16.mxu1 %v20207_v28  ;;  %v20216_v28 = vld [vmem:[%s26599_s14 + $0xa28] sm:$0xff]   ;;  %v10551_v40 = vpack.c.bf16 %v10519_v52, %v10503_v47  ;;  %v9873_v52 = vrot.slane %v24904_v31, %v21946_v23 }
0x190e   :  { %v20220_v10 = vld [vmem:[%s26599_s14 + $0xa20] sm:$0xff]   ;;  %v20232_v24 = vld [vmem:[%s26599_s14 + $0xa08] sm:$0xff]  }
0x190f   :  { %11734 = vmatmul.mubr.bf16.vlgmr.msra.gmra.mxu0 %v10544_v50  ;;  %11782 = vmatmul.mubr.bf16.vlgmr.msra.gmra.mxu1 %v10546_v17  ;;  %v10337_v12 = vpop.f32.mrf.mxu0  ;;  %v10388_v62 = vpop.f32.mrf.mxu1  ;;  %v20219_v50 = vld [vmem:[%s26599_s14 + $0xae0] sm:$0xff]   ;;  %v20233_v47 = vld [vmem:[%s26599_s14 + $0xa88] sm:$0xff]  }
0x1910   :  { %11741 = vmatprep.mubr.bf16.mxu0 %v10561_v16  ;;  %11789 = vmatprep.mubr.bf16.mxu1 %v10563_v22  ;;  %v20223_v16 = vld [vmem:[%s26599_s14 + $0xad8] sm:$0xff]   ;;  %v20226_v62 = vld [vmem:[%s26599_s14 + $0xa50] sm:$0xff]  }
0x1911   :  { %18709 = vmatpush3.bf16.msra.mxu0 %v20208_v35  ;;  %18737 = vmatpush3.bf16.msra.mxu1 %v20209_v25  ;;  %v24938_v42 = vpop.f32.mrf.mxu0  ;;  %v24940_v6 = vpop.f32.mrf.mxu1  ;;  %v20221_v35 = vld [vmem:[%s26599_s14 + $0xaa0] sm:$0xff]   ;;  %v20222_v25 = vld [vmem:[%s26599_s14 + $0xa58] sm:$0xff]  }
0x1912   :  { %18710 = vmatprep.subr.bf16.mxu0 %v20210_v32  ;;  %18738 = vmatprep.subr.bf16.mxu1 %v20211_v13  ;;  %v20224_v13 = vld [vmem:[%s26599_s14 + $0xa18] sm:$0xff]  }
0x1913   :  { %v24954_v60 = vpop.f32.mrf.mxu0  ;;  %v24956_v5 = vpop.f32.mrf.mxu1  ;;  %v20225_v12 = vld [vmem:[%s26599_s14 + $0xa98] sm:$0xff]  }
0x1915   :  { %18711 = vmatpush3.bf16.msra.mxu0 %v20212_v33  ;;  %18739 = vmatpush3.bf16.msra.mxu1 %v20213_v51  ;;  %v24958_v9 = vpop.f32.mrf.mxu0  ;;  %v24960_v14 = vpop.f32.mrf.mxu1  ;;  %v20229_v33 = vld [vmem:[%s26599_s14 + $0xa90] sm:$0xff]   ;;  %v20230_v51 = vld [vmem:[%s26599_s14 + $0xa48] sm:$0xff]  }
0x1916   :  { %18712 = vmatprep.subr.bf16.mxu0 %v20214_v19  ;;  %18740 = vmatprep.subr.bf16.mxu1 %v20215_v36  ;;  %v9881_v19 = vrot.slane %v24904_v31, %v21949_v58  ;;  %v10327_v36 = vadd.f32 %v24871_v2, %v9873_v52  ;;  %v20235_v2 = vld [vmem:[%s26599_s14 + $0xac0] sm:$0xff]  }
0x1917   :  { %11742 = vmatmul.mubr.bf16.gmra.mxu0 %v10560_v15  ;;  %11790 = vmatmul.mubr.bf16.gmra.mxu1 %v10562_v29  ;;  %v24974_v17 = vpop.f32.mrf.mxu0  ;;  %v24976_v37 = vpop.f32.mrf.mxu1  ;;  %v20234_v29 = vld [vmem:[%s26599_s14 + $0xa40] sm:$0xff]  }
0x1918   :  { %11829 = vmatprep.mubr.bf16.mxu0 %v10549_v57  ;;  %11877 = vmatprep.mubr.bf16.mxu1 %v10551_v40  ;;  %v10378_v15 = vadd.f32 %v24873_v43, %v9881_v19  ;;  %v10386_v57 = vadd.f32 %v24908_v11, %v24916_v1  ;;  %v10374_v43 = vadd.f32 %v24848_v54, %v9881_v19  ;;  %v10516_v40 = vmax.f32 %v10327_v36, 0.0  ;;  %v20239_v54 = vld [vmem:[%s26599_s14 + $0xbf8] sm:$0xff]  }
0x1919   :  { %18713 = vmatpush3.bf16.msra.mxu0 %v20216_v28  ;;  %18741 = vmatpush3.bf16.msra.mxu1 %v20217_v45  ;;  %v24978_v44 = vpop.f32.mrf.mxu0  ;;  %v24980_v4 = vpop.f32.mrf.mxu1  ;;  %v10323_v28 = vadd.f32 %v24846_v18, %v9873_v52  ;;  %v10335_v45 = vadd.f32 %v24906_v39, %v24912_v3  ;;  %v20238_v39 = vld [vmem:[%s26599_s14 + $0xb78] sm:$0xff]  }
0x191a   :  { %18714 = vmatprep.subr.bf16.mxu0 %v20218_v49  ;;  %18742 = vmatprep.subr.bf16.mxu1 %v20219_v50  ;;  %v20236_v49 = vld [vmem:[%s26599_s14 + $0xa00] sm:$0xff]   ;;  %v10518_v18 = vmax.f32 %v10378_v15, 0.0  ;;  %v10535_v1 = vmax.f32 %v10386_v57, 0.0 }
0x191b   :  { %v24994_v22 = vpop.f32.mrf.mxu0  ;;  %v24996_v63 = vpop.f32.mrf.mxu1  ;;  %v20237_v50 = vld [vmem:[%s26599_s14 + $0xa80] sm:$0xff]   ;;  %v10500_v11 = vmax.f32 %v10323_v28, 0.0  ;;  %v10533_v3 = vmax.f32 %v10335_v45, 0.0  ;;  %v20249_v28 = vld [vmem:[%s26599_s14 + $0xba8] sm:$0xff]  }
0x191d   :  { %18715 = vmatpush3.bf16.msra.mxu0 %v20220_v10  ;;  %18743 = vmatpush3.bf16.msra.mxu1 %v20221_v35  ;;  %v10438_v46 = vpop.f32.mrf.mxu0  ;;  %v10489_v32 = vpop.f32.mrf.mxu1  ;;  %v10502_v10 = vmax.f32 %v10374_v43, 0.0  ;;  %v10548_v35 = vpack.c.bf16 %v10516_v40, %v10500_v11  ;;  %v20250_v43 = vld [vmem:[%s26599_s14 + $0xb60] sm:$0xff]   ;;  %v20257_v11 = vld [vmem:[%s26599_s14 + $0xb98] sm:$0xff]  }
0x191e   :  { %18716 = vmatprep.subr.bf16.mxu0 %v20222_v25  ;;  %18744 = vmatprep.subr.bf16.mxu1 %v20223_v16  ;;  %v25060_v25 = vrot.slane %v24904_v31, %v21977_v27  ;;  %v25064_v16 = vrot.slane %v24904_v31, %v26640_v55  ;;  %v10333_v32 = vadd.f32 %v24891_v30, %v9873_v52  ;;  %v20245_v52 = vld [vmem:[%s26599_s14 + $0xbb0] sm:$0xff]   ;;  %v20251_v40 = vld [vmem:[%s26599_s14 + $0xbe0] sm:$0xff]  }
0x191f   :  { %v10439_v20 = vpop.f32.mrf.mxu0  ;;  %v10490_v61 = vpop.f32.mrf.mxu1  ;;  %v10550_v46 = vpack.c.bf16 %v10518_v18, %v10502_v10  ;;  %v20254_v18 = vld [vmem:[%s26599_s14 + $0xb58] sm:$0xff]   ;;  %v20260_v10 = vld [vmem:[%s26599_s14 + $0xb10] sm:$0xff]  }
0x1920   :  { %v10567_v20 = vpack.c.bf16 %v10535_v1, %v10535_v1  ;;  %v10431_v61 = vadd.f32 %v24974_v17, %v25060_v25  ;;  %v10482_v30 = vadd.f32 %v24976_v37, %v25064_v16  ;;  %v10532_v17 = vmax.f32 %v10333_v32, 0.0  ;;  %v20259_v1 = vld [vmem:[%s26599_s14 + $0xbd0] sm:$0xff]   ;;  %v20263_v32 = vld [vmem:[%s26599_s14 + $0xbc8] sm:$0xff]  }
0x1921   :  { %18717 = vmatpush3.bf16.msra.mxu0 %v20224_v13  ;;  %18745 = vmatpush3.bf16.msra.mxu1 %v20225_v12  ;;  %v10384_v13 = vadd.f32 %v24893_v53, %v9881_v19  ;;  %v20240_v12 = vld [vmem:[%s26599_s14 + $0xb38] sm:$0xff]   ;;  %v20242_v53 = vld [vmem:[%s26599_s14 + $0xb70] sm:$0xff]  }
0x1922   :  { %18718 = vmatprep.subr.bf16.mxu0 %v20226_v62  ;;  %18746 = vmatprep.subr.bf16.mxu1 %v20227_v26  ;;  %v20241_v62 = vld [vmem:[%s26599_s14 + $0xbb8] sm:$0xff]   ;;  %v10565_v26 = vpack.c.bf16 %v10533_v3, %v10533_v3  ;;  %v10521_v19 = vmax.f32 %v10431_v61, 0.0  ;;  %v10523_v36 = vmax.f32 %v10482_v30, 0.0  ;;  %v10564_v15 = vpack.c.bf16 %v10532_v17, %v10532_v17  ;;  %v20258_v3 = vld [vmem:[%s26599_s14 + $0xb50] sm:$0xff]   ;;  %v20267_v30 = vld [vmem:[%s26599_s14 + $0xbc0] sm:$0xff]  }
0x1923   :  { %v10534_v37 = vmax.f32 %v10384_v13, 0.0  ;;  %v9889_v13 = vrot.slane %v24904_v31, %v26641_v48 }
0x1925   :  { %18719 = vmatpush3.bf16.msra.mxu0 %v20228_v38  ;;  %18747 = vmatpush3.bf16.msra.mxu1 %v20229_v33  ;;  %v20243_v38 = vld [vmem:[%s26599_s14 + $0xbf0] sm:$0xff]   ;;  %v10427_v33 = vadd.f32 %v24954_v60, %v25060_v25  ;;  %v20246_v60 = vld [vmem:[%s26599_s14 + $0xb68] sm:$0xff]  }
0x1926   :  { %18720 = vmatprep.subr.bf16.mxu0 %v20230_v51  ;;  %18748 = vmatprep.subr.bf16.mxu1 %v20231_v59  ;;  %v10478_v51 = vadd.f32 %v24956_v5, %v25064_v16  ;;  %v20244_v59 = vld [vmem:[%s26599_s14 + $0xb30] sm:$0xff]   ;;  %v20247_v5 = vld [vmem:[%s26599_s14 + $0xbe8] sm:$0xff]  }
0x1929   :  { %18721 = vmatpush3.bf16.msra.mxu0 %v20232_v24  ;;  %18749 = vmatpush3.bf16.msra.mxu1 %v20233_v47  ;;  %v10505_v24 = vmax.f32 %v10427_v33, 0.0  ;;  %v10507_v47 = vmax.f32 %v10478_v51, 0.0  ;;  %v20268_v33 = vld [vmem:[%s26599_s14 + $0xb00] sm:$0xff]  }
0x192a   :  { %18722 = vmatprep.subr.bf16.mxu0 %v20234_v29  ;;  %18750 = vmatprep.subr.bf16.mxu1 %v20235_v2  ;;  %v10566_v29 = vpack.c.bf16 %v10534_v37, %v10534_v37  ;;  %v20248_v2 = vld [vmem:[%s26599_s14 + $0xb28] sm:$0xff]   ;;  %v20269_v51 = vld [vmem:[%s26599_s14 + $0xb80] sm:$0xff]  }
0x192b   :  { %v10553_v45 = vpack.c.bf16 %v10521_v19, %v10505_v24  ;;  %v10555_v57 = vpack.c.bf16 %v10523_v36, %v10507_v47 }
0x192d   :  { %18723 = vmatpush3.bf16.msra.mxu0 %v20236_v49  ;;  %18751 = vmatpush3.bf16.msra.mxu1 %v20237_v50  ;;  %v20252_v49 = vld [vmem:[%s26599_s14 + $0xb20] sm:$0xff]  }
0x192e   :  { %18764 = vmatprep.subr.bf16.mxu0 %v20238_v39  ;;  %18792 = vmatprep.subr.bf16.mxu1 %v20239_v54  ;;  %v20253_v50 = vld [vmem:[%s26599_s14 + $0xba0] sm:$0xff]   ;;  %v20255_v39 = vld [vmem:[%s26599_s14 + $0xbd8] sm:$0xff]  }
0x192f   :  { %v20256_v54 = vld [vmem:[%s26599_s14 + $0xb18] sm:$0xff]  }
0x1930   :  { %11830 = vmatmul.mubr.bf16.vlgmr.msra.gmra.mxu0 %v10548_v35  ;;  %11878 = vmatmul.mubr.bf16.vlgmr.msra.gmra.mxu1 %v10550_v46  ;;  %v20261_v35 = vld [vmem:[%s26599_s14 + $0xb90] sm:$0xff]   ;;  %v20262_v46 = vld [vmem:[%s26599_s14 + $0xb48] sm:$0xff]  }
0x1931   :  { %11837 = vmatprep.mubr.bf16.mxu0 %v10565_v26  ;;  %11885 = vmatprep.mubr.bf16.mxu1 %v10567_v20  ;;  %v20265_v26 = vld [vmem:[%s26599_s14 + $0xb88] sm:$0xff]   ;;  %v10429_v20 = vadd.f32 %v24958_v9, %v9889_v13  ;;  %v10425_v9 = vadd.f32 %v24938_v42, %v9889_v13 }
0x1932   :  { %18765 = vmatpush3.bf16.msra.mxu0 %v20240_v12  ;;  %18793 = vmatpush3.bf16.msra.mxu1 %v20241_v62  ;;  %v9897_v12 = vrot.slane %v24904_v31, %v26642_v34  ;;  %v20264_v62 = vld [vmem:[%s26599_s14 + $0xb08] sm:$0xff]   ;;  %v20266_v31 = vld [vmem:[%s26599_s14 + $0xb40] sm:$0xff]  }
0x1933   :  { %18766 = vmatprep.subr.bf16.mxu0 %v20242_v53  ;;  %18794 = vmatprep.subr.bf16.mxu1 %v20243_v38  ;;  %v10437_v53 = vadd.f32 %v24994_v22, %v25060_v25  ;;  %v10488_v38 = vadd.f32 %v24996_v63, %v25064_v16  ;;  %v10520_v17 = vmax.f32 %v10429_v20, 0.0  ;;  %v10504_v25 = vmax.f32 %v10425_v9, 0.0 }
0x1934   :  { %v10480_v61 = vadd.f32 %v24960_v14, %v9897_v12  ;;  %v10476_v14 = vadd.f32 %v24940_v6, %v9897_v12 }
0x1935   :  { %v10537_v22 = vmax.f32 %v10437_v53, 0.0  ;;  %v10539_v63 = vmax.f32 %v10488_v38, 0.0  ;;  %v10552_v6 = vpack.c.bf16 %v10520_v17, %v10504_v25 }
0x1936   :  { %18767 = vmatpush3.bf16.msra.mxu0 %v20244_v59  ;;  %18795 = vmatpush3.bf16.msra.mxu1 %v20245_v52  ;;  %v10522_v37 = vmax.f32 %v10480_v61, 0.0  ;;  %v10506_v42 = vmax.f32 %v10476_v14, 0.0  ;;  %v10435_v59 = vadd.f32 %v24978_v44, %v9889_v13  ;;  %v10486_v52 = vadd.f32 %v24980_v4, %v9897_v12  ;;  %v17227_v44 = vld [vmem:[%s26600_s15 + $0x2] ss:$0 sm:$0xff] }
0x1937   :  { %18768 = vmatprep.subr.bf16.mxu0 %v20246_v60  ;;  %18796 = vmatprep.subr.bf16.mxu1 %v20247_v5  ;;  %v10569_v19 = vpack.c.bf16 %v10537_v22, %v10537_v22  ;;  %v10571_v36 = vpack.c.bf16 %v10539_v63, %v10539_v63 }
0x1938   :  { %11838 = vmatmul.mubr.bf16.gmra.mxu0 %v10564_v15  ;;  %11886 = vmatmul.mubr.bf16.gmra.mxu1 %v10566_v29  ;;  %v10554_v16 = vpack.c.bf16 %v10522_v37, %v10506_v42  ;;  %v10536_v60 = vmax.f32 %v10435_v59, 0.0  ;;  %v10538_v5 = vmax.f32 %v10486_v52, 0.0 }
0x1939   :  { %11925 = vmatprep.mubr.bf16.mxu0 %v10553_v45  ;;  %11973 = vmatprep.mubr.bf16.mxu1 %v10555_v57 }
0x193a   :  { %18769 = vmatpush3.bf16.msra.mxu0 %v20248_v2  ;;  %18797 = vmatpush3.bf16.msra.mxu1 %v20249_v28  ;;  %v10568_v24 = vpack.c.bf16 %v10536_v60, %v10536_v60  ;;  %v10570_v47 = vpack.c.bf16 %v10538_v5, %v10538_v5 }
0x193b   :  { %18770 = vmatprep.subr.bf16.mxu0 %v20250_v43  ;;  %18798 = vmatprep.subr.bf16.mxu1 %v20251_v40 }
0x193e   :  { %18771 = vmatpush3.bf16.msra.mxu0 %v20252_v49  ;;  %18799 = vmatpush3.bf16.msra.mxu1 %v20253_v50 }
0x193f   :  { %18772 = vmatprep.subr.bf16.mxu0 %v20254_v18  ;;  %18800 = vmatprep.subr.bf16.mxu1 %v20255_v39 }
0x1942   :  { %18773 = vmatpush3.bf16.msra.mxu0 %v20256_v54  ;;  %18801 = vmatpush3.bf16.msra.mxu1 %v20257_v11 }
0x1943   :  { %18774 = vmatprep.subr.bf16.mxu0 %v20258_v3  ;;  %18802 = vmatprep.subr.bf16.mxu1 %v20259_v1 }
0x1946   :  { %18775 = vmatpush3.bf16.msra.mxu0 %v20260_v10  ;;  %18803 = vmatpush3.bf16.msra.mxu1 %v20261_v35 }
0x1947   :  { %18776 = vmatprep.subr.bf16.mxu0 %v20262_v46  ;;  %18804 = vmatprep.subr.bf16.mxu1 %v20263_v32 }
0x194a   :  { %18777 = vmatpush3.bf16.msra.mxu0 %v20264_v62  ;;  %18805 = vmatpush3.bf16.msra.mxu1 %v20265_v26 }
0x194b   :  { %18778 = vmatprep.subr.bf16.mxu0 %v20266_v31  ;;  %18806 = vmatprep.subr.bf16.mxu1 %v20267_v30 }
0x194e   :  { %18779 = vmatpush3.bf16.msra.mxu0 %v20268_v33  ;;  %18807 = vmatpush3.bf16.msra.mxu1 %v20269_v51 }
0x1951   :  { %11926 = vmatmul.mubr.bf16.vlgmr.msra.gmra.mxu0 %v10552_v6  ;;  %11974 = vmatmul.mubr.bf16.vlgmr.msra.gmra.mxu1 %v10554_v16 }
0x1952   :  { %11933 = vmatprep.mubr.bf16.mxu0 %v10569_v19  ;;  %11981 = vmatprep.mubr.bf16.mxu1 %v10571_v36 }
0x1959   :  { %11934 = vmatmul.mubr.bf16.gmra.mxu0 %v10568_v24  ;;  %11982 = vmatmul.mubr.bf16.gmra.mxu1 %v10570_v47 }
0x19af   :  { %v18612_v15 = vpop.f32.mrf.mxu0  ;;  %v18640_v29 = vpop.f32.mrf.mxu1 }
0x19b1   :  { %v18613_v2 = vpop.f32.mrf.mxu0  ;;  %v18641_v4 = vpop.f32.mrf.mxu1 }
0x19b2   :  { %v18614_v28 = vadd.f32 %v18613_v2, %v18612_v15  ;;  %v18642_v45 = vadd.f32 %v18641_v4, %v18640_v29 }
0x19b3   :  { %v18615_v57 = vpop.f32.mrf.mxu0  ;;  %v18643_v43 = vpop.f32.mrf.mxu1 }
0x19b4   :  { %v11640_v40 = vadd.f32 %v18614_v28, %v17227_v44 }
0x19b5   :  { %v18616_v49 = vpop.f32.mrf.mxu0  ;;  %v18644_v50 = vpop.f32.mrf.mxu1 }
0x19b6   :  { %v11688_v18 = vadd.f32 %v18642_v45, %v11640_v40  ;;  %v18617_v39 = vadd.f32 %v18616_v49, %v18615_v57  ;;  %v18645_v1 = vadd.f32 %v18644_v50, %v18643_v43 }
0x19b7   :  { %v18618_v54 = vpop.f32.mrf.mxu0  ;;  %v18646_v11 = vpop.f32.mrf.mxu1 }
0x19b8   :  { %v11643_v3 = vadd.f32 %v18617_v39, %v17227_v44 }
0x19b9   :  { %v18619_v10 = vpop.f32.mrf.mxu0  ;;  %v18647_v35 = vpop.f32.mrf.mxu1 }
0x19ba   :  { %v11691_v46 = vadd.f32 %v18645_v1, %v11643_v3  ;;  %v18620_v32 = vadd.f32 %v18619_v10, %v18618_v54  ;;  %v18648_v13 = vadd.f32 %v18647_v35, %v18646_v11 }
0x19bb   :  { %v18621_v12 = vpop.f32.mrf.mxu0  ;;  %v18649_v62 = vpop.f32.mrf.mxu1 }
0x19bc   :  { %v11648_v26 = vadd.f32 %v18620_v32, %v17227_v44 }
0x19bd   :  { %v18622_v20 = vpop.f32.mrf.mxu0  ;;  %v18650_v61 = vpop.f32.mrf.mxu1 }
0x19be   :  { %v11696_v31 = vadd.f32 %v18648_v13, %v11648_v26 }
0x19cf   :  { %v18668_v30 = vpop.f32.mrf.mxu0  ;;  %v18696_v53 = vpop.f32.mrf.mxu1 }
0x19d1   :  { %v18669_v38 = vpop.f32.mrf.mxu0  ;;  %v18697_v9 = vpop.f32.mrf.mxu1 }
0x19d2   :  { %v18670_v40 = vadd.f32 %v18669_v38, %v18668_v30  ;;  %v18698_v39 = vadd.f32 %v18697_v9, %v18696_v53 }
0x19d3   :  { %v18671_v14 = vpop.f32.mrf.mxu0  ;;  %v18699_v33 = vpop.f32.mrf.mxu1 }
0x19d4   :  { %v11736_v49 = vadd.f32 %v18670_v40, %v11688_v18 }
0x19d5   :  { %v18672_v51 = vpop.f32.mrf.mxu0  ;;  %v18700_v17 = vpop.f32.mrf.mxu1 }
0x19d6   :  { %v18673_v50 = vadd.f32 %v18672_v51, %v18671_v14  ;;  %v11784_v11 = vadd.f32 %v18698_v39, %v11736_v49  ;;  %v18701_v10 = vadd.f32 %v18700_v17, %v18699_v33 }
0x19d7   :  { %v18674_v37 = vpop.f32.mrf.mxu0  ;;  %v18702_v22 = vpop.f32.mrf.mxu1 }
0x19d8   :  { %v11739_v3 = vadd.f32 %v18673_v50, %v11691_v46 }
0x19d9   :  { %v18675_v63 = vpop.f32.mrf.mxu0  ;;  %v18703_v25 = vpop.f32.mrf.mxu1 }
0x19da   :  { %v18676_v1 = vadd.f32 %v18675_v63, %v18674_v37  ;;  %v11787_v62 = vadd.f32 %v18701_v10, %v11739_v3  ;;  %v18704_v61 = vadd.f32 %v18703_v25, %v18702_v22 }
0x19db   :  { %v18677_v42 = vpop.f32.mrf.mxu0  ;;  %v18705_v6 = vpop.f32.mrf.mxu1 }
0x19dc   :  { %v11744_v26 = vadd.f32 %v18676_v1, %v11696_v31 }
0x19dd   :  { %v18678_v16 = vpop.f32.mrf.mxu0  ;;  %v18706_v59 = vpop.f32.mrf.mxu1 }
0x19de   :  { %v11792_v14 = vadd.f32 %v18704_v61, %v11744_v26 }
0x19f0   :  { %v18724_v52 = vpop.f32.mrf.mxu0  ;;  %v18752_v19 = vpop.f32.mrf.mxu1 }
0x19f2   :  { %v18725_v36 = vpop.f32.mrf.mxu0  ;;  %v18753_v60 = vpop.f32.mrf.mxu1 }
0x19f3   :  { %v18726_v54 = vadd.f32 %v18725_v36, %v18724_v52  ;;  %v18754_v20 = vadd.f32 %v18753_v60, %v18752_v19 }
0x19f4   :  { %v18727_v5 = vpop.f32.mrf.mxu0  ;;  %v18755_v24 = vpop.f32.mrf.mxu1 }
0x19f5   :  { %v11832_v35 = vadd.f32 %v18726_v54, %v11784_v11 }
0x19f6   :  { %v18728_v47 = vpop.f32.mrf.mxu0  ;;  %v18756_v15 = vpop.f32.mrf.mxu1 }
0x19f7   :  { %v18729_v32 = vadd.f32 %v18728_v47, %v18727_v5  ;;  %v11880_v16 = vadd.f32 %v18754_v20, %v11832_v35  ;;  %v18757_v46 = vadd.f32 %v18756_v15, %v18755_v24 }
0x19f8   :  { %v18730_v29 = vpop.f32.mrf.mxu0  ;;  %v18758_v44 = vpop.f32.mrf.mxu1 }
0x19f9   :  { %v11835_v30 = vadd.f32 %v18729_v32, %v11787_v62 }
0x19fa   :  { %v18731_v2 = vpop.f32.mrf.mxu0  ;;  %v18759_v4 = vpop.f32.mrf.mxu1 }
0x19fb   :  { %v18732_v18 = vadd.f32 %v18731_v2, %v18730_v29  ;;  %v11883_v63 = vadd.f32 %v18757_v46, %v11835_v30  ;;  %v18760_v25 = vadd.f32 %v18759_v4, %v18758_v44  ;;  %v20272_v30 = vld [vmem:[%s26591_s6 + $0x30] sm:$0xff]  }
0x19fc   :  { %v18733_v28 = vpop.f32.mrf.mxu0  ;;  %v18761_v45 = vpop.f32.mrf.mxu1 }
0x19fd   :  { %v11840_v59 = vadd.f32 %v18732_v18, %v11792_v14  ;;  %v20273_v18 = vld [vmem:[%s26629_s2 + $0x30] sm:$0xff]  }
0x19fe   :  { %v18734_v57 = vpop.f32.mrf.mxu0  ;;  %v18762_v43 = vpop.f32.mrf.mxu1 }
0x19ff   :  { %v11888_v2 = vadd.f32 %v18760_v25, %v11840_v59 }
0x1a11   :  { %v18780_v13 = vpop.f32.mrf.mxu0  ;;  %v18808_v12 = vpop.f32.mrf.mxu1 }
0x1a13   :  { %v18781_v42 = vpop.f32.mrf.mxu0  ;;  %v18809_v6 = vpop.f32.mrf.mxu1 }
0x1a14   :  { %v18782_v38 = vadd.f32 %v18781_v42, %v18780_v13  ;;  %v18810_v33 = vadd.f32 %v18809_v6, %v18808_v12  ;;  %v20270_v6 = vld [vmem:[%s26591_s6 + $0x38] sm:$0xff]  }
0x1a15   :  { %v18783_v53 = vpop.f32.mrf.mxu0  ;;  %v18811_v9 = vpop.f32.mrf.mxu1  ;;  %19612 = vmatprep.subr.bf16.mxu1 %v20270_v6 }
0x1a16   :  { %v11928_v51 = vadd.f32 %v18782_v38, %v11880_v16  ;;  %v20271_v16 = vld [vmem:[%s26629_s2 + $0x38] sm:$0xff]   ;;  %19613 = vmatpush3.bf16.msra.mxu1 %v20270_v6 }
0x1a17   :  { %v18784_v17 = vpop.f32.mrf.mxu0  ;;  %v18812_v37 = vpop.f32.mrf.mxu1  ;;  %19604 = vmatprep.subr.bf16.mxu0 %v20271_v16  ;;  %19614 = vmatprep.subr.bf16.mxu1 %v20272_v30  ;;  %v20274_v38 = vld [vmem:[%s26593_s8 + $0x38] sm:$0xff]  }
0x1a18   :  { %v11976_v52 = vadd.f32 %v18810_v33, %v11928_v51  ;;  %v18785_v31 = vadd.f32 %v18784_v17, %v18783_v53  ;;  %v18813_v60 = vadd.f32 %v18812_v37, %v18811_v9  ;;  %19605 = vmatpush3.bf16.msra.mxu0 %v20271_v16 }
0x1a19   :  { %v18786_v19 = vpop.f32.mrf.mxu0  ;;  %v18814_v22 = vpop.f32.mrf.mxu1  ;;  %19606 = vmatprep.subr.bf16.mxu0 %v20273_v18 }
0x1a1a   :  { %v11931_v36 = vadd.f32 %v18785_v31, %v11883_v63  ;;  %v11989_v5 = vadd.f32 %v11976_v52, %v24526_v56  ;;  %19615 = vmatpush3.bf16.msra.mxu1 %v20272_v30  ;;  %v17358_v31 = vld [vmem:[%s26603_s18 + $0x2] ss:$0 sm:$0xff] }
0x1a1b   :  { %v18787_v47 = vpop.f32.mrf.mxu0  ;;  %v18815_v29 = vpop.f32.mrf.mxu1 }
0x1a1c   :  { %v11979_v28 = vadd.f32 %v18813_v60, %v11931_v36  ;;  %v18788_v24 = vadd.f32 %v18787_v47, %v18786_v19  ;;  %v11996_v15 = vsel %vm112_vm0, %v11989_v5, 0.0  ;;  %v18816_v40 = vadd.f32 %v18815_v29, %v18814_v22  ;;  %19607 = vmatpush3.bf16.msra.mxu0 %v20273_v18  ;;  %v17359_v36 = vld [vmem:[%s26604_s19 + $0x2] ss:$0 sm:$0xff] }
0x1a1d   :  { %v18789_v45 = vpop.f32.mrf.mxu0  ;;  %v18817_v57 = vpop.f32.mrf.mxu1  ;;  %11997 = vadd.xlane.f32.xlu0 %v11996_v15  ;;  %19620 = vmatprep.subr.bf16.mxu0 %v20274_v38 }
0x1a1e   :  { %v11936_v43 = vadd.f32 %v18788_v24, %v11888_v2  ;;  %v11990_v49 = vadd.f32 %v11979_v28, %v24528_v8  ;;  %v20275_v57 = vld [vmem:[%s26593_s8 + $0x30] sm:$0xff]  }
0x1a1f   :  { %v18790_v50 = vpop.f32.mrf.mxu0  ;;  %v18818_v44 = vpop.f32.mrf.mxu1 }
0x1a20   :  { %v11984_v4 = vadd.f32 %v18816_v40, %v11936_v43  ;;  %v11999_v39 = vsel %vm112_vm0, %v11990_v49, 0.0  ;;  %v17375_v43 = vld [vmem:[%s26592_s7 + $0x3] ss:$0 sm:$0xff] }
0x1a21   :  { %12000 = vadd.xlane.f32.xlu1 %v11999_v39  ;;  %v17365_v39 = vld [vmem:[%s26590_s5 + $0x3] ss:$0 sm:$0xff] }
0x1a22   :  { %v11991_v56 = vadd.f32 %v11984_v4, %v24561_v7 }
0x1a24   :  { %v12002_v54 = vsel %vm1694_vm4, %v11991_v56, 0.0 }
0x1a25   :  { %12003 = vadd.xlane.f32.xlu0 %v12002_v54 }
0x1aa6   :  { %v11998_v11 = vpop.xlane.xlu0 %11997 }
0x1aa7   :  { %v12005_v3 = vmul.f32 0.03125, %v11998_v11 }
0x1aa9   :  { %v12008_v1 = vsub.f32 %v11989_v5, %v12005_v3 }
0x1aaa   :  { %v12001_v10 = vpop.xlane.xlu1 %12000 }
0x1aab   :  { %v12006_v35 = vmul.f32 0.03125, %v12001_v10  ;;  %v12011_v32 = vmul.f32 %v12008_v1, %v12008_v1 }
0x1aad   :  { %v12009_v13 = vsub.f32 %v11990_v49, %v12006_v35  ;;  %v12014_v8 = vsel %vm112_vm0, %v12011_v32, 0.0 }
0x1aae   :  { %12015 = vadd.xlane.f32.xlu1 %v12014_v8  ;;  %v12004_v12 = vpop.xlane.xlu0 %12003 }
0x1aaf   :  { %v12007_v62 = vmul.f32 0.03125, %v12004_v12  ;;  %v12012_v26 = vmul.f32 %v12009_v13, %v12009_v13 }
0x1ab1   :  { %v12010_v20 = vsub.f32 %v11991_v56, %v12007_v62  ;;  %v12017_v61 = vsel %vm112_vm0, %v12012_v26, 0.0  ;;  %v25259_v62 = vld [vmem:[%s26632_s25] ss:$0 sm:$0xff] }
0x1ab2   :  { %12018 = vadd.xlane.f32.xlu0 %v12017_v61 }
0x1ab3   :  { %v12013_v7 = vmul.f32 %v12010_v20, %v12010_v20 }
0x1ab5   :  { %v12020_v42 = vsel %vm1694_vm4, %v12013_v7, 0.0  ;;  %v25270_v7 = vld [vmem:[%s26632_s25 + $0x1] ss:$0 sm:$0xff] }
0x1ab6   :  { %12021 = vadd.xlane.f32.xlu1 %v12020_v42 }
0x1b37   :  { %v12016_v53 = vpop.xlane.xlu1 %12015 }
0x1b38   :  { %v12023_v9 = vmul.f32 0.03125, %v12016_v53 }
0x1b3a   :  { %v12026_v14 = vadd.f32 1e-05, %v12023_v9 }
0x1b3b   :  { %v12019_v46 = vpop.xlane.xlu0 %12018 }
0x1b3c   :  { %20724 = vrsqrt.f32 %v12026_v14  ;;  %v12024_v51 = vmul.f32 0.03125, %v12019_v46  ;;  %v25293_v46 = vld [vmem:[%s26594_s9 + $0x3] ss:$0 sm:$0xff] }
0x1b3e   :  { %v12027_v33 = vadd.f32 1e-05, %v12024_v51 }
0x1b3f   :  { %v12022_v17 = vpop.xlane.xlu1 %12021 }
0x1b40   :  { %20726 = vrsqrt.f32 %v12027_v33  ;;  %v12025_v37 = vmul.f32 0.03125, %v12022_v17 }
0x1b42   :  { %v12028_v63 = vadd.f32 1e-05, %v12025_v37 }
0x1b44   :  { %20728 = vrsqrt.f32 %v12028_v63  ;;  %v25312_v63 = vld [vmem:[%s26632_s25 + $0x2] ss:$0 sm:$0xff] }
0x1b49   :  { %v20725_v59 = vpop.eup %20724 }
0x1b4a   :  { %v12032_v52 = vmul.f32 %v20725_v59, %v12008_v1 }
0x1b4c   :  { %v12041_v25 = vmul.f32 %v17358_v31, %v12032_v52  ;;  %v25319_v52 = vld [vmem:[%s26632_s25 + $0x3] ss:$0 sm:$0xff] }
0x1b4d   :  { %v20727_v19 = vpop.eup %20726 }
0x1b4e   :  { %v12033_v22 = vmul.f32 %v20727_v19, %v12009_v13  ;;  %v25213_v29 = vadd.f32 %v17359_v36, %v12041_v25 }
0x1b50   :  { %v12042_v60 = vmul.f32 %v17358_v31, %v12033_v22 }
0x1b51   :  { %v20729_v5 = vpop.eup %20728 }
0x1b52   :  { %v12034_v47 = vmul.f32 %v20729_v5, %v12010_v20  ;;  %v25215_v2 = vadd.f32 %v17359_v36, %v12042_v60 }
0x1b54   :  { %v12043_v28 = vmul.f32 %v17358_v31, %v12034_v47  ;;  %v12053_v24 = vpack.c.bf16 %v25215_v2, %v25213_v29 }
0x1b56   :  { %v25219_v15 = vadd.f32 %v17359_v36, %v12043_v28  ;;  %19608 = vmatprep.mubr.msk.bf16.mxu0 %vm112_vm0, %v12053_v24  ;;  %19616 = vmatprep.mubr.msk.bf16.mxu1 %vm112_vm0, %v12053_v24 }
0x1b58   :  { %v12054_v45 = vpack.c.bf16 %v25219_v15, %v25219_v15 }
0x1b5a   :  { %19609 = vmatmul.mubr.msk.bf16.vlgmr.msra.gmra.mxu0 %vm112_vm0, %v12054_v45  ;;  %19617 = vmatmul.mubr.msk.bf16.vlgmr.msra.gmra.mxu1 %vm112_vm0, %v12054_v45 }
0x1b5b   :  { %19621 = vmatpush3.bf16.msra.mxu0 %v20274_v38  ;;  %19624 = vmatprep.mubr.msk.bf16.mxu0 %vm112_vm0, %v12053_v24 }
0x1b5c   :  { %19622 = vmatprep.subr.bf16.mxu0 %v20275_v57 }
0x1b5f   :  { %19623 = vmatpush3.bf16.msra.mxu0 %v20275_v57 }
0x1b62   :  { %19625 = vmatmul.mubr.msk.bf16.vlgmr.msra.gmra.mxu0 %vm112_vm0, %v12054_v45 }
0x1c1a   :  { %v19610_v40 = vpop.f32.mrf.mxu0  ;;  %v19618_v49 = vpop.f32.mrf.mxu1 }
0x1c1b   :  { %v12202_v50 = vadd.f32 %v19618_v49, %v17375_v43  ;;  %v25276_v30 = vadd.f32 %v19610_v40, %v17365_v39  ;;  %v25352_v40 = vld [vmem:[%s26632_s25 + $0x4] ss:$0 sm:$0xff] }
0x1c1c   :  { %v12120_v44 = vpop.f32.mrf.mxu0  ;;  %v12193_v4 = vpop.f32.mrf.mxu1 }
0x1c1d   :  { %v25238_v56 = vpack.c.bf16 %v12202_v50, %v12202_v50  ;;  %v25240_v54 = vadd.f32 %v17365_v39, %v12120_v44  ;;  %v12194_v32 = vadd.f32 %v17375_v43, %v12193_v4  ;;  %v12282_v51 = vmul.f32 %v25259_v62, %v25276_v30  ;;  %v25361_v44 = vld [vmem:[%s26632_s25 + $0x5] ss:$0 sm:$0xff] }
0x1c1e   :  { %v19611_v11 = vpop.f32.mrf.mxu0  ;;  %v19619_v3 = vpop.f32.mrf.mxu1  ;;  %v12285_v33 = vmul.f32 %v25270_v7, %v25276_v30 }
0x1c1f   :  { %19836 = vmatprep.subr.msk.bf16.mxu1 %vm112_vm0, %v25238_v56  ;;  %19838 = vmatprep.subr.msk.bf16.mxu0 %vm112_vm0, %v25238_v56  ;;  %v25248_v1 = vsel %vm112_vm0, %v25238_v56, 0  ;;  %v12280_v26 = vmul.f32 %v25259_v62, %v25240_v54  ;;  %v12283_v42 = vmul.f32 %v25270_v7, %v25240_v54  ;;  %v12286_v19 = vmul.f32 %v25312_v63, %v25240_v54 }
0x1c20   :  { %v12123_v10 = vpop.f32.mrf.mxu0  ;;  %v12196_v35 = vpop.f32.mrf.mxu1  ;;  %19629 = vmatpush3.bf16.xpose.msra.mxu1 %v25248_v1  ;;  %19637 = vmatpush3.bf16.xpose.msra.mxu0 %v25248_v1  ;;  %v12305_v22 = vpack.c.bf16 %v12282_v51, %v12282_v51  ;;  %v12307_v25 = vpack.c.bf16 %v12285_v33, %v12285_v33  ;;  %v12289_v36 = vmul.f32 %v25319_v52, %v25240_v54 }
0x1c21   :  { %v25252_v13 = vadd.f32 %v17365_v39, %v12123_v10  ;;  %v12197_v8 = vadd.f32 %v17375_v43, %v12196_v35  ;;  %v25374_v10 = vld [vmem:[%s26632_s25 + $0x6] ss:$0 sm:$0xff]  ;;  %v12292_v51 = vmul.f32 %v25352_v40, %v25240_v54 }
0x1c22   :  { %v25254_v12 = vpop.f32.mrf.mxu0 }
0x1c23   :  { %v25263_v20 = vpack.c.bf16 %v12197_v8, %v12194_v32  ;;  %v12281_v61 = vmul.f32 %v25259_v62, %v25252_v13  ;;  %v12284_v6 = vmul.f32 %v25270_v7, %v25252_v13  ;;  %v12287_v59 = vmul.f32 %v25312_v63, %v25252_v13  ;;  %v25383_v8 = vld [vmem:[%s26632_s25 + $0x7] ss:$0 sm:$0xff] }
0x1c24   :  { %v12266_v16 = vpop.f32.mrf.mxu0  ;;  %v12290_v31 = vmul.f32 %v25319_v52, %v25252_v13 }
0x1c25   :  { %19837 = vmatprep.subr.msk.bf16.mxu1 %vm112_vm0, %v25263_v20  ;;  %19839 = vmatprep.subr.msk.bf16.mxu0 %vm112_vm0, %v25263_v20  ;;  %v12304_v18 = vpack.c.bf16 %v12281_v61, %v12280_v26  ;;  %v12306_v38 = vpack.c.bf16 %v12284_v6, %v12283_v42  ;;  %v25286_v9 = vsel %vm112_vm0, %v25263_v20, 0  ;;  %v25304_v17 = vadd.f32 %v25293_v46, %v12266_v16 }
0x1c26   :  { %v19627_v53 = vpop.f32.mrf.mxu0  ;;  %v12308_v60 = vpack.c.bf16 %v12287_v59, %v12286_v19  ;;  %v12310_v28 = vpack.c.bf16 %v12290_v31, %v12289_v36  ;;  %v12288_v16 = vmul.f32 %v25312_v63, %v25276_v30  ;;  %v12295_v59 = vmul.f32 %v25361_v44, %v25240_v54 }
0x1c27   :  { %19632 = vmatprep.mubr.msk.bf16.mxu1 %vm112_vm0, %v12304_v18  ;;  %19640 = vmatprep.mubr.msk.bf16.mxu0 %vm112_vm0, %v12306_v38  ;;  %v12326_v5 = vmul.f32 %v25312_v63, %v25304_v17  ;;  %v12329_v24 = vmul.f32 %v25319_v52, %v25304_v17  ;;  %v12332_v49 = vmul.f32 %v25352_v40, %v25304_v17 }
0x1c28   :  { %v12269_v14 = vpop.f32.mrf.mxu0  ;;  %19631 = vmatpush3.bf16.xpose.msra.mxu1 %v25286_v9  ;;  %19639 = vmatpush3.bf16.xpose.msra.mxu0 %v25286_v9  ;;  %v12335_v4 = vmul.f32 %v25361_v44, %v25304_v17  ;;  %v12338_v35 = vmul.f32 %v25374_v10, %v25304_v17  ;;  %v12341_v26 = vmul.f32 %v25383_v8, %v25304_v17 }
0x1c29   :  { %19840 = vmatprep.subr.msk.bf16.mxu1 %vm112_vm0, %v25238_v56  ;;  %19842 = vmatprep.subr.msk.bf16.mxu0 %vm112_vm0, %v25238_v56  ;;  %v25307_v37 = vadd.f32 %v25293_v46, %v12269_v14  ;;  %v12291_v18 = vmul.f32 %v25319_v52, %v25276_v30  ;;  %v12293_v38 = vmul.f32 %v25352_v40, %v25252_v13 }
0x1c2a   :  { %v12296_v53 = vmul.f32 %v25361_v44, %v25252_v13  ;;  %v12309_v14 = vpack.c.bf16 %v12288_v16, %v12288_v16  ;;  %v12299_v36 = vmul.f32 %v25374_v10, %v25252_v13 }
0x1c2b   :  { %v12327_v47 = vmul.f32 %v25312_v63, %v25307_v37  ;;  %v12330_v45 = vmul.f32 %v25319_v52, %v25307_v37  ;;  %v12333_v50 = vmul.f32 %v25352_v40, %v25307_v37  ;;  %v12336_v39 = vmul.f32 %v25361_v44, %v25307_v37 }
0x1c2c   :  { %v12339_v32 = vmul.f32 %v25374_v10, %v25307_v37  ;;  %v12342_v61 = vmul.f32 %v25383_v8, %v25307_v37  ;;  %v12311_v33 = vpack.c.bf16 %v12291_v18, %v12291_v18  ;;  %v12312_v31 = vpack.c.bf16 %v12293_v38, %v12292_v51  ;;  %v25492_v51 = vld [vmem:[%s26633_s30 + $0x10] sm:$0x3] }
0x1c2d   :  { %v25339_v57 = vpack.c.bf16 %v12327_v47, %v12326_v5  ;;  %v25343_v43 = vpack.c.bf16 %v12330_v45, %v12329_v24  ;;  %v25367_v11 = vpack.c.bf16 %v12333_v50, %v12332_v49  ;;  %v25369_v3 = vpack.c.bf16 %v12336_v39, %v12335_v4 }
0x1c2e   :  { %v25389_v42 = vpack.c.bf16 %v12339_v32, %v12338_v35  ;;  %v25392_v6 = vpack.c.bf16 %v12342_v61, %v12341_v26  ;;  %v12314_v19 = vpack.c.bf16 %v12296_v53, %v12295_v59  ;;  %v12298_v47 = vmul.f32 %v25374_v10, %v25240_v54 }
0x1c2f   :  { %19633 = vmatmul.mubr.msk.bf16.vlgmr.msra.gmra.mxu1 %vm112_vm0, %v12305_v22  ;;  %19641 = vmatmul.mubr.msk.bf16.vlgmr.msra.gmra.mxu0 %vm112_vm0, %v12307_v25  ;;  %v12294_v22 = vmul.f32 %v25352_v40, %v25276_v30  ;;  %v12297_v25 = vmul.f32 %v25361_v44, %v25276_v30  ;;  %v12301_v24 = vmul.f32 %v25383_v8, %v25240_v54 }
0x1c30   :  { %19645 = vmatpush3.bf16.xpose.msra.mxu1 %v25248_v1  ;;  %19648 = vmatprep.mubr.msk.bf16.mxu1 %vm112_vm0, %v12308_v60  ;;  %v12302_v60 = vmul.f32 %v25383_v8, %v25252_v13  ;;  %v12316_v45 = vpack.c.bf16 %v12299_v36, %v12298_v47  ;;  %v12321_v50 = vmul.f32 %v25259_v62, %v25307_v37  ;;  %v25503_v36 = vld [vmem:[%s26633_s30] sm:$0xff] }
0x1c31   :  { %19653 = vmatpush3.bf16.xpose.msra.mxu0 %v25248_v1  ;;  %19656 = vmatprep.mubr.msk.bf16.mxu0 %vm112_vm0, %v12310_v28  ;;  %v12313_v5 = vpack.c.bf16 %v12294_v22, %v12294_v22  ;;  %v12315_v28 = vpack.c.bf16 %v12297_v25, %v12297_v25  ;;  %v12324_v4 = vmul.f32 %v25270_v7, %v25307_v37 }
0x1c32   :  { %19841 = vmatprep.subr.msk.bf16.mxu1 %vm112_vm0, %v25263_v20  ;;  %19843 = vmatprep.subr.msk.bf16.mxu0 %vm112_vm0, %v25263_v20  ;;  %v12318_v13 = vpack.c.bf16 %v12302_v60, %v12301_v24  ;;  %v12323_v32 = vmul.f32 %v25270_v7, %v25304_v17 }
0x1c34   :  { %v12346_v16 = vpack.c.bf16 %v12324_v4, %v12323_v32 }
0x1c38   :  { %19647 = vmatpush3.bf16.xpose.msra.mxu1 %v25286_v9 }
0x1c39   :  { %19655 = vmatpush3.bf16.xpose.msra.mxu0 %v25286_v9  ;;  %19844 = vmatprep.subr.msk.bf16.mxu1 %vm112_vm0, %v25238_v56 }
0x1c3a   :  { %19846 = vmatprep.subr.msk.bf16.mxu0 %vm112_vm0, %v25238_v56 }
0x1c3f   :  { %19649 = vmatmul.mubr.msk.bf16.vlgmr.msra.gmra.mxu1 %vm112_vm0, %v12309_v14 }
0x1c40   :  { %19657 = vmatmul.mubr.msk.bf16.vlgmr.msra.gmra.mxu0 %vm112_vm0, %v12311_v33  ;;  %19661 = vmatpush3.bf16.xpose.msra.mxu1 %v25248_v1 }
0x1c41   :  { %19664 = vmatprep.mubr.msk.bf16.mxu1 %vm112_vm0, %v12312_v31  ;;  %19669 = vmatpush3.bf16.xpose.msra.mxu0 %v25248_v1 }
0x1c42   :  { %19672 = vmatprep.mubr.msk.bf16.mxu0 %vm112_vm0, %v12314_v19  ;;  %19845 = vmatprep.subr.msk.bf16.mxu1 %vm112_vm0, %v25263_v20 }
0x1c43   :  { %19847 = vmatprep.subr.msk.bf16.mxu0 %vm112_vm0, %v25263_v20 }
0x1c48   :  { %19663 = vmatpush3.bf16.xpose.msra.mxu1 %v25286_v9 }
0x1c49   :  { %19671 = vmatpush3.bf16.xpose.msra.mxu0 %v25286_v9  ;;  %19848 = vmatprep.subr.msk.bf16.mxu1 %vm112_vm0, %v25238_v56 }
0x1c4a   :  { %19850 = vmatprep.subr.msk.bf16.mxu0 %vm112_vm0, %v25238_v56  ;;  %v25441_v56 = vadd.f32 %v25254_v12, %v25293_v46 }
0x1c4c   :  { %v12322_v54 = vmul.f32 %v25259_v62, %v25441_v56  ;;  %v12325_v12 = vmul.f32 %v25270_v7, %v25441_v56 }
0x1c4e   :  { %v12345_v46 = vpack.c.bf16 %v12322_v54, %v12322_v54  ;;  %v12347_v49 = vpack.c.bf16 %v12325_v12, %v12325_v12  ;;  %v25518_v12 = vld [vmem:[%s26633_s30 + $0x8] sm:$0xff] }
0x1c4f   :  { %19665 = vmatmul.mubr.msk.bf16.vlgmr.msra.gmra.mxu1 %vm112_vm0, %v12313_v5 }
0x1c50   :  { %19673 = vmatmul.mubr.msk.bf16.vlgmr.msra.gmra.mxu0 %vm112_vm0, %v12315_v28  ;;  %19677 = vmatpush3.bf16.xpose.msra.mxu1 %v25248_v1  ;;  %v13135_v26 = vsel %vm1213_vm1, %v12345_v46, 0  ;;  %v13192_v37 = vsel %vm1213_vm1, %v12347_v49, 0 }
0x1c51   :  { %19680 = vmatprep.mubr.msk.bf16.mxu1 %vm112_vm0, %v12316_v45  ;;  %19685 = vmatpush3.bf16.xpose.msra.mxu0 %v25248_v1  ;;  %v12300_v1 = vmul.f32 %v25374_v10, %v25276_v30 }
0x1c52   :  { %19688 = vmatprep.mubr.msk.bf16.mxu0 %vm112_vm0, %v12318_v13  ;;  %19849 = vmatprep.subr.msk.bf16.mxu1 %vm112_vm0, %v25263_v20 }
0x1c53   :  { %19851 = vmatprep.subr.msk.bf16.mxu0 %vm112_vm0, %v25263_v20  ;;  %v12303_v20 = vmul.f32 %v25383_v8, %v25276_v30  ;;  %v12317_v39 = vpack.c.bf16 %v12300_v1, %v12300_v1  ;;  %v12328_v30 = vmul.f32 %v25312_v63, %v25441_v56 }
0x1c55   :  { %v12319_v35 = vpack.c.bf16 %v12303_v20, %v12303_v20  ;;  %v25481_v7 = vpack.c.bf16 %v12328_v30, %v12328_v30 }
0x1c58   :  { %19679 = vmatpush3.bf16.xpose.msra.mxu1 %v25286_v9 }
0x1c59   :  { %19687 = vmatpush3.bf16.xpose.msra.mxu0 %v25286_v9  ;;  %19852 = vmatprep.subr.msk.bf16.mxu1 %vm1213_vm1, %v12345_v46  ;;  %v12320_v9 = vmul.f32 %v25259_v62, %v25304_v17  ;;  %v12331_v62 = vmul.f32 %v25319_v52, %v25441_v56 }
0x1c5a   :  { %19853 = vmatprep.subr.msk.bf16.mxu0 %vm1213_vm1, %v12347_v49 }
0x1c5b   :  { %v12344_v61 = vpack.c.bf16 %v12321_v50, %v12320_v9  ;;  %v25483_v17 = vpack.c.bf16 %v12331_v62, %v12331_v62 }
0x1c5f   :  { %19681 = vmatmul.mubr.msk.bf16.vlgmr.msra.gmra.mxu1 %vm112_vm0, %v12317_v39 }
0x1c60   :  { %19689 = vmatmul.mubr.msk.bf16.vlgmr.msra.gmra.mxu0 %vm112_vm0, %v12319_v35  ;;  %19693 = vmatpush3.bf16.msra.mxu1 %v13135_v26 }
0x1c61   :  { %19701 = vmatpush3.bf16.msra.mxu0 %v13192_v37  ;;  %19694 = vmatprep.subr.bf16.mxu1 %v12344_v61 }
0x1c62   :  { %19702 = vmatprep.subr.bf16.mxu0 %v12346_v16 }
0x1c64   :  { %19695 = vmatpush3.bf16.msra.mxu1 %v12344_v61 }
0x1c65   :  { %19703 = vmatpush3.bf16.msra.mxu0 %v12346_v16  ;;  %19854 = vmatprep.subr.msk.bf16.mxu1 %vm1213_vm1, %v25481_v7 }
0x1c66   :  { %19855 = vmatprep.subr.msk.bf16.mxu0 %vm1213_vm1, %v25483_v17 }
0x1cef   :  { %v19634_v63 = vpop.f32.mrf.mxu1  ;;  %v19642_v18 = vpop.f32.mrf.mxu0 }
0x1cf0   :  { %v12802_v38 = vmul.f32 0.5, %v19634_v63  ;;  %v12805_v53 = vmul.f32 0.5, %v19642_v18 }
0x1cf1   :  { %v12408_v52 = vpop.f32.mrf.mxu1  ;;  %v12462_v14 = vpop.f32.mrf.mxu0 }
0x1cf2   :  { %v25495_v33 = vadd.f32 %v25492_v51, %v12802_v38  ;;  %v25498_v59 = vadd.f32 %v25492_v51, %v12805_v53  ;;  %v12800_v31 = vmul.f32 0.5, %v12408_v52  ;;  %v12803_v19 = vmul.f32 0.5, %v12462_v14 }
0x1cf3   :  { %v19635_v22 = vpop.f32.mrf.mxu1  ;;  %v19643_v25 = vpop.f32.mrf.mxu0 }
0x1cf4   :  { %v25506_v60 = vadd.f32 %v25503_v36, %v12800_v31  ;;  %v25509_v5 = vadd.f32 %v25503_v36, %v12803_v19  ;;  %v12863_v47 = vsel %vm932_vm2, %v25498_v59, -inf  ;;  %v12854_v28 = vsel %vm932_vm2, %v25495_v33, -inf }
0x1cf5   :  { %12864 = vmax.xlane.f32.xlu1 %v12863_v47  ;;  %v12465_v24 = vpop.f32.mrf.mxu0  ;;  %12855 = vmax.xlane.f32.xlu0 %v12854_v28  ;;  %v12411_v45 = vpop.f32.mrf.mxu1 }
0x1cf6   :  { %v12804_v13 = vmul.f32 0.5, %v12465_v24  ;;  %v12801_v54 = vmul.f32 0.5, %v12411_v45  ;;  %v12857_v1 = vsel %vm925_vm3, %v25509_v5, -inf  ;;  %v12848_v20 = vsel %vm925_vm3, %v25506_v60, -inf }
0x1cf8   :  { %v25521_v46 = vadd.f32 %v25518_v12, %v12804_v13  ;;  %v25524_v49 = vadd.f32 %v25518_v12, %v12801_v54 }
0x1cf9   :  { %12858 = vmax.xlane.f32.xlu1 %v12857_v1  ;;  %12849 = vmax.xlane.f32.xlu0 %v12848_v20 }
0x1cfa   :  { %v12860_v50 = vsel %vm925_vm3, %v25521_v46, -inf  ;;  %v12851_v4 = vsel %vm925_vm3, %v25524_v49, -inf }
0x1cfd   :  { %12861 = vmax.xlane.f32.xlu0 %v12860_v50  ;;  %12852 = vmax.xlane.f32.xlu1 %v12851_v4 }
0x1cff   :  { %v19650_v39 = vpop.f32.mrf.mxu1 }
0x1d00   :  { %v12808_v9 = vmul.f32 0.5, %v19650_v39  ;;  %v19658_v35 = vpop.f32.mrf.mxu0 }
0x1d01   :  { %v12811_v32 = vmul.f32 0.5, %v19658_v35  ;;  %v12516_v26 = vpop.f32.mrf.mxu1 }
0x1d02   :  { %v25535_v61 = vadd.f32 %v25492_v51, %v12808_v9  ;;  %v12806_v30 = vmul.f32 0.5, %v12516_v26  ;;  %v12570_v37 = vpop.f32.mrf.mxu0 }
0x1d03   :  { %v25538_v16 = vadd.f32 %v25492_v51, %v12811_v32  ;;  %v12809_v62 = vmul.f32 0.5, %v12570_v37  ;;  %v19651_v63 = vpop.f32.mrf.mxu1 }
0x1d04   :  { %v25541_v18 = vadd.f32 %v25503_v36, %v12806_v30  ;;  %v19659_v38 = vpop.f32.mrf.mxu0  ;;  %v12872_v53 = vsel %vm932_vm2, %v25535_v61, -inf }
0x1d05   :  { %v25546_v52 = vadd.f32 %v25503_v36, %v12809_v62  ;;  %v12881_v14 = vsel %vm932_vm2, %v25538_v16, -inf  ;;  %12873 = vmax.xlane.f32.xlu0 %v12872_v53  ;;  %v12519_v31 = vpop.f32.mrf.mxu1 }
0x1d06   :  { %v12573_v19 = vpop.f32.mrf.mxu0  ;;  %12882 = vmax.xlane.f32.xlu1 %v12881_v14  ;;  %v12807_v22 = vmul.f32 0.5, %v12519_v31  ;;  %v12866_v47 = vsel %vm925_vm3, %v25541_v18, -inf }
0x1d07   :  { %v12810_v25 = vmul.f32 0.5, %v12573_v19  ;;  %v12875_v45 = vsel %vm925_vm3, %v25546_v52, -inf }
0x1d08   :  { %v25556_v24 = vadd.f32 %v25518_v12, %v12807_v22 }
0x1d09   :  { %v25553_v28 = vadd.f32 %v25518_v12, %v12810_v25  ;;  %12867 = vmax.xlane.f32.xlu0 %v12866_v47 }
0x1d0a   :  { %12876 = vmax.xlane.f32.xlu1 %v12875_v45  ;;  %v12869_v54 = vsel %vm925_vm3, %v25556_v24, -inf }
0x1d0b   :  { %v12878_v13 = vsel %vm925_vm3, %v25553_v28, -inf }
0x1d0d   :  { %12879 = vmax.xlane.f32.xlu0 %v12878_v13 }
0x1d0e   :  { %12870 = vmax.xlane.f32.xlu1 %v12869_v54 }
0x1d0f   :  { %v19666_v1 = vpop.f32.mrf.mxu1 }
0x1d10   :  { %v12814_v20 = vmul.f32 0.5, %v19666_v1  ;;  %v19674_v50 = vpop.f32.mrf.mxu0 }
0x1d11   :  { %v12817_v4 = vmul.f32 0.5, %v19674_v50  ;;  %v12624_v39 = vpop.f32.mrf.mxu1 }
0x1d12   :  { %v25565_v9 = vadd.f32 %v25492_v51, %v12814_v20  ;;  %v12812_v35 = vmul.f32 0.5, %v12624_v39  ;;  %v12678_v32 = vpop.f32.mrf.mxu0 }
0x1d13   :  { %v25568_v26 = vadd.f32 %v25492_v51, %v12817_v4  ;;  %v12815_v30 = vmul.f32 0.5, %v12678_v32  ;;  %v19667_v37 = vpop.f32.mrf.mxu1 }
0x1d14   :  { %v25571_v62 = vadd.f32 %v25503_v36, %v12812_v35  ;;  %v19675_v63 = vpop.f32.mrf.mxu0  ;;  %v12890_v38 = vsel %vm932_vm2, %v25565_v9, -inf }
0x1d15   :  { %v25576_v53 = vadd.f32 %v25503_v36, %v12815_v30  ;;  %v12899_v14 = vsel %vm932_vm2, %v25568_v26, -inf  ;;  %12891 = vmax.xlane.f32.xlu0 %v12890_v38  ;;  %v12627_v31 = vpop.f32.mrf.mxu1 }
0x1d16   :  { %v12681_v19 = vpop.f32.mrf.mxu0  ;;  %12900 = vmax.xlane.f32.xlu1 %v12899_v14  ;;  %v12813_v22 = vmul.f32 0.5, %v12627_v31  ;;  %v12884_v47 = vsel %vm925_vm3, %v25571_v62, -inf }
0x1d17   :  { %v12816_v25 = vmul.f32 0.5, %v12681_v19  ;;  %v12893_v54 = vsel %vm925_vm3, %v25576_v53, -inf }
0x1d18   :  { %v25586_v13 = vadd.f32 %v25518_v12, %v12813_v22 }
0x1d19   :  { %v25583_v45 = vadd.f32 %v25518_v12, %v12816_v25  ;;  %12885 = vmax.xlane.f32.xlu0 %v12884_v47 }
0x1d1a   :  { %12894 = vmax.xlane.f32.xlu1 %v12893_v54  ;;  %v12887_v20 = vsel %vm925_vm3, %v25586_v13, -inf }
0x1d1b   :  { %v12896_v1 = vsel %vm925_vm3, %v25583_v45, -inf }
0x1d1d   :  { %12897 = vmax.xlane.f32.xlu0 %v12896_v1 }
0x1d1e   :  { %12888 = vmax.xlane.f32.xlu1 %v12887_v20 }
0x1d1f   :  { %v19682_v50 = vpop.f32.mrf.mxu1 }
0x1d20   :  { %v12820_v4 = vmul.f32 0.5, %v19682_v50  ;;  %v19690_v39 = vpop.f32.mrf.mxu0 }
0x1d21   :  { %v12732_v35 = vpop.f32.mrf.mxu1  ;;  %v12823_v1 = vmul.f32 0.5, %v19690_v39 }
0x1d22   :  { %v25595_v32 = vadd.f32 %v25492_v51, %v12820_v4  ;;  %v12818_v30 = vmul.f32 0.5, %v12732_v35  ;;  %v12786_v37 = vpop.f32.mrf.mxu0 }
0x1d23   :  { %v12821_v63 = vmul.f32 0.5, %v12786_v37  ;;  %v19683_v38 = vpop.f32.mrf.mxu1  ;;  %v25618_v39 = vadd.f32 %v25492_v51, %v12823_v1 }
0x1d24   :  { %v25598_v14 = vadd.f32 %v25503_v36, %v12818_v30  ;;  %v19691_v31 = vpop.f32.mrf.mxu0  ;;  %v12908_v19 = vsel %vm932_vm2, %v25595_v32, -inf }
0x1d25   :  { %v25603_v22 = vadd.f32 %v25503_v36, %v12821_v63  ;;  %12909 = vmax.xlane.f32.xlu0 %v12908_v19  ;;  %v12735_v25 = vpop.f32.mrf.mxu1  ;;  %v12917_v63 = vsel %vm932_vm2, %v25618_v39, -inf }
0x1d26   :  { %v12789_v47 = vpop.f32.mrf.mxu0  ;;  %v12819_v54 = vmul.f32 0.5, %v12735_v25  ;;  %v12902_v35 = vsel %vm925_vm3, %v25598_v14, -inf }
0x1d27   :  { %v12822_v20 = vmul.f32 0.5, %v12789_v47  ;;  %v12911_v50 = vsel %vm925_vm3, %v25603_v22, -inf }
0x1d28   :  { %v25608_v4 = vadd.f32 %v25518_v12, %v12819_v54  ;;  %12912 = vmax.xlane.f32.xlu1 %v12911_v50 }
0x1d29   :  { %v25613_v30 = vadd.f32 %v25518_v12, %v12822_v20  ;;  %12903 = vmax.xlane.f32.xlu0 %v12902_v35 }
0x1d2a   :  { %v12905_v36 = vsel %vm925_vm3, %v25608_v4, -inf }
0x1d2b   :  { %v12914_v37 = vsel %vm925_vm3, %v25613_v30, -inf }
0x1d2c   :  { %12906 = vmax.xlane.f32.xlu1 %v12905_v36 }
0x1d2d   :  { %12915 = vmax.xlane.f32.xlu0 %v12914_v37 }
0x1d30   :  { %12918 = vmax.xlane.f32.xlu1 %v12917_v63 }
0x1d7e   :  { %v12865_v38 = vpop.xlane.xlu1 %12864  ;;  %v12856_v31 = vpop.xlane.xlu0 %12855 }
0x1d7f   :  { %v12925_v12 = vsub.f32 %v25498_v59, %v12865_v38  ;;  %v12922_v19 = vsub.f32 %v25495_v33, %v12856_v31 }
0x1d81   :  { %v12954_v25 = vmul.f32 1.442695, %v12925_v12  ;;  %v12948_v47 = vmul.f32 1.442695, %v12922_v19 }
0x1d82   :  { %v12859_v54 = vpop.xlane.xlu1 %12858  ;;  %v12850_v51 = vpop.xlane.xlu0 %12849 }
0x1d83   :  { %20730 = vpow2.f32 %v12954_v25  ;;  %v12923_v1 = vsub.f32 %v25509_v5, %v12859_v54  ;;  %v12920_v20 = vsub.f32 %v25506_v60, %v12850_v51 }
0x1d84   :  { %20732 = vpow2.f32 %v12948_v47 }
0x1d85   :  { %v12950_v50 = vmul.f32 1.442695, %v12923_v1  ;;  %v12944_v35 = vmul.f32 1.442695, %v12920_v20 }
0x1d86   :  { %v12862_v36 = vpop.xlane.xlu0 %12861  ;;  %v12853_v37 = vpop.xlane.xlu1 %12852 }
0x1d87   :  { %20734 = vpow2.f32 %v12950_v50  ;;  %v12924_v63 = vsub.f32 %v25521_v46, %v12862_v36  ;;  %v12921_v59 = vsub.f32 %v25524_v49, %v12853_v37 }
0x1d88   :  { %20736 = vpow2.f32 %v12944_v35 }
0x1d89   :  { %v12952_v33 = vmul.f32 1.442695, %v12924_v63  ;;  %v12946_v38 = vmul.f32 1.442695, %v12921_v59 }
0x1d8b   :  { %20738 = vpow2.f32 %v12952_v33 }
0x1d8c   :  { %20740 = vpow2.f32 %v12946_v38 }
0x1d8e   :  { %v12874_v31 = vpop.xlane.xlu0 %12873 }
0x1d8f   :  { %v12883_v12 = vpop.xlane.xlu1 %12882  ;;  %v12928_v5 = vsub.f32 %v25535_v61, %v12874_v31 }
0x1d90   :  { %v25631_v60 = vpop.eup %20730  ;;  %v12931_v19 = vsub.f32 %v25538_v16, %v12883_v12 }
0x1d91   :  { %v25634_v25 = vpop.eup %20732  ;;  %v12960_v47 = vmul.f32 1.442695, %v12928_v5  ;;  %v13007_v46 = vsel %vm932_vm2, %v25631_v60, 0.0 }
0x1d92   :  { %v12966_v49 = vmul.f32 1.442695, %v12931_v19  ;;  %v12868_v54 = vpop.xlane.xlu0 %12867  ;;  %v12998_v51 = vsel %vm932_vm2, %v25634_v25, 0.0  ;;  %13008 = vadd.xlane.f32.xlu1 %v13007_v46 }
0x1d93   :  { %20742 = vpow2.f32 %v12960_v47  ;;  %v12877_v1 = vpop.xlane.xlu1 %12876  ;;  %v12926_v61 = vsub.f32 %v25541_v18, %v12868_v54  ;;  %12999 = vadd.xlane.f32.xlu0 %v12998_v51 }
0x1d94   :  { %v25641_v20 = vpop.eup %20734  ;;  %20744 = vpow2.f32 %v12966_v49  ;;  %v12929_v16 = vsub.f32 %v25546_v52, %v12877_v1 }
0x1d95   :  { %v25644_v50 = vpop.eup %20736  ;;  %v12956_v35 = vmul.f32 1.442695, %v12926_v61  ;;  %v13001_v36 = vsel %vm925_vm3, %v25641_v20, 0.0 }
0x1d96   :  { %v12962_v37 = vmul.f32 1.442695, %v12929_v16  ;;  %v12880_v63 = vpop.xlane.xlu0 %12879  ;;  %v12992_v59 = vsel %vm925_vm3, %v25644_v50, 0.0  ;;  %13002 = vadd.xlane.f32.xlu1 %v13001_v36 }
0x1d97   :  { %20746 = vpow2.f32 %v12956_v35  ;;  %v12930_v18 = vsub.f32 %v25553_v28, %v12880_v63  ;;  %v12871_v33 = vpop.xlane.xlu1 %12870  ;;  %12993 = vadd.xlane.f32.xlu0 %v12992_v59 }
0x1d98   :  { %v25651_v38 = vpop.eup %20738  ;;  %20748 = vpow2.f32 %v12962_v37  ;;  %v12927_v52 = vsub.f32 %v25556_v24, %v12871_v33 }
0x1d99   :  { %v25654_v31 = vpop.eup %20740  ;;  %v12964_v12 = vmul.f32 1.442695, %v12930_v18  ;;  %v13004_v5 = vsel %vm925_vm3, %v25651_v38, 0.0 }
0x1d9a   :  { %v12958_v19 = vmul.f32 1.442695, %v12927_v52  ;;  %v12995_v47 = vsel %vm925_vm3, %v25654_v31, 0.0 }
0x1d9b   :  { %20750 = vpow2.f32 %v12964_v12  ;;  %13005 = vadd.xlane.f32.xlu0 %v13004_v5  ;;  %12996 = vadd.xlane.f32.xlu1 %v12995_v47 }
0x1d9c   :  { %20752 = vpow2.f32 %v12958_v19 }
0x1d9e   :  { %v12892_v28 = vpop.xlane.xlu0 %12891 }
0x1d9f   :  { %v12901_v46 = vpop.xlane.xlu1 %12900  ;;  %v12934_v49 = vsub.f32 %v25565_v9, %v12892_v28 }
0x1da0   :  { %v25661_v54 = vpop.eup %20742  ;;  %v12937_v24 = vsub.f32 %v25568_v26, %v12901_v46 }
0x1da1   :  { %v25664_v51 = vpop.eup %20744  ;;  %v12972_v1 = vmul.f32 1.442695, %v12934_v49  ;;  %v13016_v61 = vsel %vm932_vm2, %v25661_v54, 0.0 }
0x1da2   :  { %v12978_v16 = vmul.f32 1.442695, %v12937_v24  ;;  %v12886_v35 = vpop.xlane.xlu0 %12885  ;;  %13017 = vadd.xlane.f32.xlu0 %v13016_v61  ;;  %v13025_v36 = vsel %vm932_vm2, %v25664_v51, 0.0 }
0x1da3   :  { %20754 = vpow2.f32 %v12972_v1  ;;  %v12895_v37 = vpop.xlane.xlu1 %12894  ;;  %v12932_v9 = vsub.f32 %v25571_v62, %v12886_v35  ;;  %13026 = vadd.xlane.f32.xlu1 %v13025_v36 }
0x1da4   :  { %v25671_v63 = vpop.eup %20746  ;;  %20756 = vpow2.f32 %v12978_v16  ;;  %v12935_v26 = vsub.f32 %v25576_v53, %v12895_v37 }
0x1da5   :  { %v25674_v59 = vpop.eup %20748  ;;  %v12968_v18 = vmul.f32 1.442695, %v12932_v9  ;;  %v13010_v33 = vsel %vm925_vm3, %v25671_v63, 0.0 }
0x1da6   :  { %v12974_v52 = vmul.f32 1.442695, %v12935_v26  ;;  %v12898_v12 = vpop.xlane.xlu0 %12897  ;;  %13011 = vadd.xlane.f32.xlu0 %v13010_v33  ;;  %v13019_v5 = vsel %vm925_vm3, %v25674_v59, 0.0 }
0x1da7   :  { %20758 = vpow2.f32 %v12968_v18  ;;  %v12936_v62 = vsub.f32 %v25583_v45, %v12898_v12  ;;  %v12889_v19 = vpop.xlane.xlu1 %12888  ;;  %13020 = vadd.xlane.f32.xlu1 %v13019_v5 }
0x1da8   :  { %v25681_v47 = vpop.eup %20750  ;;  %20760 = vpow2.f32 %v12974_v52  ;;  %v12933_v53 = vsub.f32 %v25586_v13, %v12889_v19 }
0x1da9   :  { %v25684_v28 = vpop.eup %20752  ;;  %v12976_v46 = vmul.f32 1.442695, %v12936_v62  ;;  %v13022_v49 = vsel %vm925_vm3, %v25681_v47, 0.0 }
0x1daa   :  { %v12970_v24 = vmul.f32 1.442695, %v12933_v53  ;;  %13023 = vadd.xlane.f32.xlu0 %v13022_v49  ;;  %v13013_v1 = vsel %vm925_vm3, %v25684_v28, 0.0 }
0x1dab   :  { %20762 = vpow2.f32 %v12976_v46  ;;  %13014 = vadd.xlane.f32.xlu1 %v13013_v1 }
0x1dac   :  { %20764 = vpow2.f32 %v12970_v24 }
0x1dae   :  { %v12910_v45 = vpop.xlane.xlu0 %12909 }
0x1daf   :  { %v12940_v61 = vsub.f32 %v25595_v32, %v12910_v45 }
0x1db0   :  { %v25691_v16 = vpop.eup %20754 }
0x1db1   :  { %v25693_v13 = vpop.eup %20756  ;;  %v12984_v35 = vmul.f32 1.442695, %v12940_v61  ;;  %v12913_v36 = vpop.xlane.xlu1 %12912  ;;  %v13034_v37 = vsel %vm932_vm2, %v25691_v16, 0.0 }
0x1db2   :  { %v12941_v9 = vsub.f32 %v25603_v22, %v12913_v36  ;;  %13035 = vadd.xlane.f32.xlu0 %v13034_v37  ;;  %v12904_v26 = vpop.xlane.xlu0 %12903  ;;  %v13043_v18 = vsel %vm932_vm2, %v25693_v13, 0.0 }
0x1db3   :  { %20766 = vpow2.f32 %v12984_v35  ;;  %v12938_v33 = vsub.f32 %v25598_v14, %v12904_v26  ;;  %13044 = vadd.xlane.f32.xlu1 %v13043_v18 }
0x1db4   :  { %v25701_v32 = vpop.eup %20758  ;;  %v12986_v52 = vmul.f32 1.442695, %v12941_v9 }
0x1db5   :  { %v25703_v12 = vpop.eup %20760  ;;  %v12980_v5 = vmul.f32 1.442695, %v12938_v33  ;;  %v12907_v62 = vpop.xlane.xlu1 %12906  ;;  %v13028_v19 = vsel %vm925_vm3, %v25701_v32, 0.0 }
0x1db6   :  { %20768 = vpow2.f32 %v12986_v52  ;;  %v12939_v22 = vsub.f32 %v25608_v4, %v12907_v62  ;;  %13029 = vadd.xlane.f32.xlu0 %v13028_v19  ;;  %v12916_v53 = vpop.xlane.xlu0 %12915  ;;  %v13037_v46 = vsel %vm925_vm3, %v25703_v12, 0.0 }
0x1db7   :  { %20770 = vpow2.f32 %v12980_v5  ;;  %v12942_v14 = vsub.f32 %v25613_v30, %v12916_v53  ;;  %13038 = vadd.xlane.f32.xlu1 %v13037_v46 }
0x1db8   :  { %v25711_v49 = vpop.eup %20762  ;;  %v12982_v24 = vmul.f32 1.442695, %v12939_v22 }
0x1db9   :  { %v25713_v1 = vpop.eup %20764  ;;  %v12988_v45 = vmul.f32 1.442695, %v12942_v14  ;;  %v12919_v61 = vpop.xlane.xlu1 %12918  ;;  %v13040_v35 = vsel %vm925_vm3, %v25711_v49, 0.0 }
0x1dba   :  { %20772 = vpow2.f32 %v12982_v24  ;;  %v12943_v4 = vsub.f32 %v25618_v39, %v12919_v61  ;;  %13041 = vadd.xlane.f32.xlu0 %v13040_v35  ;;  %v13031_v36 = vsel %vm925_vm3, %v25713_v1, 0.0 }
0x1dbb   :  { %20774 = vpow2.f32 %v12988_v45  ;;  %13032 = vadd.xlane.f32.xlu1 %v13031_v36 }
0x1dbc   :  { %v12990_v30 = vmul.f32 1.442695, %v12943_v4 }
0x1dbe   :  { %20776 = vpow2.f32 %v12990_v30 }
0x1dc0   :  { %v25720_v37 = vpop.eup %20766 }
0x1dc1   :  { %v13052_v9 = vsel %vm932_vm2, %v25720_v37, 0.0 }
0x1dc2   :  { %13053 = vadd.xlane.f32.xlu0 %v13052_v9 }
0x1dc3   :  { %v25724_v26 = vpop.eup %20768 }
0x1dc4   :  { %v25726_v18 = vpop.eup %20770  ;;  %v13055_v39 = vsel %vm925_vm3, %v25724_v26, 0.0 }
0x1dc5   :  { %13056 = vadd.xlane.f32.xlu1 %v13055_v39  ;;  %v13046_v33 = vsel %vm925_vm3, %v25726_v18, 0.0 }
0x1dc6   :  { %13047 = vadd.xlane.f32.xlu0 %v13046_v33 }
0x1dc7   :  { %v25732_v52 = vpop.eup %20772 }
0x1dc8   :  { %v25734_v5 = vpop.eup %20774  ;;  %v13049_v62 = vsel %vm925_vm3, %v25732_v52, 0.0 }
0x1dc9   :  { %13050 = vadd.xlane.f32.xlu1 %v13049_v62  ;;  %v13058_v19 = vsel %vm925_vm3, %v25734_v5, 0.0 }
0x1dca   :  { %13059 = vadd.xlane.f32.xlu0 %v13058_v19 }
0x1dcb   :  { %v25740_v22 = vpop.eup %20776 }
0x1dcc   :  { %v13061_v53 = vsel %vm932_vm2, %v25740_v22, 0.0 }
0x1dcd   :  { %13062 = vadd.xlane.f32.xlu1 %v13061_v53 }
0x1e1b   :  { %v13009_v46 = vpop.xlane.xlu1 %13008 }
0x1e1c   :  { %v13000_v14 = vpop.xlane.xlu0 %12999  ;;  %20778 = vrcp.f32 %v13009_v46 }
0x1e1d   :  { %20780 = vrcp.f32 %v13000_v14 }
0x1e1f   :  { %v13003_v24 = vpop.xlane.xlu1 %13002 }
0x1e20   :  { %v12994_v45 = vpop.xlane.xlu0 %12993  ;;  %20782 = vrcp.f32 %v13003_v24 }
0x1e21   :  { %20784 = vrcp.f32 %v12994_v45 }
0x1e24   :  { %v13006_v61 = vpop.xlane.xlu0 %13005  ;;  %v12997_v35 = vpop.xlane.xlu1 %12996 }
0x1e25   :  { %20786 = vrcp.f32 %v13006_v61 }
0x1e26   :  { %20788 = vrcp.f32 %v12997_v35 }
0x1e29   :  { %v20779_v30 = vpop.eup %20778 }
0x1e2a   :  { %v20781_v9 = vpop.eup %20780  ;;  %v13093_v46 = vmul.f32 %v20779_v30, %v25631_v60 }
0x1e2b   :  { %v13018_v4 = vpop.xlane.xlu0 %13017  ;;  %v13090_v24 = vmul.f32 %v20781_v9, %v25634_v25  ;;  %v13306_v25 = vsel %vm1213_vm1, %v25483_v17, 0 }
0x1e2c   :  { %v13027_v36 = vpop.xlane.xlu1 %13026  ;;  %20790 = vrcp.f32 %v13018_v4  ;;  %v13115_v55 = vpack.c.bf16 %v13093_v46, %v13093_v46 }
0x1e2d   :  { %v20783_v33 = vpop.eup %20782  ;;  %20792 = vrcp.f32 %v13027_v36  ;;  %v13113_v30 = vpack.c.bf16 %v13090_v24, %v13090_v24 }
0x1e2e   :  { %v20785_v19 = vpop.eup %20784  ;;  %v13091_v61 = vmul.f32 %v20783_v33, %v25641_v20  ;;  %v12337_v20 = vmul.f32 %v25361_v44, %v25441_v56 }
0x1e2f   :  { %v13012_v39 = vpop.xlane.xlu0 %13011  ;;  %v13088_v4 = vmul.f32 %v20785_v19, %v25644_v50 }
0x1e30   :  { %v13021_v62 = vpop.xlane.xlu1 %13020  ;;  %v12355_v17 = vpack.c.bf16 %v12337_v20, %v12337_v20 }
0x1e31   :  { %20794 = vrcp.f32 %v13021_v62 }
0x1e32   :  { %v20787_v53 = vpop.eup %20786  ;;  %20796 = vrcp.f32 %v13012_v39 }
0x1e33   :  { %v20789_v14 = vpop.eup %20788  ;;  %v13024_v45 = vpop.xlane.xlu0 %13023  ;;  %v13092_v35 = vmul.f32 %v20787_v53, %v25651_v38 }
0x1e34   :  { %20798 = vrcp.f32 %v13024_v45  ;;  %v13015_v34 = vpop.xlane.xlu1 %13014  ;;  %v13089_v48 = vmul.f32 %v20789_v14, %v25654_v31 }
0x1e35   :  { %20800 = vrcp.f32 %v13015_v34  ;;  %v13114_v36 = vpack.c.bf16 %v13092_v35, %v13091_v61  ;;  %v13249_v34 = vsel %vm1213_vm1, %v25481_v7, 0 }
0x1e36   :  { %v13112_v60 = vpack.c.bf16 %v13089_v48, %v13088_v4  ;;  %v12334_v48 = vmul.f32 %v25352_v40, %v25441_v56 }
0x1e37   :  { %19704 = vmatprep.mubr.msk.bf16.mxu0 %vm925_vm3, %v13114_v36 }
0x1e38   :  { %19696 = vmatprep.mubr.msk.bf16.mxu1 %vm925_vm3, %v13112_v60  ;;  %19705 = vmatmul.mubr.msk.bf16.vlgmr.msra.gmra.mxu0 %vm925_vm3, %v13115_v55  ;;  %v12353_v44 = vpack.c.bf16 %v12334_v48, %v12334_v48 }
0x1e39   :  { %19697 = vmatmul.mubr.msk.bf16.vlgmr.msra.gmra.mxu1 %vm925_vm3, %v13113_v30  ;;  %19717 = vmatpush3.bf16.msra.mxu0 %v13306_v25  ;;  %v20791_v38 = vpop.eup %20790 }
0x1e3a   :  { %19709 = vmatpush3.bf16.msra.mxu1 %v13249_v34  ;;  %19718 = vmatprep.subr.bf16.mxu0 %v25343_v43  ;;  %v20793_v31 = vpop.eup %20792 }
0x1e3b   :  { %19710 = vmatprep.subr.bf16.mxu1 %v25339_v57  ;;  %v13036_v55 = vpop.xlane.xlu0 %13035  ;;  %v13099_v62 = vmul.f32 %v20793_v31, %v25664_v51 }
0x1e3c   :  { %v13045_v50 = vpop.xlane.xlu1 %13044  ;;  %20802 = vrcp.f32 %v13036_v55 }
0x1e3d   :  { %19719 = vmatpush3.bf16.msra.mxu0 %v25343_v43  ;;  %20804 = vrcp.f32 %v13045_v50  ;;  %v13096_v43 = vmul.f32 %v20791_v38, %v25661_v54  ;;  %v13119_v35 = vpack.c.bf16 %v13099_v62, %v13099_v62  ;;  %v13420_v54 = vsel %vm1213_vm1, %v12355_v17, 0 }
0x1e3e   :  { %19711 = vmatpush3.bf16.msra.mxu1 %v25339_v57  ;;  %19857 = vmatprep.subr.msk.bf16.mxu0 %vm1213_vm1, %v12355_v17  ;;  %v20795_v7 = vpop.eup %20794 }
0x1e3f   :  { %19856 = vmatprep.subr.msk.bf16.mxu1 %vm1213_vm1, %v12353_v44  ;;  %v13030_v40 = vpop.xlane.xlu0 %13029  ;;  %v20797_v9 = vpop.eup %20796  ;;  %v13097_v53 = vmul.f32 %v20795_v7, %v25674_v59  ;;  %v13117_v4 = vpack.c.bf16 %v13096_v43, %v13096_v43  ;;  %v13363_v59 = vsel %vm1213_vm1, %v12353_v44, 0 }
0x1e40   :  { %v13039_v39 = vpop.xlane.xlu1 %13038  ;;  %v13094_v14 = vmul.f32 %v20797_v9, %v25671_v63  ;;  %v12343_v63 = vmul.f32 %v25383_v8, %v25441_v56 }
0x1e41   :  { %v20799_v33 = vpop.eup %20798  ;;  %20806 = vrcp.f32 %v13039_v39 }
0x1e42   :  { %v20801_v19 = vpop.eup %20800  ;;  %v13098_v57 = vmul.f32 %v20799_v33, %v25681_v47  ;;  %20808 = vrcp.f32 %v13030_v40  ;;  %v12340_v47 = vmul.f32 %v25374_v10, %v25441_v56  ;;  %v12359_v36 = vpack.c.bf16 %v12343_v63, %v12343_v63 }
0x1e43   :  { %v13042_v46 = vpop.xlane.xlu0 %13041  ;;  %v13095_v24 = vmul.f32 %v20801_v19, %v25684_v28 }
0x1e44   :  { %20810 = vrcp.f32 %v13042_v46  ;;  %v13033_v45 = vpop.xlane.xlu1 %13032  ;;  %v13118_v61 = vpack.c.bf16 %v13098_v57, %v13097_v53  ;;  %v12357_v60 = vpack.c.bf16 %v12340_v47, %v12340_v47 }
0x1e45   :  { %20812 = vrcp.f32 %v13033_v45  ;;  %v13116_v51 = vpack.c.bf16 %v13095_v24, %v13094_v14 }
0x1e46   :  { %19720 = vmatprep.mubr.msk.bf16.mxu0 %vm925_vm3, %v13118_v61 }
0x1e47   :  { %19712 = vmatprep.mubr.msk.bf16.mxu1 %vm925_vm3, %v13116_v51  ;;  %19721 = vmatmul.mubr.msk.bf16.vlgmr.msra.gmra.mxu0 %vm925_vm3, %v13119_v35 }
0x1e48   :  { %19713 = vmatmul.mubr.msk.bf16.vlgmr.msra.gmra.mxu1 %vm925_vm3, %v13117_v4  ;;  %19733 = vmatpush3.bf16.msra.mxu0 %v13420_v54 }
0x1e49   :  { %19725 = vmatpush3.bf16.msra.mxu1 %v13363_v59  ;;  %19734 = vmatprep.subr.bf16.mxu0 %v25369_v3  ;;  %v20803_v30 = vpop.eup %20802 }
0x1e4a   :  { %19726 = vmatprep.subr.bf16.mxu1 %v25367_v11  ;;  %v20805_v8 = vpop.eup %20804 }
0x1e4b   :  { %v13054_v28 = vpop.xlane.xlu0 %13053  ;;  %v13105_v48 = vmul.f32 %v20805_v8, %v25693_v13 }
0x1e4c   :  { %19735 = vmatpush3.bf16.msra.mxu0 %v25369_v3  ;;  %20814 = vrcp.f32 %v13054_v28  ;;  %v13102_v3 = vmul.f32 %v20803_v30, %v25691_v16  ;;  %v13534_v16 = vsel %vm1213_vm1, %v12359_v36, 0 }
0x1e4d   :  { %19727 = vmatpush3.bf16.msra.mxu1 %v25367_v11  ;;  %19859 = vmatprep.subr.msk.bf16.mxu0 %vm1213_vm1, %v12359_v36  ;;  %v13123_v40 = vpack.c.bf16 %v13105_v48, %v13105_v48 }
0x1e4e   :  { %19858 = vmatprep.subr.msk.bf16.mxu1 %vm1213_vm1, %v12357_v60  ;;  %v13057_v25 = vpop.xlane.xlu1 %13056  ;;  %v20807_v10 = vpop.eup %20806  ;;  %v13121_v9 = vpack.c.bf16 %v13102_v3, %v13102_v3 }
0x1e4f   :  { %v13048_v56 = vpop.xlane.xlu0 %13047  ;;  %v20809_v20 = vpop.eup %20808  ;;  %v13103_v11 = vmul.f32 %v20807_v10, %v25703_v12 }
0x1e50   :  { %20816 = vrcp.f32 %v13048_v56  ;;  %v13100_v44 = vmul.f32 %v20809_v20, %v25701_v32  ;;  %v13477_v32 = vsel %vm1213_vm1, %v12357_v60, 0 }
0x1e51   :  { %v20811_v34 = vpop.eup %20810  ;;  %20818 = vrcp.f32 %v13057_v25 }
0x1e52   :  { %v20813_v55 = vpop.eup %20812  ;;  %v13051_v50 = vpop.xlane.xlu1 %13050  ;;  %v13104_v17 = vmul.f32 %v20811_v34, %v25711_v49 }
0x1e53   :  { %20820 = vrcp.f32 %v13051_v50  ;;  %v13060_v38 = vpop.xlane.xlu0 %13059  ;;  %v13101_v31 = vmul.f32 %v20813_v55, %v25713_v1 }
0x1e54   :  { %20822 = vrcp.f32 %v13060_v38  ;;  %v13122_v7 = vpack.c.bf16 %v13104_v17, %v13103_v11 }
0x1e55   :  { %v13120_v13 = vpack.c.bf16 %v13101_v31, %v13100_v44 }
0x1e56   :  { %v13063_v39 = vpop.xlane.xlu1 %13062  ;;  %19736 = vmatprep.mubr.msk.bf16.mxu0 %vm925_vm3, %v13122_v7 }
0x1e57   :  { %20824 = vrcp.f32 %v13063_v39  ;;  %19728 = vmatprep.mubr.msk.bf16.mxu1 %vm925_vm3, %v13120_v13  ;;  %19737 = vmatmul.mubr.msk.bf16.vlgmr.msra.gmra.mxu0 %vm925_vm3, %v13123_v40 }
0x1e58   :  { %19729 = vmatmul.mubr.msk.bf16.vlgmr.msra.gmra.mxu1 %vm925_vm3, %v13121_v9  ;;  %19749 = vmatpush3.bf16.msra.mxu0 %v13534_v16 }
0x1e59   :  { %19741 = vmatpush3.bf16.msra.mxu1 %v13477_v32  ;;  %19750 = vmatprep.subr.bf16.mxu0 %v25392_v6  ;;  %v20815_v12 = vpop.eup %20814 }
0x1e5a   :  { %19742 = vmatprep.subr.bf16.mxu1 %v25389_v42  ;;  %v13108_v62 = vmul.f32 %v20815_v12, %v25720_v37 }
0x1e5c   :  { %19751 = vmatpush3.bf16.msra.mxu0 %v25392_v6  ;;  %v13125_v6 = vpack.c.bf16 %v13108_v62, %v13108_v62 }
0x1e5d   :  { %19743 = vmatpush3.bf16.msra.mxu1 %v25389_v42  ;;  %v20817_v49 = vpop.eup %20816 }
0x1e5e   :  { %v20819_v1 = vpop.eup %20818  ;;  %v13106_v43 = vmul.f32 %v20817_v49, %v25726_v18  ;;  %v20277_v18 = vld [vmem:[%s26595_s10 + $0x30] sm:$0xff]  }
0x1e5f   :  { %v13109_v57 = vmul.f32 %v20819_v1, %v25724_v26  ;;  %v20276_v26 = vld [vmem:[%s26595_s10 + $0x38] sm:$0xff]  }
0x1e60   :  { %v20821_v33 = vpop.eup %20820  ;;  %19756 = vmatprep.subr.bf16.mxu1 %v20276_v26 }
0x1e61   :  { %v20823_v19 = vpop.eup %20822  ;;  %v13107_v53 = vmul.f32 %v20821_v33, %v25732_v52 }
0x1e62   :  { %v13110_v46 = vmul.f32 %v20823_v19, %v25734_v5 }
0x1e63   :  { %v13124_v14 = vpack.c.bf16 %v13107_v53, %v13106_v43 }
0x1e64   :  { %v20825_v24 = vpop.eup %20824  ;;  %v13126_v45 = vpack.c.bf16 %v13110_v46, %v13109_v57 }
0x1e65   :  { %v13111_v42 = vmul.f32 %v20825_v24, %v25740_v22  ;;  %19744 = vmatprep.mubr.msk.bf16.mxu1 %vm925_vm3, %v13124_v14 }
0x1e66   :  { %19745 = vmatmul.mubr.msk.bf16.vlgmr.msra.gmra.mxu1 %vm925_vm3, %v13125_v6  ;;  %19752 = vmatprep.mubr.msk.bf16.mxu0 %vm925_vm3, %v13126_v45 }
0x1e67   :  { %v13127_v37 = vpack.c.bf16 %v13111_v42, %v13111_v42  ;;  %19757 = vmatpush3.bf16.msra.mxu1 %v20276_v26 }
0x1e68   :  { %19758 = vmatprep.subr.bf16.mxu1 %v20277_v18 }
0x1e69   :  { %19753 = vmatmul.mubr.msk.bf16.vlgmr.msra.gmra.mxu0 %vm925_vm3, %v13127_v37 }
0x1e6a   :  { %14092 = vmatprep.mubr.bf16.mxu0 %v26637_v0 }
0x1e6b   :  { %19759 = vmatpush3.bf16.msra.mxu1 %v20277_v18 }
0x1ef8   :  { %v19706_v52 = vpop.f32.mrf.mxu0 }
0x1ef9   :  { %v19698_v5 = vpop.f32.mrf.mxu1  ;;  %v13615_v48 = vsel %vm1694_vm4, %v19706_v52, 0.0 }
0x1efa   :  { %v13228_v22 = vpop.f32.mrf.mxu0  ;;  %v13614_v34 = vsel %vm1694_vm4, %v19698_v5, 0.0 }
0x1efb   :  { %v13171_v61 = vpop.f32.mrf.mxu1  ;;  %v13585_v50 = vsel %vm112_vm0, %v13228_v22, 0.0  ;;  %v13616_v31 = vadd.f32 %v13615_v48, %v13614_v34 }
0x1efc   :  { %v19707_v35 = vpop.f32.mrf.mxu0  ;;  %v13584_v3 = vsel %vm112_vm0, %v13171_v61, 0.0 }
0x1efd   :  { %v19699_v51 = vpop.f32.mrf.mxu1  ;;  %v13586_v40 = vadd.f32 %v13585_v50, %v13584_v3 }
0x1efe   :  { %v13231_v4 = vpop.f32.mrf.mxu0 }
0x1eff   :  { %v13174_v54 = vpop.f32.mrf.mxu1  ;;  %v13600_v38 = vsel %vm112_vm0, %v13231_v4, 0.0 }
0x1f00   :  { %v13599_v17 = vsel %vm112_vm0, %v13174_v54, 0.0 }
0x1f01   :  { %v13601_v9 = vadd.f32 %v13600_v38, %v13599_v17 }
0x1f07   :  { %v19722_v63 = vpop.f32.mrf.mxu0 }
0x1f08   :  { %v19714_v59 = vpop.f32.mrf.mxu1  ;;  %v13619_v49 = vsel %vm1694_vm4, %v19722_v63, 0.0 }
0x1f09   :  { %v13342_v47 = vpop.f32.mrf.mxu0  ;;  %v13617_v44 = vsel %vm1694_vm4, %v19714_v59, 0.0 }
0x1f0a   :  { %v13285_v28 = vpop.f32.mrf.mxu1  ;;  %v13618_v39 = vadd.f32 %v13617_v44, %v13616_v31  ;;  %v13589_v62 = vsel %vm112_vm0, %v13342_v47, 0.0 }
0x1f0b   :  { %v19723_v36 = vpop.f32.mrf.mxu0  ;;  %v13587_v7 = vsel %vm112_vm0, %v13285_v28, 0.0 }
0x1f0c   :  { %v19715_v60 = vpop.f32.mrf.mxu1  ;;  %v13588_v16 = vadd.f32 %v13587_v7, %v13586_v40  ;;  %v13620_v33 = vadd.f32 %v13619_v49, %v13618_v39 }
0x1f0d   :  { %v13345_v30 = vpop.f32.mrf.mxu0 }
0x1f0e   :  { %v13288_v8 = vpop.f32.mrf.mxu1  ;;  %v13590_v43 = vadd.f32 %v13589_v62, %v13588_v16  ;;  %v13604_v53 = vsel %vm112_vm0, %v13345_v30, 0.0 }
0x1f0f   :  { %v13602_v13 = vsel %vm112_vm0, %v13288_v8, 0.0 }
0x1f10   :  { %v13603_v32 = vadd.f32 %v13602_v13, %v13601_v9 }
0x1f12   :  { %v13605_v46 = vadd.f32 %v13604_v53, %v13603_v32 }
0x1f17   :  { %v19738_v25 = vpop.f32.mrf.mxu0 }
0x1f18   :  { %v19730_v10 = vpop.f32.mrf.mxu1  ;;  %v13623_v26 = vsel %vm1694_vm4, %v19738_v25, 0.0 }
0x1f19   :  { %v13456_v56 = vpop.f32.mrf.mxu0  ;;  %v13621_v1 = vsel %vm1694_vm4, %v19730_v10, 0.0 }
0x1f1a   :  { %v13399_v20 = vpop.f32.mrf.mxu1  ;;  %v13622_v14 = vadd.f32 %v13621_v1, %v13620_v33  ;;  %v13593_v22 = vsel %vm112_vm0, %v13456_v56, 0.0 }
0x1f1b   :  { %v19739_v55 = vpop.f32.mrf.mxu0  ;;  %v13591_v19 = vsel %vm112_vm0, %v13399_v20, 0.0 }
0x1f1c   :  { %v19731_v11 = vpop.f32.mrf.mxu1  ;;  %v13592_v6 = vadd.f32 %v13591_v19, %v13590_v43  ;;  %v13624_v5 = vadd.f32 %v13623_v26, %v13622_v14 }
0x1f1d   :  { %v13459_v45 = vpop.f32.mrf.mxu0  ;;  %v17427_v11 = vld [vmem:[%s26596_s11 + $0x3] ss:$0 sm:$0xff] }
0x1f1e   :  { %v13402_v12 = vpop.f32.mrf.mxu1  ;;  %v13594_v51 = vadd.f32 %v13593_v22, %v13592_v6  ;;  %v13608_v4 = vsel %vm112_vm0, %v13459_v45, 0.0  ;;  %v17452_v45 = vld [vmem:[%s26597_s12 + $0x380] sm:$0xff] }
0x1f1f   :  { %v13606_v57 = vsel %vm112_vm0, %v13402_v12, 0.0  ;;  %v17444_v22 = vld [vmem:[%s26597_s12 + $0x340] sm:$0xff] }
0x1f20   :  { %v13607_v42 = vadd.f32 %v13606_v57, %v13605_v46 }
0x1f22   :  { %v13609_v63 = vadd.f32 %v13608_v4, %v13607_v42  ;;  %v17460_v42 = vld [vmem:[%s26597_s12 + $0x3c0] sm:$0xff]  ;;  %v17437_v4 = vld [vmem:[%s26597_s12 + $0x308] sm:$0xff] }
0x1f23   :  { %v17486_v26 = vcombine.low %v17452_v45, %v17460_v42 }
0x1f26   :  { %v19746_v24 = vpop.f32.mrf.mxu1 }
0x1f27   :  { %v13625_v18 = vsel %vm1694_vm4, %v19746_v24, 0.0 }
0x1f28   :  { %v13513_v37 = vpop.f32.mrf.mxu1  ;;  %v13626_v59 = vadd.f32 %v13625_v18, %v13624_v5  ;;  %v17487_v18 = vcombine.high %v17452_v45, %v17460_v42  ;;  %v17436_v5 = vld [vmem:[%s26597_s12 + $0x300] sm:$0xff] }
0x1f29   :  { %v19754_v52 = vpop.f32.mrf.mxu0  ;;  %v13595_v61 = vsel %vm112_vm0, %v13513_v37, 0.0  ;;  %v17453_v37 = vld [vmem:[%s26597_s12 + $0x388] sm:$0xff] }
0x1f2a   :  { %v19747_v35 = vpop.f32.mrf.mxu1  ;;  %v13596_v28 = vadd.f32 %v13595_v61, %v13594_v51  ;;  %v13627_v36 = vsel %vm1694_vm4, %v19754_v52, 0.0  ;;  %v17461_v52 = vld [vmem:[%s26597_s12 + $0x3c8] sm:$0xff]  ;;  %v17471_v51 = vcombine.high %v17436_v5, %v17444_v22  ;;  %14072 = vmatprep.subr.bf16.mxu0 %v17487_v18 }
0x1f2b   :  { %v13570_v54 = vpop.f32.mrf.mxu0  ;;  %v13628_v56 = vadd.f32 %v13627_v36, %v13626_v59  ;;  %v17488_v61 = vcombine.low %v17453_v37, %v17461_v52  ;;  %v17489_v35 = vcombine.high %v17453_v37, %v17461_v52  ;;  %14073 = vmatpush1.bf16.msra.mxu0 %v17486_v26  ;;  %v17470_v59 = vcombine.low %v17436_v5, %v17444_v22  ;;  %v17462_v36 = vld [vmem:[%s26597_s12 + $0x3d0] sm:$0xff]  ;;  %v17440_v52 = vld [vmem:[%s26597_s12 + $0x320] sm:$0xff]  ;;  %v17441_v22 = vld [vmem:[%s26597_s12 + $0x328] sm:$0xff] }
0x1f2c   :  { %v13516_v47 = vpop.f32.mrf.mxu1  ;;  %v13597_v8 = vsel %vm112_vm0, %v13570_v54, 0.0  ;;  %v17445_v54 = vld [vmem:[%s26597_s12 + $0x348] sm:$0xff]  ;;  %14074 = vmatprep.subr.bf16.mxu0 %v17471_v51  ;;  %v17448_v5 = vld [vmem:[%s26597_s12 + $0x360] sm:$0xff] }
0x1f2d   :  { %v13610_v60 = vsel %vm112_vm0, %v13516_v47, 0.0  ;;  %v19755_v30 = vpop.f32.mrf.mxu0  ;;  %v13598_v34 = vadd.f32 %v13597_v8, %v13596_v28  ;;  %v13630_v3 = vpack.c.bf16 %v13628_v56, %v13628_v56  ;;  %14123 = vmatprep.subr.bf16.mxu1 %v17489_v35  ;;  %v17472_v47 = vcombine.low %v17437_v4, %v17445_v54  ;;  %v17454_v28 = vld [vmem:[%s26597_s12 + $0x390] sm:$0xff] }
0x1f2e   :  { %v13611_v25 = vadd.f32 %v13610_v60, %v13609_v63  ;;  %v17473_v63 = vcombine.high %v17437_v4, %v17445_v54  ;;  %v17455_v60 = vld [vmem:[%s26597_s12 + $0x398] sm:$0xff]  ;;  %v17490_v30 = vcombine.low %v17454_v28, %v17462_v36  ;;  %v17491_v8 = vcombine.high %v17454_v28, %v17462_v36 }
0x1f2f   :  { %v13573_v10 = vpop.f32.mrf.mxu0  ;;  %14075 = vmatpush1.bf16.msra.mxu0 %v17470_v59  ;;  %v17479_v4 = vcombine.high %v17440_v52, %v17448_v5  ;;  %v17466_v59 = vld [vmem:[%s26597_s12 + $0x3f0] sm:$0xff]  ;;  %v17467_v28 = vld [vmem:[%s26597_s12 + $0x3f8] sm:$0xff]  ;;  %v17478_v36 = vcombine.low %v17440_v52, %v17448_v5  ;;  %v20309_v52 = vld [vmem:[%s26599_s14 + $0xc80] sm:$0xff]  }
0x1f30   :  { %v13612_v20 = vsel %vm112_vm0, %v13573_v10, 0.0  ;;  %14174 = vmatprep.subr.bf16.mxu0 %v17491_v8  ;;  %v20310_v5 = vld [vmem:[%s26599_s14 + $0xd78] sm:$0xff]  }
0x1f31   :  { %v13613_v48 = vadd.f32 %v13612_v20, %v13611_v25  ;;  %v17463_v25 = vld [vmem:[%s26597_s12 + $0x3d8] sm:$0xff] }
0x1f32   :  { %v17492_v10 = vcombine.low %v17455_v60, %v17463_v25  ;;  %v17493_v56 = vcombine.high %v17455_v60, %v17463_v25  ;;  %v17442_v25 = vld [vmem:[%s26597_s12 + $0x330] sm:$0xff] }
0x1f33   :  { %v13629_v55 = vpack.c.bf16 %v13613_v48, %v13598_v34 }
0x1f35   :  { %19760 = vmatprep.mubr.msk.bf16.mxu1 %vm112_vm0, %v13629_v55 }
0x1f36   :  { %19761 = vmatmul.mubr.msk.bf16.vlgmr.msra.gmra.mxu1 %vm112_vm0, %v13630_v3 }
0x1f37   :  { %14143 = vmatprep.mubr.bf16.mxu1 %v26637_v0  ;;  %14124 = vmatpush1.bf16.msra.mxu1 %v17488_v61  ;;  %v17449_v61 = vld [vmem:[%s26597_s12 + $0x368] sm:$0xff] }
0x1f38   :  { %14125 = vmatprep.subr.bf16.mxu1 %v17473_v63  ;;  %v17481_v54 = vcombine.high %v17441_v22, %v17449_v61  ;;  %v17458_v63 = vld [vmem:[%s26597_s12 + $0x3b0] sm:$0xff]  ;;  %v17480_v60 = vcombine.low %v17441_v22, %v17449_v61  ;;  %v20311_v22 = vld [vmem:[%s26599_s14 + $0xdf8] sm:$0xff]  }
0x1f39   :  { %v26135_v61 = vld [vmem:[%s26598_s13 + $0x30] sm:$0xff] }
0x1f3b   :  { %14126 = vmatpush1.bf16.msra.mxu1 %v17472_v47  ;;  %v17459_v47 = vld [vmem:[%s26597_s12 + $0x3b8] sm:$0xff] }
0x1f3c   :  { %14225 = vmatprep.subr.bf16.mxu1 %v17493_v56  ;;  %v17501_v8 = vcombine.high %v17459_v47, %v17467_v28  ;;  %v17443_v56 = vld [vmem:[%s26597_s12 + $0x338] sm:$0xff] }
0x1ff6   :  { %v19762_v50 = vpop.f32.mrf.mxu1 }
0x1ff7   :  { %v13705_v38 = vadd.f32 %v19762_v50, %v17427_v11 }
0x1ff8   :  { %v13696_v17 = vpop.f32.mrf.mxu1 }
0x1ff9   :  { %v13697_v44 = vadd.f32 %v17427_v11, %v13696_v17  ;;  %v13712_v13 = vadd.f32 %v13705_v38, %v25219_v15 }
0x1ffa   :  { %v19763_v31 = vpop.f32.mrf.mxu1 }
0x1ffb   :  { %v13710_v7 = vadd.f32 %v13697_v44, %v25213_v29  ;;  %v13723_v12 = vsel %vm1694_vm4, %v13712_v13, 0.0 }
0x1ffc   :  { %v13699_v40 = vpop.f32.mrf.mxu1 }
0x1ffd   :  { %v13700_v9 = vadd.f32 %v17427_v11, %v13699_v40  ;;  %v13717_v39 = vsel %vm112_vm0, %v13710_v7, 0.0 }
0x1ffe   :  { %13718 = vadd.xlane.f32.xlu0 %v13717_v39 }
0x1fff   :  { %v13711_v16 = vadd.f32 %v13700_v9, %v25215_v2 }
0x2001   :  { %v13720_v32 = vsel %vm112_vm0, %v13711_v16, 0.0 }
0x2002   :  { %13721 = vadd.xlane.f32.xlu1 %v13720_v32  ;;  %13724 = vadd.xlane.f32.xlu0 %v13723_v12 }
0x2087   :  { %v13719_v49 = vpop.xlane.xlu0 %13718 }
0x2088   :  { %v13726_v1 = vmul.f32 0.03125, %v13719_v49  ;;  %v17438_v49 = vld [vmem:[%s26597_s12 + $0x310] sm:$0xff] }
0x208a   :  { %v25859_v33 = vsub.f32 %v13710_v7, %v13726_v1  ;;  %v17434_v7 = vld [vmem:[%s26601_s16 + $0x3] ss:$0 sm:$0xff] }
0x208b   :  { %v13722_v29 = vpop.xlane.xlu1 %13721  ;;  %v13725_v62 = vpop.xlane.xlu0 %13724 }
0x208c   :  { %v13727_v19 = vmul.f32 0.03125, %v13722_v29  ;;  %v13728_v15 = vmul.f32 0.03125, %v13725_v62  ;;  %v13732_v43 = vmul.f32 %v25859_v33, %v25859_v33  ;;  %v17446_v29 = vld [vmem:[%s26597_s12 + $0x350] sm:$0xff]  ;;  %v17439_v62 = vld [vmem:[%s26597_s12 + $0x318] sm:$0xff] }
0x208d   :  { %v17474_v45 = vcombine.low %v17438_v49, %v17446_v29 }
0x208e   :  { %v13730_v53 = vsub.f32 %v13711_v16, %v13727_v19  ;;  %v25863_v57 = vsub.f32 %v13712_v13, %v13728_v15  ;;  %v13735_v2 = vsel %vm112_vm0, %v13732_v43, 0.0  ;;  %v17435_v16 = vld [vmem:[%s26602_s17 + $0x3] ss:$0 sm:$0xff]  ;;  %v17447_v19 = vld [vmem:[%s26597_s12 + $0x358] sm:$0xff] }
0x208f   :  { %13736 = vadd.xlane.f32.xlu1 %v13735_v2  ;;  %v17456_v2 = vld [vmem:[%s26597_s12 + $0x3a0] sm:$0xff]  ;;  %v17476_v42 = vcombine.low %v17439_v62, %v17447_v19 }
0x2090   :  { %v13733_v46 = vmul.f32 %v13730_v53, %v13730_v53  ;;  %v13734_v14 = vmul.f32 %v25863_v57, %v25863_v57 }
0x2092   :  { %v13738_v24 = vsel %vm112_vm0, %v13733_v46, 0.0  ;;  %v13741_v6 = vsel %vm1694_vm4, %v13734_v14, 0.0  ;;  %v17464_v46 = vld [vmem:[%s26597_s12 + $0x3e0] sm:$0xff]  ;;  %v17457_v14 = vld [vmem:[%s26597_s12 + $0x3a8] sm:$0xff] }
0x2093   :  { %13739 = vadd.xlane.f32.xlu0 %v13738_v24  ;;  %13742 = vadd.xlane.f32.xlu1 %v13741_v6  ;;  %v17465_v24 = vld [vmem:[%s26597_s12 + $0x3e8] sm:$0xff]  ;;  %v17495_v37 = vcombine.high %v17456_v2, %v17464_v46  ;;  %v17494_v35 = vcombine.low %v17456_v2, %v17464_v46  ;;  %v20299_v2 = vld [vmem:[%s26599_s14 + $0xcd0] sm:$0xff]  }
0x2094   :  { %v17497_v26 = vcombine.high %v17457_v14, %v17465_v24  ;;  %v17496_v51 = vcombine.low %v17457_v14, %v17465_v24  ;;  %v20300_v46 = vld [vmem:[%s26599_s14 + $0xc10] sm:$0xff]   ;;  %v20302_v24 = vld [vmem:[%s26599_s14 + $0xc48] sm:$0xff]  }
0x2095   :  { %v20301_v14 = vld [vmem:[%s26599_s14 + $0xc90] sm:$0xff]  }
0x2118   :  { %v13737_v20 = vpop.xlane.xlu1 %13736 }
0x2119   :  { %v13744_v34 = vmul.f32 0.03125, %v13737_v20  ;;  %v17451_v20 = vld [vmem:[%s26597_s12 + $0x378] sm:$0xff] }
0x211b   :  { %v13747_v48 = vadd.f32 1e-05, %v13744_v34  ;;  %v17498_v34 = vcombine.low %v17458_v63, %v17466_v59 }
0x211c   :  { %v13743_v55 = vpop.xlane.xlu1 %13742  ;;  %v13740_v3 = vpop.xlane.xlu0 %13739 }
0x211d   :  { %20826 = vrsqrt.f32 %v13747_v48  ;;  %v13746_v50 = vmul.f32 0.03125, %v13743_v55  ;;  %v13745_v11 = vmul.f32 0.03125, %v13740_v3  ;;  %v17500_v48 = vcombine.low %v17459_v47, %v17467_v28 }
0x211e   :  { %v17485_v3 = vcombine.high %v17443_v56, %v17451_v20 }
0x211f   :  { %v13749_v17 = vadd.f32 1e-05, %v13746_v50  ;;  %v13748_v38 = vadd.f32 1e-05, %v13745_v11  ;;  %v17484_v11 = vcombine.low %v17443_v56, %v17451_v20 }
0x2121   :  { %20828 = vrsqrt.f32 %v13749_v17  ;;  %v20278_v17 = vld [vmem:[%s26599_s14 + $0xc78] sm:$0xff]  }
0x2122   :  { %20830 = vrsqrt.f32 %v13748_v38  ;;  %v20279_v38 = vld [vmem:[%s26599_s14 + $0xcf8] sm:$0xff]  }
0x212a   :  { %v20827_v44 = vpop.eup %20826 }
0x212b   :  { %v13753_v31 = vmul.f32 %v20827_v44, %v25859_v33  ;;  %v20280_v44 = vld [vmem:[%s26599_s14 + $0xc38] sm:$0xff]  }
0x212d   :  { %v13762_v9 = vmul.f32 %v17434_v7, %v13753_v31  ;;  %v20281_v31 = vld [vmem:[%s26599_s14 + $0xcb8] sm:$0xff]  }
0x212e   :  { %v20829_v40 = vpop.eup %20828 }
0x212f   :  { %v20831_v13 = vpop.eup %20830  ;;  %v13755_v32 = vmul.f32 %v20829_v40, %v25863_v57  ;;  %v25917_v1 = vadd.f32 %v17435_v16, %v13762_v9  ;;  %v17477_v57 = vcombine.high %v17439_v62, %v17447_v19  ;;  %v20283_v40 = vld [vmem:[%s26599_s14 + $0xcf0] sm:$0xff]   ;;  %v20293_v62 = vld [vmem:[%s26599_s14 + $0xca0] sm:$0xff]   ;;  %v20294_v19 = vld [vmem:[%s26599_s14 + $0xc58] sm:$0xff]  }
0x2130   :  { %v13754_v39 = vmul.f32 %v20831_v13, %v13730_v53  ;;  %v17475_v53 = vcombine.high %v17438_v49, %v17446_v29  ;;  %v20284_v13 = vld [vmem:[%s26599_s14 + $0xc30] sm:$0xff]   ;;  %v20291_v49 = vld [vmem:[%s26599_s14 + $0xce0] sm:$0xff]  }
0x2131   :  { %v13764_v15 = vmul.f32 %v17434_v7, %v13755_v32  ;;  %v20285_v9 = vld [vmem:[%s26599_s14 + $0xcb0] sm:$0xff]   ;;  %v20289_v32 = vld [vmem:[%s26599_s14 + $0xca8] sm:$0xff]   ;;  %v20292_v29 = vld [vmem:[%s26599_s14 + $0xc20] sm:$0xff]  }
0x2132   :  { %v13763_v12 = vmul.f32 %v17434_v7, %v13754_v39  ;;  %v20282_v7 = vld [vmem:[%s26599_s14 + $0xc70] sm:$0xff]   ;;  %v20286_v39 = vld [vmem:[%s26599_s14 + $0xc68] sm:$0xff]  }
0x2133   :  { %v13773_v6 = vadd.f32 %v17435_v16, %v13764_v15  ;;  %v20295_v15 = vld [vmem:[%s26599_s14 + $0xcd8] sm:$0xff]  }
0x2134   :  { %v25919_v33 = vadd.f32 %v17435_v16, %v13763_v12  ;;  %v20288_v16 = vld [vmem:[%s26599_s14 + $0xc28] sm:$0xff]   ;;  %v20290_v12 = vld [vmem:[%s26599_s14 + $0xc60] sm:$0xff]  }
0x2135   :  { %v25952_v18 = vpack.c.bf16 %v13773_v6, %v13773_v6  ;;  %v20303_v6 = vld [vmem:[%s26599_s14 + $0xcc8] sm:$0xff]  }
0x2136   :  { %v25932_v43 = vpack.c.bf16 %v25919_v33, %v25917_v1 }
0x2138   :  { %17502 = vmatmul.mubr.msk.bf16.vlgmr.msra.gmra.mxu0 %vm112_vm0, %v25932_v43  ;;  %17504 = vmatmul.mubr.msk.bf16.vlgmr.msra.gmra.mxu1 %vm112_vm0, %v25932_v43 }
0x2139   :  { %14102 = vmatprep.mubr.bf16.mxu0 %v26637_v0  ;;  %14153 = vmatprep.mubr.bf16.mxu1 %v26637_v0 }
0x213a   :  { %14175 = vmatpush1.bf16.msra.mxu0 %v17490_v30  ;;  %14226 = vmatpush1.bf16.msra.mxu1 %v17492_v10  ;;  %v17499_v30 = vcombine.high %v17458_v63, %v17466_v59  ;;  %v17450_v10 = vld [vmem:[%s26597_s12 + $0x370] sm:$0xff]  ;;  %v13817_v63 = vrot.slane %v26135_v61, %v21946_v23  ;;  %v13825_v59 = vrot.slane %v26135_v61, %v21949_v58 }
0x213b   :  { %14176 = vmatprep.subr.bf16.mxu0 %v17475_v53  ;;  %14227 = vmatprep.subr.bf16.mxu1 %v17477_v57  ;;  %v17483_v55 = vcombine.high %v17442_v25, %v17450_v10  ;;  %v17482_v50 = vcombine.low %v17442_v25, %v17450_v10  ;;  %v20297_v53 = vld [vmem:[%s26599_s14 + $0xc98] sm:$0xff]   ;;  %v20298_v57 = vld [vmem:[%s26599_s14 + $0xc50] sm:$0xff]  }
0x213e   :  { %14177 = vmatpush1.bf16.msra.mxu0 %v17474_v45  ;;  %14228 = vmatpush1.bf16.msra.mxu1 %v17476_v42  ;;  %v20304_v45 = vld [vmem:[%s26599_s14 + $0xc08] sm:$0xff]  }
0x213f   :  { %14276 = vmatprep.subr.bf16.mxu0 %v17495_v37  ;;  %14327 = vmatprep.subr.bf16.mxu1 %v17497_v26  ;;  %v20305_v42 = vld [vmem:[%s26599_s14 + $0xc88] sm:$0xff]   ;;  %v20306_v37 = vld [vmem:[%s26599_s14 + $0xc40] sm:$0xff]  }
0x2140   :  { %17503 = vmatmul.mubr.msk.bf16.gmra.mxu0 %vm112_vm0, %v25952_v18  ;;  %17505 = vmatmul.mubr.msk.bf16.gmra.mxu1 %vm112_vm0, %v25952_v18  ;;  %v20307_v26 = vld [vmem:[%s26599_s14 + $0xcc0] sm:$0xff]  }
0x2141   :  { %14194 = vmatprep.mubr.bf16.mxu0 %v26637_v0  ;;  %14245 = vmatprep.mubr.bf16.mxu1 %v26637_v0 }
0x2148   :  { %17506 = vmatmul.mubr.msk.bf16.vlgmr.msra.gmra.mxu0 %vm112_vm0, %v25932_v43  ;;  %17508 = vmatmul.mubr.msk.bf16.vlgmr.msra.gmra.mxu1 %vm112_vm0, %v25932_v43 }
0x2149   :  { %14204 = vmatprep.mubr.bf16.mxu0 %v26637_v0  ;;  %14255 = vmatprep.mubr.bf16.mxu1 %v26637_v0 }
0x214a   :  { %14277 = vmatpush1.bf16.msra.mxu0 %v17494_v35  ;;  %14328 = vmatpush1.bf16.msra.mxu1 %v17496_v51 }
0x214b   :  { %14278 = vmatprep.subr.bf16.mxu0 %v17479_v4  ;;  %14329 = vmatprep.subr.bf16.mxu1 %v17481_v54  ;;  %v13821_v4 = vrot.slane %v26135_v61, %v21940_v41  ;;  %v13829_v54 = vrot.slane %v26135_v61, %v21943_v21 }
0x214e   :  { %14279 = vmatpush1.bf16.msra.mxu0 %v17478_v36  ;;  %14330 = vmatpush1.bf16.msra.mxu1 %v17480_v60 }
0x214f   :  { %14378 = vmatprep.subr.bf16.mxu0 %v17499_v30  ;;  %14429 = vmatprep.subr.bf16.mxu1 %v17501_v8 }
0x2150   :  { %17507 = vmatmul.mubr.msk.bf16.gmra.mxu0 %vm112_vm0, %v25952_v18  ;;  %17509 = vmatmul.mubr.msk.bf16.gmra.mxu1 %vm112_vm0, %v25952_v18 }
0x2151   :  { %14296 = vmatprep.mubr.bf16.mxu0 %v26637_v0  ;;  %14347 = vmatprep.mubr.bf16.mxu1 %v26637_v0 }
0x2158   :  { %17510 = vmatmul.mubr.msk.bf16.vlgmr.msra.gmra.mxu0 %vm112_vm0, %v25932_v43  ;;  %17512 = vmatmul.mubr.msk.bf16.vlgmr.msra.gmra.mxu1 %vm112_vm0, %v25932_v43 }
0x2159   :  { %14306 = vmatprep.mubr.bf16.mxu0 %v26637_v0  ;;  %14357 = vmatprep.mubr.bf16.mxu1 %v26637_v0 }
0x215a   :  { %14379 = vmatpush1.bf16.msra.mxu0 %v17498_v34  ;;  %14430 = vmatpush1.bf16.msra.mxu1 %v17500_v48 }
0x215b   :  { %14380 = vmatprep.subr.bf16.mxu0 %v17483_v55  ;;  %14431 = vmatprep.subr.bf16.mxu1 %v17485_v3 }
0x215e   :  { %14381 = vmatpush1.bf16.msra.mxu0 %v17482_v50  ;;  %14432 = vmatpush1.bf16.msra.mxu1 %v17484_v11 }
0x215f   :  { %18900 = vmatprep.subr.bf16.mxu0 %v20278_v17  ;;  %18928 = vmatprep.subr.bf16.mxu1 %v20279_v38 }
0x2160   :  { %17511 = vmatmul.mubr.msk.bf16.gmra.mxu0 %vm112_vm0, %v25952_v18  ;;  %17513 = vmatmul.mubr.msk.bf16.gmra.mxu1 %vm112_vm0, %v25952_v18 }
0x2161   :  { %14398 = vmatprep.mubr.bf16.mxu0 %v26637_v0  ;;  %14449 = vmatprep.mubr.bf16.mxu1 %v26637_v0 }
0x2168   :  { %17514 = vmatmul.mubr.msk.bf16.vlgmr.msra.gmra.mxu0 %vm112_vm0, %v25932_v43  ;;  %17516 = vmatmul.mubr.msk.bf16.vlgmr.msra.gmra.mxu1 %vm112_vm0, %v25932_v43  ;;  %v20296_v43 = vld [vmem:[%s26599_s14 + $0xc18] sm:$0xff]  }
0x2169   :  { %14408 = vmatprep.mubr.bf16.mxu0 %v26637_v0  ;;  %14459 = vmatprep.mubr.bf16.mxu1 %v26637_v0  ;;  %v20287_v0 = vld [vmem:[%s26599_s14 + $0xce8] sm:$0xff]  }
0x216a   :  { %18901 = vmatpush3.bf16.msra.mxu0 %v20280_v44  ;;  %18929 = vmatpush3.bf16.msra.mxu1 %v20281_v31 }
0x216b   :  { %18902 = vmatprep.subr.bf16.mxu0 %v20282_v7  ;;  %18930 = vmatprep.subr.bf16.mxu1 %v20283_v40 }
0x216e   :  { %18903 = vmatpush3.bf16.msra.mxu0 %v20284_v13  ;;  %18931 = vmatpush3.bf16.msra.mxu1 %v20285_v9 }
0x216f   :  { %18904 = vmatprep.subr.bf16.mxu0 %v20286_v39  ;;  %18932 = vmatprep.subr.bf16.mxu1 %v20287_v0 }
0x2170   :  { %17515 = vmatmul.mubr.msk.bf16.gmra.mxu0 %vm112_vm0, %v25952_v18  ;;  %17517 = vmatmul.mubr.msk.bf16.gmra.mxu1 %vm112_vm0, %v25952_v18  ;;  %v20308_v18 = vld [vmem:[%s26599_s14 + $0xc00] sm:$0xff]  }
0x2172   :  { %18905 = vmatpush3.bf16.msra.mxu0 %v20288_v16  ;;  %18933 = vmatpush3.bf16.msra.mxu1 %v20289_v32 }
0x2173   :  { %18906 = vmatprep.subr.bf16.mxu0 %v20290_v12  ;;  %18934 = vmatprep.subr.bf16.mxu1 %v20291_v49 }
0x2176   :  { %18907 = vmatpush3.bf16.msra.mxu0 %v20292_v29  ;;  %18935 = vmatpush3.bf16.msra.mxu1 %v20293_v62  ;;  %v20312_v29 = vld [vmem:[%s26599_s14 + $0xd38] sm:$0xff]  }
0x2177   :  { %18908 = vmatprep.subr.bf16.mxu0 %v20294_v19  ;;  %18936 = vmatprep.subr.bf16.mxu1 %v20295_v15  ;;  %v20313_v62 = vld [vmem:[%s26599_s14 + $0xdb8] sm:$0xff]  }
0x217a   :  { %18909 = vmatpush3.bf16.msra.mxu0 %v20296_v43  ;;  %18937 = vmatpush3.bf16.msra.mxu1 %v20297_v53 }
0x217b   :  { %18910 = vmatprep.subr.bf16.mxu0 %v20298_v57  ;;  %18938 = vmatprep.subr.bf16.mxu1 %v20299_v2 }
0x217e   :  { %18911 = vmatpush3.bf16.msra.mxu0 %v20300_v46  ;;  %18939 = vmatpush3.bf16.msra.mxu1 %v20301_v14  ;;  %v20314_v46 = vld [vmem:[%s26599_s14 + $0xd70] sm:$0xff]  }
0x217f   :  { %18912 = vmatprep.subr.bf16.mxu0 %v20302_v24  ;;  %18940 = vmatprep.subr.bf16.mxu1 %v20303_v6  ;;  %v20315_v14 = vld [vmem:[%s26599_s14 + $0xdf0] sm:$0xff]  }
0x2182   :  { %18913 = vmatpush3.bf16.msra.mxu0 %v20304_v45  ;;  %18941 = vmatpush3.bf16.msra.mxu1 %v20305_v42 }
0x2183   :  { %18914 = vmatprep.subr.bf16.mxu0 %v20306_v37  ;;  %18942 = vmatprep.subr.bf16.mxu1 %v20307_v26 }
0x2186   :  { %18915 = vmatpush3.bf16.msra.mxu0 %v20308_v18  ;;  %18943 = vmatpush3.bf16.msra.mxu1 %v20309_v52  ;;  %v20316_v18 = vld [vmem:[%s26599_s14 + $0xd30] sm:$0xff]  }
0x2187   :  { %18956 = vmatprep.subr.bf16.mxu0 %v20310_v5  ;;  %18984 = vmatprep.subr.bf16.mxu1 %v20311_v22  ;;  %v20317_v52 = vld [vmem:[%s26599_s14 + $0xdb0] sm:$0xff]  }
0x21f8   :  { %v14094_v35 = vpop.f32.mrf.mxu0  ;;  %v14145_v51 = vpop.f32.mrf.mxu1 }
0x21f9   :  { %v14095_v56 = vadd.f32 %v14094_v35, %v13817_v63  ;;  %v14146_v20 = vadd.f32 %v14145_v51, %v13825_v59 }
0x21fa   :  { %v14096_v47 = vpop.f32.mrf.mxu0  ;;  %v14147_v28 = vpop.f32.mrf.mxu1 }
0x21fb   :  { %v14097_v30 = vadd.f32 %v14096_v47, %v13821_v4  ;;  %v14148_v8 = vadd.f32 %v14147_v28, %v13829_v54  ;;  %v14468_v13 = vmax.f32 %v14095_v56, 0.0  ;;  %v14470_v9 = vmax.f32 %v14146_v20, 0.0  ;;  %v20322_v20 = vld [vmem:[%s26599_s14 + $0xd60] sm:$0xff]  }
0x21fc   :  { %v14098_v36 = vpop.f32.mrf.mxu0  ;;  %v14149_v60 = vpop.f32.mrf.mxu1 }
0x21fd   :  { %v14099_v25 = vadd.f32 %v14098_v36, %v13817_v63  ;;  %v14150_v10 = vadd.f32 %v14149_v60, %v13825_v59  ;;  %v14469_v44 = vmax.f32 %v14097_v30, 0.0  ;;  %v14471_v31 = vmax.f32 %v14148_v8, 0.0  ;;  %v20320_v60 = vld [vmem:[%s26599_s14 + $0xd28] sm:$0xff]  }
0x21fe   :  { %v14100_v34 = vpop.f32.mrf.mxu0  ;;  %v14151_v48 = vpop.f32.mrf.mxu1  ;;  %v20321_v30 = vld [vmem:[%s26599_s14 + $0xda8] sm:$0xff]  }
0x21ff   :  { %v14101_v55 = vadd.f32 %v14100_v34, %v13821_v4  ;;  %v14152_v3 = vadd.f32 %v14151_v48, %v13829_v54  ;;  %v14484_v50 = vmax.f32 %v14099_v25, 0.0  ;;  %v14486_v11 = vmax.f32 %v14150_v10, 0.0  ;;  %v20323_v34 = vld [vmem:[%s26599_s14 + $0xde0] sm:$0xff]  }
0x2200   :  { %v14104_v17 = vpop.f32.mrf.mxu0  ;;  %v14155_v38 = vpop.f32.mrf.mxu1 }
0x2201   :  { %v14485_v7 = vmax.f32 %v14101_v55, 0.0  ;;  %v14487_v40 = vmax.f32 %v14152_v3, 0.0  ;;  %v14516_v19 = vpack.c.bf16 %v14484_v50, %v14468_v13  ;;  %v14518_v15 = vpack.c.bf16 %v14486_v11, %v14470_v9 }
0x2202   :  { %v14106_v39 = vpop.f32.mrf.mxu0  ;;  %v14157_v0 = vpop.f32.mrf.mxu1  ;;  %v14105_v43 = vadd.f32 %v14104_v17, %v13817_v63  ;;  %v14156_v53 = vadd.f32 %v14155_v38, %v13825_v59  ;;  %v26175_v63 = vrot.slane %v26135_v61, %v21977_v27  ;;  %v26643_v59 = vld [vmem:[#allocation5_spill] sm:$0xff] }
0x2203   :  { %v14517_v16 = vpack.c.bf16 %v14485_v7, %v14469_v44  ;;  %v14519_v32 = vpack.c.bf16 %v14487_v40, %v14471_v31  ;;  %v14107_v12 = vadd.f32 %v14106_v39, %v13821_v4  ;;  %v14158_v49 = vadd.f32 %v14157_v0, %v13829_v54  ;;  %v20318_v4 = vld [vmem:[%s26599_s14 + $0xd68] sm:$0xff]   ;;  %v20324_v38 = vld [vmem:[%s26599_s14 + $0xd20] sm:$0xff]   ;;  %v20326_v40 = vld [vmem:[%s26599_s14 + $0xd58] sm:$0xff]  }
0x2204   :  { %v14108_v57 = vpop.f32.mrf.mxu0  ;;  %v14159_v2 = vpop.f32.mrf.mxu1  ;;  %v14500_v5 = vmax.f32 %v14105_v43, 0.0  ;;  %v14502_v22 = vmax.f32 %v14156_v53, 0.0  ;;  %v20319_v54 = vld [vmem:[%s26599_s14 + $0xde8] sm:$0xff]   ;;  %v26179_v47 = vrot.slane %v26135_v61, %v26643_v59  ;;  %v20325_v7 = vld [vmem:[%s26599_s14 + $0xda0] sm:$0xff]   ;;  %v20329_v43 = vld [vmem:[%s26599_s14 + $0xd98] sm:$0xff]  }
0x2205   :  { %v14501_v24 = vmax.f32 %v14107_v12, 0.0  ;;  %v14503_v6 = vmax.f32 %v14158_v49, 0.0  ;;  %15613 = vmatprep.mubr.bf16.mxu0 %v14517_v16  ;;  %15660 = vmatprep.mubr.bf16.mxu1 %v14519_v32  ;;  %v20327_v16 = vld [vmem:[%s26599_s14 + $0xdd8] sm:$0xff]   ;;  %v20330_v53 = vld [vmem:[%s26599_s14 + $0xd50] sm:$0xff]  }
0x2206   :  { %v14109_v45 = vpop.f32.mrf.mxu0  ;;  %v14160_v42 = vpop.f32.mrf.mxu1  ;;  %15614 = vmatmul.mubr.bf16.vlgmr.msra.gmra.mxu0 %v14516_v19  ;;  %15661 = vmatmul.mubr.bf16.vlgmr.msra.gmra.mxu1 %v14518_v15  ;;  %v14532_v8 = vpack.c.bf16 %v14500_v5, %v14500_v5  ;;  %v14534_v25 = vpack.c.bf16 %v14502_v22, %v14502_v22  ;;  %v20331_v57 = vld [vmem:[%s26599_s14 + $0xdd0] sm:$0xff]  }
0x2207   :  { %v14533_v37 = vpack.c.bf16 %v14501_v24, %v14501_v24  ;;  %v14535_v26 = vpack.c.bf16 %v14503_v6, %v14503_v6  ;;  %18957 = vmatpush3.bf16.msra.mxu0 %v20312_v29  ;;  %18985 = vmatpush3.bf16.msra.mxu1 %v20313_v62  ;;  %v20328_v62 = vld [vmem:[%s26599_s14 + $0xd18] sm:$0xff]   ;;  %v20333_v45 = vld [vmem:[%s26599_s14 + $0xd90] sm:$0xff]   ;;  %v20334_v42 = vld [vmem:[%s26599_s14 + $0xd48] sm:$0xff]  }
0x2208   :  { %v26163_v35 = vpop.f32.mrf.mxu0  ;;  %v26165_v51 = vpop.f32.mrf.mxu1  ;;  %18958 = vmatprep.subr.bf16.mxu0 %v20314_v46  ;;  %18986 = vmatprep.subr.bf16.mxu1 %v20315_v14  ;;  %v20332_v14 = vld [vmem:[%s26599_s14 + $0xd10] sm:$0xff]  }
0x2209   :  { %15621 = vmatprep.mubr.bf16.mxu0 %v14533_v37  ;;  %15668 = vmatprep.mubr.bf16.mxu1 %v14535_v26  ;;  %v20335_v37 = vld [vmem:[%s26599_s14 + $0xdc8] sm:$0xff]   ;;  %v26645_v22 = vld [vmem:[#allocation7_spill] sm:$0xff] }
0x220a   :  { %v14198_v28 = vpop.f32.mrf.mxu0  ;;  %v14249_v36 = vpop.f32.mrf.mxu1  ;;  %v26644_v26 = vld [vmem:[#allocation6_spill] sm:$0xff] }
0x220b   :  { %18959 = vmatpush3.bf16.msra.mxu0 %v20316_v18  ;;  %18987 = vmatpush3.bf16.msra.mxu1 %v20317_v52  ;;  %v14199_v48 = vadd.f32 %v14198_v28, %v26175_v63  ;;  %v14250_v55 = vadd.f32 %v14249_v36, %v26179_v47  ;;  %v13833_v18 = vrot.slane %v26135_v61, %v26644_v26 }
0x220c   :  { %v14200_v10 = vpop.f32.mrf.mxu0  ;;  %v26187_v56 = vpop.f32.mrf.mxu1  ;;  %18960 = vmatprep.subr.bf16.mxu0 %v20318_v4  ;;  %18988 = vmatprep.subr.bf16.mxu1 %v20319_v54  ;;  %v13841_v4 = vrot.slane %v26135_v61, %v26645_v22  ;;  %v20336_v54 = vld [vmem:[%s26599_s14 + $0xd08] sm:$0xff]   ;;  %v20338_v61 = vld [vmem:[%s26599_s14 + $0xd40] sm:$0xff]  }
0x220d   :  { %v14473_v13 = vmax.f32 %v14199_v48, 0.0  ;;  %v14475_v9 = vmax.f32 %v14250_v55, 0.0  ;;  %v14201_v28 = vadd.f32 %v14200_v10, %v13833_v18  ;;  %v20339_v10 = vld [vmem:[%s26599_s14 + $0xdc0] sm:$0xff]  }
0x220e   :  { %v14202_v3 = vpop.f32.mrf.mxu0  ;;  %v14253_v50 = vpop.f32.mrf.mxu1  ;;  %15622 = vmatmul.mubr.bf16.gmra.mxu0 %v14532_v8  ;;  %15669 = vmatmul.mubr.bf16.gmra.mxu1 %v14534_v25  ;;  %v14252_v8 = vadd.f32 %v26187_v56, %v13841_v4  ;;  %v20340_v56 = vld [vmem:[%s26599_s14 + $0xd00] sm:$0xff]  }
0x220f   :  { %v14203_v11 = vadd.f32 %v14202_v3, %v26175_v63  ;;  %v14254_v17 = vadd.f32 %v14253_v50, %v26179_v47  ;;  %18961 = vmatpush3.bf16.msra.mxu0 %v20320_v60  ;;  %18989 = vmatpush3.bf16.msra.mxu1 %v20321_v30  ;;  %v20337_v30 = vld [vmem:[%s26599_s14 + $0xd88] sm:$0xff]   ;;  %v14248_v3 = vadd.f32 %v26165_v51, %v13841_v4  ;;  %v14488_v50 = vmax.f32 %v14201_v28, 0.0  ;;  %v20342_v51 = vld [vmem:[%s26599_s14 + $0xe78] sm:$0xff]  }
0x2210   :  { %v26202_v44 = vpop.f32.mrf.mxu0  ;;  %v26204_v31 = vpop.f32.mrf.mxu1  ;;  %18962 = vmatprep.subr.bf16.mxu0 %v20322_v20  ;;  %18990 = vmatprep.subr.bf16.mxu1 %v20323_v34  ;;  %v14197_v20 = vadd.f32 %v26163_v35, %v13833_v18  ;;  %v20341_v35 = vld [vmem:[%s26599_s14 + $0xd80] sm:$0xff]  }
0x2211   :  { %v14489_v39 = vmax.f32 %v14203_v11, 0.0  ;;  %v14491_v0 = vmax.f32 %v14254_v17, 0.0 }
0x2212   :  { %v14208_v32 = vpop.f32.mrf.mxu0  ;;  %v14259_v12 = vpop.f32.mrf.mxu1 }
0x2213   :  { %v14521_v49 = vpack.c.bf16 %v14489_v39, %v14473_v13  ;;  %v14523_v29 = vpack.c.bf16 %v14491_v0, %v14475_v9  ;;  %18963 = vmatpush3.bf16.msra.mxu0 %v20324_v38  ;;  %18991 = vmatpush3.bf16.msra.mxu1 %v20325_v7  ;;  %v14209_v25 = vadd.f32 %v14208_v32, %v26175_v63  ;;  %v20343_v38 = vld [vmem:[%s26599_s14 + $0xef8] sm:$0xff]   ;;  %v14472_v7 = vmax.f32 %v14197_v20, 0.0 }
0x2214   :  { %v14210_v19 = vpop.f32.mrf.mxu0  ;;  %v14261_v15 = vpop.f32.mrf.mxu1  ;;  %18964 = vmatprep.subr.bf16.mxu0 %v20326_v40  ;;  %18992 = vmatprep.subr.bf16.mxu1 %v20327_v16  ;;  %v14260_v34 = vadd.f32 %v14259_v12, %v26179_v47  ;;  %v14490_v47 = vmax.f32 %v14252_v8, 0.0  ;;  %v26291_v13 = vld [vmem:[%s26598_s13 + $0x38] sm:$0xff]  ;;  %v14474_v0 = vmax.f32 %v14248_v3, 0.0  ;;  %v14207_v12 = vadd.f32 %v26202_v44, %v13833_v18  ;;  %v20346_v44 = vld [vmem:[%s26599_s14 + $0xe70] sm:$0xff]   ;;  %s20875_s13 = scalar_lea.vmem %s16016_s4, 32 }
0x2215   :  { %15707 = vmatprep.mubr.bf16.mxu0 %v14521_v49  ;;  %15754 = vmatprep.mubr.bf16.mxu1 %v14523_v29  ;;  %v14505_v17 = vmax.f32 %v14209_v25, 0.0  ;;  %v26299_v16 = vrot.slane %v26291_v13, %v21940_v41  ;;  %v14520_v32 = vpack.c.bf16 %v14488_v50, %v14472_v7  ;;  %v26304_v49 = vrot.slane %v26291_v13, %v21943_v21  ;;  %v20344_v19 = vld [vmem:[%s26599_s14 + $0xe38] sm:$0xff]   ;;  %p20876_p0 = scmp.ne.s32.totalorder %s16016_s4, %s20875_s13  ;;  %p20881_p2 = scmp.lt.s32.totalorder %s20875_s13, %s20875_s13 }
0x2216   :  { %v14211_v2 = vpop.f32.mrf.mxu0  ;;  %v14262_v46 = vpop.f32.mrf.mxu1  ;;  %v14507_v40 = vmax.f32 %v14260_v34, 0.0  ;;  %v14522_v15 = vpack.c.bf16 %v14490_v47, %v14474_v0  ;;  %v14258_v41 = vadd.f32 %v26204_v31, %v13841_v4  ;;  %v20345_v21 = vld [vmem:[%s26599_s14 + $0xeb8] sm:$0xff]   ;;  %v20347_v31 = vld [vmem:[%s26599_s14 + $0xef0] sm:$0xff]   ;;  %v20354_v47 = vld [vmem:[%s26599_s14 + $0xe60] sm:$0xff]  }
0x2217   :  { %18965 = vmatpush3.bf16.msra.mxu0 %v20328_v62  ;;  %18993 = vmatpush3.bf16.msra.mxu1 %v20329_v43  ;;  %v14537_v43 = vpack.c.bf16 %v14505_v17, %v14505_v17  ;;  %p20882_p3 = por %p20881_p2, %p20880_p1 }
0x2218   :  { %v26230_v24 = vpop.f32.mrf.mxu0  ;;  %v26232_v6 = vpop.f32.mrf.mxu1  ;;  %18966 = vmatprep.subr.bf16.mxu0 %v20330_v53  ;;  %18994 = vmatprep.subr.bf16.mxu1 %v20331_v57  ;;  %v14539_v57 = vpack.c.bf16 %v14507_v40, %v14507_v40  ;;  %v14506_v28 = vmax.f32 %v14258_v41, 0.0  ;;  %v20355_v40 = vld [vmem:[%s26599_s14 + $0xee0] sm:$0xff]   ;;  %v20359_v41 = vld [vmem:[%s26599_s14 + $0xed8] sm:$0xff]  }
0x2219   :  { %p20883_p4 = pnand %p20882_p3, %p20876_p0 }
0x221a   :  { %v26245_v52 = vpop.f32.mrf.mxu0  ;;  %v26247_v5 = vpop.f32.mrf.mxu1  ;;  %v14538_v50 = vpack.c.bf16 %v14506_v28, %v14506_v28  ;;  %v13857_v28 = vrot.slane %v26291_v13, %v21949_v58 }
0x221b   :  { %18967 = vmatpush3.bf16.msra.mxu0 %v20332_v14  ;;  %18995 = vmatpush3.bf16.msra.mxu1 %v20333_v45  ;;  %v14301_v45 = vadd.f32 %v26245_v52, %v26299_v16  ;;  %v20349_v52 = vld [vmem:[%s26599_s14 + $0xeb0] sm:$0xff]  }
0x221c   :  { %v26254_v36 = vpop.f32.mrf.mxu0  ;;  %v26256_v60 = vpop.f32.mrf.mxu1  ;;  %18968 = vmatprep.subr.bf16.mxu0 %v20334_v42  ;;  %18996 = vmatprep.subr.bf16.mxu1 %v20335_v37  ;;  %v14504_v42 = vmax.f32 %v14207_v12, 0.0  ;;  %v14352_v37 = vadd.f32 %v26247_v5, %v26304_v49  ;;  %v20350_v5 = vld [vmem:[%s26599_s14 + $0xe68] sm:$0xff]   ;;  %v20356_v12 = vld [vmem:[%s26599_s14 + $0xe20] sm:$0xff]  }
0x221d   :  { %v14477_v20 = vmax.f32 %v14301_v45, 0.0  ;;  %v20365_v45 = vld [vmem:[%s26599_s14 + $0xe90] sm:$0xff]  }
0x221e   :  { %v14304_v48 = vpop.f32.mrf.mxu0  ;;  %v14355_v55 = vpop.f32.mrf.mxu1  ;;  %v14536_v34 = vpack.c.bf16 %v14504_v42, %v14504_v42  ;;  %v20366_v42 = vld [vmem:[%s26599_s14 + $0xe48] sm:$0xff]  }
0x221f   :  { %18969 = vmatpush3.bf16.msra.mxu0 %v20336_v54  ;;  %18997 = vmatpush3.bf16.msra.mxu1 %v20337_v30  ;;  %v14305_v53 = vadd.f32 %v14304_v48, %v26299_v16  ;;  %v14356_v2 = vadd.f32 %v14355_v55, %v26304_v49  ;;  %v20348_v54 = vld [vmem:[%s26599_s14 + $0xe30] sm:$0xff]   ;;  %v14479_v48 = vmax.f32 %v14352_v37, 0.0  ;;  %v20367_v37 = vld [vmem:[%s26599_s14 + $0xec8] sm:$0xff]  }
0x2220   :  { %v26275_v63 = vpop.f32.mrf.mxu0  ;;  %v26277_v11 = vpop.f32.mrf.mxu1  ;;  %18970 = vmatprep.subr.bf16.mxu0 %v20338_v61  ;;  %18998 = vmatprep.subr.bf16.mxu1 %v20339_v10  ;;  %v20351_v10 = vld [vmem:[%s26599_s14 + $0xee8] sm:$0xff]  }
0x2221   :  { %v14493_v30 = vmax.f32 %v14305_v53, 0.0  ;;  %v14495_v61 = vmax.f32 %v14356_v2, 0.0 }
0x2222   :  { %v26293_v9 = vpop.f32.mrf.mxu0  ;;  %v26295_v39 = vpop.f32.mrf.mxu1 }
0x2223   :  { %18971 = vmatpush3.bf16.msra.mxu0 %v20340_v56  ;;  %18999 = vmatpush3.bf16.msra.mxu1 %v20341_v35  ;;  %v20352_v56 = vld [vmem:[%s26599_s14 + $0xe28] sm:$0xff]   ;;  %v14525_v35 = vpack.c.bf16 %v14493_v30, %v14477_v20  ;;  %v14527_v17 = vpack.c.bf16 %v14495_v61, %v14479_v48  ;;  %v14354_v61 = vadd.f32 %v26256_v60, %v13857_v28  ;;  %v20372_v60 = vld [vmem:[%s26599_s14 + $0xe00] sm:$0xff]  }
0x2224   :  { %v14312_v29 = vpop.f32.mrf.mxu0  ;;  %v14363_v62 = vpop.f32.mrf.mxu1  ;;  %19012 = vmatprep.subr.bf16.mxu0 %v20342_v51  ;;  %19040 = vmatprep.subr.bf16.mxu1 %v20343_v38  ;;  %v20353_v51 = vld [vmem:[%s26599_s14 + $0xea8] sm:$0xff]   ;;  %v14311_v58 = vadd.f32 %v26293_v9, %v26299_v16  ;;  %v14362_v20 = vadd.f32 %v26295_v39, %v26304_v49  ;;  %v20373_v9 = vld [vmem:[%s26599_s14 + $0xe80] sm:$0xff]  }
0x2225   :  { %v20357_v29 = vld [vmem:[%s26599_s14 + $0xea0] sm:$0xff]   ;;  %v20358_v62 = vld [vmem:[%s26599_s14 + $0xe58] sm:$0xff]   ;;  %v20368_v30 = vld [vmem:[%s26599_s14 + $0xe08] sm:$0xff]   ;;  %v14494_v16 = vmax.f32 %v14354_v61, 0.0 }
0x2226   :  { %15708 = vmatmul.mubr.bf16.vlgmr.msra.gmra.mxu0 %v14520_v32  ;;  %v14313_v46 = vpop.f32.mrf.mxu0  ;;  %v14364_v14 = vpop.f32.mrf.mxu1  ;;  %15755 = vmatmul.mubr.bf16.vlgmr.msra.gmra.mxu1 %v14522_v15  ;;  %v14509_v39 = vmax.f32 %v14311_v58, 0.0  ;;  %v20389_v61 = vld [vmem:[%s26599_s14 + $0xfa0] sm:$0xff]   ;;  %v20390_v58 = vld [vmem:[%s26599_s14 + $0xf58] sm:$0xff]  }
0x2227   :  { %15715 = vmatprep.mubr.bf16.mxu0 %v14537_v43  ;;  %15762 = vmatprep.mubr.bf16.mxu1 %v14539_v57  ;;  %v20362_v57 = vld [vmem:[%s26599_s14 + $0xe50] sm:$0xff]  }
0x2228   :  { %19013 = vmatpush3.bf16.msra.mxu0 %v20344_v19  ;;  %v26325_v18 = vpop.f32.mrf.mxu0  ;;  %v26327_v4 = vpop.f32.mrf.mxu1  ;;  %19041 = vmatpush3.bf16.msra.mxu1 %v20345_v21  ;;  %v20360_v21 = vld [vmem:[%s26599_s14 + $0xe18] sm:$0xff]   ;;  %v20363_v14 = vld [vmem:[%s26599_s14 + $0xed0] sm:$0xff]  }
0x2229   :  { %19014 = vmatprep.subr.bf16.mxu0 %v20346_v44  ;;  %19042 = vmatprep.subr.bf16.mxu1 %v20347_v31  ;;  %v20361_v44 = vld [vmem:[%s26599_s14 + $0xe98] sm:$0xff]   ;;  %v20364_v31 = vld [vmem:[%s26599_s14 + $0xe10] sm:$0xff]  }
0x222a   :  { %v26338_v8 = vpop.f32.mrf.mxu0  ;;  %v26340_v25 = vpop.f32.mrf.mxu1 }
0x222c   :  { %19015 = vmatpush3.bf16.msra.mxu0 %v20348_v54  ;;  %v26345_v55 = vpop.f32.mrf.mxu0  ;;  %v26347_v3 = vpop.f32.mrf.mxu1  ;;  %19043 = vmatpush3.bf16.msra.mxu1 %v20349_v52  ;;  %v13849_v54 = vrot.slane %v26291_v13, %v21946_v23  ;;  %v20370_v23 = vld [vmem:[%s26599_s14 + $0xe40] sm:$0xff]  }
0x222d   :  { %19016 = vmatprep.subr.bf16.mxu0 %v20350_v5  ;;  %19044 = vmatprep.subr.bf16.mxu1 %v20351_v10  ;;  %v20369_v5 = vld [vmem:[%s26599_s14 + $0xe88] sm:$0xff]  }
0x222e   :  { %15716 = vmatmul.mubr.bf16.gmra.mxu0 %v14536_v34  ;;  %v26358_v38 = vpop.f32.mrf.mxu0  ;;  %v26360_v7 = vpop.f32.mrf.mxu1  ;;  %15763 = vmatmul.mubr.bf16.gmra.mxu1 %v14538_v50  ;;  %v14303_v52 = vadd.f32 %v26254_v36, %v13849_v54  ;;  %v20371_v36 = vld [vmem:[%s26599_s14 + $0xec0] sm:$0xff]   ;;  %v14299_v10 = vadd.f32 %v26230_v24, %v13849_v54  ;;  %v14350_v34 = vadd.f32 %v26232_v6, %v13857_v28  ;;  %v20374_v24 = vld [vmem:[%s26599_s14 + $0xf78] sm:$0xff]  }
0x222f   :  { %15801 = vmatprep.mubr.bf16.mxu0 %v14525_v35  ;;  %15848 = vmatprep.mubr.bf16.mxu1 %v14527_v17  ;;  %v20375_v6 = vld [vmem:[%s26599_s14 + $0xff8] sm:$0xff]   ;;  %v26447_v35 = vrot.slane %v26291_v13, %v21977_v27  ;;  %v26452_v17 = vrot.slane %v26291_v13, %v26643_v59  ;;  %v20378_v59 = vld [vmem:[%s26599_s14 + $0xf70] sm:$0xff]  }
0x2230   :  { %19017 = vmatpush3.bf16.msra.mxu0 %v20352_v56  ;;  %v26365_v0 = vpop.f32.mrf.mxu0  ;;  %v26367_v32 = vpop.f32.mrf.mxu1  ;;  %19045 = vmatpush3.bf16.msra.mxu1 %v20353_v51  ;;  %v14492_v48 = vmax.f32 %v14303_v52, 0.0  ;;  %v14476_v49 = vmax.f32 %v14299_v10, 0.0  ;;  %v14511_v56 = vmax.f32 %v14362_v20, 0.0  ;;  %v14478_v50 = vmax.f32 %v14350_v34, 0.0  ;;  %v20392_v10 = vld [vmem:[%s26599_s14 + $0xf18] sm:$0xff]   ;;  %v20394_v34 = vld [vmem:[%s26599_s14 + $0xf50] sm:$0xff]  }
0x2231   :  { %19018 = vmatprep.subr.bf16.mxu0 %v20354_v47  ;;  %19046 = vmatprep.subr.bf16.mxu1 %v20355_v40  ;;  %v14309_v47 = vadd.f32 %v26275_v63, %v13849_v54  ;;  %v20376_v40 = vld [vmem:[%s26599_s14 + $0xf38] sm:$0xff]   ;;  %v14407_v27 = vadd.f32 %v26358_v38, %v26447_v35  ;;  %v14403_v38 = vadd.f32 %v26338_v8, %v26447_v35  ;;  %v20381_v8 = vld [vmem:[%s26599_s14 + $0xfb0] sm:$0xff]  }
0x2232   :  { %v26378_v19 = vpop.f32.mrf.mxu0  ;;  %v26380_v15 = vpop.f32.mrf.mxu1  ;;  %v14524_v51 = vpack.c.bf16 %v14492_v48, %v14476_v49  ;;  %v20377_v63 = vld [vmem:[%s26599_s14 + $0xfb8] sm:$0xff]   ;;  %v20396_v48 = vld [vmem:[%s26599_s14 + $0xf10] sm:$0xff]   ;;  %v20400_v49 = vld [vmem:[%s26599_s14 + $0xf08] sm:$0xff]  }
0x2233   :  { %v20393_v20 = vld [vmem:[%s26599_s14 + $0xf98] sm:$0xff]  }
0x2234   :  { %19019 = vmatpush3.bf16.msra.mxu0 %v20356_v12  ;;  %v14414_v43 = vpop.f32.mrf.mxu0  ;;  %v14465_v53 = vpop.f32.mrf.mxu1  ;;  %19047 = vmatpush3.bf16.msra.mxu1 %v20357_v29  ;;  %v14526_v12 = vpack.c.bf16 %v14494_v16, %v14478_v50  ;;  %v14360_v29 = vadd.f32 %v26277_v11, %v13857_v28  ;;  %v20379_v11 = vld [vmem:[%s26599_s14 + $0xff0] sm:$0xff]   ;;  %v20385_v28 = vld [vmem:[%s26599_s14 + $0xfa8] sm:$0xff]  }
0x2235   :  { %19020 = vmatprep.subr.bf16.mxu0 %v20358_v62  ;;  %19048 = vmatprep.subr.bf16.mxu1 %v20359_v41  ;;  %v14541_v62 = vpack.c.bf16 %v14509_v39, %v14509_v39  ;;  %v14543_v41 = vpack.c.bf16 %v14511_v56, %v14511_v56  ;;  %v14458_v43 = vadd.f32 %v26360_v7, %v26452_v17  ;;  %v14508_v53 = vmax.f32 %v14309_v47, 0.0  ;;  %v20380_v7 = vld [vmem:[%s26599_s14 + $0xf30] sm:$0xff]   ;;  %v20399_v16 = vld [vmem:[%s26599_s14 + $0xfc8] sm:$0xff]  }
0x2236   :  { %v14415_v2 = vpop.f32.mrf.mxu0  ;;  %v14466_v46 = vpop.f32.mrf.mxu1  ;;  %v13865_v39 = vrot.slane %v26291_v13, %v26644_v26  ;;  %v20401_v50 = vld [vmem:[%s26599_s14 + $0xf88] sm:$0xff]   ;;  %v20402_v26 = vld [vmem:[%s26599_s14 + $0xf40] sm:$0xff]   ;;  %v14464_v47 = vadd.f32 %v26380_v15, %v26452_v17 }
0x2237   :  { %v20382_v2 = vld [vmem:[%s26599_s14 + $0xf68] sm:$0xff]   ;;  %v14499_v46 = vmax.f32 %v14458_v43, 0.0 }
0x2238   :  { %19021 = vmatpush3.bf16.msra.mxu0 %v20360_v21  ;;  %19049 = vmatpush3.bf16.msra.mxu1 %v20361_v44  ;;  %v14454_v21 = vadd.f32 %v26340_v25, %v26452_v17  ;;  %v14510_v44 = vmax.f32 %v14360_v29, 0.0  ;;  %v20383_v25 = vld [vmem:[%s26599_s14 + $0xfe8] sm:$0xff]   ;;  %v14405_v56 = vadd.f32 %v26345_v55, %v13865_v39  ;;  %v14401_v55 = vadd.f32 %v26325_v18, %v13865_v39 }
0x2239   :  { %19022 = vmatprep.subr.bf16.mxu0 %v20362_v57  ;;  %19050 = vmatprep.subr.bf16.mxu1 %v20363_v14  ;;  %v14497_v57 = vmax.f32 %v14407_v27, 0.0  ;;  %v14481_v14 = vmax.f32 %v14403_v38, 0.0  ;;  %v14411_v17 = vadd.f32 %v26365_v0, %v13865_v39  ;;  %v17775_v0 = vld [vmem:[%s26600_s15 + $0x3] ss:$0 sm:$0xff] }
0x223a   :  { %v14480_v18 = vmax.f32 %v14401_v55, 0.0 }
0x223b   :  { %v14529_v54 = vpack.c.bf16 %v14497_v57, %v14481_v14  ;;  %v14512_v43 = vmax.f32 %v14411_v17, 0.0 }
0x223c   :  { %19023 = vmatpush3.bf16.msra.mxu0 %v20364_v31  ;;  %19051 = vmatpush3.bf16.msra.mxu1 %v20365_v45  ;;  %v14540_v31 = vpack.c.bf16 %v14508_v53, %v14508_v53  ;;  %v14483_v45 = vmax.f32 %v14454_v21, 0.0 }
0x223d   :  { %19024 = vmatprep.subr.bf16.mxu0 %v20366_v42  ;;  %19052 = vmatprep.subr.bf16.mxu1 %v20367_v37  ;;  %v20384_v42 = vld [vmem:[%s26599_s14 + $0xf28] sm:$0xff]   ;;  %v14542_v37 = vpack.c.bf16 %v14510_v44, %v14510_v44  ;;  %v14544_v38 = vpack.c.bf16 %v14512_v43, %v14512_v43 }
0x223e   :  { %v14531_v52 = vpack.c.bf16 %v14499_v46, %v14483_v45 }
0x2240   :  { %19025 = vmatpush3.bf16.msra.mxu0 %v20368_v30  ;;  %19053 = vmatpush3.bf16.msra.mxu1 %v20369_v5  ;;  %v20386_v30 = vld [vmem:[%s26599_s14 + $0xf60] sm:$0xff]  }
0x2241   :  { %19026 = vmatprep.subr.bf16.mxu0 %v20370_v23  ;;  %19054 = vmatprep.subr.bf16.mxu1 %v20371_v36  ;;  %v20387_v5 = vld [vmem:[%s26599_s14 + $0xfe0] sm:$0xff]   ;;  %v20391_v36 = vld [vmem:[%s26599_s14 + $0xfd8] sm:$0xff]  }
0x2242   :  { %v20388_v23 = vld [vmem:[%s26599_s14 + $0xf20] sm:$0xff]  }
0x2244   :  { %19027 = vmatpush3.bf16.msra.mxu0 %v20372_v60  ;;  %19055 = vmatpush3.bf16.msra.mxu1 %v20373_v9  ;;  %v20395_v60 = vld [vmem:[%s26599_s14 + $0xfd0] sm:$0xff]  }
0x2245   :  { %19068 = vmatprep.subr.bf16.mxu0 %v20374_v24  ;;  %19096 = vmatprep.subr.bf16.mxu1 %v20375_v6  ;;  %v20397_v9 = vld [vmem:[%s26599_s14 + $0xf90] sm:$0xff]   ;;  %v20398_v24 = vld [vmem:[%s26599_s14 + $0xf48] sm:$0xff]   ;;  %v13873_v6 = vrot.slane %v26291_v13, %v26645_v22  ;;  %v14413_v22 = vadd.f32 %v26378_v19, %v26447_v35  ;;  %v20403_v13 = vld [vmem:[%s26599_s14 + $0xfc0] sm:$0xff]  }
0x2246   :  { %v20405_v19 = vld [vmem:[%s26599_s14 + $0xf80] sm:$0xff]  }
0x2247   :  { %15802 = vmatmul.mubr.bf16.vlgmr.msra.gmra.mxu0 %v14524_v51  ;;  %15849 = vmatmul.mubr.bf16.vlgmr.msra.gmra.mxu1 %v14526_v12  ;;  %v14456_v51 = vadd.f32 %v26347_v3, %v13873_v6  ;;  %v20404_v3 = vld [vmem:[%s26599_s14 + $0xf00] sm:$0xff]   ;;  %v14496_v12 = vmax.f32 %v14405_v56, 0.0  ;;  %v14513_v29 = vmax.f32 %v14413_v22, 0.0 }
0x2248   :  { %15809 = vmatprep.mubr.bf16.mxu0 %v14541_v62  ;;  %15856 = vmatprep.mubr.bf16.mxu1 %v14543_v41  ;;  %v14515_v62 = vmax.f32 %v14464_v47, 0.0 }
0x2249   :  { %19069 = vmatpush3.bf16.msra.mxu0 %v20376_v40  ;;  %19097 = vmatpush3.bf16.msra.mxu1 %v20377_v63  ;;  %v14452_v40 = vadd.f32 %v26327_v4, %v13873_v6  ;;  %v14498_v35 = vmax.f32 %v14456_v51, 0.0  ;;  %v14528_v4 = vpack.c.bf16 %v14496_v12, %v14480_v18  ;;  %v14462_v63 = vadd.f32 %v26367_v32, %v13873_v6 }
0x224a   :  { %19070 = vmatprep.subr.bf16.mxu0 %v20378_v59  ;;  %19098 = vmatprep.subr.bf16.mxu1 %v20379_v11  ;;  %v14545_v59 = vpack.c.bf16 %v14513_v29, %v14513_v29  ;;  %v14547_v41 = vpack.c.bf16 %v14515_v62, %v14515_v62 }
0x224b   :  { %v14482_v15 = vmax.f32 %v14452_v40, 0.0  ;;  %v14514_v11 = vmax.f32 %v14462_v63, 0.0 }
0x224d   :  { %19071 = vmatpush3.bf16.msra.mxu0 %v20380_v7  ;;  %19099 = vmatpush3.bf16.msra.mxu1 %v20381_v8  ;;  %v14530_v27 = vpack.c.bf16 %v14498_v35, %v14482_v15  ;;  %v14546_v53 = vpack.c.bf16 %v14514_v11, %v14514_v11 }
0x224e   :  { %19072 = vmatprep.subr.bf16.mxu0 %v20382_v2  ;;  %19100 = vmatprep.subr.bf16.mxu1 %v20383_v25 }
0x224f   :  { %15810 = vmatmul.mubr.bf16.gmra.mxu0 %v14540_v31  ;;  %15857 = vmatmul.mubr.bf16.gmra.mxu1 %v14542_v37 }
0x2250   :  { %15895 = vmatprep.mubr.bf16.mxu0 %v14529_v54  ;;  %15942 = vmatprep.mubr.bf16.mxu1 %v14531_v52 }
0x2251   :  { %19073 = vmatpush3.bf16.msra.mxu0 %v20384_v42  ;;  %19101 = vmatpush3.bf16.msra.mxu1 %v20385_v28 }
0x2252   :  { %19074 = vmatprep.subr.bf16.mxu0 %v20386_v30  ;;  %19102 = vmatprep.subr.bf16.mxu1 %v20387_v5 }
0x2255   :  { %19075 = vmatpush3.bf16.msra.mxu0 %v20388_v23  ;;  %19103 = vmatpush3.bf16.msra.mxu1 %v20389_v61 }
0x2256   :  { %19076 = vmatprep.subr.bf16.mxu0 %v20390_v58  ;;  %19104 = vmatprep.subr.bf16.mxu1 %v20391_v36 }
0x2259   :  { %19077 = vmatpush3.bf16.msra.mxu0 %v20392_v10  ;;  %19105 = vmatpush3.bf16.msra.mxu1 %v20393_v20 }
0x225a   :  { %19078 = vmatprep.subr.bf16.mxu0 %v20394_v34  ;;  %19106 = vmatprep.subr.bf16.mxu1 %v20395_v60 }
0x225d   :  { %19079 = vmatpush3.bf16.msra.mxu0 %v20396_v48  ;;  %19107 = vmatpush3.bf16.msra.mxu1 %v20397_v9 }
0x225e   :  { %19080 = vmatprep.subr.bf16.mxu0 %v20398_v24  ;;  %19108 = vmatprep.subr.bf16.mxu1 %v20399_v16 }
0x2261   :  { %19081 = vmatpush3.bf16.msra.mxu0 %v20400_v49  ;;  %19109 = vmatpush3.bf16.msra.mxu1 %v20401_v50 }
0x2262   :  { %19082 = vmatprep.subr.bf16.mxu0 %v20402_v26  ;;  %19110 = vmatprep.subr.bf16.mxu1 %v20403_v13 }
0x2265   :  { %19083 = vmatpush3.bf16.msra.mxu0 %v20404_v3  ;;  %19111 = vmatpush3.bf16.msra.mxu1 %v20405_v19 }
0x2268   :  { %15896 = vmatmul.mubr.bf16.vlgmr.msra.gmra.mxu0 %v14528_v4  ;;  %15943 = vmatmul.mubr.bf16.vlgmr.msra.gmra.mxu1 %v14530_v27 }
0x2269   :  { %15903 = vmatprep.mubr.bf16.mxu0 %v14545_v59  ;;  %15950 = vmatprep.mubr.bf16.mxu1 %v14547_v41 }
0x2270   :  { %15904 = vmatmul.mubr.bf16.gmra.mxu0 %v14544_v38  ;;  %15951 = vmatmul.mubr.bf16.gmra.mxu1 %v14546_v53 }
0x22c6   :  { %v18916_v21 = vpop.f32.mrf.mxu0  ;;  %v18944_v7 = vpop.f32.mrf.mxu1 }
0x22c8   :  { %v18917_v44 = vpop.f32.mrf.mxu0  ;;  %v18945_v32 = vpop.f32.mrf.mxu1 }
0x22c9   :  { %v18918_v57 = vadd.f32 %v18917_v44, %v18916_v21  ;;  %v18946_v8 = vadd.f32 %v18945_v32, %v18944_v7 }
0x22ca   :  { %v18919_v2 = vpop.f32.mrf.mxu0  ;;  %v18947_v46 = vpop.f32.mrf.mxu1 }
0x22cb   :  { %v15616_v25 = vadd.f32 %v18918_v57, %v17775_v0 }
0x22cc   :  { %v18920_v14 = vpop.f32.mrf.mxu0  ;;  %v18948_v31 = vpop.f32.mrf.mxu1 }
0x22cd   :  { %v15663_v45 = vadd.f32 %v18946_v8, %v15616_v25  ;;  %v18921_v42 = vadd.f32 %v18920_v14, %v18919_v2  ;;  %v18949_v37 = vadd.f32 %v18948_v31, %v18947_v46 }
0x22ce   :  { %v18922_v54 = vpop.f32.mrf.mxu0  ;;  %v18950_v28 = vpop.f32.mrf.mxu1 }
0x22cf   :  { %v15619_v30 = vadd.f32 %v18921_v42, %v17775_v0 }
0x22d0   :  { %v18923_v52 = vpop.f32.mrf.mxu0  ;;  %v18951_v5 = vpop.f32.mrf.mxu1 }
0x22d1   :  { %v15666_v23 = vadd.f32 %v18949_v37, %v15619_v30 }
0x22d2   :  { %v18925_v61 = vpop.f32.mrf.mxu0  ;;  %v18953_v58 = vpop.f32.mrf.mxu1 }
0x22d4   :  { %v18926_v36 = vpop.f32.mrf.mxu0  ;;  %v18954_v10 = vpop.f32.mrf.mxu1 }
0x22e6   :  { %v18972_v20 = vpop.f32.mrf.mxu0  ;;  %v19000_v34 = vpop.f32.mrf.mxu1 }
0x22e8   :  { %v18973_v60 = vpop.f32.mrf.mxu0  ;;  %v19001_v48 = vpop.f32.mrf.mxu1 }
0x22e9   :  { %v18974_v41 = vadd.f32 %v18973_v60, %v18972_v20  ;;  %v19002_v38 = vadd.f32 %v19001_v48, %v19000_v34 }
0x22ea   :  { %v18975_v9 = vpop.f32.mrf.mxu0  ;;  %v19003_v24 = vpop.f32.mrf.mxu1 }
0x22eb   :  { %v15710_v43 = vadd.f32 %v18974_v41, %v15663_v45 }
0x22ec   :  { %v18976_v16 = vpop.f32.mrf.mxu0  ;;  %v19004_v39 = vpop.f32.mrf.mxu1 }
0x22ed   :  { %v18977_v11 = vadd.f32 %v18976_v16, %v18975_v9  ;;  %v15757_v21 = vadd.f32 %v19002_v38, %v15710_v43  ;;  %v19005_v0 = vadd.f32 %v19004_v39, %v19003_v24 }
0x22ee   :  { %v18978_v6 = vpop.f32.mrf.mxu0  ;;  %v19006_v49 = vpop.f32.mrf.mxu1 }
0x22ef   :  { %v15713_v7 = vadd.f32 %v18977_v11, %v15666_v23 }
0x22f0   :  { %v18979_v56 = vpop.f32.mrf.mxu0  ;;  %v19007_v50 = vpop.f32.mrf.mxu1 }
0x22f1   :  { %v15760_v8 = vadd.f32 %v19005_v0, %v15713_v7 }
0x22f2   :  { %v18981_v26 = vpop.f32.mrf.mxu0  ;;  %v19009_v51 = vpop.f32.mrf.mxu1 }
0x22f4   :  { %v18982_v22 = vpop.f32.mrf.mxu0  ;;  %v19010_v13 = vpop.f32.mrf.mxu1 }
0x2307   :  { %v19028_v55 = vpop.f32.mrf.mxu0  ;;  %v19056_v47 = vpop.f32.mrf.mxu1 }
0x2309   :  { %v19029_v40 = vpop.f32.mrf.mxu0  ;;  %v19057_v3 = vpop.f32.mrf.mxu1 }
0x230a   :  { %v19030_v53 = vadd.f32 %v19029_v40, %v19028_v55  ;;  %v19058_v2 = vadd.f32 %v19057_v3, %v19056_v47 }
0x230b   :  { %v19031_v12 = vpop.f32.mrf.mxu0  ;;  %v19059_v19 = vpop.f32.mrf.mxu1 }
0x230c   :  { %v15804_v44 = vadd.f32 %v19030_v53, %v15757_v21 }
0x230d   :  { %v19032_v35 = vpop.f32.mrf.mxu0  ;;  %v19060_v29 = vpop.f32.mrf.mxu1 }
0x230e   :  { %v19033_v32 = vadd.f32 %v19032_v35, %v19031_v12  ;;  %v15851_v14 = vadd.f32 %v19058_v2, %v15804_v44  ;;  %v19061_v28 = vadd.f32 %v19060_v29, %v19059_v19 }
0x230f   :  { %v19034_v18 = vpop.f32.mrf.mxu0  ;;  %v19062_v62 = vpop.f32.mrf.mxu1 }
0x2310   :  { %v15807_v31 = vadd.f32 %v19033_v32, %v15760_v8 }
0x2311   :  { %v19035_v15 = vpop.f32.mrf.mxu0  ;;  %v19063_v4 = vpop.f32.mrf.mxu1 }
0x2312   :  { %v15854_v61 = vadd.f32 %v19061_v28, %v15807_v31 }
0x2313   :  { %v19037_v17 = vpop.f32.mrf.mxu0  ;;  %v19065_v27 = vpop.f32.mrf.mxu1 }
0x2314   :  { %v17906_v27 = vld [vmem:[%s26603_s18 + $0x3] ss:$0 sm:$0xff] }
0x2315   :  { %v19038_v63 = vpop.f32.mrf.mxu0  ;;  %v19066_v59 = vpop.f32.mrf.mxu1 }
0x2316   :  { %v17907_v59 = vld [vmem:[%s26604_s19 + $0x3] ss:$0 sm:$0xff] }
0x2328   :  { %v19084_v57 = vpop.f32.mrf.mxu0  ;;  %v19112_v46 = vpop.f32.mrf.mxu1 }
0x232a   :  { %v19085_v25 = vpop.f32.mrf.mxu0  ;;  %v19113_v37 = vpop.f32.mrf.mxu1 }
0x232b   :  { %v19086_v42 = vadd.f32 %v19085_v25, %v19084_v57  ;;  %v19114_v30 = vadd.f32 %v19113_v37, %v19112_v46 }
0x232c   :  { %v19087_v54 = vpop.f32.mrf.mxu0  ;;  %v19115_v52 = vpop.f32.mrf.mxu1 }
0x232d   :  { %v15898_v45 = vadd.f32 %v19086_v42, %v15851_v14 }
0x232e   :  { %v19088_v5 = vpop.f32.mrf.mxu0  ;;  %v19116_v36 = vpop.f32.mrf.mxu1 }
0x232f   :  { %v15945_v23 = vadd.f32 %v19114_v30, %v15898_v45  ;;  %v19089_v58 = vadd.f32 %v19088_v5, %v19087_v54  ;;  %v19117_v34 = vadd.f32 %v19116_v36, %v19115_v52 }
0x2330   :  { %v19090_v10 = vpop.f32.mrf.mxu0  ;;  %v19118_v60 = vpop.f32.mrf.mxu1 }
0x2331   :  { %v15901_v20 = vadd.f32 %v19089_v58, %v15854_v61  ;;  %v15957_v48 = vadd.f32 %v15945_v23, %v25917_v1 }
0x2332   :  { %v19091_v9 = vpop.f32.mrf.mxu0  ;;  %v19119_v16 = vpop.f32.mrf.mxu1 }
0x2333   :  { %v15948_v24 = vadd.f32 %v19117_v34, %v15901_v20  ;;  %v15963_v39 = vsel %vm112_vm0, %v15957_v48, 0.0 }
0x2334   :  { %v19093_v6 = vpop.f32.mrf.mxu0  ;;  %15964 = vadd.xlane.f32.xlu0 %v15963_v39  ;;  %v19121_v49 = vpop.f32.mrf.mxu1 }
0x2335   :  { %v15958_v56 = vadd.f32 %v15948_v24, %v25919_v33 }
0x2336   :  { %v19094_v50 = vpop.f32.mrf.mxu0  ;;  %v19122_v26 = vpop.f32.mrf.mxu1 }
0x2337   :  { %v15966_v51 = vsel %vm112_vm0, %v15958_v56, 0.0 }
0x2338   :  { %15967 = vadd.xlane.f32.xlu1 %v15966_v51 }
0x23bd   :  { %v15965_v22 = vpop.xlane.xlu0 %15964 }
0x23be   :  { %v15969_v13 = vmul.f32 0.03125, %v15965_v22 }
0x23c0   :  { %v15971_v55 = vsub.f32 %v15957_v48, %v15969_v13 }
0x23c1   :  { %v15968_v47 = vpop.xlane.xlu1 %15967 }
0x23c2   :  { %v15970_v1 = vmul.f32 0.03125, %v15968_v47  ;;  %v15973_v40 = vmul.f32 %v15971_v55, %v15971_v55 }
0x23c4   :  { %v15972_v3 = vsub.f32 %v15958_v56, %v15970_v1  ;;  %v15975_v12 = vsel %vm112_vm0, %v15973_v40, 0.0 }
0x23c5   :  { %15976 = vadd.xlane.f32.xlu0 %v15975_v12 }
0x23c6   :  { %v15974_v19 = vmul.f32 %v15972_v3, %v15972_v3 }
0x23c8   :  { %v15978_v35 = vsel %vm112_vm0, %v15974_v19, 0.0 }
0x23c9   :  { %15979 = vadd.xlane.f32.xlu1 %v15978_v35 }
0x244e   :  { %v15977_v33 = vpop.xlane.xlu0 %15976 }
0x244f   :  { %v15981_v29 = vmul.f32 0.03125, %v15977_v33 }
0x2451   :  { %v15983_v18 = vadd.f32 1e-05, %v15981_v29 }
0x2452   :  { %v15980_v62 = vpop.xlane.xlu1 %15979 }
0x2453   :  { %20832 = vrsqrt.f32 %v15983_v18  ;;  %v15982_v15 = vmul.f32 0.03125, %v15980_v62 }
0x2455   :  { %v15984_v4 = vadd.f32 1e-05, %v15982_v15 }
0x2457   :  { %20834 = vrsqrt.f32 %v15984_v4 }
0x2460   :  { %v20833_v17 = vpop.eup %20832 }
0x2461   :  { %v15987_v63 = vmul.f32 %v20833_v17, %v15971_v55 }
0x2463   :  { %v15995_v41 = vmul.f32 %v17906_v27, %v15987_v63 }
0x2464   :  { %v20835_v43 = vpop.eup %20834 }
0x2465   :  { %v15988_v11 = vmul.f32 %v20835_v43, %v15972_v3  ;;  %v16003_v38 = vadd.f32 %v17907_v59, %v15995_v41 }
0x2467   :  { %v15996_v53 = vmul.f32 %v17906_v27, %v15988_v11  ;;  %16006 = vst.msk [vmem:[#allocation2] sm:$0x1] %vm16005_vm5, %v16003_v38 }
0x2469   :  { %v16004_v21 = vadd.f32 %v17907_v59, %v15996_v53 }
0x246b   :  { %16008 = vst.msk [vmem:[#allocation2] sm:$0x2] %vm16007_vm6, %v16004_v21 }
0x246c   :  { %20886 = shalt.err (!%p20883_p4)
}
0x246d   :  { %16018 = dma.vmem_to_hbm [thread:$0]  %s16016_s4, 32, %s26605_s20, [#allocation3]  }
0x246e   :  { %20895 = dma.done.wait [#allocation3], 32  }
0x246f   :  { %20896 = vsyncadd [#allocation3], 4294967264 }
0x2470   :  { %16022 = vsyncpa [#allocation3], 1 }

</bundles_post_ra>
